<compile_context>
chip_gen: v7x
topology: tpu7x:2x2x1
jax: 0.10.0
libtpu: 0.0.40
codegen_flags: <defaults>
</compile_context>

<pallas_src>
import jax
import jax.numpy as jnp
from jax.experimental import pallas as pl
from jax.experimental.pallas import tpu as pltpu

# ---- small synthetic hyperparameters consistent with the module ----
CARDINALITIES = [5, 7, 4, 6]
EMB_SIZES     = [8, 8, 8, 8]
CAT_DIM       = sum(EMB_SIZES)          # concatenated embedding length = 32
NUM_SIZE      = 16                      # numerical_size
PROJ_DIM      = 112                     # embedding_projected_dim
HIDDEN        = 56                      # hidden_size == ODST num_trees
OUT_SIZE      = 1
DEPTH         = 6                       # ODST default depth
LEAVES        = 2 ** DEPTH              # 64
ODST_IN       = PROJ_DIM + NUM_SIZE     # 128
AUX_H         = HIDDEN // 3             # 18
BATCH         = 8
BN_EPS        = 1e-5

# tree-axis chunking (bounds live ODST state; 896 = 7*128 lanes per chunk)
TREE_CHUNK     = 14                     # 56 trees = 4 chunks of 14
N_CHUNKS       = HIDDEN // TREE_CHUNK
CHUNK_LANES    = TREE_CHUNK * LEAVES    # 896
COLS_PER_CHUNK = 128                    # lane-aligned bins_lo block per chunk
ONES_COL       = DEPTH * TREE_CHUNK     # 84: synthetic "bins_lo == 1" column
SEL_COLS       = N_CHUNKS * COLS_PER_CHUNK   # 512


# --------------------------- Pallas kernel ---------------------------
def _iskander_kernel(emb_ref, xnum_ref,
                     pe_w1_ref, pe_b1_ref, pe_w2_ref, pe_b2_ref,
                     sel_e_ref, sel_n_ref, inv_t_ref, thr_ref,
                     expand_ref, reduce_ref,
                     head_wy_ref, aux_w1_ref, aux_b1_ref, head_wa_ref, head_b_ref,
                     out_ref, rw_ref):
    f32 = jnp.float32
    emb  = emb_ref[...]                                   # [BT, CAT_DIM]
    xnum = xnum_ref[...]                                  # [BT, NUM_SIZE]

    # project_embeddings: Linear -> ReLU -> Linear
    h = jnp.maximum(
        jnp.dot(emb, pe_w1_ref[...], preferred_element_type=f32) + pe_b1_ref[...], 0.0)
    proj = jnp.dot(h, pe_w2_ref[...], preferred_element_type=f32) + pe_b2_ref[...]

    # ODST feature values for all (chunk, depth, tree) columns at once; the columns are
    # laid out chunk-major and 128-padded so every per-chunk slice below is lane-aligned.
    fv = (jnp.dot(proj, sel_e_ref[...], preferred_element_type=f32)
          + jnp.dot(xnum, sel_n_ref[...], preferred_element_type=f32))      # [BT, 512]

    # temperature/threshold prefolded: t = fv*exp(-log_temp) - thr*exp(-log_temp)
    # (the "ones" column has inv_t=0, thr=1  ->  t=-1  ->  bins_lo=1)
    t = fv * inv_t_ref[...] - thr_ref[...]
    bins_lo = jnp.clip(0.5 - 0.5 * t, 0.0, 1.0)           # sparsemoid(-t); hi == 1 - lo

    expand = expand_ref[...]                               # [128, DEPTH*CHUNK_LANES]
    for g in range(N_CHUNKS):                              # static unroll over tree chunks
        bl = bins_lo[:, g * COLS_PER_CHUNK:(g + 1) * COLS_PER_CHUNK]   # aligned [BT,128]
        # one block matmul produces all DEPTH levels: block d of bm equals
        # (1-code[d]) + (2*code[d]-1)*bins_lo[d]  (cn folded via the "ones" row).
        bm = jnp.dot(bl, expand, preferred_element_type=f32)           # [BT, D*896]
        rw = bm[:, :CHUNK_LANES]
        for d in range(1, DEPTH):                          # leaf-weight product over depth
            rw = rw * bm[:, d * CHUNK_LANES:(d + 1) * CHUNK_LANES]
        rw_ref[:, g * CHUNK_LANES:(g + 1) * CHUNK_LANES] = rw          # stage in scratch

    # single block-diagonal reduce with leaf response AND BatchNorm scale folded in
    z = jnp.dot(rw_ref[...], reduce_ref[...], preferred_element_type=f32)  # [BT, HIDDEN]

    # heads merged into one lane-contiguous [BT, 2] output (col 0: risk, col 1: efs);
    # BatchNorm shift is folded into aux_b1 / head_b in the wrapper.
    ah = jnp.maximum(
        jnp.dot(z, aux_w1_ref[...], preferred_element_type=f32) + aux_b1_ref[...], 0.0)
    out_ref[...] = (jnp.dot(z, head_wy_ref[...], preferred_element_type=f32)
                    + jnp.dot(ah, head_wa_ref[...], preferred_element_type=f32)
                    + head_b_ref[...])


# --------------------------- glue / params ---------------------------
def sparsemax(logits, axis):
    z = jnp.moveaxis(logits, axis, -1)
    n = z.shape[-1]
    z_sorted = jnp.sort(z, axis=-1)[..., ::-1]
    k = jnp.arange(1, n + 1, dtype=z.dtype)
    z_cumsum = jnp.cumsum(z_sorted, axis=-1)
    support = (1.0 + k * z_sorted) > z_cumsum
    k_z = jnp.sum(support.astype(jnp.int32), axis=-1, keepdims=True)
    tau_sum = jnp.take_along_axis(z_cumsum, k_z - 1, axis=-1)
    tau = (tau_sum - 1.0) / k_z.astype(z.dtype)
    out = jnp.clip(z - tau, 0.0, None)
    return jnp.moveaxis(out, -1, axis)


def _bin_codes():
    idx = jnp.arange(LEAVES)
    return ((idx[None, :] // (2 ** jnp.arange(DEPTH))[:, None]) % 2).astype(jnp.float32)  # [D, L]


def _pick_bt(B: int) -> int:
    """Batch tile: multiple of 8 (or == B), capped at 256, and >= 2 grid steps when B
    allows so v7x's two TensorCores both get work via dimension_semantics=("parallel",)."""
    if B <= 8:
        return max(B, 1)
    if B <= 16:
        return 8
    half = -(-B // 2)                  # ceil(B/2)
    half = -(-half // 8) * 8           # round up to a multiple of 8
    return min(256, half)


def init_params(key):
    ks = jax.random.split(key, 10)

    def xavier(k, fan_in, fan_out):
        std = (2.0 / (fan_in + fan_out)) ** 0.5
        return std * jax.random.normal(k, (fan_in, fan_out), jnp.float32)

    p = {}
    p["emb_tables"] = [jax.random.normal(k, (c, e), jnp.float32)
                       for k, c, e in zip(jax.random.split(ks[0], len(CARDINALITIES)),
                                          CARDINALITIES, EMB_SIZES)]
    p["pe_w1"] = xavier(ks[1], CAT_DIM, PROJ_DIM);  p["pe_b1"] = jnp.zeros((1, PROJ_DIM), jnp.float32)
    p["pe_w2"] = xavier(ks[2], PROJ_DIM, PROJ_DIM); p["pe_b2"] = jnp.zeros((1, PROJ_DIM), jnp.float32)
    # ODST parameters
    p["fs_logits"]  = jax.random.normal(ks[3], (ODST_IN, HIDDEN, DEPTH), jnp.float32)
    p["thresholds"] = jax.random.normal(ks[4], (HIDDEN, DEPTH), jnp.float32)
    p["log_temp"]   = jnp.zeros((HIDDEN, DEPTH), jnp.float32)
    p["response"]   = jax.random.normal(ks[5], (HIDDEN, LEAVES), jnp.float32)
    # BatchNorm1d
    p["bn_gamma"] = jnp.ones((HIDDEN,), jnp.float32)
    p["bn_beta"]  = jnp.zeros((HIDDEN,), jnp.float32)
    p["bn_mean"]  = jnp.zeros((HIDDEN,), jnp.float32)
    p["bn_var"]   = jnp.ones((HIDDEN,), jnp.float32)
    # heads
    p["risk_w"] = xavier(ks[6], HIDDEN, OUT_SIZE); p["risk_b"] = jnp.zeros((1, OUT_SIZE), jnp.float32)
    p["aux_w1"] = xavier(ks[7], HIDDEN, AUX_H);    p["aux_b1"] = jnp.zeros((1, AUX_H), jnp.float32)
    p["aux_w2"] = xavier(ks[8], AUX_H, OUT_SIZE);  p["aux_b2"] = jnp.zeros((1, OUT_SIZE), jnp.float32)
    return p


def iskander_forward(params, x_cat, x_num):
    B = x_cat.shape[0]
    bt = _pick_bt(B)
    n_tiles = -(-B // bt)
    Bp = n_tiles * bt

    # embedding lookup + concat (gather glue) + batch padding to a tile multiple
    embs = [params["emb_tables"][i][x_cat[:, i]] for i in range(len(CARDINALITIES))]
    emb = jnp.concatenate(embs, axis=1).astype(jnp.float32)            # [B, CAT_DIM]
    xnum = x_num.astype(jnp.float32)
    if Bp != B:
        emb  = jnp.pad(emb,  ((0, Bp - B), (0, 0)))
        xnum = jnp.pad(xnum, ((0, Bp - B), (0, 0)))

    # ----- parameter-only preprocessing (trace-time, tiny) -----
    # chunk-major, 128-padded column layout: col = g*128 + d*TREE_CHUNK + t, tree = g*14+t
    sel = sparsemax(params["fs_logits"], axis=0)                        # [F, N, D]
    sel_fdgt = jnp.transpose(sel, (0, 2, 1)).reshape(ODST_IN, DEPTH, N_CHUNKS, TREE_CHUNK)
    sel_fgdt = jnp.transpose(sel_fdgt, (0, 2, 1, 3)).reshape(ODST_IN, N_CHUNKS,
                                                             DEPTH * TREE_CHUNK)
    sel_cols = (jnp.zeros((ODST_IN, N_CHUNKS, COLS_PER_CHUNK), jnp.float32)
                .at[:, :, :DEPTH * TREE_CHUNK].set(sel_fgdt)
                .reshape(ODST_IN, SEL_COLS))
    sel_e_cols = sel_cols[:PROJ_DIM]                                    # [112, 512]
    sel_n_cols = sel_cols[PROJ_DIM:]                                    # [16,  512]

    inv_t = jnp.exp(-params["log_temp"])                                # [N, D]

    def chunk_cols(m_nd):   # [N, D] -> [N_CHUNKS, 128] with col = d*TREE_CHUNK + t
        x = jnp.transpose(m_nd.reshape(N_CHUNKS, TREE_CHUNK, DEPTH), (0, 2, 1))
        x = x.reshape(N_CHUNKS, DEPTH * TREE_CHUNK)
        return (jnp.zeros((N_CHUNKS, COLS_PER_CHUNK), jnp.float32)
                .at[:, :DEPTH * TREE_CHUNK].set(x))

    inv_t_cols = chunk_cols(inv_t).reshape(1, SEL_COLS)
    thr_cols = chunk_cols(params["thresholds"] * inv_t)
    # synthetic "ones" column: inv_t = 0, thr = 1  ->  t = -1  ->  bins_lo = 1
    thr_cols = thr_cols.at[:, ONES_COL].set(1.0).reshape(1, SEL_COLS)

    # expand matrix [128, DEPTH*CHUNK_LANES] (shared across chunks):
    #   row d*14+t, col d*896 + t*64 + l  ->  2*code[d,l]-1     (code sign folded in)
    #   row 84 (ones),  col d*896 + t*64 + l  ->  1-code[d,l]   (offset folded in)
    codes = _bin_codes()                                                # [D, L]
    cs = 2.0 * codes - 1.0
    cn = 1.0 - codes
    eye_d = jnp.eye(DEPTH, dtype=jnp.float32)
    eye_t = jnp.eye(TREE_CHUNK, dtype=jnp.float32)
    e_main = (eye_d[:, None, :, None, None] * eye_t[None, :, None, :, None]
              * cs[:, None, None, None, :]).reshape(DEPTH * TREE_CHUNK,
                                                    DEPTH * CHUNK_LANES)
    e_ones = jnp.tile(cn[:, None, :], (1, TREE_CHUNK, 1)).reshape(1, DEPTH * CHUNK_LANES)
    expand = jnp.concatenate(
        [e_main, e_ones,
         jnp.zeros((COLS_PER_CHUNK - ONES_COL - 1, DEPTH * CHUNK_LANES), jnp.float32)],
        axis=0)                                                          # [128, 5376]

    # single block-diagonal reduce: response AND BatchNorm scale folded in
    bn_scale = params["bn_gamma"] / jnp.sqrt(params["bn_var"] + BN_EPS)  # [H]
    bn_shift = params["bn_beta"] - params["bn_mean"] * bn_scale          # [H]
    resp_g = (params["response"] * bn_scale[:, None]).reshape(N_CHUNKS, TREE_CHUNK, LEAVES)
    eye_g = jnp.eye(N_CHUNKS, dtype=jnp.float32)
    reduce_w = (resp_g[:, :, :, None, None] * eye_g[:, None, None, :, None]
                * eye_t[None, :, None, None, :]).reshape(N_CHUNKS * CHUNK_LANES, HIDDEN)

    # merge the two N=1 heads into a single N=2 output; fold the BN shift into biases
    head_wy = jnp.concatenate([params["risk_w"],
                               jnp.zeros((HIDDEN, OUT_SIZE), jnp.float32)], axis=1)   # [H, 2]
    head_wa = jnp.concatenate([jnp.zeros((AUX_H, OUT_SIZE), jnp.float32),
                               params["aux_w2"]], axis=1)                              # [AUX_H, 2]
    head_b = jnp.concatenate([params["risk_b"] + bn_shift[None, :] @ params["risk_w"],
                              params["aux_b2"]], axis=1)                               # [1, 2]
    aux_b1 = params["aux_b1"] + bn_shift[None, :] @ params["aux_w1"]                   # [1, AUX_H]

    args = (emb, xnum,
            params["pe_w1"], params["pe_b1"], params["pe_w2"], params["pe_b2"],
            sel_e_cols, sel_n_cols, inv_t_cols, thr_cols,
            expand, reduce_w,
            head_wy, params["aux_w1"], aux_b1, head_wa, head_b)

    def batch_spec(shape):
        rest = tuple(int(s) for s in shape[1:])
        return pl.BlockSpec((bt,) + rest, lambda i, _n=len(rest): (i,) + (0,) * _n)

    def const_spec(shape):
        dims = tuple(int(s) for s in shape)
        return pl.BlockSpec(dims, lambda i, _n=len(dims): (0,) * _n)

    in_specs = [batch_spec(emb.shape), batch_spec(xnum.shape)]
    in_specs += [const_spec(a.shape) for a in args[2:]]

    out = pl.pallas_call(
        _iskander_kernel,
        out_shape=jax.ShapeDtypeStruct((Bp, 2), jnp.float32),
        grid_spec=pltpu.PrefetchScalarGridSpec(
            num_scalar_prefetch=0,
            grid=(n_tiles,),
            in_specs=in_specs,
            out_specs=pl.BlockSpec((bt, 2), lambda i: (i, 0)),
            scratch_shapes=[pltpu.VMEM((bt, N_CHUNKS * CHUNK_LANES), jnp.float32)]),
        compiler_params=pltpu.CompilerParams(
            dimension_semantics=("parallel",),
            vmem_limit_bytes=48 * 1024 * 1024),
    )(*args)

    return out[:B, 0:1], out[:B, 1:2]


# --------------------------- pure-JAX reference ---------------------------
def reference_forward(params, x_cat, x_num):
    embs = [params["emb_tables"][i][x_cat[:, i]] for i in range(len(CARDINALITIES))]
    emb = jnp.concatenate(embs, axis=1).astype(jnp.float32)
    h = jnp.maximum(emb @ params["pe_w1"] + params["pe_b1"][0], 0.0)
    proj = h @ params["pe_w2"] + params["pe_b2"][0]
    x = jnp.concatenate([proj, x_num.astype(jnp.float32)], axis=1)

    sel = sparsemax(params["fs_logits"], axis=0)                       # [F, N, D]
    fv = jnp.einsum("bf,fnd->bnd", x, sel)
    t = (fv - params["thresholds"][None]) * jnp.exp(-params["log_temp"][None])
    bins = jnp.clip(0.5 * jnp.stack([-t, t], axis=-1) + 0.5, 0.0, 1.0)  # sparsemoid
    codes = _bin_codes()                                               # [D, C]
    codes_1hot = jnp.stack([codes, 1.0 - codes], axis=-1)              # [D, C, 2]
    bm = jnp.einsum("bnds,dcs->bndc", bins, codes_1hot)
    rw = jnp.prod(bm, axis=2)                                          # [B, N, C]
    odst = jnp.einsum("bnc,nc->bn", rw, params["response"])

    bn_scale = params["bn_gamma"] / jnp.sqrt(params["bn_var"] + BN_EPS)
    y = (odst - params["bn_mean"]) * bn_scale + params["bn_beta"]

    risk = y @ params["risk_w"] + params["risk_b"][0]
    ah = jnp.maximum(y @ params["aux_w1"] + params["aux_b1"][0], 0.0)
    efs = ah @ params["aux_w2"] + params["aux_b2"][0]
    return risk, efs


if __name__ == "__main__":
    key = jax.random.PRNGKey(0)
    pkey, ckey, nkey = jax.random.split(key, 3)
    params = init_params(pkey)
    fwd = jax.jit(iskander_forward)

    # ---- small check (B=8, single grid step) ----
    cat_keys = jax.random.split(ckey, len(CARDINALITIES))
    x_cat = jnp.stack([jax.random.randint(k, (BATCH,), 0, c)
                       for k, c in zip(cat_keys, CARDINALITIES)], axis=1).astype(jnp.int32)
    x_num = jax.random.normal(nkey, (BATCH, NUM_SIZE), jnp.float32)

    risk, efs = fwd(params, x_cat, x_num)
    jax.block_until_ready((risk, efs))
    r_risk, r_efs = reference_forward(params, x_cat, x_num)
    assert risk.shape == (BATCH, OUT_SIZE) and efs.shape == (BATCH, OUT_SIZE)
    assert jnp.allclose(risk, r_risk, atol=1e-4, rtol=1e-4)
    assert jnp.allclose(efs, r_efs, atol=1e-4, rtol=1e-4)

    # ---- multi-tile check (B=512 -> bt=256, 2 grid steps: exercises the megacore
    #      batch split and constant VMEM residency across steps) ----
    BIG = 512
    kc2, kn2 = jax.random.split(jax.random.fold_in(key, 1))
    cat_keys2 = jax.random.split(kc2, len(CARDINALITIES))
    x_cat2 = jnp.stack([jax.random.randint(k, (BIG,), 0, c)
                        for k, c in zip(cat_keys2, CARDINALITIES)], axis=1).astype(jnp.int32)
    x_num2 = jax.random.normal(kn2, (BIG, NUM_SIZE), jnp.float32)

    risk2, efs2 = fwd(params, x_cat2, x_num2)
    jax.block_until_ready((risk2, efs2))
    r_risk2, r_efs2 = reference_forward(params, x_cat2, x_num2)
    assert risk2.shape == (BIG, OUT_SIZE) and efs2.shape == (BIG, OUT_SIZE)
    assert jnp.allclose(risk2, r_risk2, atol=2e-4, rtol=2e-4)
    assert jnp.allclose(efs2, r_efs2, atol=2e-4, rtol=2e-4)

    print("KERNEL_OK")
</pallas_src>

<mosaic_0001>
module attributes {stable_mosaic.version = 11 : i64} {
  func.func @_iskander_kernel(%arg0: i32, %arg1: memref<8x32xf32, #tpu.memory_space<vmem>>, %arg2: memref<8x16xf32, #tpu.memory_space<vmem>>, %arg3: memref<32x112xf32, #tpu.memory_space<vmem>>, %arg4: memref<1x112xf32, #tpu.memory_space<vmem>>, %arg5: memref<112x112xf32, #tpu.memory_space<vmem>>, %arg6: memref<1x112xf32, #tpu.memory_space<vmem>>, %arg7: memref<112x512xf32, #tpu.memory_space<vmem>>, %arg8: memref<16x512xf32, #tpu.memory_space<vmem>>, %arg9: memref<1x512xf32, #tpu.memory_space<vmem>>, %arg10: memref<1x512xf32, #tpu.memory_space<vmem>>, %arg11: memref<128x5376xf32, #tpu.memory_space<vmem>>, %arg12: memref<3584x56xf32, #tpu.memory_space<vmem>>, %arg13: memref<56x2xf32, #tpu.memory_space<vmem>>, %arg14: memref<56x18xf32, #tpu.memory_space<vmem>>, %arg15: memref<1x18xf32, #tpu.memory_space<vmem>>, %arg16: memref<18x2xf32, #tpu.memory_space<vmem>>, %arg17: memref<1x2xf32, #tpu.memory_space<vmem>>, %arg18: memref<8x2xf32, #tpu.memory_space<vmem>>, %arg19: memref<8x3584xf32, #tpu.memory_space<vmem>>) attributes {dimension_semantics = [#tpu.dimension_semantics<parallel>], iteration_bounds = array<i64: 1>, scalar_prefetch = 0 : i64, scratch_operands = 1 : i64, tpu.core_type = #tpu.core_type<tc>, window_params = [{transform_indices = @transform_0, window_bounds = array<i64: 8, 32>}, {transform_indices = @transform_1, window_bounds = array<i64: 8, 16>}, {pipeline_mode = #tpu.pipeline_mode<synchronous>, transform_indices = @transform_2, window_bounds = array<i64: 32, 112>}, {pipeline_mode = #tpu.pipeline_mode<synchronous>, transform_indices = @transform_3, window_bounds = array<i64: 1, 112>}, {pipeline_mode = #tpu.pipeline_mode<synchronous>, transform_indices = @transform_4, window_bounds = array<i64: 112, 112>}, {pipeline_mode = #tpu.pipeline_mode<synchronous>, transform_indices = @transform_5, window_bounds = array<i64: 1, 112>}, {pipeline_mode = #tpu.pipeline_mode<synchronous>, transform_indices = @transform_6, window_bounds = array<i64: 112, 512>}, {pipeline_mode = #tpu.pipeline_mode<synchronous>, transform_indices = @transform_7, window_bounds = array<i64: 16, 512>}, {pipeline_mode = #tpu.pipeline_mode<synchronous>, transform_indices = @transform_8, window_bounds = array<i64: 1, 512>}, {pipeline_mode = #tpu.pipeline_mode<synchronous>, transform_indices = @transform_9, window_bounds = array<i64: 1, 512>}, {pipeline_mode = #tpu.pipeline_mode<synchronous>, transform_indices = @transform_10, window_bounds = array<i64: 128, 5376>}, {pipeline_mode = #tpu.pipeline_mode<synchronous>, transform_indices = @transform_11, window_bounds = array<i64: 3584, 56>}, {pipeline_mode = #tpu.pipeline_mode<synchronous>, transform_indices = @transform_12, window_bounds = array<i64: 56, 2>}, {pipeline_mode = #tpu.pipeline_mode<synchronous>, transform_indices = @transform_13, window_bounds = array<i64: 56, 18>}, {pipeline_mode = #tpu.pipeline_mode<synchronous>, transform_indices = @transform_14, window_bounds = array<i64: 1, 18>}, {pipeline_mode = #tpu.pipeline_mode<synchronous>, transform_indices = @transform_15, window_bounds = array<i64: 18, 2>}, {pipeline_mode = #tpu.pipeline_mode<synchronous>, transform_indices = @transform_16, window_bounds = array<i64: 1, 2>}, {transform_indices = @transform_17, window_bounds = array<i64: 8, 2>}]} {
    %c0 = arith.constant 0 : index
    %c0_0 = arith.constant 0 : index
    %0 = vector.load %arg1[%c0, %c0_0] : memref<8x32xf32, #tpu.memory_space<vmem>>, vector<8x32xf32>
    %c0_1 = arith.constant 0 : index
    %c0_2 = arith.constant 0 : index
    %1 = vector.load %arg2[%c0_1, %c0_2] : memref<8x16xf32, #tpu.memory_space<vmem>>, vector<8x16xf32>
    %c0_3 = arith.constant 0 : index
    %c0_4 = arith.constant 0 : index
    %2 = vector.load %arg3[%c0_3, %c0_4] : memref<32x112xf32, #tpu.memory_space<vmem>>, vector<32x112xf32>
    %cst = arith.constant dense<0.000000e+00> : vector<8x112xf32>
    %3 = tpu.matmul %0, %2, %cst {dimension_numbers = #tpu.dot_dimension_numbers<[1], [0], [0], [1], [0, 0, 1, 1], [], []>} : vector<8x32xf32>, vector<32x112xf32>, vector<8x112xf32> -> vector<8x112xf32>
    %c0_5 = arith.constant 0 : index
    %c0_6 = arith.constant 0 : index
    %4 = vector.load %arg4[%c0_5, %c0_6] : memref<1x112xf32, #tpu.memory_space<vmem>>, vector<1x112xf32>
    %5 = vector.broadcast %4 : vector<1x112xf32> to vector<8x112xf32>
    %6 = arith.addf %3, %5 : vector<8x112xf32>
    %cst_7 = arith.constant 0.000000e+00 : f32
    %7 = vector.broadcast %cst_7 : f32 to vector<8x112xf32>
    %8 = arith.maximumf %6, %7 : vector<8x112xf32>
    %c0_8 = arith.constant 0 : index
    %c0_9 = arith.constant 0 : index
    %9 = vector.load %arg5[%c0_8, %c0_9] : memref<112x112xf32, #tpu.memory_space<vmem>>, vector<112x112xf32>
    %cst_10 = arith.constant dense<0.000000e+00> : vector<8x112xf32>
    %10 = tpu.matmul %8, %9, %cst_10 {dimension_numbers = #tpu.dot_dimension_numbers<[1], [0], [0], [1], [0, 0, 1, 1], [], []>} : vector<8x112xf32>, vector<112x112xf32>, vector<8x112xf32> -> vector<8x112xf32>
    %c0_11 = arith.constant 0 : index
    %c0_12 = arith.constant 0 : index
    %11 = vector.load %arg6[%c0_11, %c0_12] : memref<1x112xf32, #tpu.memory_space<vmem>>, vector<1x112xf32>
    %12 = vector.broadcast %11 : vector<1x112xf32> to vector<8x112xf32>
    %13 = arith.addf %10, %12 : vector<8x112xf32>
    %c0_13 = arith.constant 0 : index
    %c0_14 = arith.constant 0 : index
    %14 = vector.load %arg7[%c0_13, %c0_14] : memref<112x512xf32, #tpu.memory_space<vmem>>, vector<112x512xf32>
    %cst_15 = arith.constant dense<0.000000e+00> : vector<8x512xf32>
    %15 = tpu.matmul %13, %14, %cst_15 {dimension_numbers = #tpu.dot_dimension_numbers<[1], [0], [0], [1], [0, 0, 1, 1], [], []>} : vector<8x112xf32>, vector<112x512xf32>, vector<8x512xf32> -> vector<8x512xf32>
    %c0_16 = arith.constant 0 : index
    %c0_17 = arith.constant 0 : index
    %16 = vector.load %arg8[%c0_16, %c0_17] : memref<16x512xf32, #tpu.memory_space<vmem>>, vector<16x512xf32>
    %cst_18 = arith.constant dense<0.000000e+00> : vector<8x512xf32>
    %17 = tpu.matmul %1, %16, %cst_18 {dimension_numbers = #tpu.dot_dimension_numbers<[1], [0], [0], [1], [0, 0, 1, 1], [], []>} : vector<8x16xf32>, vector<16x512xf32>, vector<8x512xf32> -> vector<8x512xf32>
    %18 = arith.addf %15, %17 : vector<8x512xf32>
    %c0_19 = arith.constant 0 : index
    %c0_20 = arith.constant 0 : index
    %19 = vector.load %arg9[%c0_19, %c0_20] : memref<1x512xf32, #tpu.memory_space<vmem>>, vector<1x512xf32>
    %20 = vector.broadcast %19 : vector<1x512xf32> to vector<8x512xf32>
    %21 = arith.mulf %18, %20 : vector<8x512xf32>
    %c0_21 = arith.constant 0 : index
    %c0_22 = arith.constant 0 : index
    %22 = vector.load %arg10[%c0_21, %c0_22] : memref<1x512xf32, #tpu.memory_space<vmem>>, vector<1x512xf32>
    %23 = vector.broadcast %22 : vector<1x512xf32> to vector<8x512xf32>
    %24 = arith.subf %21, %23 : vector<8x512xf32>
    %cst_23 = arith.constant 5.000000e-01 : f32
    %25 = vector.broadcast %cst_23 : f32 to vector<8x512xf32>
    %26 = arith.mulf %25, %24 : vector<8x512xf32>
    %cst_24 = arith.constant 5.000000e-01 : f32
    %27 = vector.broadcast %cst_24 : f32 to vector<8x512xf32>
    %28 = arith.subf %27, %26 : vector<8x512xf32>
    %cst_25 = arith.constant 0.000000e+00 : f32
    %cst_26 = arith.constant 1.000000e+00 : f32
    %29 = vector.broadcast %cst_25 : f32 to vector<8x512xf32>
    %30 = arith.maximumf %29, %28 : vector<8x512xf32>
    %31 = vector.broadcast %cst_26 : f32 to vector<8x512xf32>
    %32 = arith.minimumf %31, %30 : vector<8x512xf32>
    %c0_27 = arith.constant 0 : index
    %c0_28 = arith.constant 0 : index
    %33 = vector.load %arg11[%c0_27, %c0_28] : memref<128x5376xf32, #tpu.memory_space<vmem>>, vector<128x5376xf32>
    %34 = vector.extract_strided_slice %32 {offsets = [0, 0], sizes = [8, 128], strides = [1, 1]} : vector<8x512xf32> to vector<8x128xf32>
    %cst_29 = arith.constant dense<0.000000e+00> : vector<8x5376xf32>
    %35 = tpu.matmul %34, %33, %cst_29 {dimension_numbers = #tpu.dot_dimension_numbers<[1], [0], [0], [1], [0, 0, 1, 1], [], []>} : vector<8x128xf32>, vector<128x5376xf32>, vector<8x5376xf32> -> vector<8x5376xf32>
    %36 = vector.extract_strided_slice %35 {offsets = [0, 0], sizes = [8, 896], strides = [1, 1]} : vector<8x5376xf32> to vector<8x896xf32>
    %37 = vector.extract_strided_slice %35 {offsets = [0, 896], sizes = [8, 896], strides = [1, 1]} : vector<8x5376xf32> to vector<8x896xf32>
    %38 = arith.mulf %36, %37 : vector<8x896xf32>
    %39 = vector.extract_strided_slice %35 {offsets = [0, 1792], sizes = [8, 896], strides = [1, 1]} : vector<8x5376xf32> to vector<8x896xf32>
    %40 = arith.mulf %38, %39 : vector<8x896xf32>
    %41 = vector.extract_strided_slice %35 {offsets = [0, 2688], sizes = [8, 896], strides = [1, 1]} : vector<8x5376xf32> to vector<8x896xf32>
    %42 = arith.mulf %40, %41 : vector<8x896xf32>
    %43 = vector.extract_strided_slice %35 {offsets = [0, 3584], sizes = [8, 896], strides = [1, 1]} : vector<8x5376xf32> to vector<8x896xf32>
    %44 = arith.mulf %42, %43 : vector<8x896xf32>
    %45 = vector.extract_strided_slice %35 {offsets = [0, 4480], sizes = [8, 896], strides = [1, 1]} : vector<8x5376xf32> to vector<8x896xf32>
    %46 = arith.mulf %44, %45 : vector<8x896xf32>
    %c0_30 = arith.constant 0 : index
    %c0_31 = arith.constant 0 : index
    %47 = vector.load %arg19[%c0_30, %c0_31] : memref<8x3584xf32, #tpu.memory_space<vmem>>, vector<8x896xf32>
    tpu.vector_store %arg19[%c0_30, %c0_31], %46 {strides = array<i32>} : memref<8x3584xf32, #tpu.memory_space<vmem>>, vector<8x896xf32>,
    %48 = vector.extract_strided_slice %32 {offsets = [0, 128], sizes = [8, 128], strides = [1, 1]} : vector<8x512xf32> to vector<8x128xf32>
    %cst_32 = arith.constant dense<0.000000e+00> : vector<8x5376xf32>
    %49 = tpu.matmul %48, %33, %cst_32 {dimension_numbers = #tpu.dot_dimension_numbers<[1], [0], [0], [1], [0, 0, 1, 1], [], []>} : vector<8x128xf32>, vector<128x5376xf32>, vector<8x5376xf32> -> vector<8x5376xf32>
    %50 = vector.extract_strided_slice %49 {offsets = [0, 0], sizes = [8, 896], strides = [1, 1]} : vector<8x5376xf32> to vector<8x896xf32>
    %51 = vector.extract_strided_slice %49 {offsets = [0, 896], sizes = [8, 896], strides = [1, 1]} : vector<8x5376xf32> to vector<8x896xf32>
    %52 = arith.mulf %50, %51 : vector<8x896xf32>
    %53 = vector.extract_strided_slice %49 {offsets = [0, 1792], sizes = [8, 896], strides = [1, 1]} : vector<8x5376xf32> to vector<8x896xf32>
    %54 = arith.mulf %52, %53 : vector<8x896xf32>
    %55 = vector.extract_strided_slice %49 {offsets = [0, 2688], sizes = [8, 896], strides = [1, 1]} : vector<8x5376xf32> to vector<8x896xf32>
    %56 = arith.mulf %54, %55 : vector<8x896xf32>
    %57 = vector.extract_strided_slice %49 {offsets = [0, 3584], sizes = [8, 896], strides = [1, 1]} : vector<8x5376xf32> to vector<8x896xf32>
    %58 = arith.mulf %56, %57 : vector<8x896xf32>
    %59 = vector.extract_strided_slice %49 {offsets = [0, 4480], sizes = [8, 896], strides = [1, 1]} : vector<8x5376xf32> to vector<8x896xf32>
    %60 = arith.mulf %58, %59 : vector<8x896xf32>
    %c0_33 = arith.constant 0 : index
    %c896 = arith.constant 896 : index
    %61 = vector.load %arg19[%c0_33, %c896] : memref<8x3584xf32, #tpu.memory_space<vmem>>, vector<8x896xf32>
    tpu.vector_store %arg19[%c0_33, %c896], %60 {strides = array<i32>} : memref<8x3584xf32, #tpu.memory_space<vmem>>, vector<8x896xf32>,
    %62 = vector.extract_strided_slice %32 {offsets = [0, 256], sizes = [8, 128], strides = [1, 1]} : vector<8x512xf32> to vector<8x128xf32>
    %cst_34 = arith.constant dense<0.000000e+00> : vector<8x5376xf32>
    %63 = tpu.matmul %62, %33, %cst_34 {dimension_numbers = #tpu.dot_dimension_numbers<[1], [0], [0], [1], [0, 0, 1, 1], [], []>} : vector<8x128xf32>, vector<128x5376xf32>, vector<8x5376xf32> -> vector<8x5376xf32>
    %64 = vector.extract_strided_slice %63 {offsets = [0, 0], sizes = [8, 896], strides = [1, 1]} : vector<8x5376xf32> to vector<8x896xf32>
    %65 = vector.extract_strided_slice %63 {offsets = [0, 896], sizes = [8, 896], strides = [1, 1]} : vector<8x5376xf32> to vector<8x896xf32>
    %66 = arith.mulf %64, %65 : vector<8x896xf32>
    %67 = vector.extract_strided_slice %63 {offsets = [0, 1792], sizes = [8, 896], strides = [1, 1]} : vector<8x5376xf32> to vector<8x896xf32>
    %68 = arith.mulf %66, %67 : vector<8x896xf32>
    %69 = vector.extract_strided_slice %63 {offsets = [0, 2688], sizes = [8, 896], strides = [1, 1]} : vector<8x5376xf32> to vector<8x896xf32>
    %70 = arith.mulf %68, %69 : vector<8x896xf32>
    %71 = vector.extract_strided_slice %63 {offsets = [0, 3584], sizes = [8, 896], strides = [1, 1]} : vector<8x5376xf32> to vector<8x896xf32>
    %72 = arith.mulf %70, %71 : vector<8x896xf32>
    %73 = vector.extract_strided_slice %63 {offsets = [0, 4480], sizes = [8, 896], strides = [1, 1]} : vector<8x5376xf32> to vector<8x896xf32>
    %74 = arith.mulf %72, %73 : vector<8x896xf32>
    %c0_35 = arith.constant 0 : index
    %c1792 = arith.constant 1792 : index
    %75 = vector.load %arg19[%c0_35, %c1792] : memref<8x3584xf32, #tpu.memory_space<vmem>>, vector<8x896xf32>
    tpu.vector_store %arg19[%c0_35, %c1792], %74 {strides = array<i32>} : memref<8x3584xf32, #tpu.memory_space<vmem>>, vector<8x896xf32>,
    %76 = vector.extract_strided_slice %32 {offsets = [0, 384], sizes = [8, 128], strides = [1, 1]} : vector<8x512xf32> to vector<8x128xf32>
    %cst_36 = arith.constant dense<0.000000e+00> : vector<8x5376xf32>
    %77 = tpu.matmul %76, %33, %cst_36 {dimension_numbers = #tpu.dot_dimension_numbers<[1], [0], [0], [1], [0, 0, 1, 1], [], []>} : vector<8x128xf32>, vector<128x5376xf32>, vector<8x5376xf32> -> vector<8x5376xf32>
    %78 = vector.extract_strided_slice %77 {offsets = [0, 0], sizes = [8, 896], strides = [1, 1]} : vector<8x5376xf32> to vector<8x896xf32>
    %79 = vector.extract_strided_slice %77 {offsets = [0, 896], sizes = [8, 896], strides = [1, 1]} : vector<8x5376xf32> to vector<8x896xf32>
    %80 = arith.mulf %78, %79 : vector<8x896xf32>
    %81 = vector.extract_strided_slice %77 {offsets = [0, 1792], sizes = [8, 896], strides = [1, 1]} : vector<8x5376xf32> to vector<8x896xf32>
    %82 = arith.mulf %80, %81 : vector<8x896xf32>
    %83 = vector.extract_strided_slice %77 {offsets = [0, 2688], sizes = [8, 896], strides = [1, 1]} : vector<8x5376xf32> to vector<8x896xf32>
    %84 = arith.mulf %82, %83 : vector<8x896xf32>
    %85 = vector.extract_strided_slice %77 {offsets = [0, 3584], sizes = [8, 896], strides = [1, 1]} : vector<8x5376xf32> to vector<8x896xf32>
    %86 = arith.mulf %84, %85 : vector<8x896xf32>
    %87 = vector.extract_strided_slice %77 {offsets = [0, 4480], sizes = [8, 896], strides = [1, 1]} : vector<8x5376xf32> to vector<8x896xf32>
    %88 = arith.mulf %86, %87 : vector<8x896xf32>
    %c0_37 = arith.constant 0 : index
    %c2688 = arith.constant 2688 : index
    %89 = vector.load %arg19[%c0_37, %c2688] : memref<8x3584xf32, #tpu.memory_space<vmem>>, vector<8x896xf32>
    tpu.vector_store %arg19[%c0_37, %c2688], %88 {strides = array<i32>} : memref<8x3584xf32, #tpu.memory_space<vmem>>, vector<8x896xf32>,
    %c0_38 = arith.constant 0 : index
    %c0_39 = arith.constant 0 : index
    %90 = vector.load %arg19[%c0_38, %c0_39] : memref<8x3584xf32, #tpu.memory_space<vmem>>, vector<8x3584xf32>
    %c0_40 = arith.constant 0 : index
    %c0_41 = arith.constant 0 : index
    %91 = vector.load %arg12[%c0_40, %c0_41] : memref<3584x56xf32, #tpu.memory_space<vmem>>, vector<3584x56xf32>
    %cst_42 = arith.constant dense<0.000000e+00> : vector<8x56xf32>
    %92 = tpu.matmul %90, %91, %cst_42 {dimension_numbers = #tpu.dot_dimension_numbers<[1], [0], [0], [1], [0, 0, 1, 1], [], []>} : vector<8x3584xf32>, vector<3584x56xf32>, vector<8x56xf32> -> vector<8x56xf32>
    %c0_43 = arith.constant 0 : index
    %c0_44 = arith.constant 0 : index
    %93 = vector.load %arg14[%c0_43, %c0_44] : memref<56x18xf32, #tpu.memory_space<vmem>>, vector<56x18xf32>
    %cst_45 = arith.constant dense<0.000000e+00> : vector<8x18xf32>
    %94 = tpu.matmul %92, %93, %cst_45 {dimension_numbers = #tpu.dot_dimension_numbers<[1], [0], [0], [1], [0, 0, 1, 1], [], []>} : vector<8x56xf32>, vector<56x18xf32>, vector<8x18xf32> -> vector<8x18xf32>
    %c0_46 = arith.constant 0 : index
    %c0_47 = arith.constant 0 : index
    %95 = vector.load %arg15[%c0_46, %c0_47] : memref<1x18xf32, #tpu.memory_space<vmem>>, vector<1x18xf32>
    %96 = vector.broadcast %95 : vector<1x18xf32> to vector<8x18xf32>
    %97 = arith.addf %94, %96 : vector<8x18xf32>
    %cst_48 = arith.constant 0.000000e+00 : f32
    %98 = vector.broadcast %cst_48 : f32 to vector<8x18xf32>
    %99 = arith.maximumf %97, %98 : vector<8x18xf32>
    %c0_49 = arith.constant 0 : index
    %c0_50 = arith.constant 0 : index
    %100 = vector.load %arg13[%c0_49, %c0_50] : memref<56x2xf32, #tpu.memory_space<vmem>>, vector<56x2xf32>
    %cst_51 = arith.constant dense<0.000000e+00> : vector<8x2xf32>
    %101 = tpu.matmul %92, %100, %cst_51 {dimension_numbers = #tpu.dot_dimension_numbers<[1], [0], [0], [1], [0, 0, 1, 1], [], []>} : vector<8x56xf32>, vector<56x2xf32>, vector<8x2xf32> -> vector<8x2xf32>
    %c0_52 = arith.constant 0 : index
    %c0_53 = arith.constant 0 : index
    %102 = vector.load %arg16[%c0_52, %c0_53] : memref<18x2xf32, #tpu.memory_space<vmem>>, vector<18x2xf32>
    %cst_54 = arith.constant dense<0.000000e+00> : vector<8x2xf32>
    %103 = tpu.matmul %99, %102, %cst_54 {dimension_numbers = #tpu.dot_dimension_numbers<[1], [0], [0], [1], [0, 0, 1, 1], [], []>} : vector<8x18xf32>, vector<18x2xf32>, vector<8x2xf32> -> vector<8x2xf32>
    %104 = arith.addf %101, %103 : vector<8x2xf32>
    %c0_55 = arith.constant 0 : index
    %c0_56 = arith.constant 0 : index
    %105 = vector.load %arg17[%c0_55, %c0_56] : memref<1x2xf32, #tpu.memory_space<vmem>>, vector<1x2xf32>
    %106 = vector.broadcast %105 : vector<1x2xf32> to vector<8x2xf32>
    %107 = arith.addf %104, %106 : vector<8x2xf32>
    %c0_57 = arith.constant 0 : index
    %c0_58 = arith.constant 0 : index
    %108 = vector.load %arg18[%c0_57, %c0_58] : memref<8x2xf32, #tpu.memory_space<vmem>>, vector<8x2xf32>
    tpu.vector_store %arg18[%c0_57, %c0_58], %107 {strides = array<i32>} : memref<8x2xf32, #tpu.memory_space<vmem>>, vector<8x2xf32>,
    return
  }
  func.func @transform_0(%arg0: i32) -> (i32, i32) {
    %c0_i32 = arith.constant 0 : i32
    %c0_i32_0 = arith.constant 0 : i32
    return %arg0, %c0_i32 : i32, i32
  }
  func.func @transform_1(%arg0: i32) -> (i32, i32) {
    %c0_i32 = arith.constant 0 : i32
    %c0_i32_0 = arith.constant 0 : i32
    return %arg0, %c0_i32 : i32, i32
  }
  func.func @transform_2(%arg0: i32) -> (i32, i32) {
    %c0_i32 = arith.constant 0 : i32
    %c0_i32_0 = arith.constant 0 : i32
    %c0_i32_1 = arith.constant 0 : i32
    return %c0_i32, %c0_i32_0 : i32, i32
  }
  func.func @transform_3(%arg0: i32) -> (i32, i32) {
    %c0_i32 = arith.constant 0 : i32
    %c0_i32_0 = arith.constant 0 : i32
    %c0_i32_1 = arith.constant 0 : i32
    return %c0_i32, %c0_i32_0 : i32, i32
  }
  func.func @transform_4(%arg0: i32) -> (i32, i32) {
    %c0_i32 = arith.constant 0 : i32
    %c0_i32_0 = arith.constant 0 : i32
    %c0_i32_1 = arith.constant 0 : i32
    return %c0_i32, %c0_i32_0 : i32, i32
  }
  func.func @transform_5(%arg0: i32) -> (i32, i32) {
    %c0_i32 = arith.constant 0 : i32
    %c0_i32_0 = arith.constant 0 : i32
    %c0_i32_1 = arith.constant 0 : i32
    return %c0_i32, %c0_i32_0 : i32, i32
  }
  func.func @transform_6(%arg0: i32) -> (i32, i32) {
    %c0_i32 = arith.constant 0 : i32
    %c0_i32_0 = arith.constant 0 : i32
    %c0_i32_1 = arith.constant 0 : i32
    return %c0_i32, %c0_i32_0 : i32, i32
  }
  func.func @transform_7(%arg0: i32) -> (i32, i32) {
    %c0_i32 = arith.constant 0 : i32
    %c0_i32_0 = arith.constant 0 : i32
    %c0_i32_1 = arith.constant 0 : i32
    return %c0_i32, %c0_i32_0 : i32, i32
  }
  func.func @transform_8(%arg0: i32) -> (i32, i32) {
    %c0_i32 = arith.constant 0 : i32
    %c0_i32_0 = arith.constant 0 : i32
    %c0_i32_1 = arith.constant 0 : i32
    return %c0_i32, %c0_i32_0 : i32, i32
  }
  func.func @transform_9(%arg0: i32) -> (i32, i32) {
    %c0_i32 = arith.constant 0 : i32
    %c0_i32_0 = arith.constant 0 : i32
    %c0_i32_1 = arith.constant 0 : i32
    return %c0_i32, %c0_i32_0 : i32, i32
  }
  func.func @transform_10(%arg0: i32) -> (i32, i32) {
    %c0_i32 = arith.constant 0 : i32
    %c0_i32_0 = arith.constant 0 : i32
    %c0_i32_1 = arith.constant 0 : i32
    return %c0_i32, %c0_i32_0 : i32, i32
  }
  func.func @transform_11(%arg0: i32) -> (i32, i32) {
    %c0_i32 = arith.constant 0 : i32
    %c0_i32_0 = arith.constant 0 : i32
    %c0_i32_1 = arith.constant 0 : i32
    return %c0_i32, %c0_i32_0 : i32, i32
  }
  func.func @transform_12(%arg0: i32) -> (i32, i32) {
    %c0_i32 = arith.constant 0 : i32
    %c0_i32_0 = arith.constant 0 : i32
    %c0_i32_1 = arith.constant 0 : i32
    return %c0_i32, %c0_i32_0 : i32, i32
  }
  func.func @transform_13(%arg0: i32) -> (i32, i32) {
    %c0_i32 = arith.constant 0 : i32
    %c0_i32_0 = arith.constant 0 : i32
    %c0_i32_1 = arith.constant 0 : i32
    return %c0_i32, %c0_i32_0 : i32, i32
  }
  func.func @transform_14(%arg0: i32) -> (i32, i32) {
    %c0_i32 = arith.constant 0 : i32
    %c0_i32_0 = arith.constant 0 : i32
    %c0_i32_1 = arith.constant 0 : i32
    return %c0_i32, %c0_i32_0 : i32, i32
  }
  func.func @transform_15(%arg0: i32) -> (i32, i32) {
    %c0_i32 = arith.constant 0 : i32
    %c0_i32_0 = arith.constant 0 : i32
    %c0_i32_1 = arith.constant 0 : i32
    return %c0_i32, %c0_i32_0 : i32, i32
  }
  func.func @transform_16(%arg0: i32) -> (i32, i32) {
    %c0_i32 = arith.constant 0 : i32
    %c0_i32_0 = arith.constant 0 : i32
    %c0_i32_1 = arith.constant 0 : i32
    return %c0_i32, %c0_i32_0 : i32, i32
  }
  func.func @transform_17(%arg0: i32) -> (i32, i32) {
    %c0_i32 = arith.constant 0 : i32
    %c0_i32_0 = arith.constant 0 : i32
    return %arg0, %c0_i32 : i32, i32
  }
}

</mosaic_0001>

<bundles_post_ra>
// kernel: iskander_forward.1
= control target key start
LH: loop header
LB: loop body
LE: loop exit
PB: predicated region body
PF: predicated region fallthrough
CT: control target
= control target key end

     0   :  { %v19523_v0 = vmov 0.0|0.0   ;;  %vm13068_vm0 = vmmov 0   ;;  %v19525_v4 = vmov 0.0   ;;  %vm69_vm1 = vcmask 261120   ;;  %s19503_s2 = inlined_call_operand.vmem [shape: f32[32,112], index: 2, kind: input, shape index: {}]   ;;  %s19504_s4 = inlined_call_operand.vmem [shape: f32[112,112], index: 4, kind: input, shape index: {}]   ;;  %s19505_s0 = inlined_call_operand.vmem [shape: f32[8,32], index: 0, kind: input, shape index: {}]   ;;  %s19506_s7 = inlined_call_operand.vmem [shape: f32[16,512], index: 7, kind: input, shape index: {}]   ;;  %s19507_s6 = inlined_call_operand.vmem [shape: f32[112,512], index: 6, kind: input, shape index: {}]   ;;  %s19508_s1 = inlined_call_operand.vmem [shape: f32[8,16], index: 1, kind: input, shape index: {}]   ;;  %s19509_s3 = inlined_call_operand.vmem [shape: f32[1,112], index: 3, kind: input, shape index: {}]   ;;  %s19510_s10 = inlined_call_operand.vmem [shape: f32[128,5376], index: 10, kind: input, shape index: {}]   ;;  %s19511_s5 = inlined_call_operand.vmem [shape: f32[1,112], index: 5, kind: input, shape index: {}]   ;;  %s19512_s8 = inlined_call_operand.vmem [shape: f32[1,512], index: 8, kind: input, shape index: {}]   ;;  %s19513_s9 = inlined_call_operand.vmem [shape: f32[1,512], index: 9, kind: input, shape index: {}]   ;;  %s19514_s11 = inlined_call_operand.vmem [shape: f32[3584,56], index: 11, kind: input, shape index: {}]   ;;  %s19515_s13 = inlined_call_operand.vmem [shape: f32[56,18], index: 13, kind: input, shape index: {}]   ;;  %s19516_s15 = inlined_call_operand.vmem [shape: f32[18,2], index: 15, kind: input, shape index: {}]   ;;  %s19517_s14 = inlined_call_operand.vmem [shape: f32[1,18], index: 14, kind: input, shape index: {}]   ;;  %s19518_s12 = inlined_call_operand.vmem [shape: f32[56,2], index: 12, kind: input, shape index: {}]   ;;  %s19519_s16 = inlined_call_operand.vmem [shape: f32[1,2], index: 16, kind: input, shape index: {}]   ;;  %s19520_s17 = inlined_call_operand.vmem [shape: f32[8,2], index: 17, kind: output, shape index: {}]  }
   0x1   :  { %20248 = sst [smem:[#allocation350_spill]] %s19503_s2  ;;  %9812 = vmatprep.subr.bf16.mxu1 %v19523_v0  ;;  %9735 = vmatprep.mubr.msk.f32.mxu1 %vm13068_vm0, %v19525_v4  ;;  %v56_v10 = vld [vmem:[%s19505_s0] sm:$0xff]  ;;  %v296_v30 = vld [vmem:[%s19506_s7 + $0x8] sm:$0xff]  ;;  %v298_v35 = vld [vmem:[%s19506_s7 + $0x18] sm:$0xff]  ;;  %vm303_vm2 = vcmask 130048   ;;  %vm165_vm3 = vcmask 916480  }
   0x2   :  { %20249 = sst [smem:[#allocation351_spill]] %s19504_s4  ;;  %s20250_s26 = sld [smem:[#allocation350_spill]]  ;;  %371 = vmatprep.mubr.f32.mxu0 %v19525_v4  ;;  %v300_v31 = vld [vmem:[%s19506_s7 + $0x28] sm:$0xff]  ;;  %v295_v32 = vld [vmem:[%s19506_s7] sm:$0xff]  ;;  %v302_v36 = vld [vmem:[%s19506_s7 + $0x38] sm:$0xff]  ;;  %vm8936_vm4 = vcmask 457728  }
   0x3   :  { %s20251_s20 = sld [smem:[#allocation351_spill]]  ;;  %v9839_v33 = vpack.c.bf16 %v300_v31, %v296_v30  ;;  %v299_v34 = vld [vmem:[%s19506_s7 + $0x20] sm:$0xff]  ;;  %v9843_v38 = vpack.c.bf16 %v302_v36, %v298_v35  ;;  %v297_v39 = vld [vmem:[%s19506_s7 + $0x10] sm:$0xff]  ;;  %v240_v41 = vld [vmem:[%s19507_s6 + $0x8] sm:$0xff]  ;;  %vm9025_vm5 = vcmask 1041408   ;;  %vm9021_vm6 = vcmask 146432  }
   0x4   :  { %v9841_v37 = vpack.c.bf16 %v299_v34, %v295_v32  ;;  %v301_v40 = vld [vmem:[%s19506_s7 + $0x30] sm:$0xff]  ;;  %v244_v42 = vld [vmem:[%s19507_s6 + $0x28] sm:$0xff]  ;;  %v57_v43 = vld [vmem:[%s19508_s1] sm:$0xff]  ;;  %vm9177_vm7 = vcmask 15360  }
   0x5   :  { %9840 = vmatprep.subr.bf16.mxu0 %v9839_v33  ;;  %v9845_v44 = vpack.c.bf16 %v301_v40, %v297_v39  ;;  %v9847_v45 = vpack.c.bf16 %v244_v42, %v240_v41  ;;  %v239_v46 = vld [vmem:[%s19507_s6] sm:$0xff]  ;;  %v248_v48 = vld [vmem:[%s19507_s6 + $0x48] sm:$0xff]  ;;  %v705_v32 = vld [vmem:[%s19510_s10 + $0x158] sm:$0xff] }
   0x6   :  { %9842 = vmatpush1.bf16.msra.mxu0 %v9841_v37  ;;  %v243_v47 = vld [vmem:[%s19507_s6 + $0x20] sm:$0xff]  ;;  %v252_v49 = vld [vmem:[%s19507_s6 + $0x68] sm:$0xff]  ;;  %v704_v35 = vld [vmem:[%s19510_s10 + $0x150] sm:$0xff] }
   0x7   :  { %9844 = vmatprep.subr.bf16.mxu0 %v9843_v38  ;;  %v9849_v50 = vpack.c.bf16 %v243_v47, %v239_v46  ;;  %v9851_v51 = vpack.c.bf16 %v252_v49, %v248_v48  ;;  %v247_v52 = vld [vmem:[%s19507_s6 + $0x40] sm:$0xff]  ;;  %v256_v54 = vld [vmem:[%s19507_s6 + $0x88] sm:$0xff]  ;;  %v789_v38 = vld [vmem:[%s19510_s10 + $0x3f8] sm:$0xff] }
   0x8   :  { %v58_v1 = vld [vmem:[%s20250_s26] sm:$0xff]  ;;  %v59_v2 = vld [vmem:[%s20250_s26 + $0x8] sm:$0xff]  ;;  %v60_v3 = vld [vmem:[%s20250_s26 + $0x10] sm:$0xff] }
   0x9   :  { %v9813_v5 = vpack.c.bf16 %v59_v2, %v58_v1  ;;  %v61_v6 = vld [vmem:[%s20250_s26 + $0x18] sm:$0xff]  ;;  %v144_v8 = vld [vmem:[%s20251_s20] sm:$0xff]  ;;  %v145_v9 = vld [vmem:[%s20251_s20 + $0x8] sm:$0xff]  ;;  %9187 = vmatmul.mubr.msk.f32.vlgmr.msra.gmra.mrb[0].mxu0 %vm303_vm2, %v57_v43 }
   0xa   :  { %v9816_v7 = vpack.c.bf16 %v61_v6, %v60_v3  ;;  %v9819_v11 = vpack.c.bf16 %v145_v9, %v144_v8  ;;  %v146_v12 = vld [vmem:[%s20251_s20 + $0x10] sm:$0xff]  ;;  %v147_v13 = vld [vmem:[%s20251_s20 + $0x18] sm:$0xff]  ;;  %v148_v15 = vld [vmem:[%s20251_s20 + $0x20] sm:$0xff]  ;;  %9846 = vmatpush1.bf16.msra.mxu0 %v9845_v44  ;;  %442 = vmatprep.mubr.f32.mxu0 %v19525_v4 }
   0xb   :  { %9814 = vmatpush3.bf16.msra.mxu1 %v9813_v5  ;;  %v9822_v14 = vpack.c.bf16 %v147_v13, %v146_v12  ;;  %v149_v16 = vld [vmem:[%s20251_s20 + $0x28] sm:$0xff]  ;;  %v150_v18 = vld [vmem:[%s20251_s20 + $0x30] sm:$0xff]  ;;  %v151_v19 = vld [vmem:[%s20251_s20 + $0x38] sm:$0xff]  ;;  %9848 = vmatprep.subr.bf16.mxu0 %v9847_v45 }
   0xc   :  { %9815 = vmatprep.subr.bf16.mxu1 %v19523_v0  ;;  %v9825_v17 = vpack.c.bf16 %v149_v16, %v148_v15  ;;  %v9828_v20 = vpack.c.bf16 %v151_v19, %v150_v18  ;;  %v152_v21 = vld [vmem:[%s20251_s20 + $0x40] sm:$0xff]  ;;  %v153_v22 = vld [vmem:[%s20251_s20 + $0x48] sm:$0xff]  ;;  %v154_v24 = vld [vmem:[%s20251_s20 + $0x50] sm:$0xff] }
   0xd   :  { %v9831_v23 = vpack.c.bf16 %v153_v22, %v152_v21  ;;  %v155_v25 = vld [vmem:[%s20251_s20 + $0x58] sm:$0xff]  ;;  %v156_v27 = vld [vmem:[%s20251_s20 + $0x60] sm:$0xff]  ;;  %v157_v28 = vld [vmem:[%s20251_s20 + $0x68] sm:$0xff]  ;;  %9188 = vmatmul.mubr.msk.f32.vlgmr.msra.gmra.mrb[2].mxu0 %vm303_vm2, %v57_v43 }
   0xe   :  { %v9834_v26 = vpack.c.bf16 %v155_v25, %v154_v24  ;;  %v9837_v29 = vpack.c.bf16 %v157_v28, %v156_v27  ;;  %v251_v53 = vld [vmem:[%s19507_s6 + $0x60] sm:$0xff]  ;;  %v260_v55 = vld [vmem:[%s19507_s6 + $0xa8] sm:$0xff]  ;;  %9850 = vmatpush1.bf16.msra.mxu0 %v9849_v50  ;;  %516 = vmatprep.mubr.f32.mxu0 %v19525_v4  ;;  %v242_v28 = vld [vmem:[%s19507_s6 + $0x18] sm:$0xff] }
   0xf   :  { %9817 = vmatpush3.bf16.msra.mxu1 %v9816_v7  ;;  %v9853_v56 = vpack.c.bf16 %v251_v53, %v247_v52  ;;  %9852 = vmatprep.subr.bf16.mxu0 %v9851_v51  ;;  %v9855_v57 = vpack.c.bf16 %v260_v55, %v256_v54  ;;  %v255_v58 = vld [vmem:[%s19507_s6 + $0x80] sm:$0xff]  ;;  %v264_v60 = vld [vmem:[%s19507_s6 + $0xc8] sm:$0xff]  ;;  %v788_v41 = vld [vmem:[%s19510_s10 + $0x3f0] sm:$0xff] }
  0x10   :  { %9818 = vmatprep.subr.bf16.mxu1 %v19523_v0  ;;  %v259_v59 = vld [vmem:[%s19507_s6 + $0xa0] sm:$0xff]  ;;  %v268_v61 = vld [vmem:[%s19507_s6 + $0xe8] sm:$0xff]  ;;  %v873_v44 = vld [vmem:[%s19510_s10 + $0x698] sm:$0xff] }
  0x11   :  { %v9857_v62 = vpack.c.bf16 %v259_v59, %v255_v58  ;;  %v9859_v63 = vpack.c.bf16 %v268_v61, %v264_v60  ;;  %v263_v1 = vld [vmem:[%s19507_s6 + $0xc0] sm:$0xff]  ;;  %v272_v3 = vld [vmem:[%s19507_s6 + $0x108] sm:$0xff]  ;;  %v872_v47 = vld [vmem:[%s19510_s10 + $0x690] sm:$0xff] }
  0x12   :  { %9736 = vmatmul.mubr.msk.f32.vlgmr.msra.gmra.mrb[0].mxu1 %vm69_vm1, %v56_v10  ;;  %9854 = vmatpush1.bf16.msra.mxu0 %v9853_v56  ;;  %v267_v2 = vld [vmem:[%s19507_s6 + $0xe0] sm:$0xff]  ;;  %v276_v5 = vld [vmem:[%s19507_s6 + $0x128] sm:$0xff]  ;;  %v957_v50 = vld [vmem:[%s19510_s10 + $0x938] sm:$0xff] }
  0x13   :  { %9820 = vmatpush3.bf16.msra.mxu1 %v9819_v11  ;;  %9766 = vmatprep.mubr.msk.f32.mxu1 %vm13068_vm0, %v19525_v4  ;;  %v9861_v6 = vpack.c.bf16 %v267_v2, %v263_v1  ;;  %v9863_v7 = vpack.c.bf16 %v276_v5, %v272_v3  ;;  %v271_v8 = vld [vmem:[%s19507_s6 + $0x100] sm:$0xff]  ;;  %v280_v10 = vld [vmem:[%s19507_s6 + $0x148] sm:$0xff]  ;;  %v956_v53 = vld [vmem:[%s19510_s10 + $0x930] sm:$0xff] }
  0x14   :  { %9821 = vmatprep.subr.bf16.mxu1 %v19523_v0  ;;  %9856 = vmatprep.subr.bf16.mxu0 %v9855_v57  ;;  %v275_v9 = vld [vmem:[%s19507_s6 + $0x120] sm:$0xff]  ;;  %v284_v11 = vld [vmem:[%s19507_s6 + $0x168] sm:$0xff]  ;;  %v1041_v56 = vld [vmem:[%s19510_s10 + $0xbd8] sm:$0xff] }
  0x15   :  { %v9865_v12 = vpack.c.bf16 %v275_v9, %v271_v8  ;;  %v9867_v13 = vpack.c.bf16 %v284_v11, %v280_v10  ;;  %v283_v15 = vld [vmem:[%s19507_s6 + $0x160] sm:$0xff]  ;;  %v288_v16 = vld [vmem:[%s19507_s6 + $0x188] sm:$0xff]  ;;  %v1040_v59 = vld [vmem:[%s19510_s10 + $0xbd0] sm:$0xff] }
  0x16   :  { %9858 = vmatpush1.bf16.msra.mxu0 %v9857_v62  ;;  %v291_v21 = vld [vmem:[%s19507_s6 + $0x1a0] sm:$0xff]  ;;  %v663_v31 = vld [vmem:[%s19510_s10 + $0x8] sm:$0xff]  ;;  %v241_v61 = vld [vmem:[%s19507_s6 + $0x10] sm:$0xff] }
  0x17   :  { %9823 = vmatpush3.bf16.msra.mxu1 %v9822_v14  ;;  %9860 = vmatprep.subr.bf16.mxu0 %v9859_v63  ;;  %v279_v14 = vld [vmem:[%s19507_s6 + $0x140] sm:$0xff]  ;;  %v13363_v33 = vpack.c.bf16 %v705_v32, %v663_v31  ;;  %v747_v37 = vld [vmem:[%s19510_s10 + $0x2a8] sm:$0xff]  ;;  %v245_v62 = vld [vmem:[%s19507_s6 + $0x30] sm:$0xff] }
  0x18   :  { %9824 = vmatprep.subr.bf16.mxu1 %v19523_v0  ;;  %v9869_v18 = vpack.c.bf16 %v283_v15, %v279_v14  ;;  %v662_v34 = vld [vmem:[%s19510_s10] sm:$0xff]  ;;  %v13381_v39 = vpack.c.bf16 %v789_v38, %v747_v37  ;;  %v831_v43 = vld [vmem:[%s19510_s10 + $0x548] sm:$0xff]  ;;  %v250_v1 = vld [vmem:[%s19507_s6 + $0x58] sm:$0xff]  ;;  %v9877_v5 = vpack.c.bf16 %v245_v62, %v241_v61 }
  0x19   :  { %20252 = vst [vmem:[#allocation3_spill] sm:$0xff] %v13363_v33  ;;  %v13371_v36 = vpack.c.bf16 %v704_v35, %v662_v34  ;;  %v746_v40 = vld [vmem:[%s19510_s10 + $0x2a0] sm:$0xff]  ;;  %v13398_v45 = vpack.c.bf16 %v873_v44, %v831_v43  ;;  %v915_v49 = vld [vmem:[%s19510_s10 + $0x7e8] sm:$0xff]  ;;  %v254_v2 = vld [vmem:[%s19507_s6 + $0x78] sm:$0xff] }
  0x1a   :  { %9862 = vmatpush1.bf16.msra.mxu0 %v9861_v6  ;;  %20254 = vst [vmem:[#allocation5_spill] sm:$0xff] %v13381_v39  ;;  %v13389_v42 = vpack.c.bf16 %v788_v41, %v746_v40  ;;  %v830_v46 = vld [vmem:[%s19510_s10 + $0x540] sm:$0xff]  ;;  %v13416_v51 = vpack.c.bf16 %v957_v50, %v915_v49  ;;  %v999_v55 = vld [vmem:[%s19510_s10 + $0xa88] sm:$0xff]  ;;  %v9879_v8 = vpack.c.bf16 %v254_v2, %v250_v1  ;;  %v249_v9 = vld [vmem:[%s19507_s6 + $0x50] sm:$0xff] }
  0x1b   :  { %9826 = vmatpush3.bf16.msra.mxu1 %v9825_v17  ;;  %9864 = vmatprep.subr.bf16.mxu0 %v9863_v7  ;;  %v292_v17 = vld [vmem:[%s19507_s6 + $0x1a8] sm:$0xff]  ;;  %20253 = vst [vmem:[#allocation4_spill] sm:$0xff] %v13371_v36  ;;  %20256 = vst [vmem:[#allocation7_spill] sm:$0xff] %v13398_v45  ;;  %v13407_v48 = vpack.c.bf16 %v872_v47, %v830_v46  ;;  %v914_v52 = vld [vmem:[%s19510_s10 + $0x7e0] sm:$0xff]  ;;  %v13434_v57 = vpack.c.bf16 %v1041_v56, %v999_v55 }
  0x1c   :  { %9827 = vmatprep.subr.bf16.mxu1 %v19523_v0  ;;  %v9871_v19 = vpack.c.bf16 %v292_v17, %v288_v16  ;;  %20255 = vst [vmem:[#allocation6_spill] sm:$0xff] %v13389_v42  ;;  %20258 = vst [vmem:[#allocation9_spill] sm:$0xff] %v13416_v51  ;;  %v13425_v54 = vpack.c.bf16 %v956_v53, %v914_v52  ;;  %v998_v58 = vld [vmem:[%s19510_s10 + $0xa80] sm:$0xff]  ;;  %v253_v10 = vld [vmem:[%s19507_s6 + $0x70] sm:$0xff] }
  0x1d   :  { %20257 = vst [vmem:[#allocation8_spill] sm:$0xff] %v13407_v48  ;;  %20260 = vst [vmem:[#allocation11_spill] sm:$0xff] %v13434_v57  ;;  %v13443_v60 = vpack.c.bf16 %v1040_v59, %v998_v58  ;;  %v9185_v63 = vld [vmem:[%s19511_s5] ss:$0 sm:$0xff]  ;;  %v258_v11 = vld [vmem:[%s19507_s6 + $0x98] sm:$0xff] }
  0x1e   :  { %9866 = vmatpush1.bf16.msra.mxu0 %v9865_v12  ;;  %20259 = vst [vmem:[#allocation10_spill] sm:$0xff] %v13425_v54  ;;  %v262_v12 = vld [vmem:[%s19507_s6 + $0xb8] sm:$0xff]  ;;  %v257_v15 = vld [vmem:[%s19507_s6 + $0x90] sm:$0xff]  ;;  %v667_v46 = vld [vmem:[%s19510_s10 + $0x28] sm:$0xff] }
  0x1f   :  { %9829 = vmatpush3.bf16.msra.mxu1 %v9828_v20  ;;  %9868 = vmatprep.subr.bf16.mxu0 %v9867_v13  ;;  %v287_v20 = vld [vmem:[%s19507_s6 + $0x180] sm:$0xff]  ;;  %20261 = vst [vmem:[#allocation12_spill] sm:$0xff] %v13443_v60  ;;  %v9881_v13 = vpack.c.bf16 %v253_v10, %v249_v9  ;;  %v9883_v14 = vpack.c.bf16 %v262_v12, %v258_v11  ;;  %v261_v16 = vld [vmem:[%s19507_s6 + $0xb0] sm:$0xff]  ;;  %v266_v17 = vld [vmem:[%s19507_s6 + $0xd8] sm:$0xff] }
  0x20   :  { %9830 = vmatprep.subr.bf16.mxu1 %v19523_v0  ;;  %v9873_v22 = vpack.c.bf16 %v291_v21, %v287_v20  ;;  %v265_v21 = vld [vmem:[%s19507_s6 + $0xd0] sm:$0xff]  ;;  %v290_v37 = vld [vmem:[%s19507_s6 + $0x198] sm:$0xff]  ;;  %v666_v52 = vld [vmem:[%s19510_s10 + $0x20] sm:$0xff] }
  0x21   :  { %v281_v34 = vld [vmem:[%s19507_s6 + $0x150] sm:$0xff]  ;;  %v294_v38 = vld [vmem:[%s19507_s6 + $0x1b8] sm:$0xff]  ;;  %v751_v55 = vld [vmem:[%s19510_s10 + $0x2c8] sm:$0xff] }
  0x22   :  { %9870 = vmatpush1.bf16.msra.mxu0 %v9869_v18  ;;  %v270_v18 = vld [vmem:[%s19507_s6 + $0xf8] sm:$0xff]  ;;  %v285_v35 = vld [vmem:[%s19507_s6 + $0x170] sm:$0xff]  ;;  %v9899_v41 = vpack.c.bf16 %v294_v38, %v290_v37  ;;  %v750_v61 = vld [vmem:[%s19510_s10 + $0x2c0] sm:$0xff] }
  0x23   :  { %9832 = vmatpush3.bf16.msra.mxu1 %v9831_v23  ;;  %9872 = vmatprep.subr.bf16.mxu0 %v9871_v19  ;;  %v9183_v23 = vld [vmem:[%s19509_s3] ss:$0 sm:$0xff]  ;;  %v9885_v19 = vpack.c.bf16 %v261_v16, %v257_v15  ;;  %v9887_v20 = vpack.c.bf16 %v270_v18, %v266_v17  ;;  %v9897_v40 = vpack.c.bf16 %v285_v35, %v281_v34  ;;  %v289_v43 = vld [vmem:[%s19507_s6 + $0x190] sm:$0xff]  ;;  %v709_v47 = vld [vmem:[%s19510_s10 + $0x178] sm:$0xff] }
  0x24   :  { %9833 = vmatprep.subr.bf16.mxu1 %v19523_v0  ;;  %v293_v44 = vld [vmem:[%s19507_s6 + $0x1b0] sm:$0xff]  ;;  %v13539_v50 = vpack.c.bf16 %v709_v47, %v667_v46  ;;  %v793_v56 = vld [vmem:[%s19510_s10 + $0x418] sm:$0xff]  ;;  %v918_v11 = vld [vmem:[%s19510_s10 + $0x800] sm:$0xff] }
  0x25   :  { %v9901_v49 = vpack.c.bf16 %v293_v44, %v289_v43  ;;  %v708_v53 = vld [vmem:[%s19510_s10 + $0x170] sm:$0xff]  ;;  %v13556_v59 = vpack.c.bf16 %v793_v56, %v751_v55  ;;  %v877_v1 = vld [vmem:[%s19510_s10 + $0x6b8] sm:$0xff]  ;;  %v1002_v17 = vld [vmem:[%s19510_s10 + $0xaa0] sm:$0xff] }
  0x26   :  { %9874 = vmatpush1.bf16.msra.mxu0 %v9873_v22  ;;  %v269_v22 = vld [vmem:[%s19507_s6 + $0xf0] sm:$0xff]  ;;  %20262 = vst [vmem:[#allocation13_spill] sm:$0xff] %v13539_v50  ;;  %v13553_v58 = vpack.c.bf16 %v708_v53, %v666_v52  ;;  %v620_v35 = vld [vmem:[%s19513_s9] sm:$0xf]  ;;  %v1209_v43 = vld [vmem:[%s19510_s10 + $0x1118] sm:$0xff] }
  0x27   :  { %9835 = vmatpush3.bf16.msra.mxu1 %v9834_v26  ;;  %20264 = vst [vmem:[#allocation15_spill] sm:$0xff] %v13556_v59  ;;  %v792_v62 = vld [vmem:[%s19510_s10 + $0x410] sm:$0xff]  ;;  %v1171_v44 = vld [vmem:[%s19510_s10 + $0xfe8] sm:$0xff]  ;;  %v1166_v52 = vld [vmem:[%s19510_s10 + $0xfc0] sm:$0xff] }
  0x28   :  { %9836 = vmatprep.subr.bf16.mxu1 %v19523_v0  ;;  %20263 = vst [vmem:[#allocation14_spill] sm:$0xff] %v13553_v58  ;;  %v13573_v2 = vpack.c.bf16 %v792_v62, %v750_v61  ;;  %v960_v12 = vld [vmem:[%s19510_s10 + $0x950] sm:$0xff]  ;;  %v1170_v61 = vld [vmem:[%s19510_s10 + $0xfe0] sm:$0xff] }
  0x29   :  { %v13610_v15 = vpack.c.bf16 %v960_v12, %v918_v11  ;;  %v1044_v18 = vld [vmem:[%s19510_s10 + $0xbf0] sm:$0xff]  ;;  %v1250_v11 = vld [vmem:[%s19510_s10 + $0x1260] sm:$0xff] }
  0x2a   :  { %20265 = vst [vmem:[#allocation16_spill] sm:$0xff] %v13573_v2  ;;  %v1128_v34 = vld [vmem:[%s19510_s10 + $0xe90] sm:$0xff] }
  0x2b   :  { %9838 = vmatpush3.bf16.msra.mxu1 %v9837_v29  ;;  %v246_v29 = vld [vmem:[%s19507_s6 + $0x38] sm:$0xff]  ;;  %20269 = vst [vmem:[#allocation20_spill] sm:$0xff] %v13610_v15  ;;  %v1208_v53 = vld [vmem:[%s19510_s10 + $0x1110] sm:$0xff] }
  0x2c   :  { %v9875_v30 = vpack.c.bf16 %v246_v29, %v242_v28  ;;  %9904 = vmatprep.subr.bf16.mxu1 %v13363_v33  ;;  %v277_v28 = vld [vmem:[%s19507_s6 + $0x130] sm:$0xff]  ;;  %v282_v29 = vld [vmem:[%s19507_s6 + $0x158] sm:$0xff]  ;;  %v13698_v56 = vpack.c.bf16 %v1208_v53, %v1166_v52 }
  0x2d   :  { %v1212_v62 = vld [vmem:[%s19510_s10 + $0x1130] sm:$0xff] }
  0x2e   :  { %9876 = vmatprep.subr.bf16.mxu0 %v9875_v30  ;;  %v286_v30 = vld [vmem:[%s19507_s6 + $0x178] sm:$0xff]  ;;  %20278 = vst [vmem:[#allocation29_spill] sm:$0xff] %v13698_v56  ;;  %v1292_v12 = vld [vmem:[%s19510_s10 + $0x13b0] sm:$0xff] }
  0x2f   :  { %v9895_v32 = vpack.c.bf16 %v286_v30, %v282_v29  ;;  %v1082_v29 = vld [vmem:[%s19510_s10 + $0xd20] sm:$0xff] }
  0xe5   :  { %v139_v24 = vpop.f32.mrb[0].mxu1 }
  0xe6   :  { %v140_v25 = vadd.f32 %v9183_v23, %v139_v24  ;;  %v9737_v26 = vpop.f32.mrb[1].mxu1  ;;  %v274_v23 = vld [vmem:[%s19507_s6 + $0x118] sm:$0xff] }
  0xe7   :  { %v278_v24 = vld [vmem:[%s19507_s6 + $0x138] sm:$0xff] }
  0xe8   :  { %v143_v27 = vmax.f32 %v140_v25, 0.0  ;;  %v9889_v25 = vpack.c.bf16 %v269_v22, %v265_v21  ;;  %v9891_v26 = vpack.c.bf16 %v278_v24, %v274_v23  ;;  %v1083_v22 = vld [vmem:[%s19510_s10 + $0xd28] sm:$0xff]  ;;  %v1125_v23 = vld [vmem:[%s19510_s10 + $0xe78] sm:$0xff] }
  0xe9   :  { %v1087_v24 = vld [vmem:[%s19510_s10 + $0xd48] sm:$0xff] }
  0xea   :  { %9767 = vmatmul.mubr.msk.f32.vlgmr.msra.gmra.mrb[2].mxu1 %vm165_vm3, %v143_v27  ;;  %v273_v27 = vld [vmem:[%s19507_s6 + $0x110] sm:$0xff] }
  0xeb   :  { %1398 = vmatprep.mubr.f32.mxu1 %v19525_v4  ;;  %9906 = vmatpush1.bf16.msra.mxu1 %v13371_v36  ;;  %v9893_v31 = vpack.c.bf16 %v277_v28, %v273_v27  ;;  %v1129_v27 = vld [vmem:[%s19510_s10 + $0xe98] sm:$0xff] }
  0xec   :  { %9908 = vmatprep.subr.bf16.mxu1 %v13381_v39  ;;  %v13651_v30 = vpack.c.bf16 %v1129_v27, %v1087_v24  ;;  %v671_v24 = vld [vmem:[%s19510_s10 + $0x48] sm:$0xff] }
  0xee   :  { %20273 = vst [vmem:[#allocation24_spill] sm:$0xff] %v13651_v30 }
  0xef   :  { %9910 = vmatpush1.bf16.msra.mxu1 %v13389_v42 }
  0xf0   :  { %9912 = vmatprep.subr.bf16.mxu1 %v13398_v45 }
  0xf3   :  { %9914 = vmatpush1.bf16.msra.mxu1 %v13407_v48 }
  0xf4   :  { %9916 = vmatprep.subr.bf16.mxu1 %v13416_v51 }
  0xf7   :  { %9918 = vmatpush1.bf16.msra.mxu1 %v13425_v54 }
  0xf8   :  { %9920 = vmatprep.subr.bf16.mxu1 %v13434_v57 }
  0xfb   :  { %9922 = vmatpush1.bf16.msra.mxu1 %v13443_v60 }
 0x1bd   :  { %v235_v3 = vpop.f32.mrb[2].mxu1 }
 0x1be   :  { %v13462_v6 = vadd.f32 %v9185_v63, %v235_v3  ;;  %v9768_v7 = vpop.f32.mrb[3].mxu1  ;;  %v835_v63 = vld [vmem:[%s19510_s10 + $0x568] sm:$0xff] }
 0x1bf   :  { %v13577_v3 = vpack.c.bf16 %v877_v1, %v835_v63  ;;  %v876_v7 = vld [vmem:[%s19510_s10 + $0x6b0] sm:$0xff]  ;;  %v13707_v63 = vpack.c.bf16 %v1212_v62, %v1170_v61  ;;  %v1251_v1 = vld [vmem:[%s19510_s10 + $0x1268] sm:$0xff] }
 0x1c0   :  { %9189 = vmatmul.mubr.msk.f32.vlgmr.msra.gmra.mrb[0].mxu0 %vm165_vm3, %v13462_v6 }
 0x1c1   :  { %9878 = vmatpush1.bf16.msra.mxu0 %v9877_v5  ;;  %587 = vmatprep.mubr.f32.mxu0 %v19525_v4  ;;  %20266 = vst [vmem:[#allocation17_spill] sm:$0xff] %v13577_v3  ;;  %v834_v5 = vld [vmem:[%s19510_s10 + $0x560] sm:$0xff]  ;;  %20279 = vst [vmem:[#allocation30_spill] sm:$0xff] %v13707_v63 }
 0x1c2   :  { %9880 = vmatprep.subr.bf16.mxu0 %v9879_v8  ;;  %v961_v8 = vld [vmem:[%s19510_s10 + $0x958] sm:$0xff]  ;;  %v13592_v9 = vpack.c.bf16 %v876_v7, %v834_v5  ;;  %v1255_v7 = vld [vmem:[%s19510_s10 + $0x1288] sm:$0xff] }
 0x1c3   :  { %v1293_v5 = vld [vmem:[%s19510_s10 + $0x13b8] sm:$0xff] }
 0x1c4   :  { %20267 = vst [vmem:[#allocation18_spill] sm:$0xff] %v13592_v9 }
 0x1c5   :  { %9882 = vmatpush1.bf16.msra.mxu0 %v9881_v13  ;;  %v1003_v13 = vld [vmem:[%s19510_s10 + $0xaa8] sm:$0xff] }
 0x1c6   :  { %9884 = vmatprep.subr.bf16.mxu0 %v9883_v14  ;;  %v1045_v14 = vld [vmem:[%s19510_s10 + $0xbf8] sm:$0xff] }
 0x1c7   :  { %v13613_v16 = vpack.c.bf16 %v1045_v14, %v1003_v13  ;;  %v13734_v14 = vpack.c.bf16 %v1292_v12, %v1250_v11  ;;  %v664_v12 = vld [vmem:[%s19510_s10 + $0x10] sm:$0xff] }
 0x1c9   :  { %9886 = vmatpush1.bf16.msra.mxu0 %v9885_v19  ;;  %20270 = vst [vmem:[#allocation21_spill] sm:$0xff] %v13613_v16  ;;  %v13622_v19 = vpack.c.bf16 %v1044_v18, %v1002_v17  ;;  %20282 = vst [vmem:[#allocation33_spill] sm:$0xff] %v13734_v14  ;;  %v1254_v17 = vld [vmem:[%s19510_s10 + $0x1280] sm:$0xff]  ;;  %v1296_v18 = vld [vmem:[%s19510_s10 + $0x13d0] sm:$0xff] }
 0x1ca   :  { %9888 = vmatprep.subr.bf16.mxu0 %v9887_v20  ;;  %v596_v20 = vlaneseq }
 0x1cb   :  { %20271 = vst [vmem:[#allocation22_spill] sm:$0xff] %v13622_v19 }
 0x1cc   :  { %v13626_v21 = vshrl.u32 %v596_v20, 7  ;;  %v13743_v20 = vpack.c.bf16 %v1296_v18, %v1254_v17  ;;  %v749_v17 = vld [vmem:[%s19510_s10 + $0x2b8] sm:$0xff]  ;;  %v791_v18 = vld [vmem:[%s19510_s10 + $0x408] sm:$0xff] }
 0x1cd   :  { %9890 = vmatpush1.bf16.msra.mxu0 %v9889_v25  ;;  %v13640_v25 = vld [vmem:[%s19512_s8] sm:$0xf] }
 0x1ce   :  { %9892 = vmatprep.subr.bf16.mxu0 %v9891_v26  ;;  %v13642_v26 = vpack.c.bf16 %v1125_v23, %v1083_v22  ;;  %v602_v28 = vsub.s32 1, %v13626_v21  ;;  %20283 = vst [vmem:[#allocation34_spill] sm:$0xff] %v13743_v20  ;;  %v665_v22 = vld [vmem:[%s19510_s10 + $0x18] sm:$0xff]  ;;  %v707_v23 = vld [vmem:[%s19510_s10 + $0x168] sm:$0xff] }
 0x1cf   :  { %v13757_v27 = vpack.c.bf16 %v707_v23, %v665_v22  ;;  %v755_v22 = vld [vmem:[%s19510_s10 + $0x2e8] sm:$0xff]  ;;  %v797_v23 = vld [vmem:[%s19510_s10 + $0x438] sm:$0xff] }
 0x1d0   :  { %20272 = vst [vmem:[#allocation23_spill] sm:$0xff] %v13642_v26  ;;  %9924 = vmatprep.subr.bf16.mxu1 %v13642_v26  ;;  %v603_v37 = vrot.slane %v13640_v25, %v602_v28  ;;  %v13681_v46 = vrot.slane %v620_v35, %v602_v28  ;;  %v713_v28 = vld [vmem:[%s19510_s10 + $0x198] sm:$0xff] }
 0x1d1   :  { %9894 = vmatpush1.bf16.msra.mxu0 %v9893_v31  ;;  %v1124_v31 = vld [vmem:[%s19510_s10 + $0xe70] sm:$0xff]  ;;  %20284 = vst [vmem:[#allocation35_spill] sm:$0xff] %v13757_v27 }
 0x1d2   :  { %9896 = vmatprep.subr.bf16.mxu0 %v9895_v32  ;;  %v1086_v32 = vld [vmem:[%s19510_s10 + $0xd40] sm:$0xff]  ;;  %v13667_v38 = vpack.c.bf16 %v1124_v31, %v1082_v29  ;;  %v13762_v29 = vpack.c.bf16 %v713_v28, %v671_v24  ;;  %v606_v31 = vsub.s32 2, %v13626_v21 }
 0x1d4   :  { %20274 = vst [vmem:[#allocation25_spill] sm:$0xff] %v13667_v38  ;;  %9926 = vmatpush1.bf16.msra.mxu1 %v13667_v38  ;;  %20285 = vst [vmem:[#allocation36_spill] sm:$0xff] %v13762_v29 }
 0x1d5   :  { %9898 = vmatpush1.bf16.msra.mxu0 %v9897_v40  ;;  %v13669_v40 = vpack.c.bf16 %v1128_v34, %v1086_v32  ;;  %v610_v32 = vsub.s32 3, %v13626_v21  ;;  %v13769_v34 = vrot.slane %v13640_v25, %v606_v31 }
 0x1d6   :  { %9900 = vmatprep.subr.bf16.mxu0 %v9899_v41  ;;  %v1167_v41 = vld [vmem:[%s19510_s10 + $0xfc8] sm:$0xff] }
 0x1d7   :  { %20275 = vst [vmem:[#allocation26_spill] sm:$0xff] %v13669_v40  ;;  %v13685_v47 = vpack.c.bf16 %v1209_v43, %v1167_v41  ;;  %v13772_v41 = vrot.slane %v13640_v25, %v610_v32  ;;  %v13774_v43 = vrot.slane %v620_v35, %v606_v31 }
 0x1d9   :  { %9902 = vmatpush1.bf16.msra.mxu0 %v9901_v49  ;;  %20276 = vst [vmem:[#allocation27_spill] sm:$0xff] %v13685_v47  ;;  %v1213_v49 = vld [vmem:[%s19510_s10 + $0x1138] sm:$0xff]  ;;  %9928 = vmatprep.subr.bf16.mxu1 %v13685_v47  ;;  %20286 = vst [vmem:[#allocation37_spill] sm:$0xff] %v13774_v43  ;;  %v1318_v47 = vld [vmem:[%s19510_s10 + $0x1480] sm:$0xff] }
 0x1da   :  { %9968 = vmatprep.subr.bf16.mxu0 %v13539_v50  ;;  %v13696_v55 = vpack.c.bf16 %v1213_v49, %v1171_v44  ;;  %9930 = vmatpush1.bf16.msra.mxu1 %v13698_v56  ;;  %v13776_v44 = vrot.slane %v620_v35, %v610_v32  ;;  %v598_v49 = vsub.s32 0, %v13626_v21  ;;  %v706_v21 = vld [vmem:[%s19510_s10 + $0x160] sm:$0xff]  ;;  %v748_v32 = vld [vmem:[%s19510_s10 + $0x2b0] sm:$0xff] }
 0x1db   :  { %v13808_v28 = vpack.c.bf16 %v706_v21, %v664_v12  ;;  %v839_v12 = vld [vmem:[%s19510_s10 + $0x588] sm:$0xff]  ;;  %v881_v21 = vld [vmem:[%s19510_s10 + $0x6d8] sm:$0xff] }
 0x1dc   :  { %9190 = vmatmul.mubr.msk.f32.vlgmr.msra.gmra.mrb[2].mxu0 %vm165_vm3, %v13462_v6  ;;  %v919_v6 = vld [vmem:[%s19510_s10 + $0x808] sm:$0xff]  ;;  %20277 = vst [vmem:[#allocation28_spill] sm:$0xff] %v13696_v55  ;;  %20287 = vst [vmem:[#allocation38_spill] sm:$0xff] %v13776_v44  ;;  %v599_v52 = vrot.slane %v13640_v25, %v598_v49  ;;  %v625_v53 = vrot.slane %v620_v35, %v598_v49  ;;  %v670_v35 = vld [vmem:[%s19510_s10 + $0x40] sm:$0xff] }
 0x1dd   :  { %9970 = vmatpush1.bf16.msra.mxu0 %v13553_v58  ;;  %1540 = vmatprep.mubr.f32.mxu0 %v19525_v4  ;;  %v13595_v10 = vpack.c.bf16 %v961_v8, %v919_v6  ;;  %v13721_v6 = vpack.c.bf16 %v1293_v5, %v1251_v1  ;;  %v1297_v8 = vld [vmem:[%s19510_s10 + $0x13d8] sm:$0xff]  ;;  %20288 = vst [vmem:[#allocation39_spill] sm:$0xff] %v13808_v28  ;;  %v790_v49 = vld [vmem:[%s19510_s10 + $0x400] sm:$0xff] }
 0x1de   :  { %9972 = vmatprep.subr.bf16.mxu0 %v13556_v59  ;;  %v13732_v13 = vpack.c.bf16 %v1297_v8, %v1255_v7  ;;  %v1294_v44 = vld [vmem:[%s19510_s10 + $0x13c0] sm:$0xff] }
 0x1df   :  { %20268 = vst [vmem:[#allocation19_spill] sm:$0xff] %v13595_v10  ;;  %20280 = vst [vmem:[#allocation31_spill] sm:$0xff] %v13721_v6  ;;  %9932 = vmatprep.subr.bf16.mxu1 %v13721_v6 }
 0x1e0   :  { %20281 = vst [vmem:[#allocation32_spill] sm:$0xff] %v13732_v13  ;;  %9934 = vmatpush1.bf16.msra.mxu1 %v13734_v14 }
 0x1e1   :  { %9974 = vmatpush1.bf16.msra.mxu0 %v13573_v2  ;;  %9936 = vmatprep.subr.bf16.mxu1 %v13757_v27 }
 0x1e2   :  { %9976 = vmatprep.subr.bf16.mxu0 %v13577_v3 }
 0x1e5   :  { %9978 = vmatpush1.bf16.msra.mxu0 %v13592_v9 }
 0x1e6   :  { %9980 = vmatprep.subr.bf16.mxu0 %v13595_v10 }
 0x1e9   :  { %9982 = vmatpush1.bf16.msra.mxu0 %v13610_v15 }
 0x1ea   :  { %9984 = vmatprep.subr.bf16.mxu0 %v13613_v16 }
 0x1ed   :  { %9986 = vmatpush1.bf16.msra.mxu0 %v13622_v19  ;;  %v962_v19 = vld [vmem:[%s19510_s10 + $0x960] sm:$0xff] }
 0x1ee   :  { %9988 = vmatprep.subr.bf16.mxu0 %v13651_v30 }
 0x1f1   :  { %9990 = vmatpush1.bf16.msra.mxu0 %v13669_v40 }
 0x1f2   :  { %9992 = vmatprep.subr.bf16.mxu0 %v13696_v55 }
 0x1f5   :  { %9994 = vmatpush1.bf16.msra.mxu0 %v13707_v63  ;;  %v1168_v63 = vld [vmem:[%s19510_s10 + $0xfd0] sm:$0xff] }
 0x1f6   :  { %9996 = vmatprep.subr.bf16.mxu0 %v13732_v13 }
 0x1f9   :  { %9998 = vmatpush1.bf16.msra.mxu0 %v13743_v20 }
 0x1fa   :  { %10032 = vmatprep.subr.bf16.mxu0 %v13762_v29 }
 0x293   :  { %v518_v61 = vpop.f32.mrb[0].mxu0 }
 0x294   :  { %v616_v62 = vmul.f32 %v599_v52, %v518_v61  ;;  %v520_v1 = vpop.f32.mrb[1].mxu0  ;;  %v13822_v61 = vpack.c.bf16 %v797_v23, %v755_v22  ;;  %v13860_v22 = vpack.c.bf16 %v881_v21, %v839_v12  ;;  %v838_v23 = vld [vmem:[%s19510_s10 + $0x580] sm:$0xff]  ;;  %v916_v12 = vld [vmem:[%s19510_s10 + $0x7f0] sm:$0xff] }
 0x295   :  { %v13780_v5 = vmul.f32 %v603_v37, %v520_v1  ;;  %v712_v37 = vld [vmem:[%s19510_s10 + $0x190] sm:$0xff]  ;;  %v958_v21 = vld [vmem:[%s19510_s10 + $0x940] sm:$0xff] }
 0x296   :  { %v642_v7 = vsub.f32 %v616_v62, %v625_v53  ;;  %v13810_v31 = vpack.c.bf16 %v712_v37, %v670_v35  ;;  %v13820_v53 = vpack.c.bf16 %v791_v18, %v749_v17  ;;  %20291 = vst [vmem:[#allocation42_spill] sm:$0xff] %v13822_v61  ;;  %v754_v62 = vld [vmem:[%s19510_s10 + $0x2e0] sm:$0xff]  ;;  %v796_v1 = vld [vmem:[%s19510_s10 + $0x430] sm:$0xff]  ;;  %20295 = vst [vmem:[#allocation46_spill] sm:$0xff] %v13860_v22 }
 0x297   :  { %v13848_v35 = vpack.c.bf16 %v796_v1, %v754_v62  ;;  %v832_v37 = vld [vmem:[%s19510_s10 + $0x550] sm:$0xff]  ;;  %v874_v17 = vld [vmem:[%s19510_s10 + $0x6a0] sm:$0xff]  ;;  %v923_v62 = vld [vmem:[%s19510_s10 + $0x828] sm:$0xff] }
 0x298   :  { %v646_v11 = vmul.f32 0.5, %v642_v7  ;;  %20289 = vst [vmem:[#allocation40_spill] sm:$0xff] %v13810_v31  ;;  %20290 = vst [vmem:[#allocation41_spill] sm:$0xff] %v13820_v53  ;;  %v833_v7 = vld [vmem:[%s19510_s10 + $0x558] sm:$0xff] }
 0x299   :  { %20293 = vst [vmem:[#allocation44_spill] sm:$0xff] %v13848_v35  ;;  %v965_v1 = vld [vmem:[%s19510_s10 + $0x978] sm:$0xff] }
 0x29a   :  { %v650_v25 = vsub.f32 0.5, %v646_v11  ;;  %v875_v11 = vld [vmem:[%s19510_s10 + $0x6a8] sm:$0xff]  ;;  %v13898_v8 = vpack.c.bf16 %v965_v1, %v923_v62  ;;  %v13920_v62 = vpack.c.bf16 %v958_v21, %v916_v12  ;;  %v1006_v12 = vld [vmem:[%s19510_s10 + $0xac0] sm:$0xff]  ;;  %v1048_v21 = vld [vmem:[%s19510_s10 + $0xc10] sm:$0xff] }
 0x29b   :  { %v13858_v18 = vpack.c.bf16 %v875_v11, %v833_v7  ;;  %v13884_v7 = vpack.c.bf16 %v874_v17, %v832_v37  ;;  %v922_v37 = vld [vmem:[%s19510_s10 + $0x820] sm:$0xff]  ;;  %v964_v17 = vld [vmem:[%s19510_s10 + $0x970] sm:$0xff] }
 0x29c   :  { %v654_v24 = vmax.f32 %v650_v25, 0.0  ;;  %v13846_v25 = vpack.c.bf16 %v790_v49, %v748_v32  ;;  %v917_v32 = vld [vmem:[%s19510_s10 + $0x7f8] sm:$0xff]  ;;  %v959_v49 = vld [vmem:[%s19510_s10 + $0x948] sm:$0xff]  ;;  %20299 = vst [vmem:[#allocation50_spill] sm:$0xff] %v13898_v8  ;;  %20300 = vst [vmem:[#allocation51_spill] sm:$0xff] %v13920_v62  ;;  %v13922_v1 = vpack.c.bf16 %v964_v17, %v922_v37 }
 0x29d   :  { %20294 = vst [vmem:[#allocation45_spill] sm:$0xff] %v13858_v18  ;;  %20296 = vst [vmem:[#allocation47_spill] sm:$0xff] %v13884_v7  ;;  %v13896_v0 = vpack.c.bf16 %v959_v49, %v917_v32  ;;  %v1007_v32 = vld [vmem:[%s19510_s10 + $0xac8] sm:$0xff]  ;;  %v1049_v49 = vld [vmem:[%s19510_s10 + $0xc18] sm:$0xff] }
 0x29e   :  { %v13818_v52 = vmin.f32 %v654_v24, 1.0  ;;  %20292 = vst [vmem:[#allocation43_spill] sm:$0xff] %v13846_v25  ;;  %v880_v24 = vld [vmem:[%s19510_s10 + $0x6d0] sm:$0xff]  ;;  %20301 = vst [vmem:[#allocation52_spill] sm:$0xff] %v13922_v1  ;;  %v1085_v37 = vld [vmem:[%s19510_s10 + $0xd38] sm:$0xff] }
 0x29f   :  { %v13886_v11 = vpack.c.bf16 %v880_v24, %v838_v23  ;;  %20298 = vst [vmem:[#allocation49_spill] sm:$0xff] %v13896_v0  ;;  %v1001_v23 = vld [vmem:[%s19510_s10 + $0xa98] sm:$0xff]  ;;  %v1043_v24 = vld [vmem:[%s19510_s10 + $0xbe8] sm:$0xff] }
 0x2a0   :  { %1399 = vmatmul.mubr.f32.vlgmr.msra.gmra.mrb[4].mxu1 %v13818_v52  ;;  %1541 = vmatmul.mubr.f32.vlgmr.msra.gmra.mrb[4].mxu0 %v13818_v52  ;;  %v1127_v17 = vld [vmem:[%s19510_s10 + $0xe88] sm:$0xff] }
 0x2a1   :  { %9938 = vmatpush1.bf16.msra.mxu1 %v13808_v28  ;;  %10034 = vmatpush1.bf16.msra.mxu0 %v13810_v31  ;;  %20297 = vst [vmem:[#allocation48_spill] sm:$0xff] %v13886_v11  ;;  %v13968_v31 = vpack.c.bf16 %v1127_v17, %v1085_v37  ;;  %v1211_v37 = vld [vmem:[%s19510_s10 + $0x1128] sm:$0xff] }
 0x2a2   :  { %9940 = vmatprep.subr.bf16.mxu1 %v13820_v53  ;;  %10036 = vmatprep.subr.bf16.mxu0 %v13822_v61  ;;  %v13934_v61 = vpack.c.bf16 %v1049_v49, %v1007_v32  ;;  %v13958_v49 = vpack.c.bf16 %v1048_v21, %v1006_v12  ;;  %v1169_v12 = vld [vmem:[%s19510_s10 + $0xfd8] sm:$0xff]  ;;  %v1175_v17 = vld [vmem:[%s19510_s10 + $0x1008] sm:$0xff] }
 0x2a3   :  { %1469 = vmatprep.mubr.f32.mxu1 %v19525_v4  ;;  %1682 = vmatprep.mubr.f32.mxu0 %v19525_v4  ;;  %v1000_v4 = vld [vmem:[%s19510_s10 + $0xa90] sm:$0xff]  ;;  %20306 = vst [vmem:[#allocation57_spill] sm:$0xff] %v13968_v31 }
 0x2a4   :  { %20303 = vst [vmem:[#allocation54_spill] sm:$0xff] %v13934_v61  ;;  %20305 = vst [vmem:[#allocation56_spill] sm:$0xff] %v13958_v49 }
 0x2a5   :  { %9942 = vmatpush1.bf16.msra.mxu1 %v13846_v25  ;;  %10038 = vmatpush1.bf16.msra.mxu0 %v13848_v35  ;;  %v13932_v35 = vpack.c.bf16 %v1043_v24, %v1001_v23  ;;  %v1091_v23 = vld [vmem:[%s19510_s10 + $0xd68] sm:$0xff]  ;;  %v1133_v24 = vld [vmem:[%s19510_s10 + $0xeb8] sm:$0xff] }
 0x2a6   :  { %9944 = vmatprep.subr.bf16.mxu1 %v13858_v18  ;;  %10040 = vmatprep.subr.bf16.mxu0 %v13860_v22  ;;  %v1042_v22 = vld [vmem:[%s19510_s10 + $0xbe0] sm:$0xff]  ;;  %v13970_v29 = vpack.c.bf16 %v1133_v24, %v1091_v23  ;;  %v1217_v23 = vld [vmem:[%s19510_s10 + $0x1158] sm:$0xff] }
 0x2a7   :  { %20302 = vst [vmem:[#allocation53_spill] sm:$0xff] %v13932_v35  ;;  %v13956_v32 = vpack.c.bf16 %v1042_v22, %v1000_v4  ;;  %v1090_v4 = vld [vmem:[%s19510_s10 + $0xd60] sm:$0xff]  ;;  %v1132_v22 = vld [vmem:[%s19510_s10 + $0xeb0] sm:$0xff] }
 0x2a8   :  { %20307 = vst [vmem:[#allocation58_spill] sm:$0xff] %v13970_v29  ;;  %v14000_v13 = vpack.c.bf16 %v1132_v22, %v1090_v4  ;;  %v1216_v4 = vld [vmem:[%s19510_s10 + $0x1150] sm:$0xff]  ;;  %v1253_v22 = vld [vmem:[%s19510_s10 + $0x1278] sm:$0xff] }
 0x2a9   :  { %9946 = vmatpush1.bf16.msra.mxu1 %v13884_v7  ;;  %10042 = vmatpush1.bf16.msra.mxu0 %v13886_v11  ;;  %20304 = vst [vmem:[#allocation55_spill] sm:$0xff] %v13956_v32  ;;  %v1126_v11 = vld [vmem:[%s19510_s10 + $0xe80] sm:$0xff] }
 0x2aa   :  { %9948 = vmatprep.subr.bf16.mxu1 %v13896_v0  ;;  %10044 = vmatprep.subr.bf16.mxu0 %v13898_v8  ;;  %v1084_v8 = vld [vmem:[%s19510_s10 + $0xd30] sm:$0xff]  ;;  %20311 = vst [vmem:[#allocation62_spill] sm:$0xff] %v14000_v13 }
 0x2ab   :  { %v13998_v20 = vpack.c.bf16 %v1126_v11, %v1084_v8  ;;  %v14014_v8 = vpack.c.bf16 %v1217_v23, %v1175_v17  ;;  %v1174_v11 = vld [vmem:[%s19510_s10 + $0x1000] sm:$0xff]  ;;  %v1301_v17 = vld [vmem:[%s19510_s10 + $0x13f8] sm:$0xff] }
 0x2ad   :  { %9950 = vmatpush1.bf16.msra.mxu1 %v13920_v62  ;;  %10046 = vmatpush1.bf16.msra.mxu0 %v13922_v1  ;;  %20310 = vst [vmem:[#allocation61_spill] sm:$0xff] %v13998_v20  ;;  %20313 = vst [vmem:[#allocation64_spill] sm:$0xff] %v14014_v8 }
 0x2ae   :  { %9952 = vmatprep.subr.bf16.mxu1 %v13932_v35  ;;  %10048 = vmatprep.subr.bf16.mxu0 %v13934_v61 }
 0x2af   :  { %v589_v21 = vpop.f32.mrb[2].mxu0 }
 0x2b0   :  { %v13991_v24 = vmul.f32 %v13769_v34, %v589_v21  ;;  %v591_v61 = vpop.f32.mrb[3].mxu0  ;;  %v1210_v34 = vld [vmem:[%s19510_s10 + $0x1120] sm:$0xff]  ;;  %v1252_v21 = vld [vmem:[%s19510_s10 + $0x1270] sm:$0xff] }
 0x2b1   :  { %v13994_v1 = vmul.f32 %v13772_v41, %v591_v61  ;;  %9954 = vmatpush1.bf16.msra.mxu1 %v13956_v32  ;;  %10050 = vmatpush1.bf16.msra.mxu0 %v13958_v49  ;;  %v14012_v61 = vpack.c.bf16 %v1211_v37, %v1169_v12  ;;  %v1295_v12 = vld [vmem:[%s19510_s10 + $0x13c8] sm:$0xff]  ;;  %v14038_v23 = vpack.c.bf16 %v1210_v34, %v1168_v63  ;;  %v1258_v63 = vld [vmem:[%s19510_s10 + $0x12a0] sm:$0xff]  ;;  %v1300_v34 = vld [vmem:[%s19510_s10 + $0x13f0] sm:$0xff] }
 0x2b2   :  { %20308 = vst [vmem:[#allocation59_spill] sm:$0xff] %v13991_v24  ;;  %9956 = vmatprep.subr.bf16.mxu1 %v13968_v31  ;;  %10052 = vmatprep.subr.bf16.mxu0 %v13970_v29  ;;  %v1259_v37 = vld [vmem:[%s19510_s10 + $0x12a8] sm:$0xff]  ;;  %v14040_v41 = vpack.c.bf16 %v1216_v4, %v1174_v11  ;;  %v669_v11 = vld [vmem:[%s19510_s10 + $0x38] sm:$0xff]  ;;  %v668_v24 = vld [vmem:[%s19510_s10 + $0x30] sm:$0xff] }
 0x2b3   :  { %20309 = vst [vmem:[#allocation60_spill] sm:$0xff] %v13994_v1  ;;  %20312 = vst [vmem:[#allocation63_spill] sm:$0xff] %v14012_v61  ;;  %v14050_v1 = vpack.c.bf16 %v1295_v12, %v1253_v22  ;;  %v14052_v43 = vpack.c.bf16 %v1301_v17, %v1259_v37  ;;  %v711_v4 = vld [vmem:[%s19510_s10 + $0x188] sm:$0xff]  ;;  %v717_v12 = vld [vmem:[%s19510_s10 + $0x1b8] sm:$0xff]  ;;  %v14074_v37 = vpack.c.bf16 %v1294_v44, %v1252_v21 }
 0x2b4   :  { %20314 = vst [vmem:[#allocation65_spill] sm:$0xff] %v14038_v23  ;;  %20315 = vst [vmem:[#allocation66_spill] sm:$0xff] %v14040_v41  ;;  %v675_v22 = vld [vmem:[%s19510_s10 + $0x68] sm:$0xff]  ;;  %v14076_v17 = vpack.c.bf16 %v1300_v34, %v1258_v63  ;;  %v674_v44 = vld [vmem:[%s19510_s10 + $0x60] sm:$0xff] }
 0x2b5   :  { %9958 = vmatpush1.bf16.msra.mxu1 %v13998_v20  ;;  %10054 = vmatpush1.bf16.msra.mxu0 %v14000_v13  ;;  %20316 = vst [vmem:[#allocation67_spill] sm:$0xff] %v14050_v1  ;;  %20317 = vst [vmem:[#allocation68_spill] sm:$0xff] %v14052_v43  ;;  %v14086_v13 = vpack.c.bf16 %v711_v4, %v669_v11  ;;  %v14088_v29 = vpack.c.bf16 %v717_v12, %v675_v22  ;;  %v716_v21 = vld [vmem:[%s19510_s10 + $0x1b0] sm:$0xff]  ;;  %v753_v63 = vld [vmem:[%s19510_s10 + $0x2d8] sm:$0xff] }
 0x2b6   :  { %9960 = vmatprep.subr.bf16.mxu1 %v14012_v61  ;;  %10056 = vmatprep.subr.bf16.mxu0 %v14014_v8  ;;  %20318 = vst [vmem:[#allocation69_spill] sm:$0xff] %v14074_v37  ;;  %20319 = vst [vmem:[#allocation70_spill] sm:$0xff] %v14076_v17  ;;  %v710_v8 = vld [vmem:[%s19510_s10 + $0x180] sm:$0xff]  ;;  %v795_v34 = vld [vmem:[%s19510_s10 + $0x428] sm:$0xff]  ;;  %v14112_v12 = vpack.c.bf16 %v716_v21, %v674_v44 }
 0x2b7   :  { %20320 = vst [vmem:[#allocation71_spill] sm:$0xff] %v14086_v13  ;;  %20321 = vst [vmem:[#allocation72_spill] sm:$0xff] %v14088_v29  ;;  %v759_v11 = vld [vmem:[%s19510_s10 + $0x308] sm:$0xff]  ;;  %v801_v4 = vld [vmem:[%s19510_s10 + $0x458] sm:$0xff]  ;;  %v14110_v22 = vpack.c.bf16 %v710_v8, %v668_v24  ;;  %v14122_v49 = vpack.c.bf16 %v795_v34, %v753_v63 }
 0x2b8   :  { %20323 = vst [vmem:[#allocation74_spill] sm:$0xff] %v14112_v12  ;;  %v14124_v55 = vpack.c.bf16 %v801_v4, %v759_v11  ;;  %v758_v24 = vld [vmem:[%s19510_s10 + $0x300] sm:$0xff]  ;;  %v800_v8 = vld [vmem:[%s19510_s10 + $0x450] sm:$0xff]  ;;  %v837_v44 = vld [vmem:[%s19510_s10 + $0x578] sm:$0xff] }
 0x2b9   :  { %9962 = vmatpush1.bf16.msra.mxu1 %v14038_v23  ;;  %10058 = vmatpush1.bf16.msra.mxu0 %v14040_v41  ;;  %20322 = vst [vmem:[#allocation73_spill] sm:$0xff] %v14110_v22  ;;  %v794_v41 = vld [vmem:[%s19510_s10 + $0x420] sm:$0xff]  ;;  %20324 = vst [vmem:[#allocation75_spill] sm:$0xff] %v14122_v49  ;;  %v879_v21 = vld [vmem:[%s19510_s10 + $0x6c8] sm:$0xff]  ;;  %v14150_v4 = vpack.c.bf16 %v800_v8, %v758_v24 }
 0x2ba   :  { %9964 = vmatprep.subr.bf16.mxu1 %v14050_v1  ;;  %10060 = vmatprep.subr.bf16.mxu0 %v14052_v43  ;;  %v752_v43 = vld [vmem:[%s19510_s10 + $0x2d0] sm:$0xff]  ;;  %20325 = vst [vmem:[#allocation76_spill] sm:$0xff] %v14124_v55  ;;  %v843_v63 = vld [vmem:[%s19510_s10 + $0x5a8] sm:$0xff]  ;;  %v885_v34 = vld [vmem:[%s19510_s10 + $0x6f8] sm:$0xff]  ;;  %v14160_v40 = vpack.c.bf16 %v879_v21, %v837_v44 }
 0x2bb   :  { %v14148_v11 = vpack.c.bf16 %v794_v41, %v752_v43  ;;  %20327 = vst [vmem:[#allocation78_spill] sm:$0xff] %v14150_v4  ;;  %v14162_v30 = vpack.c.bf16 %v885_v34, %v843_v63  ;;  %v842_v43 = vld [vmem:[%s19510_s10 + $0x5a0] sm:$0xff]  ;;  %v884_v41 = vld [vmem:[%s19510_s10 + $0x6f0] sm:$0xff]  ;;  %v921_v24 = vld [vmem:[%s19510_s10 + $0x818] sm:$0xff]  ;;  %v20330_v63 = vmov 0.0  }
 0x2bc   :  { %20328 = vst [vmem:[#allocation79_spill] sm:$0xff] %v14160_v40  ;;  %v963_v8 = vld [vmem:[%s19510_s10 + $0x968] sm:$0xff]  ;;  %v969_v21 = vld [vmem:[%s19510_s10 + $0x998] sm:$0xff] }
 0x2bd   :  { %9966 = vmatpush1.bf16.msra.mxu1 %v14074_v37  ;;  %10062 = vmatpush1.bf16.msra.mxu0 %v14076_v17  ;;  %20326 = vst [vmem:[#allocation77_spill] sm:$0xff] %v14148_v11  ;;  %v878_v17 = vld [vmem:[%s19510_s10 + $0x6c0] sm:$0xff]  ;;  %20329 = vst [vmem:[#allocation80_spill] sm:$0xff] %v14162_v30  ;;  %v927_v44 = vld [vmem:[%s19510_s10 + $0x848] sm:$0xff]  ;;  %v14198_v16 = vpack.c.bf16 %v963_v8, %v921_v24 }
 0x2be   :  { %10000 = vmatprep.subr.bf16.mxu1 %v14086_v13  ;;  %10096 = vmatprep.subr.bf16.mxu0 %v14088_v29  ;;  %v836_v29 = vld [vmem:[%s19510_s10 + $0x570] sm:$0xff]  ;;  %v14200_v15 = vpack.c.bf16 %v969_v21, %v927_v44  ;;  %v1011_v24 = vld [vmem:[%s19510_s10 + $0xae8] sm:$0xff]  ;;  %v1053_v8 = vld [vmem:[%s19510_s10 + $0xc38] sm:$0xff] }
 0x2bf   :  { %v14186_v34 = vpack.c.bf16 %v878_v17, %v836_v29  ;;  %20333 = vst [vmem:[#allocation83_spill] sm:$0xff] %v14198_v16  ;;  %v926_v29 = vld [vmem:[%s19510_s10 + $0x840] sm:$0xff]  ;;  %v968_v17 = vld [vmem:[%s19510_s10 + $0x990] sm:$0xff]  ;;  %v14236_v9 = vpack.c.bf16 %v1053_v8, %v1011_v24 }
 0x2c0   :  { %1470 = vmatmul.mubr.f32.vlgmr.msra.gmra.mrb[6].mxu1 %v13818_v52  ;;  %1683 = vmatmul.mubr.f32.vlgmr.msra.gmra.mrb[6].mxu0 %v13818_v52  ;;  %20334 = vst [vmem:[#allocation84_spill] sm:$0xff] %v14200_v15  ;;  %v14224_v21 = vpack.c.bf16 %v968_v17, %v926_v29  ;;  %v1089_v29 = vld [vmem:[%s19510_s10 + $0xd58] sm:$0xff]  ;;  %v1131_v17 = vld [vmem:[%s19510_s10 + $0xea8] sm:$0xff] }
 0x2c1   :  { %10002 = vmatpush1.bf16.msra.mxu1 %v14110_v22  ;;  %10098 = vmatpush1.bf16.msra.mxu0 %v14112_v12  ;;  %20331 = vst [vmem:[#allocation81_spill] sm:$0xff] %v14186_v34  ;;  %v920_v12 = vld [vmem:[%s19510_s10 + $0x810] sm:$0xff]  ;;  %20338 = vst [vmem:[#allocation88_spill] sm:$0xff] %v14236_v9  ;;  %v14270_v3 = vpack.c.bf16 %v1131_v17, %v1089_v29  ;;  %v1179_v29 = vld [vmem:[%s19510_s10 + $0x1028] sm:$0xff] }
 0x2c2   :  { %10004 = vmatprep.subr.bf16.mxu1 %v14122_v49  ;;  %10100 = vmatprep.subr.bf16.mxu0 %v14124_v55  ;;  %v14188_v55 = vpack.c.bf16 %v884_v41, %v842_v43  ;;  %v1005_v43 = vld [vmem:[%s19510_s10 + $0xab8] sm:$0xff]  ;;  %v1047_v41 = vld [vmem:[%s19510_s10 + $0xc08] sm:$0xff]  ;;  %v14222_v44 = vpack.c.bf16 %v962_v19, %v920_v12  ;;  %20336 = vst [vmem:[#allocation86_spill] sm:$0xff] %v14224_v21  ;;  %v1010_v19 = vld [vmem:[%s19510_s10 + $0xae0] sm:$0xff] }
 0x2c3   :  { %1611 = vmatprep.mubr.f32.mxu1 %v20330_v63  ;;  %1824 = vmatprep.mubr.f32.mxu0 %v20330_v63  ;;  %v14234_v10 = vpack.c.bf16 %v1047_v41, %v1005_v43  ;;  %v1052_v12 = vld [vmem:[%s19510_s10 + $0xc30] sm:$0xff]  ;;  %v1095_v43 = vld [vmem:[%s19510_s10 + $0xd88] sm:$0xff]  ;;  %v1137_v41 = vld [vmem:[%s19510_s10 + $0xed8] sm:$0xff]  ;;  %20341 = vst [vmem:[#allocation91_spill] sm:$0xff] %v14270_v3 }
 0x2c4   :  { %20332 = vst [vmem:[#allocation82_spill] sm:$0xff] %v14188_v55  ;;  %20335 = vst [vmem:[#allocation85_spill] sm:$0xff] %v14222_v44  ;;  %v14260_v8 = vpack.c.bf16 %v1052_v12, %v1010_v19  ;;  %v14272_v2 = vpack.c.bf16 %v1137_v41, %v1095_v43  ;;  %v1173_v19 = vld [vmem:[%s19510_s10 + $0xff8] sm:$0xff]  ;;  %v1215_v12 = vld [vmem:[%s19510_s10 + $0x1148] sm:$0xff] }
 0x2c5   :  { %10006 = vmatpush1.bf16.msra.mxu1 %v14148_v11  ;;  %10102 = vmatpush1.bf16.msra.mxu0 %v14150_v4  ;;  %v1046_v4 = vld [vmem:[%s19510_s10 + $0xc00] sm:$0xff]  ;;  %20337 = vst [vmem:[#allocation87_spill] sm:$0xff] %v14234_v10  ;;  %v1221_v17 = vld [vmem:[%s19510_s10 + $0x1178] sm:$0xff]  ;;  %v14306_v59 = vpack.c.bf16 %v1215_v12, %v1173_v19  ;;  %v1263_v19 = vld [vmem:[%s19510_s10 + $0x12c8] sm:$0xff] }
 0x2c6   :  { %10008 = vmatprep.subr.bf16.mxu1 %v14160_v40  ;;  %10104 = vmatprep.subr.bf16.mxu0 %v14162_v30  ;;  %v1004_v30 = vld [vmem:[%s19510_s10 + $0xab0] sm:$0xff]  ;;  %20340 = vst [vmem:[#allocation90_spill] sm:$0xff] %v14260_v8  ;;  %20342 = vst [vmem:[#allocation92_spill] sm:$0xff] %v14272_v2  ;;  %v14308_v58 = vpack.c.bf16 %v1221_v17, %v1179_v29  ;;  %v1305_v12 = vld [vmem:[%s19510_s10 + $0x1418] sm:$0xff] }
 0x2c7   :  { %v14258_v24 = vpack.c.bf16 %v1046_v4, %v1004_v30  ;;  %v1094_v30 = vld [vmem:[%s19510_s10 + $0xd80] sm:$0xff]  ;;  %v1136_v4 = vld [vmem:[%s19510_s10 + $0xed0] sm:$0xff]  ;;  %20345 = vst [vmem:[#allocation95_spill] sm:$0xff] %v14306_v59  ;;  %v14344_v14 = vpack.c.bf16 %v1305_v12, %v1263_v19 }
 0x2c8   :  { %v14296_v41 = vpack.c.bf16 %v1136_v4, %v1094_v30  ;;  %20346 = vst [vmem:[#allocation96_spill] sm:$0xff] %v14308_v58  ;;  %v1257_v30 = vld [vmem:[%s19510_s10 + $0x1298] sm:$0xff]  ;;  %v1299_v4 = vld [vmem:[%s19510_s10 + $0x13e8] sm:$0xff] }
 0x2c9   :  { %10010 = vmatpush1.bf16.msra.mxu1 %v14186_v34  ;;  %10106 = vmatpush1.bf16.msra.mxu0 %v14188_v55  ;;  %20339 = vst [vmem:[#allocation89_spill] sm:$0xff] %v14258_v24  ;;  %v1130_v55 = vld [vmem:[%s19510_s10 + $0xea0] sm:$0xff]  ;;  %v14342_v50 = vpack.c.bf16 %v1299_v4, %v1257_v30  ;;  %20350 = vst [vmem:[#allocation100_spill] sm:$0xff] %v14344_v14  ;;  %v679_v30 = vld [vmem:[%s19510_s10 + $0x88] sm:$0xff] }
 0x2ca   :  { %10012 = vmatprep.subr.bf16.mxu1 %v14198_v16  ;;  %10108 = vmatprep.subr.bf16.mxu0 %v14200_v15  ;;  %v1088_v15 = vld [vmem:[%s19510_s10 + $0xd50] sm:$0xff]  ;;  %20344 = vst [vmem:[#allocation94_spill] sm:$0xff] %v14296_v41  ;;  %v721_v4 = vld [vmem:[%s19510_s10 + $0x1d8] sm:$0xff] }
 0x2cb   :  { %v14294_v43 = vpack.c.bf16 %v1130_v55, %v1088_v15  ;;  %v1178_v15 = vld [vmem:[%s19510_s10 + $0x1020] sm:$0xff]  ;;  %v1220_v55 = vld [vmem:[%s19510_s10 + $0x1170] sm:$0xff]  ;;  %20349 = vst [vmem:[#allocation99_spill] sm:$0xff] %v14342_v50 }
 0x2cc   :  { %v14332_v17 = vpack.c.bf16 %v1220_v55, %v1178_v15  ;;  %v673_v15 = vld [vmem:[%s19510_s10 + $0x58] sm:$0xff]  ;;  %v715_v55 = vld [vmem:[%s19510_s10 + $0x1a8] sm:$0xff] }
 0x2cd   :  { %10014 = vmatpush1.bf16.msra.mxu1 %v14222_v44  ;;  %10110 = vmatpush1.bf16.msra.mxu0 %v14224_v21  ;;  %20343 = vst [vmem:[#allocation93_spill] sm:$0xff] %v14294_v43  ;;  %v1214_v21 = vld [vmem:[%s19510_s10 + $0x1140] sm:$0xff]  ;;  %v14378_v6 = vpack.c.bf16 %v715_v55, %v673_v15  ;;  %v763_v15 = vld [vmem:[%s19510_s10 + $0x328] sm:$0xff]  ;;  %v805_v55 = vld [vmem:[%s19510_s10 + $0x478] sm:$0xff] }
 0x2ce   :  { %10016 = vmatprep.subr.bf16.mxu1 %v14234_v10  ;;  %10112 = vmatprep.subr.bf16.mxu0 %v14236_v9  ;;  %v1172_v9 = vld [vmem:[%s19510_s10 + $0xff0] sm:$0xff]  ;;  %20348 = vst [vmem:[#allocation98_spill] sm:$0xff] %v14332_v17 }
 0x2cf   :  { %v14330_v29 = vpack.c.bf16 %v1214_v21, %v1172_v9  ;;  %v1262_v9 = vld [vmem:[%s19510_s10 + $0x12c0] sm:$0xff]  ;;  %v1304_v21 = vld [vmem:[%s19510_s10 + $0x1410] sm:$0xff]  ;;  %20353 = vst [vmem:[#allocation103_spill] sm:$0xff] %v14378_v6 }
 0x2d0   :  { %v14368_v12 = vpack.c.bf16 %v1304_v21, %v1262_v9  ;;  %v757_v9 = vld [vmem:[%s19510_s10 + $0x2f8] sm:$0xff]  ;;  %v799_v21 = vld [vmem:[%s19510_s10 + $0x448] sm:$0xff] }
 0x2d1   :  { %10018 = vmatpush1.bf16.msra.mxu1 %v14258_v24  ;;  %10114 = vmatpush1.bf16.msra.mxu0 %v14260_v8  ;;  %20347 = vst [vmem:[#allocation97_spill] sm:$0xff] %v14330_v29  ;;  %v1298_v8 = vld [vmem:[%s19510_s10 + $0x13e0] sm:$0xff]  ;;  %v1280_v24 = vld [vmem:[%s19510_s10 + $0x1350] sm:$0xff] }
 0x2d2   :  { %10020 = vmatprep.subr.bf16.mxu1 %v14270_v3  ;;  %10116 = vmatprep.subr.bf16.mxu0 %v14272_v2  ;;  %v1256_v2 = vld [vmem:[%s19510_s10 + $0x1290] sm:$0xff]  ;;  %20352 = vst [vmem:[#allocation102_spill] sm:$0xff] %v14368_v12 }
 0x2d3   :  { %v14366_v19 = vpack.c.bf16 %v1298_v8, %v1256_v2  ;;  %v678_v2 = vld [vmem:[%s19510_s10 + $0x80] sm:$0xff]  ;;  %v720_v8 = vld [vmem:[%s19510_s10 + $0x1d0] sm:$0xff] }
 0x2d5   :  { %10022 = vmatpush1.bf16.msra.mxu1 %v14294_v43  ;;  %10118 = vmatpush1.bf16.msra.mxu0 %v14296_v41  ;;  %20351 = vst [vmem:[#allocation101_spill] sm:$0xff] %v14366_v19  ;;  %v714_v41 = vld [vmem:[%s19510_s10 + $0x1a0] sm:$0xff] }
 0x2d6   :  { %10024 = vmatprep.subr.bf16.mxu1 %v14306_v59  ;;  %10120 = vmatprep.subr.bf16.mxu0 %v14308_v58  ;;  %v672_v58 = vld [vmem:[%s19510_s10 + $0x50] sm:$0xff] }
 0x2d7   :  { %v1276_v59 = vld [vmem:[%s19510_s10 + $0x1330] sm:$0xff] }
 0x2d9   :  { %10026 = vmatpush1.bf16.msra.mxu1 %v14330_v29  ;;  %10122 = vmatpush1.bf16.msra.mxu0 %v14332_v17  ;;  %v14380_v29 = vpack.c.bf16 %v721_v4, %v679_v30  ;;  %v14402_v30 = vpack.c.bf16 %v714_v41, %v672_v58  ;;  %v14404_v4 = vpack.c.bf16 %v720_v8, %v678_v2  ;;  %v798_v17 = vld [vmem:[%s19510_s10 + $0x440] sm:$0xff]  ;;  %v804_v41 = vld [vmem:[%s19510_s10 + $0x470] sm:$0xff]  ;;  %v841_v2 = vld [vmem:[%s19510_s10 + $0x598] sm:$0xff] }
 0x2da   :  { %10028 = vmatprep.subr.bf16.mxu1 %v14342_v50  ;;  %10124 = vmatprep.subr.bf16.mxu0 %v14344_v14  ;;  %v756_v14 = vld [vmem:[%s19510_s10 + $0x2f0] sm:$0xff]  ;;  %v14414_v50 = vpack.c.bf16 %v799_v21, %v757_v9  ;;  %v762_v58 = vld [vmem:[%s19510_s10 + $0x320] sm:$0xff]  ;;  %v883_v8 = vld [vmem:[%s19510_s10 + $0x6e8] sm:$0xff] }
 0x2db   :  { %20354 = vst [vmem:[#allocation104_spill] sm:$0xff] %v14380_v29  ;;  %20355 = vst [vmem:[#allocation105_spill] sm:$0xff] %v14402_v30  ;;  %v847_v9 = vld [vmem:[%s19510_s10 + $0x5c8] sm:$0xff]  ;;  %v889_v21 = vld [vmem:[%s19510_s10 + $0x718] sm:$0xff] }
 0x2dc   :  { %20356 = vst [vmem:[#allocation106_spill] sm:$0xff] %v14404_v4  ;;  %20357 = vst [vmem:[#allocation107_spill] sm:$0xff] %v14414_v50 }
 0x2dd   :  { %10030 = vmatpush1.bf16.msra.mxu1 %v14366_v19  ;;  %10126 = vmatpush1.bf16.msra.mxu0 %v14368_v12  ;;  %v14416_v19 = vpack.c.bf16 %v805_v55, %v763_v15  ;;  %v14440_v15 = vpack.c.bf16 %v798_v17, %v756_v14  ;;  %v14442_v55 = vpack.c.bf16 %v804_v41, %v762_v58  ;;  %v882_v12 = vld [vmem:[%s19510_s10 + $0x6e0] sm:$0xff]  ;;  %v888_v17 = vld [vmem:[%s19510_s10 + $0x710] sm:$0xff]  ;;  %v925_v58 = vld [vmem:[%s19510_s10 + $0x838] sm:$0xff] }
 0x2de   :  { %10064 = vmatprep.subr.bf16.mxu1 %v14378_v6  ;;  %10160 = vmatprep.subr.bf16.mxu0 %v14380_v29  ;;  %v840_v29 = vld [vmem:[%s19510_s10 + $0x590] sm:$0xff]  ;;  %v14452_v6 = vpack.c.bf16 %v883_v8, %v841_v2  ;;  %v846_v14 = vld [vmem:[%s19510_s10 + $0x5c0] sm:$0xff]  ;;  %v967_v41 = vld [vmem:[%s19510_s10 + $0x988] sm:$0xff] }
 0x2df   :  { %20358 = vst [vmem:[#allocation108_spill] sm:$0xff] %v14416_v19  ;;  %20359 = vst [vmem:[#allocation109_spill] sm:$0xff] %v14440_v15  ;;  %v931_v2 = vld [vmem:[%s19510_s10 + $0x868] sm:$0xff]  ;;  %v973_v8 = vld [vmem:[%s19510_s10 + $0x9b8] sm:$0xff] }
 0x2e0   :  { %1612 = vmatmul.mubr.f32.vlgmr.msra.gmra.mrb[8].mxu1 %v13818_v52  ;;  %1825 = vmatmul.mubr.f32.vlgmr.msra.gmra.mrb[8].mxu0 %v13818_v52  ;;  %20360 = vst [vmem:[#allocation110_spill] sm:$0xff] %v14442_v55  ;;  %20361 = vst [vmem:[#allocation111_spill] sm:$0xff] %v14452_v6 }
 0x2e1   :  { %10066 = vmatpush1.bf16.msra.mxu1 %v14402_v30  ;;  %10162 = vmatpush1.bf16.msra.mxu0 %v14404_v4  ;;  %v14454_v30 = vpack.c.bf16 %v889_v21, %v847_v9  ;;  %v14478_v9 = vpack.c.bf16 %v882_v12, %v840_v29  ;;  %v14480_v21 = vpack.c.bf16 %v888_v17, %v846_v14  ;;  %v966_v4 = vld [vmem:[%s19510_s10 + $0x980] sm:$0xff]  ;;  %v972_v12 = vld [vmem:[%s19510_s10 + $0x9b0] sm:$0xff]  ;;  %v1009_v14 = vld [vmem:[%s19510_s10 + $0xad8] sm:$0xff] }
 0x2e2   :  { %10068 = vmatprep.subr.bf16.mxu1 %v14414_v50  ;;  %10164 = vmatprep.subr.bf16.mxu0 %v14416_v19  ;;  %v924_v19 = vld [vmem:[%s19510_s10 + $0x830] sm:$0xff]  ;;  %v14490_v50 = vpack.c.bf16 %v967_v41, %v925_v58  ;;  %v930_v29 = vld [vmem:[%s19510_s10 + $0x860] sm:$0xff]  ;;  %v1051_v17 = vld [vmem:[%s19510_s10 + $0xc28] sm:$0xff] }
 0x2e3   :  { %20362 = vst [vmem:[#allocation112_spill] sm:$0xff] %v14454_v30  ;;  %1753 = vmatprep.mubr.f32.mxu1 %v20330_v63  ;;  %1966 = vmatprep.mubr.f32.mxu0 %v20330_v63  ;;  %20363 = vst [vmem:[#allocation113_spill] sm:$0xff] %v14478_v9  ;;  %v1015_v58 = vld [vmem:[%s19510_s10 + $0xb08] sm:$0xff]  ;;  %v1057_v41 = vld [vmem:[%s19510_s10 + $0xc58] sm:$0xff] }
 0x2e4   :  { %20364 = vst [vmem:[#allocation114_spill] sm:$0xff] %v14480_v21  ;;  %20365 = vst [vmem:[#allocation115_spill] sm:$0xff] %v14490_v50 }
 0x2e5   :  { %10070 = vmatpush1.bf16.msra.mxu1 %v14440_v15  ;;  %10166 = vmatpush1.bf16.msra.mxu0 %v14442_v55  ;;  %v14492_v15 = vpack.c.bf16 %v973_v8, %v931_v2  ;;  %v14514_v2 = vpack.c.bf16 %v966_v4, %v924_v19  ;;  %v14516_v8 = vpack.c.bf16 %v972_v12, %v930_v29  ;;  %v1050_v55 = vld [vmem:[%s19510_s10 + $0xc20] sm:$0xff]  ;;  %v1056_v4 = vld [vmem:[%s19510_s10 + $0xc50] sm:$0xff]  ;;  %v1093_v29 = vld [vmem:[%s19510_s10 + $0xd78] sm:$0xff] }
 0x2e6   :  { %10072 = vmatprep.subr.bf16.mxu1 %v14452_v6  ;;  %10168 = vmatprep.subr.bf16.mxu0 %v14454_v30  ;;  %v1008_v30 = vld [vmem:[%s19510_s10 + $0xad0] sm:$0xff]  ;;  %v14526_v6 = vpack.c.bf16 %v1051_v17, %v1009_v14  ;;  %v1014_v19 = vld [vmem:[%s19510_s10 + $0xb00] sm:$0xff]  ;;  %v1135_v12 = vld [vmem:[%s19510_s10 + $0xec8] sm:$0xff] }
 0x2e7   :  { %20366 = vst [vmem:[#allocation116_spill] sm:$0xff] %v14492_v15  ;;  %20367 = vst [vmem:[#allocation117_spill] sm:$0xff] %v14514_v2  ;;  %v1099_v14 = vld [vmem:[%s19510_s10 + $0xda8] sm:$0xff]  ;;  %v1141_v17 = vld [vmem:[%s19510_s10 + $0xef8] sm:$0xff] }
 0x2e8   :  { %20368 = vst [vmem:[#allocation118_spill] sm:$0xff] %v14516_v8  ;;  %20369 = vst [vmem:[#allocation119_spill] sm:$0xff] %v14526_v6 }
 0x2e9   :  { %10074 = vmatpush1.bf16.msra.mxu1 %v14478_v9  ;;  %10170 = vmatpush1.bf16.msra.mxu0 %v14480_v21  ;;  %v14528_v9 = vpack.c.bf16 %v1057_v41, %v1015_v58  ;;  %v14550_v58 = vpack.c.bf16 %v1050_v55, %v1008_v30  ;;  %v14552_v41 = vpack.c.bf16 %v1056_v4, %v1014_v19  ;;  %v1134_v21 = vld [vmem:[%s19510_s10 + $0xec0] sm:$0xff]  ;;  %v1140_v55 = vld [vmem:[%s19510_s10 + $0xef0] sm:$0xff]  ;;  %v1177_v19 = vld [vmem:[%s19510_s10 + $0x1018] sm:$0xff] }
 0x2ea   :  { %10076 = vmatprep.subr.bf16.mxu1 %v14490_v50  ;;  %10172 = vmatprep.subr.bf16.mxu0 %v14492_v15  ;;  %v1092_v15 = vld [vmem:[%s19510_s10 + $0xd70] sm:$0xff]  ;;  %v14562_v50 = vpack.c.bf16 %v1135_v12, %v1093_v29  ;;  %v1098_v30 = vld [vmem:[%s19510_s10 + $0xda0] sm:$0xff]  ;;  %v1219_v4 = vld [vmem:[%s19510_s10 + $0x1168] sm:$0xff] }
 0x2eb   :  { %20370 = vst [vmem:[#allocation120_spill] sm:$0xff] %v14528_v9  ;;  %20371 = vst [vmem:[#allocation121_spill] sm:$0xff] %v14550_v58  ;;  %v1183_v29 = vld [vmem:[%s19510_s10 + $0x1048] sm:$0xff]  ;;  %v1225_v12 = vld [vmem:[%s19510_s10 + $0x1198] sm:$0xff] }
 0x2ec   :  { %20372 = vst [vmem:[#allocation122_spill] sm:$0xff] %v14552_v41  ;;  %20373 = vst [vmem:[#allocation123_spill] sm:$0xff] %v14562_v50 }
 0x2ed   :  { %10078 = vmatpush1.bf16.msra.mxu1 %v14514_v2  ;;  %10174 = vmatpush1.bf16.msra.mxu0 %v14516_v8  ;;  %v14564_v2 = vpack.c.bf16 %v1141_v17, %v1099_v14  ;;  %v14586_v14 = vpack.c.bf16 %v1134_v21, %v1092_v15  ;;  %v14588_v17 = vpack.c.bf16 %v1140_v55, %v1098_v30  ;;  %v1218_v8 = vld [vmem:[%s19510_s10 + $0x1160] sm:$0xff]  ;;  %v1224_v21 = vld [vmem:[%s19510_s10 + $0x1190] sm:$0xff]  ;;  %v1261_v30 = vld [vmem:[%s19510_s10 + $0x12b8] sm:$0xff] }
 0x2ee   :  { %10080 = vmatprep.subr.bf16.mxu1 %v14526_v6  ;;  %10176 = vmatprep.subr.bf16.mxu0 %v14528_v9  ;;  %v1176_v9 = vld [vmem:[%s19510_s10 + $0x1010] sm:$0xff]  ;;  %v14598_v6 = vpack.c.bf16 %v1219_v4, %v1177_v19  ;;  %v1182_v15 = vld [vmem:[%s19510_s10 + $0x1040] sm:$0xff]  ;;  %v1303_v55 = vld [vmem:[%s19510_s10 + $0x1408] sm:$0xff] }
 0x2ef   :  { %20374 = vst [vmem:[#allocation124_spill] sm:$0xff] %v14564_v2  ;;  %20375 = vst [vmem:[#allocation125_spill] sm:$0xff] %v14586_v14  ;;  %v1267_v19 = vld [vmem:[%s19510_s10 + $0x12e8] sm:$0xff]  ;;  %v1309_v4 = vld [vmem:[%s19510_s10 + $0x1438] sm:$0xff] }
 0x2f0   :  { %20376 = vst [vmem:[#allocation126_spill] sm:$0xff] %v14588_v17  ;;  %20377 = vst [vmem:[#allocation127_spill] sm:$0xff] %v14598_v6 }
 0x2f1   :  { %10082 = vmatpush1.bf16.msra.mxu1 %v14550_v58  ;;  %10178 = vmatpush1.bf16.msra.mxu0 %v14552_v41  ;;  %v14600_v58 = vpack.c.bf16 %v1225_v12, %v1183_v29  ;;  %v14622_v29 = vpack.c.bf16 %v1218_v8, %v1176_v9  ;;  %v14624_v12 = vpack.c.bf16 %v1224_v21, %v1182_v15  ;;  %v1302_v41 = vld [vmem:[%s19510_s10 + $0x1400] sm:$0xff]  ;;  %v1308_v8 = vld [vmem:[%s19510_s10 + $0x1430] sm:$0xff]  ;;  %v677_v15 = vld [vmem:[%s19510_s10 + $0x78] sm:$0xff] }
 0x2f2   :  { %10084 = vmatprep.subr.bf16.mxu1 %v14562_v50  ;;  %10180 = vmatprep.subr.bf16.mxu0 %v14564_v2  ;;  %v1260_v2 = vld [vmem:[%s19510_s10 + $0x12b0] sm:$0xff]  ;;  %v14634_v50 = vpack.c.bf16 %v1303_v55, %v1261_v30  ;;  %v1266_v9 = vld [vmem:[%s19510_s10 + $0x12e0] sm:$0xff]  ;;  %v719_v21 = vld [vmem:[%s19510_s10 + $0x1c8] sm:$0xff] }
 0x2f3   :  { %20378 = vst [vmem:[#allocation128_spill] sm:$0xff] %v14600_v58  ;;  %20379 = vst [vmem:[#allocation129_spill] sm:$0xff] %v14622_v29  ;;  %v683_v30 = vld [vmem:[%s19510_s10 + $0xa8] sm:$0xff]  ;;  %v725_v55 = vld [vmem:[%s19510_s10 + $0x1f8] sm:$0xff] }
 0x2f4   :  { %20380 = vst [vmem:[#allocation130_spill] sm:$0xff] %v14624_v12  ;;  %20381 = vst [vmem:[#allocation131_spill] sm:$0xff] %v14634_v50 }
 0x2f5   :  { %10086 = vmatpush1.bf16.msra.mxu1 %v14586_v14  ;;  %10182 = vmatpush1.bf16.msra.mxu0 %v14588_v17  ;;  %v14636_v14 = vpack.c.bf16 %v1309_v4, %v1267_v19  ;;  %v14658_v19 = vpack.c.bf16 %v1302_v41, %v1260_v2  ;;  %v14660_v4 = vpack.c.bf16 %v1308_v8, %v1266_v9  ;;  %v718_v17 = vld [vmem:[%s19510_s10 + $0x1c0] sm:$0xff]  ;;  %v724_v41 = vld [vmem:[%s19510_s10 + $0x1f0] sm:$0xff]  ;;  %v761_v9 = vld [vmem:[%s19510_s10 + $0x318] sm:$0xff] }
 0x2f6   :  { %10088 = vmatprep.subr.bf16.mxu1 %v14598_v6  ;;  %10184 = vmatprep.subr.bf16.mxu0 %v14600_v58  ;;  %v676_v58 = vld [vmem:[%s19510_s10 + $0x70] sm:$0xff]  ;;  %v14670_v6 = vpack.c.bf16 %v719_v21, %v677_v15  ;;  %v682_v2 = vld [vmem:[%s19510_s10 + $0xa0] sm:$0xff]  ;;  %v803_v8 = vld [vmem:[%s19510_s10 + $0x468] sm:$0xff] }
 0x2f7   :  { %20382 = vst [vmem:[#allocation132_spill] sm:$0xff] %v14636_v14  ;;  %20383 = vst [vmem:[#allocation133_spill] sm:$0xff] %v14658_v19  ;;  %v767_v15 = vld [vmem:[%s19510_s10 + $0x348] sm:$0xff]  ;;  %v809_v21 = vld [vmem:[%s19510_s10 + $0x498] sm:$0xff] }
 0x2f8   :  { %20384 = vst [vmem:[#allocation134_spill] sm:$0xff] %v14660_v4  ;;  %20385 = vst [vmem:[#allocation135_spill] sm:$0xff] %v14670_v6 }
 0x2f9   :  { %10090 = vmatpush1.bf16.msra.mxu1 %v14622_v29  ;;  %10186 = vmatpush1.bf16.msra.mxu0 %v14624_v12  ;;  %v14672_v29 = vpack.c.bf16 %v725_v55, %v683_v30  ;;  %v14694_v30 = vpack.c.bf16 %v718_v17, %v676_v58  ;;  %v14696_v55 = vpack.c.bf16 %v724_v41, %v682_v2  ;;  %v802_v12 = vld [vmem:[%s19510_s10 + $0x460] sm:$0xff]  ;;  %v808_v17 = vld [vmem:[%s19510_s10 + $0x490] sm:$0xff]  ;;  %v845_v2 = vld [vmem:[%s19510_s10 + $0x5b8] sm:$0xff] }
 0x2fa   :  { %10092 = vmatprep.subr.bf16.mxu1 %v14634_v50  ;;  %10188 = vmatprep.subr.bf16.mxu0 %v14636_v14  ;;  %v760_v14 = vld [vmem:[%s19510_s10 + $0x310] sm:$0xff]  ;;  %v14706_v50 = vpack.c.bf16 %v803_v8, %v761_v9  ;;  %v766_v58 = vld [vmem:[%s19510_s10 + $0x340] sm:$0xff]  ;;  %v887_v41 = vld [vmem:[%s19510_s10 + $0x708] sm:$0xff] }
 0x2fb   :  { %20386 = vst [vmem:[#allocation136_spill] sm:$0xff] %v14672_v29  ;;  %20387 = vst [vmem:[#allocation137_spill] sm:$0xff] %v14694_v30  ;;  %v851_v9 = vld [vmem:[%s19510_s10 + $0x5e8] sm:$0xff]  ;;  %v893_v8 = vld [vmem:[%s19510_s10 + $0x738] sm:$0xff] }
 0x2fc   :  { %20388 = vst [vmem:[#allocation138_spill] sm:$0xff] %v14696_v55  ;;  %20389 = vst [vmem:[#allocation139_spill] sm:$0xff] %v14706_v50 }
 0x2fd   :  { %10094 = vmatpush1.bf16.msra.mxu1 %v14658_v19  ;;  %10190 = vmatpush1.bf16.msra.mxu0 %v14660_v4  ;;  %v14708_v19 = vpack.c.bf16 %v809_v21, %v767_v15  ;;  %v14732_v15 = vpack.c.bf16 %v802_v12, %v760_v14  ;;  %v14734_v21 = vpack.c.bf16 %v808_v17, %v766_v58  ;;  %v886_v4 = vld [vmem:[%s19510_s10 + $0x700] sm:$0xff]  ;;  %v892_v12 = vld [vmem:[%s19510_s10 + $0x730] sm:$0xff]  ;;  %v929_v58 = vld [vmem:[%s19510_s10 + $0x858] sm:$0xff] }
 0x2fe   :  { %10128 = vmatprep.subr.bf16.mxu1 %v14670_v6  ;;  %10224 = vmatprep.subr.bf16.mxu0 %v14672_v29  ;;  %v844_v29 = vld [vmem:[%s19510_s10 + $0x5b0] sm:$0xff]  ;;  %v14744_v6 = vpack.c.bf16 %v887_v41, %v845_v2  ;;  %v850_v14 = vld [vmem:[%s19510_s10 + $0x5e0] sm:$0xff]  ;;  %v971_v17 = vld [vmem:[%s19510_s10 + $0x9a8] sm:$0xff] }
 0x2ff   :  { %20390 = vst [vmem:[#allocation140_spill] sm:$0xff] %v14708_v19  ;;  %20391 = vst [vmem:[#allocation141_spill] sm:$0xff] %v14732_v15  ;;  %v935_v2 = vld [vmem:[%s19510_s10 + $0x888] sm:$0xff]  ;;  %v977_v41 = vld [vmem:[%s19510_s10 + $0x9d8] sm:$0xff] }
 0x300   :  { %1754 = vmatmul.mubr.f32.vlgmr.msra.gmra.mrb[10].mxu1 %v13818_v52  ;;  %1967 = vmatmul.mubr.f32.vlgmr.msra.gmra.mrb[10].mxu0 %v13818_v52  ;;  %20392 = vst [vmem:[#allocation142_spill] sm:$0xff] %v14734_v21  ;;  %20393 = vst [vmem:[#allocation143_spill] sm:$0xff] %v14744_v6 }
 0x301   :  { %10130 = vmatpush1.bf16.msra.mxu1 %v14694_v30  ;;  %10226 = vmatpush1.bf16.msra.mxu0 %v14696_v55  ;;  %v14746_v30 = vpack.c.bf16 %v893_v8, %v851_v9  ;;  %v14770_v9 = vpack.c.bf16 %v886_v4, %v844_v29  ;;  %v14772_v8 = vpack.c.bf16 %v892_v12, %v850_v14  ;;  %v970_v55 = vld [vmem:[%s19510_s10 + $0x9a0] sm:$0xff]  ;;  %v976_v4 = vld [vmem:[%s19510_s10 + $0x9d0] sm:$0xff]  ;;  %v1013_v14 = vld [vmem:[%s19510_s10 + $0xaf8] sm:$0xff] }
 0x302   :  { %10132 = vmatprep.subr.bf16.mxu1 %v14706_v50  ;;  %10228 = vmatprep.subr.bf16.mxu0 %v14708_v19  ;;  %v928_v19 = vld [vmem:[%s19510_s10 + $0x850] sm:$0xff]  ;;  %v14782_v50 = vpack.c.bf16 %v971_v17, %v929_v58  ;;  %v934_v29 = vld [vmem:[%s19510_s10 + $0x880] sm:$0xff]  ;;  %v1055_v12 = vld [vmem:[%s19510_s10 + $0xc48] sm:$0xff] }
 0x303   :  { %20394 = vst [vmem:[#allocation144_spill] sm:$0xff] %v14746_v30  ;;  %1895 = vmatprep.mubr.f32.mxu1 %v20330_v63  ;;  %2108 = vmatprep.mubr.f32.mxu0 %v20330_v63  ;;  %20395 = vst [vmem:[#allocation145_spill] sm:$0xff] %v14770_v9  ;;  %v1019_v58 = vld [vmem:[%s19510_s10 + $0xb28] sm:$0xff]  ;;  %v1061_v17 = vld [vmem:[%s19510_s10 + $0xc78] sm:$0xff] }
 0x304   :  { %20396 = vst [vmem:[#allocation146_spill] sm:$0xff] %v14772_v8  ;;  %20397 = vst [vmem:[#allocation147_spill] sm:$0xff] %v14782_v50 }
 0x305   :  { %10134 = vmatpush1.bf16.msra.mxu1 %v14732_v15  ;;  %10230 = vmatpush1.bf16.msra.mxu0 %v14734_v21  ;;  %v14784_v15 = vpack.c.bf16 %v977_v41, %v935_v2  ;;  %v14806_v2 = vpack.c.bf16 %v970_v55, %v928_v19  ;;  %v14808_v41 = vpack.c.bf16 %v976_v4, %v934_v29  ;;  %v1054_v21 = vld [vmem:[%s19510_s10 + $0xc40] sm:$0xff]  ;;  %v1060_v55 = vld [vmem:[%s19510_s10 + $0xc70] sm:$0xff]  ;;  %v1097_v29 = vld [vmem:[%s19510_s10 + $0xd98] sm:$0xff] }
 0x306   :  { %10136 = vmatprep.subr.bf16.mxu1 %v14744_v6  ;;  %10232 = vmatprep.subr.bf16.mxu0 %v14746_v30  ;;  %v1012_v30 = vld [vmem:[%s19510_s10 + $0xaf0] sm:$0xff]  ;;  %v14818_v6 = vpack.c.bf16 %v1055_v12, %v1013_v14  ;;  %v1018_v19 = vld [vmem:[%s19510_s10 + $0xb20] sm:$0xff]  ;;  %v1139_v4 = vld [vmem:[%s19510_s10 + $0xee8] sm:$0xff] }
 0x307   :  { %20398 = vst [vmem:[#allocation148_spill] sm:$0xff] %v14784_v15  ;;  %20399 = vst [vmem:[#allocation149_spill] sm:$0xff] %v14806_v2  ;;  %v1103_v14 = vld [vmem:[%s19510_s10 + $0xdc8] sm:$0xff]  ;;  %v1145_v12 = vld [vmem:[%s19510_s10 + $0xf18] sm:$0xff] }
 0x308   :  { %20400 = vst [vmem:[#allocation150_spill] sm:$0xff] %v14808_v41  ;;  %20401 = vst [vmem:[#allocation151_spill] sm:$0xff] %v14818_v6 }
 0x309   :  { %10138 = vmatpush1.bf16.msra.mxu1 %v14770_v9  ;;  %10234 = vmatpush1.bf16.msra.mxu0 %v14772_v8  ;;  %v14820_v9 = vpack.c.bf16 %v1061_v17, %v1019_v58  ;;  %v14842_v58 = vpack.c.bf16 %v1054_v21, %v1012_v30  ;;  %v14844_v17 = vpack.c.bf16 %v1060_v55, %v1018_v19  ;;  %v1138_v8 = vld [vmem:[%s19510_s10 + $0xee0] sm:$0xff]  ;;  %v1144_v21 = vld [vmem:[%s19510_s10 + $0xf10] sm:$0xff]  ;;  %v1181_v19 = vld [vmem:[%s19510_s10 + $0x1038] sm:$0xff] }
 0x30a   :  { %10140 = vmatprep.subr.bf16.mxu1 %v14782_v50  ;;  %10236 = vmatprep.subr.bf16.mxu0 %v14784_v15  ;;  %v1096_v15 = vld [vmem:[%s19510_s10 + $0xd90] sm:$0xff]  ;;  %v14854_v50 = vpack.c.bf16 %v1139_v4, %v1097_v29  ;;  %v1102_v30 = vld [vmem:[%s19510_s10 + $0xdc0] sm:$0xff]  ;;  %v1223_v55 = vld [vmem:[%s19510_s10 + $0x1188] sm:$0xff] }
 0x30b   :  { %20402 = vst [vmem:[#allocation152_spill] sm:$0xff] %v14820_v9  ;;  %20403 = vst [vmem:[#allocation153_spill] sm:$0xff] %v14842_v58  ;;  %v1187_v29 = vld [vmem:[%s19510_s10 + $0x1068] sm:$0xff]  ;;  %v1229_v4 = vld [vmem:[%s19510_s10 + $0x11b8] sm:$0xff] }
 0x30c   :  { %20404 = vst [vmem:[#allocation154_spill] sm:$0xff] %v14844_v17  ;;  %20405 = vst [vmem:[#allocation155_spill] sm:$0xff] %v14854_v50 }
 0x30d   :  { %10142 = vmatpush1.bf16.msra.mxu1 %v14806_v2  ;;  %10238 = vmatpush1.bf16.msra.mxu0 %v14808_v41  ;;  %v14856_v2 = vpack.c.bf16 %v1145_v12, %v1103_v14  ;;  %v14878_v14 = vpack.c.bf16 %v1138_v8, %v1096_v15  ;;  %v14880_v12 = vpack.c.bf16 %v1144_v21, %v1102_v30  ;;  %v1222_v41 = vld [vmem:[%s19510_s10 + $0x1180] sm:$0xff]  ;;  %v1228_v8 = vld [vmem:[%s19510_s10 + $0x11b0] sm:$0xff]  ;;  %v1265_v30 = vld [vmem:[%s19510_s10 + $0x12d8] sm:$0xff] }
 0x30e   :  { %10144 = vmatprep.subr.bf16.mxu1 %v14818_v6  ;;  %10240 = vmatprep.subr.bf16.mxu0 %v14820_v9  ;;  %v1180_v9 = vld [vmem:[%s19510_s10 + $0x1030] sm:$0xff]  ;;  %v14890_v6 = vpack.c.bf16 %v1223_v55, %v1181_v19  ;;  %v1186_v15 = vld [vmem:[%s19510_s10 + $0x1060] sm:$0xff]  ;;  %v1307_v21 = vld [vmem:[%s19510_s10 + $0x1428] sm:$0xff] }
 0x30f   :  { %20406 = vst [vmem:[#allocation156_spill] sm:$0xff] %v14856_v2  ;;  %20407 = vst [vmem:[#allocation157_spill] sm:$0xff] %v14878_v14  ;;  %v1271_v19 = vld [vmem:[%s19510_s10 + $0x1308] sm:$0xff]  ;;  %v1313_v55 = vld [vmem:[%s19510_s10 + $0x1458] sm:$0xff] }
 0x310   :  { %20408 = vst [vmem:[#allocation158_spill] sm:$0xff] %v14880_v12  ;;  %20409 = vst [vmem:[#allocation159_spill] sm:$0xff] %v14890_v6 }
 0x311   :  { %10146 = vmatpush1.bf16.msra.mxu1 %v14842_v58  ;;  %10242 = vmatpush1.bf16.msra.mxu0 %v14844_v17  ;;  %v14892_v58 = vpack.c.bf16 %v1229_v4, %v1187_v29  ;;  %v14914_v29 = vpack.c.bf16 %v1222_v41, %v1180_v9  ;;  %v14916_v4 = vpack.c.bf16 %v1228_v8, %v1186_v15  ;;  %v1306_v17 = vld [vmem:[%s19510_s10 + $0x1420] sm:$0xff]  ;;  %v1312_v41 = vld [vmem:[%s19510_s10 + $0x1450] sm:$0xff]  ;;  %v681_v15 = vld [vmem:[%s19510_s10 + $0x98] sm:$0xff] }
 0x312   :  { %10148 = vmatprep.subr.bf16.mxu1 %v14854_v50  ;;  %10244 = vmatprep.subr.bf16.mxu0 %v14856_v2  ;;  %v1264_v2 = vld [vmem:[%s19510_s10 + $0x12d0] sm:$0xff]  ;;  %v14926_v50 = vpack.c.bf16 %v1307_v21, %v1265_v30  ;;  %v1270_v9 = vld [vmem:[%s19510_s10 + $0x1300] sm:$0xff]  ;;  %v723_v8 = vld [vmem:[%s19510_s10 + $0x1e8] sm:$0xff] }
 0x313   :  { %20410 = vst [vmem:[#allocation160_spill] sm:$0xff] %v14892_v58  ;;  %20411 = vst [vmem:[#allocation161_spill] sm:$0xff] %v14914_v29  ;;  %v687_v30 = vld [vmem:[%s19510_s10 + $0xc8] sm:$0xff]  ;;  %v729_v21 = vld [vmem:[%s19510_s10 + $0x218] sm:$0xff] }
 0x314   :  { %20412 = vst [vmem:[#allocation162_spill] sm:$0xff] %v14916_v4  ;;  %20413 = vst [vmem:[#allocation163_spill] sm:$0xff] %v14926_v50 }
 0x315   :  { %10150 = vmatpush1.bf16.msra.mxu1 %v14878_v14  ;;  %10246 = vmatpush1.bf16.msra.mxu0 %v14880_v12  ;;  %v14928_v14 = vpack.c.bf16 %v1313_v55, %v1271_v19  ;;  %v14950_v19 = vpack.c.bf16 %v1306_v17, %v1264_v2  ;;  %v14952_v55 = vpack.c.bf16 %v1312_v41, %v1270_v9  ;;  %v722_v12 = vld [vmem:[%s19510_s10 + $0x1e0] sm:$0xff]  ;;  %v728_v17 = vld [vmem:[%s19510_s10 + $0x210] sm:$0xff]  ;;  %v765_v9 = vld [vmem:[%s19510_s10 + $0x338] sm:$0xff] }
 0x316   :  { %10152 = vmatprep.subr.bf16.mxu1 %v14890_v6  ;;  %10248 = vmatprep.subr.bf16.mxu0 %v14892_v58  ;;  %v680_v58 = vld [vmem:[%s19510_s10 + $0x90] sm:$0xff]  ;;  %v14962_v6 = vpack.c.bf16 %v723_v8, %v681_v15  ;;  %v686_v2 = vld [vmem:[%s19510_s10 + $0xc0] sm:$0xff]  ;;  %v807_v41 = vld [vmem:[%s19510_s10 + $0x488] sm:$0xff] }
 0x317   :  { %20414 = vst [vmem:[#allocation164_spill] sm:$0xff] %v14928_v14  ;;  %20415 = vst [vmem:[#allocation165_spill] sm:$0xff] %v14950_v19  ;;  %v771_v15 = vld [vmem:[%s19510_s10 + $0x368] sm:$0xff]  ;;  %v813_v8 = vld [vmem:[%s19510_s10 + $0x4b8] sm:$0xff] }
 0x318   :  { %20416 = vst [vmem:[#allocation166_spill] sm:$0xff] %v14952_v55  ;;  %20417 = vst [vmem:[#allocation167_spill] sm:$0xff] %v14962_v6 }
 0x319   :  { %10154 = vmatpush1.bf16.msra.mxu1 %v14914_v29  ;;  %10250 = vmatpush1.bf16.msra.mxu0 %v14916_v4  ;;  %v14964_v29 = vpack.c.bf16 %v729_v21, %v687_v30  ;;  %v14986_v30 = vpack.c.bf16 %v722_v12, %v680_v58  ;;  %v14988_v21 = vpack.c.bf16 %v728_v17, %v686_v2  ;;  %v806_v4 = vld [vmem:[%s19510_s10 + $0x480] sm:$0xff]  ;;  %v812_v12 = vld [vmem:[%s19510_s10 + $0x4b0] sm:$0xff]  ;;  %v849_v2 = vld [vmem:[%s19510_s10 + $0x5d8] sm:$0xff] }
 0x31a   :  { %10156 = vmatprep.subr.bf16.mxu1 %v14926_v50  ;;  %10252 = vmatprep.subr.bf16.mxu0 %v14928_v14  ;;  %v764_v14 = vld [vmem:[%s19510_s10 + $0x330] sm:$0xff]  ;;  %v14998_v50 = vpack.c.bf16 %v807_v41, %v765_v9  ;;  %v770_v58 = vld [vmem:[%s19510_s10 + $0x360] sm:$0xff]  ;;  %v891_v17 = vld [vmem:[%s19510_s10 + $0x728] sm:$0xff] }
 0x31b   :  { %20418 = vst [vmem:[#allocation168_spill] sm:$0xff] %v14964_v29  ;;  %20419 = vst [vmem:[#allocation169_spill] sm:$0xff] %v14986_v30  ;;  %v855_v9 = vld [vmem:[%s19510_s10 + $0x608] sm:$0xff]  ;;  %v897_v41 = vld [vmem:[%s19510_s10 + $0x758] sm:$0xff] }
 0x31c   :  { %20420 = vst [vmem:[#allocation170_spill] sm:$0xff] %v14988_v21  ;;  %20421 = vst [vmem:[#allocation171_spill] sm:$0xff] %v14998_v50 }
 0x31d   :  { %10158 = vmatpush1.bf16.msra.mxu1 %v14950_v19  ;;  %10254 = vmatpush1.bf16.msra.mxu0 %v14952_v55  ;;  %v15000_v19 = vpack.c.bf16 %v813_v8, %v771_v15  ;;  %v15024_v15 = vpack.c.bf16 %v806_v4, %v764_v14  ;;  %v15026_v8 = vpack.c.bf16 %v812_v12, %v770_v58  ;;  %v890_v55 = vld [vmem:[%s19510_s10 + $0x720] sm:$0xff]  ;;  %v896_v4 = vld [vmem:[%s19510_s10 + $0x750] sm:$0xff]  ;;  %v933_v58 = vld [vmem:[%s19510_s10 + $0x878] sm:$0xff] }
 0x31e   :  { %10192 = vmatprep.subr.bf16.mxu1 %v14962_v6  ;;  %10288 = vmatprep.subr.bf16.mxu0 %v14964_v29  ;;  %v848_v29 = vld [vmem:[%s19510_s10 + $0x5d0] sm:$0xff]  ;;  %v15036_v6 = vpack.c.bf16 %v891_v17, %v849_v2  ;;  %v854_v14 = vld [vmem:[%s19510_s10 + $0x600] sm:$0xff]  ;;  %v975_v12 = vld [vmem:[%s19510_s10 + $0x9c8] sm:$0xff] }
 0x31f   :  { %20422 = vst [vmem:[#allocation172_spill] sm:$0xff] %v15000_v19  ;;  %20423 = vst [vmem:[#allocation173_spill] sm:$0xff] %v15024_v15  ;;  %v939_v2 = vld [vmem:[%s19510_s10 + $0x8a8] sm:$0xff]  ;;  %v981_v17 = vld [vmem:[%s19510_s10 + $0x9f8] sm:$0xff] }
 0x320   :  { %1896 = vmatmul.mubr.f32.vlgmr.msra.gmra.mrb[12].mxu1 %v13818_v52  ;;  %2109 = vmatmul.mubr.f32.vlgmr.msra.gmra.mrb[12].mxu0 %v13818_v52  ;;  %20424 = vst [vmem:[#allocation174_spill] sm:$0xff] %v15026_v8  ;;  %20425 = vst [vmem:[#allocation175_spill] sm:$0xff] %v15036_v6 }
 0x321   :  { %10194 = vmatpush1.bf16.msra.mxu1 %v14986_v30  ;;  %10290 = vmatpush1.bf16.msra.mxu0 %v14988_v21  ;;  %v15038_v30 = vpack.c.bf16 %v897_v41, %v855_v9  ;;  %v15062_v9 = vpack.c.bf16 %v890_v55, %v848_v29  ;;  %v15064_v41 = vpack.c.bf16 %v896_v4, %v854_v14  ;;  %v974_v21 = vld [vmem:[%s19510_s10 + $0x9c0] sm:$0xff]  ;;  %v980_v55 = vld [vmem:[%s19510_s10 + $0x9f0] sm:$0xff]  ;;  %v1017_v14 = vld [vmem:[%s19510_s10 + $0xb18] sm:$0xff] }
 0x322   :  { %10196 = vmatprep.subr.bf16.mxu1 %v14998_v50  ;;  %10292 = vmatprep.subr.bf16.mxu0 %v15000_v19  ;;  %v932_v19 = vld [vmem:[%s19510_s10 + $0x870] sm:$0xff]  ;;  %v15074_v50 = vpack.c.bf16 %v975_v12, %v933_v58  ;;  %v938_v29 = vld [vmem:[%s19510_s10 + $0x8a0] sm:$0xff]  ;;  %v1059_v4 = vld [vmem:[%s19510_s10 + $0xc68] sm:$0xff] }
 0x323   :  { %20426 = vst [vmem:[#allocation176_spill] sm:$0xff] %v15038_v30  ;;  %2037 = vmatprep.mubr.f32.mxu1 %v20330_v63  ;;  %2250 = vmatprep.mubr.f32.mxu0 %v20330_v63  ;;  %20427 = vst [vmem:[#allocation177_spill] sm:$0xff] %v15062_v9  ;;  %v1023_v58 = vld [vmem:[%s19510_s10 + $0xb48] sm:$0xff]  ;;  %v1065_v12 = vld [vmem:[%s19510_s10 + $0xc98] sm:$0xff] }
 0x324   :  { %20428 = vst [vmem:[#allocation178_spill] sm:$0xff] %v15064_v41  ;;  %20429 = vst [vmem:[#allocation179_spill] sm:$0xff] %v15074_v50 }
 0x325   :  { %10198 = vmatpush1.bf16.msra.mxu1 %v15024_v15  ;;  %10294 = vmatpush1.bf16.msra.mxu0 %v15026_v8  ;;  %v15076_v15 = vpack.c.bf16 %v981_v17, %v939_v2  ;;  %v15098_v2 = vpack.c.bf16 %v974_v21, %v932_v19  ;;  %v15100_v17 = vpack.c.bf16 %v980_v55, %v938_v29  ;;  %v1058_v8 = vld [vmem:[%s19510_s10 + $0xc60] sm:$0xff]  ;;  %v1064_v21 = vld [vmem:[%s19510_s10 + $0xc90] sm:$0xff]  ;;  %v1101_v29 = vld [vmem:[%s19510_s10 + $0xdb8] sm:$0xff] }
 0x326   :  { %10200 = vmatprep.subr.bf16.mxu1 %v15036_v6  ;;  %10296 = vmatprep.subr.bf16.mxu0 %v15038_v30  ;;  %v1016_v30 = vld [vmem:[%s19510_s10 + $0xb10] sm:$0xff]  ;;  %v15110_v6 = vpack.c.bf16 %v1059_v4, %v1017_v14  ;;  %v1022_v19 = vld [vmem:[%s19510_s10 + $0xb40] sm:$0xff]  ;;  %v1143_v55 = vld [vmem:[%s19510_s10 + $0xf08] sm:$0xff] }
 0x327   :  { %20430 = vst [vmem:[#allocation180_spill] sm:$0xff] %v15076_v15  ;;  %20431 = vst [vmem:[#allocation181_spill] sm:$0xff] %v15098_v2  ;;  %v1107_v14 = vld [vmem:[%s19510_s10 + $0xde8] sm:$0xff]  ;;  %v1149_v4 = vld [vmem:[%s19510_s10 + $0xf38] sm:$0xff] }
 0x328   :  { %20432 = vst [vmem:[#allocation182_spill] sm:$0xff] %v15100_v17  ;;  %20433 = vst [vmem:[#allocation183_spill] sm:$0xff] %v15110_v6 }
 0x329   :  { %10202 = vmatpush1.bf16.msra.mxu1 %v15062_v9  ;;  %10298 = vmatpush1.bf16.msra.mxu0 %v15064_v41  ;;  %v15112_v9 = vpack.c.bf16 %v1065_v12, %v1023_v58  ;;  %v15134_v58 = vpack.c.bf16 %v1058_v8, %v1016_v30  ;;  %v15136_v12 = vpack.c.bf16 %v1064_v21, %v1022_v19  ;;  %v1142_v41 = vld [vmem:[%s19510_s10 + $0xf00] sm:$0xff]  ;;  %v1148_v8 = vld [vmem:[%s19510_s10 + $0xf30] sm:$0xff]  ;;  %v1185_v19 = vld [vmem:[%s19510_s10 + $0x1058] sm:$0xff] }
 0x32a   :  { %10204 = vmatprep.subr.bf16.mxu1 %v15074_v50  ;;  %10300 = vmatprep.subr.bf16.mxu0 %v15076_v15  ;;  %v1100_v15 = vld [vmem:[%s19510_s10 + $0xdb0] sm:$0xff]  ;;  %v15146_v50 = vpack.c.bf16 %v1143_v55, %v1101_v29  ;;  %v1106_v30 = vld [vmem:[%s19510_s10 + $0xde0] sm:$0xff]  ;;  %v1227_v21 = vld [vmem:[%s19510_s10 + $0x11a8] sm:$0xff] }
 0x32b   :  { %20434 = vst [vmem:[#allocation184_spill] sm:$0xff] %v15112_v9  ;;  %20435 = vst [vmem:[#allocation185_spill] sm:$0xff] %v15134_v58  ;;  %v1191_v29 = vld [vmem:[%s19510_s10 + $0x1088] sm:$0xff]  ;;  %v1233_v55 = vld [vmem:[%s19510_s10 + $0x11d8] sm:$0xff] }
 0x32c   :  { %20436 = vst [vmem:[#allocation186_spill] sm:$0xff] %v15136_v12  ;;  %20437 = vst [vmem:[#allocation187_spill] sm:$0xff] %v15146_v50 }
 0x32d   :  { %10206 = vmatpush1.bf16.msra.mxu1 %v15098_v2  ;;  %10302 = vmatpush1.bf16.msra.mxu0 %v15100_v17  ;;  %v15148_v2 = vpack.c.bf16 %v1149_v4, %v1107_v14  ;;  %v15170_v14 = vpack.c.bf16 %v1142_v41, %v1100_v15  ;;  %v15172_v4 = vpack.c.bf16 %v1148_v8, %v1106_v30  ;;  %v1226_v17 = vld [vmem:[%s19510_s10 + $0x11a0] sm:$0xff]  ;;  %v1232_v41 = vld [vmem:[%s19510_s10 + $0x11d0] sm:$0xff]  ;;  %v1269_v30 = vld [vmem:[%s19510_s10 + $0x12f8] sm:$0xff] }
 0x32e   :  { %10208 = vmatprep.subr.bf16.mxu1 %v15110_v6  ;;  %10304 = vmatprep.subr.bf16.mxu0 %v15112_v9  ;;  %v1184_v9 = vld [vmem:[%s19510_s10 + $0x1050] sm:$0xff]  ;;  %v15182_v6 = vpack.c.bf16 %v1227_v21, %v1185_v19  ;;  %v1190_v15 = vld [vmem:[%s19510_s10 + $0x1080] sm:$0xff]  ;;  %v1311_v8 = vld [vmem:[%s19510_s10 + $0x1448] sm:$0xff] }
 0x32f   :  { %20438 = vst [vmem:[#allocation188_spill] sm:$0xff] %v15148_v2  ;;  %20439 = vst [vmem:[#allocation189_spill] sm:$0xff] %v15170_v14  ;;  %v1275_v19 = vld [vmem:[%s19510_s10 + $0x1328] sm:$0xff]  ;;  %v1317_v21 = vld [vmem:[%s19510_s10 + $0x1478] sm:$0xff] }
 0x330   :  { %20440 = vst [vmem:[#allocation190_spill] sm:$0xff] %v15172_v4  ;;  %20441 = vst [vmem:[#allocation191_spill] sm:$0xff] %v15182_v6 }
 0x331   :  { %10210 = vmatpush1.bf16.msra.mxu1 %v15134_v58  ;;  %10306 = vmatpush1.bf16.msra.mxu0 %v15136_v12  ;;  %v15184_v58 = vpack.c.bf16 %v1233_v55, %v1191_v29  ;;  %v15206_v29 = vpack.c.bf16 %v1226_v17, %v1184_v9  ;;  %v15208_v55 = vpack.c.bf16 %v1232_v41, %v1190_v15  ;;  %v1310_v12 = vld [vmem:[%s19510_s10 + $0x1440] sm:$0xff]  ;;  %v1316_v17 = vld [vmem:[%s19510_s10 + $0x1470] sm:$0xff]  ;;  %v685_v15 = vld [vmem:[%s19510_s10 + $0xb8] sm:$0xff] }
 0x332   :  { %10212 = vmatprep.subr.bf16.mxu1 %v15146_v50  ;;  %10308 = vmatprep.subr.bf16.mxu0 %v15148_v2  ;;  %v1268_v2 = vld [vmem:[%s19510_s10 + $0x12f0] sm:$0xff]  ;;  %v15218_v50 = vpack.c.bf16 %v1311_v8, %v1269_v30  ;;  %v1274_v9 = vld [vmem:[%s19510_s10 + $0x1320] sm:$0xff]  ;;  %v727_v41 = vld [vmem:[%s19510_s10 + $0x208] sm:$0xff] }
 0x333   :  { %20442 = vst [vmem:[#allocation192_spill] sm:$0xff] %v15184_v58  ;;  %20443 = vst [vmem:[#allocation193_spill] sm:$0xff] %v15206_v29  ;;  %v691_v30 = vld [vmem:[%s19510_s10 + $0xe8] sm:$0xff]  ;;  %v733_v8 = vld [vmem:[%s19510_s10 + $0x238] sm:$0xff] }
 0x334   :  { %20444 = vst [vmem:[#allocation194_spill] sm:$0xff] %v15208_v55  ;;  %20445 = vst [vmem:[#allocation195_spill] sm:$0xff] %v15218_v50 }
 0x335   :  { %10214 = vmatpush1.bf16.msra.mxu1 %v15170_v14  ;;  %10310 = vmatpush1.bf16.msra.mxu0 %v15172_v4  ;;  %v15220_v14 = vpack.c.bf16 %v1317_v21, %v1275_v19  ;;  %v15242_v19 = vpack.c.bf16 %v1310_v12, %v1268_v2  ;;  %v15244_v21 = vpack.c.bf16 %v1316_v17, %v1274_v9  ;;  %v726_v4 = vld [vmem:[%s19510_s10 + $0x200] sm:$0xff]  ;;  %v732_v12 = vld [vmem:[%s19510_s10 + $0x230] sm:$0xff]  ;;  %v769_v9 = vld [vmem:[%s19510_s10 + $0x358] sm:$0xff] }
 0x336   :  { %10216 = vmatprep.subr.bf16.mxu1 %v15182_v6  ;;  %10312 = vmatprep.subr.bf16.mxu0 %v15184_v58  ;;  %v684_v58 = vld [vmem:[%s19510_s10 + $0xb0] sm:$0xff]  ;;  %v15254_v6 = vpack.c.bf16 %v727_v41, %v685_v15  ;;  %v690_v2 = vld [vmem:[%s19510_s10 + $0xe0] sm:$0xff]  ;;  %v811_v17 = vld [vmem:[%s19510_s10 + $0x4a8] sm:$0xff] }
 0x337   :  { %20446 = vst [vmem:[#allocation196_spill] sm:$0xff] %v15220_v14  ;;  %20447 = vst [vmem:[#allocation197_spill] sm:$0xff] %v15242_v19  ;;  %v775_v15 = vld [vmem:[%s19510_s10 + $0x388] sm:$0xff]  ;;  %v817_v41 = vld [vmem:[%s19510_s10 + $0x4d8] sm:$0xff] }
 0x338   :  { %20448 = vst [vmem:[#allocation198_spill] sm:$0xff] %v15244_v21  ;;  %20449 = vst [vmem:[#allocation199_spill] sm:$0xff] %v15254_v6 }
 0x339   :  { %10218 = vmatpush1.bf16.msra.mxu1 %v15206_v29  ;;  %10314 = vmatpush1.bf16.msra.mxu0 %v15208_v55  ;;  %v15256_v29 = vpack.c.bf16 %v733_v8, %v691_v30  ;;  %v15278_v30 = vpack.c.bf16 %v726_v4, %v684_v58  ;;  %v15280_v8 = vpack.c.bf16 %v732_v12, %v690_v2  ;;  %v810_v55 = vld [vmem:[%s19510_s10 + $0x4a0] sm:$0xff]  ;;  %v816_v4 = vld [vmem:[%s19510_s10 + $0x4d0] sm:$0xff]  ;;  %v853_v2 = vld [vmem:[%s19510_s10 + $0x5f8] sm:$0xff] }
 0x33a   :  { %10220 = vmatprep.subr.bf16.mxu1 %v15218_v50  ;;  %10316 = vmatprep.subr.bf16.mxu0 %v15220_v14  ;;  %v768_v14 = vld [vmem:[%s19510_s10 + $0x350] sm:$0xff]  ;;  %v15290_v50 = vpack.c.bf16 %v811_v17, %v769_v9  ;;  %v774_v58 = vld [vmem:[%s19510_s10 + $0x380] sm:$0xff]  ;;  %v895_v12 = vld [vmem:[%s19510_s10 + $0x748] sm:$0xff] }
 0x33b   :  { %20450 = vst [vmem:[#allocation200_spill] sm:$0xff] %v15256_v29  ;;  %20451 = vst [vmem:[#allocation201_spill] sm:$0xff] %v15278_v30  ;;  %v859_v9 = vld [vmem:[%s19510_s10 + $0x628] sm:$0xff]  ;;  %v901_v17 = vld [vmem:[%s19510_s10 + $0x778] sm:$0xff] }
 0x33c   :  { %20452 = vst [vmem:[#allocation202_spill] sm:$0xff] %v15280_v8  ;;  %20453 = vst [vmem:[#allocation203_spill] sm:$0xff] %v15290_v50 }
 0x33d   :  { %10222 = vmatpush1.bf16.msra.mxu1 %v15242_v19  ;;  %10318 = vmatpush1.bf16.msra.mxu0 %v15244_v21  ;;  %v15292_v19 = vpack.c.bf16 %v817_v41, %v775_v15  ;;  %v15316_v15 = vpack.c.bf16 %v810_v55, %v768_v14  ;;  %v15318_v41 = vpack.c.bf16 %v816_v4, %v774_v58  ;;  %v894_v21 = vld [vmem:[%s19510_s10 + $0x740] sm:$0xff]  ;;  %v900_v55 = vld [vmem:[%s19510_s10 + $0x770] sm:$0xff]  ;;  %v937_v58 = vld [vmem:[%s19510_s10 + $0x898] sm:$0xff] }
 0x33e   :  { %10256 = vmatprep.subr.bf16.mxu1 %v15254_v6  ;;  %10352 = vmatprep.subr.bf16.mxu0 %v15256_v29  ;;  %v852_v29 = vld [vmem:[%s19510_s10 + $0x5f0] sm:$0xff]  ;;  %v15328_v6 = vpack.c.bf16 %v895_v12, %v853_v2  ;;  %v858_v14 = vld [vmem:[%s19510_s10 + $0x620] sm:$0xff]  ;;  %v979_v4 = vld [vmem:[%s19510_s10 + $0x9e8] sm:$0xff] }
 0x33f   :  { %20454 = vst [vmem:[#allocation204_spill] sm:$0xff] %v15292_v19  ;;  %20455 = vst [vmem:[#allocation205_spill] sm:$0xff] %v15316_v15  ;;  %v943_v2 = vld [vmem:[%s19510_s10 + $0x8c8] sm:$0xff]  ;;  %v985_v12 = vld [vmem:[%s19510_s10 + $0xa18] sm:$0xff] }
 0x340   :  { %2038 = vmatmul.mubr.f32.vlgmr.msra.gmra.mrb[14].mxu1 %v13818_v52  ;;  %2251 = vmatmul.mubr.f32.vlgmr.msra.gmra.mrb[14].mxu0 %v13818_v52  ;;  %20456 = vst [vmem:[#allocation206_spill] sm:$0xff] %v15318_v41  ;;  %20457 = vst [vmem:[#allocation207_spill] sm:$0xff] %v15328_v6 }
 0x341   :  { %10258 = vmatpush1.bf16.msra.mxu1 %v15278_v30  ;;  %10354 = vmatpush1.bf16.msra.mxu0 %v15280_v8  ;;  %v15330_v30 = vpack.c.bf16 %v901_v17, %v859_v9  ;;  %v15354_v9 = vpack.c.bf16 %v894_v21, %v852_v29  ;;  %v15356_v17 = vpack.c.bf16 %v900_v55, %v858_v14  ;;  %v978_v8 = vld [vmem:[%s19510_s10 + $0x9e0] sm:$0xff]  ;;  %v984_v21 = vld [vmem:[%s19510_s10 + $0xa10] sm:$0xff]  ;;  %v1021_v14 = vld [vmem:[%s19510_s10 + $0xb38] sm:$0xff] }
 0x342   :  { %10260 = vmatprep.subr.bf16.mxu1 %v15290_v50  ;;  %10356 = vmatprep.subr.bf16.mxu0 %v15292_v19  ;;  %v936_v19 = vld [vmem:[%s19510_s10 + $0x890] sm:$0xff]  ;;  %v15366_v50 = vpack.c.bf16 %v979_v4, %v937_v58  ;;  %v942_v29 = vld [vmem:[%s19510_s10 + $0x8c0] sm:$0xff]  ;;  %v1063_v55 = vld [vmem:[%s19510_s10 + $0xc88] sm:$0xff] }
 0x343   :  { %20458 = vst [vmem:[#allocation208_spill] sm:$0xff] %v15330_v30  ;;  %2179 = vmatprep.mubr.f32.mxu1 %v20330_v63  ;;  %2392 = vmatprep.mubr.f32.mxu0 %v20330_v63  ;;  %20459 = vst [vmem:[#allocation209_spill] sm:$0xff] %v15354_v9  ;;  %v1027_v58 = vld [vmem:[%s19510_s10 + $0xb68] sm:$0xff]  ;;  %v1069_v4 = vld [vmem:[%s19510_s10 + $0xcb8] sm:$0xff] }
 0x344   :  { %20460 = vst [vmem:[#allocation210_spill] sm:$0xff] %v15356_v17  ;;  %20461 = vst [vmem:[#allocation211_spill] sm:$0xff] %v15366_v50 }
 0x345   :  { %10262 = vmatpush1.bf16.msra.mxu1 %v15316_v15  ;;  %10358 = vmatpush1.bf16.msra.mxu0 %v15318_v41  ;;  %v15368_v15 = vpack.c.bf16 %v985_v12, %v943_v2  ;;  %v15390_v2 = vpack.c.bf16 %v978_v8, %v936_v19  ;;  %v15392_v12 = vpack.c.bf16 %v984_v21, %v942_v29  ;;  %v1062_v41 = vld [vmem:[%s19510_s10 + $0xc80] sm:$0xff]  ;;  %v1068_v8 = vld [vmem:[%s19510_s10 + $0xcb0] sm:$0xff]  ;;  %v1105_v29 = vld [vmem:[%s19510_s10 + $0xdd8] sm:$0xff] }
 0x346   :  { %10264 = vmatprep.subr.bf16.mxu1 %v15328_v6  ;;  %10360 = vmatprep.subr.bf16.mxu0 %v15330_v30  ;;  %v1020_v30 = vld [vmem:[%s19510_s10 + $0xb30] sm:$0xff]  ;;  %v15402_v6 = vpack.c.bf16 %v1063_v55, %v1021_v14  ;;  %v1026_v19 = vld [vmem:[%s19510_s10 + $0xb60] sm:$0xff]  ;;  %v1147_v21 = vld [vmem:[%s19510_s10 + $0xf28] sm:$0xff] }
 0x347   :  { %20462 = vst [vmem:[#allocation212_spill] sm:$0xff] %v15368_v15  ;;  %20463 = vst [vmem:[#allocation213_spill] sm:$0xff] %v15390_v2  ;;  %v1111_v14 = vld [vmem:[%s19510_s10 + $0xe08] sm:$0xff]  ;;  %v1153_v55 = vld [vmem:[%s19510_s10 + $0xf58] sm:$0xff] }
 0x348   :  { %20464 = vst [vmem:[#allocation214_spill] sm:$0xff] %v15392_v12  ;;  %20465 = vst [vmem:[#allocation215_spill] sm:$0xff] %v15402_v6 }
 0x349   :  { %10266 = vmatpush1.bf16.msra.mxu1 %v15354_v9  ;;  %10362 = vmatpush1.bf16.msra.mxu0 %v15356_v17  ;;  %v15404_v9 = vpack.c.bf16 %v1069_v4, %v1027_v58  ;;  %v15426_v58 = vpack.c.bf16 %v1062_v41, %v1020_v30  ;;  %v15428_v4 = vpack.c.bf16 %v1068_v8, %v1026_v19  ;;  %v1146_v17 = vld [vmem:[%s19510_s10 + $0xf20] sm:$0xff]  ;;  %v1152_v41 = vld [vmem:[%s19510_s10 + $0xf50] sm:$0xff]  ;;  %v1189_v19 = vld [vmem:[%s19510_s10 + $0x1078] sm:$0xff] }
 0x34a   :  { %10268 = vmatprep.subr.bf16.mxu1 %v15366_v50  ;;  %10364 = vmatprep.subr.bf16.mxu0 %v15368_v15  ;;  %v1104_v15 = vld [vmem:[%s19510_s10 + $0xdd0] sm:$0xff]  ;;  %v15438_v50 = vpack.c.bf16 %v1147_v21, %v1105_v29  ;;  %v1110_v30 = vld [vmem:[%s19510_s10 + $0xe00] sm:$0xff]  ;;  %v1231_v8 = vld [vmem:[%s19510_s10 + $0x11c8] sm:$0xff] }
 0x34b   :  { %20466 = vst [vmem:[#allocation216_spill] sm:$0xff] %v15404_v9  ;;  %20467 = vst [vmem:[#allocation217_spill] sm:$0xff] %v15426_v58  ;;  %v1195_v29 = vld [vmem:[%s19510_s10 + $0x10a8] sm:$0xff]  ;;  %v1237_v21 = vld [vmem:[%s19510_s10 + $0x11f8] sm:$0xff] }
 0x34c   :  { %20468 = vst [vmem:[#allocation218_spill] sm:$0xff] %v15428_v4  ;;  %20469 = vst [vmem:[#allocation219_spill] sm:$0xff] %v15438_v50 }
 0x34d   :  { %10270 = vmatpush1.bf16.msra.mxu1 %v15390_v2  ;;  %10366 = vmatpush1.bf16.msra.mxu0 %v15392_v12  ;;  %v15440_v2 = vpack.c.bf16 %v1153_v55, %v1111_v14  ;;  %v15462_v14 = vpack.c.bf16 %v1146_v17, %v1104_v15  ;;  %v15464_v55 = vpack.c.bf16 %v1152_v41, %v1110_v30  ;;  %v1230_v12 = vld [vmem:[%s19510_s10 + $0x11c0] sm:$0xff]  ;;  %v1236_v17 = vld [vmem:[%s19510_s10 + $0x11f0] sm:$0xff]  ;;  %v1273_v30 = vld [vmem:[%s19510_s10 + $0x1318] sm:$0xff] }
 0x34e   :  { %10272 = vmatprep.subr.bf16.mxu1 %v15402_v6  ;;  %10368 = vmatprep.subr.bf16.mxu0 %v15404_v9  ;;  %v1188_v9 = vld [vmem:[%s19510_s10 + $0x1070] sm:$0xff]  ;;  %v15474_v6 = vpack.c.bf16 %v1231_v8, %v1189_v19  ;;  %v1194_v15 = vld [vmem:[%s19510_s10 + $0x10a0] sm:$0xff]  ;;  %v1315_v41 = vld [vmem:[%s19510_s10 + $0x1468] sm:$0xff] }
 0x34f   :  { %20470 = vst [vmem:[#allocation220_spill] sm:$0xff] %v15440_v2  ;;  %20471 = vst [vmem:[#allocation221_spill] sm:$0xff] %v15462_v14  ;;  %v1279_v19 = vld [vmem:[%s19510_s10 + $0x1348] sm:$0xff]  ;;  %v1321_v8 = vld [vmem:[%s19510_s10 + $0x1498] sm:$0xff] }
 0x350   :  { %20472 = vst [vmem:[#allocation222_spill] sm:$0xff] %v15464_v55  ;;  %20473 = vst [vmem:[#allocation223_spill] sm:$0xff] %v15474_v6 }
 0x351   :  { %10274 = vmatpush1.bf16.msra.mxu1 %v15426_v58  ;;  %10370 = vmatpush1.bf16.msra.mxu0 %v15428_v4  ;;  %v15476_v58 = vpack.c.bf16 %v1237_v21, %v1195_v29  ;;  %v15498_v29 = vpack.c.bf16 %v1230_v12, %v1188_v9  ;;  %v15500_v21 = vpack.c.bf16 %v1236_v17, %v1194_v15  ;;  %v1314_v4 = vld [vmem:[%s19510_s10 + $0x1460] sm:$0xff]  ;;  %v1320_v12 = vld [vmem:[%s19510_s10 + $0x1490] sm:$0xff]  ;;  %v689_v15 = vld [vmem:[%s19510_s10 + $0xd8] sm:$0xff] }
 0x352   :  { %10276 = vmatprep.subr.bf16.mxu1 %v15438_v50  ;;  %10372 = vmatprep.subr.bf16.mxu0 %v15440_v2  ;;  %v1272_v2 = vld [vmem:[%s19510_s10 + $0x1310] sm:$0xff]  ;;  %v15510_v50 = vpack.c.bf16 %v1315_v41, %v1273_v30  ;;  %v1278_v9 = vld [vmem:[%s19510_s10 + $0x1340] sm:$0xff]  ;;  %v731_v17 = vld [vmem:[%s19510_s10 + $0x228] sm:$0xff] }
 0x353   :  { %20474 = vst [vmem:[#allocation224_spill] sm:$0xff] %v15476_v58  ;;  %20475 = vst [vmem:[#allocation225_spill] sm:$0xff] %v15498_v29  ;;  %v695_v30 = vld [vmem:[%s19510_s10 + $0x108] sm:$0xff]  ;;  %v737_v41 = vld [vmem:[%s19510_s10 + $0x258] sm:$0xff] }
 0x354   :  { %20476 = vst [vmem:[#allocation226_spill] sm:$0xff] %v15500_v21  ;;  %20477 = vst [vmem:[#allocation227_spill] sm:$0xff] %v15510_v50 }
 0x355   :  { %10278 = vmatpush1.bf16.msra.mxu1 %v15462_v14  ;;  %10374 = vmatpush1.bf16.msra.mxu0 %v15464_v55  ;;  %v15512_v14 = vpack.c.bf16 %v1321_v8, %v1279_v19  ;;  %v15534_v19 = vpack.c.bf16 %v1314_v4, %v1272_v2  ;;  %v15536_v8 = vpack.c.bf16 %v1320_v12, %v1278_v9  ;;  %v730_v55 = vld [vmem:[%s19510_s10 + $0x220] sm:$0xff]  ;;  %v736_v4 = vld [vmem:[%s19510_s10 + $0x250] sm:$0xff]  ;;  %v773_v9 = vld [vmem:[%s19510_s10 + $0x378] sm:$0xff] }
 0x356   :  { %10280 = vmatprep.subr.bf16.mxu1 %v15474_v6  ;;  %10376 = vmatprep.subr.bf16.mxu0 %v15476_v58  ;;  %v688_v58 = vld [vmem:[%s19510_s10 + $0xd0] sm:$0xff]  ;;  %v15546_v6 = vpack.c.bf16 %v731_v17, %v689_v15  ;;  %v694_v2 = vld [vmem:[%s19510_s10 + $0x100] sm:$0xff]  ;;  %v815_v12 = vld [vmem:[%s19510_s10 + $0x4c8] sm:$0xff] }
 0x357   :  { %20478 = vst [vmem:[#allocation228_spill] sm:$0xff] %v15512_v14  ;;  %20479 = vst [vmem:[#allocation229_spill] sm:$0xff] %v15534_v19  ;;  %v779_v15 = vld [vmem:[%s19510_s10 + $0x3a8] sm:$0xff]  ;;  %v821_v17 = vld [vmem:[%s19510_s10 + $0x4f8] sm:$0xff] }
 0x358   :  { %20480 = vst [vmem:[#allocation230_spill] sm:$0xff] %v15536_v8  ;;  %20481 = vst [vmem:[#allocation231_spill] sm:$0xff] %v15546_v6 }
 0x359   :  { %10282 = vmatpush1.bf16.msra.mxu1 %v15498_v29  ;;  %10378 = vmatpush1.bf16.msra.mxu0 %v15500_v21  ;;  %v15548_v29 = vpack.c.bf16 %v737_v41, %v695_v30  ;;  %v15570_v30 = vpack.c.bf16 %v730_v55, %v688_v58  ;;  %v15572_v41 = vpack.c.bf16 %v736_v4, %v694_v2  ;;  %v814_v21 = vld [vmem:[%s19510_s10 + $0x4c0] sm:$0xff]  ;;  %v820_v55 = vld [vmem:[%s19510_s10 + $0x4f0] sm:$0xff]  ;;  %v857_v2 = vld [vmem:[%s19510_s10 + $0x618] sm:$0xff] }
 0x35a   :  { %10284 = vmatprep.subr.bf16.mxu1 %v15510_v50  ;;  %10380 = vmatprep.subr.bf16.mxu0 %v15512_v14  ;;  %v772_v14 = vld [vmem:[%s19510_s10 + $0x370] sm:$0xff]  ;;  %v15582_v50 = vpack.c.bf16 %v815_v12, %v773_v9  ;;  %v778_v58 = vld [vmem:[%s19510_s10 + $0x3a0] sm:$0xff]  ;;  %v899_v4 = vld [vmem:[%s19510_s10 + $0x768] sm:$0xff] }
 0x35b   :  { %20482 = vst [vmem:[#allocation232_spill] sm:$0xff] %v15548_v29  ;;  %20483 = vst [vmem:[#allocation233_spill] sm:$0xff] %v15570_v30  ;;  %v863_v9 = vld [vmem:[%s19510_s10 + $0x648] sm:$0xff]  ;;  %v905_v12 = vld [vmem:[%s19510_s10 + $0x798] sm:$0xff] }
 0x35c   :  { %20484 = vst [vmem:[#allocation234_spill] sm:$0xff] %v15572_v41  ;;  %20485 = vst [vmem:[#allocation235_spill] sm:$0xff] %v15582_v50 }
 0x35d   :  { %10286 = vmatpush1.bf16.msra.mxu1 %v15534_v19  ;;  %10382 = vmatpush1.bf16.msra.mxu0 %v15536_v8  ;;  %v15584_v19 = vpack.c.bf16 %v821_v17, %v779_v15  ;;  %v15608_v15 = vpack.c.bf16 %v814_v21, %v772_v14  ;;  %v15610_v17 = vpack.c.bf16 %v820_v55, %v778_v58  ;;  %v898_v8 = vld [vmem:[%s19510_s10 + $0x760] sm:$0xff]  ;;  %v904_v21 = vld [vmem:[%s19510_s10 + $0x790] sm:$0xff]  ;;  %v941_v58 = vld [vmem:[%s19510_s10 + $0x8b8] sm:$0xff] }
 0x35e   :  { %10320 = vmatprep.subr.bf16.mxu1 %v15546_v6  ;;  %10416 = vmatprep.subr.bf16.mxu0 %v15548_v29  ;;  %v856_v29 = vld [vmem:[%s19510_s10 + $0x610] sm:$0xff]  ;;  %v15620_v6 = vpack.c.bf16 %v899_v4, %v857_v2  ;;  %v862_v14 = vld [vmem:[%s19510_s10 + $0x640] sm:$0xff]  ;;  %v983_v55 = vld [vmem:[%s19510_s10 + $0xa08] sm:$0xff] }
 0x35f   :  { %20486 = vst [vmem:[#allocation236_spill] sm:$0xff] %v15584_v19  ;;  %20487 = vst [vmem:[#allocation237_spill] sm:$0xff] %v15608_v15  ;;  %v947_v2 = vld [vmem:[%s19510_s10 + $0x8e8] sm:$0xff]  ;;  %v989_v4 = vld [vmem:[%s19510_s10 + $0xa38] sm:$0xff] }
 0x360   :  { %2180 = vmatmul.mubr.f32.vlgmr.msra.gmra.mrb[16].mxu1 %v13818_v52  ;;  %2393 = vmatmul.mubr.f32.vlgmr.msra.gmra.mrb[16].mxu0 %v13818_v52  ;;  %20488 = vst [vmem:[#allocation238_spill] sm:$0xff] %v15610_v17  ;;  %20489 = vst [vmem:[#allocation239_spill] sm:$0xff] %v15620_v6 }
 0x361   :  { %10322 = vmatpush1.bf16.msra.mxu1 %v15570_v30  ;;  %10418 = vmatpush1.bf16.msra.mxu0 %v15572_v41  ;;  %v15622_v30 = vpack.c.bf16 %v905_v12, %v863_v9  ;;  %v15646_v9 = vpack.c.bf16 %v898_v8, %v856_v29  ;;  %v15648_v12 = vpack.c.bf16 %v904_v21, %v862_v14  ;;  %v982_v41 = vld [vmem:[%s19510_s10 + $0xa00] sm:$0xff]  ;;  %v988_v8 = vld [vmem:[%s19510_s10 + $0xa30] sm:$0xff]  ;;  %v1025_v14 = vld [vmem:[%s19510_s10 + $0xb58] sm:$0xff] }
 0x362   :  { %10324 = vmatprep.subr.bf16.mxu1 %v15582_v50  ;;  %10420 = vmatprep.subr.bf16.mxu0 %v15584_v19  ;;  %v940_v19 = vld [vmem:[%s19510_s10 + $0x8b0] sm:$0xff]  ;;  %v15658_v50 = vpack.c.bf16 %v983_v55, %v941_v58  ;;  %v946_v29 = vld [vmem:[%s19510_s10 + $0x8e0] sm:$0xff]  ;;  %v1067_v21 = vld [vmem:[%s19510_s10 + $0xca8] sm:$0xff] }
 0x363   :  { %20490 = vst [vmem:[#allocation240_spill] sm:$0xff] %v15622_v30  ;;  %2321 = vmatprep.mubr.f32.mxu1 %v20330_v63  ;;  %2534 = vmatprep.mubr.f32.mxu0 %v20330_v63  ;;  %20491 = vst [vmem:[#allocation241_spill] sm:$0xff] %v15646_v9  ;;  %v1031_v58 = vld [vmem:[%s19510_s10 + $0xb88] sm:$0xff]  ;;  %v1073_v55 = vld [vmem:[%s19510_s10 + $0xcd8] sm:$0xff] }
 0x364   :  { %20492 = vst [vmem:[#allocation242_spill] sm:$0xff] %v15648_v12  ;;  %20493 = vst [vmem:[#allocation243_spill] sm:$0xff] %v15658_v50 }
 0x365   :  { %10326 = vmatpush1.bf16.msra.mxu1 %v15608_v15  ;;  %10422 = vmatpush1.bf16.msra.mxu0 %v15610_v17  ;;  %v15660_v15 = vpack.c.bf16 %v989_v4, %v947_v2  ;;  %v15682_v2 = vpack.c.bf16 %v982_v41, %v940_v19  ;;  %v15684_v4 = vpack.c.bf16 %v988_v8, %v946_v29  ;;  %v1066_v17 = vld [vmem:[%s19510_s10 + $0xca0] sm:$0xff]  ;;  %v1072_v41 = vld [vmem:[%s19510_s10 + $0xcd0] sm:$0xff]  ;;  %v1109_v29 = vld [vmem:[%s19510_s10 + $0xdf8] sm:$0xff] }
 0x366   :  { %10328 = vmatprep.subr.bf16.mxu1 %v15620_v6  ;;  %10424 = vmatprep.subr.bf16.mxu0 %v15622_v30  ;;  %v1024_v30 = vld [vmem:[%s19510_s10 + $0xb50] sm:$0xff]  ;;  %v15694_v6 = vpack.c.bf16 %v1067_v21, %v1025_v14  ;;  %v1030_v19 = vld [vmem:[%s19510_s10 + $0xb80] sm:$0xff]  ;;  %v1151_v8 = vld [vmem:[%s19510_s10 + $0xf48] sm:$0xff] }
 0x367   :  { %20494 = vst [vmem:[#allocation244_spill] sm:$0xff] %v15660_v15  ;;  %20495 = vst [vmem:[#allocation245_spill] sm:$0xff] %v15682_v2  ;;  %v1115_v14 = vld [vmem:[%s19510_s10 + $0xe28] sm:$0xff]  ;;  %v1157_v21 = vld [vmem:[%s19510_s10 + $0xf78] sm:$0xff] }
 0x368   :  { %20496 = vst [vmem:[#allocation246_spill] sm:$0xff] %v15684_v4  ;;  %20497 = vst [vmem:[#allocation247_spill] sm:$0xff] %v15694_v6 }
 0x369   :  { %10330 = vmatpush1.bf16.msra.mxu1 %v15646_v9  ;;  %10426 = vmatpush1.bf16.msra.mxu0 %v15648_v12  ;;  %v15696_v9 = vpack.c.bf16 %v1073_v55, %v1031_v58  ;;  %v15718_v58 = vpack.c.bf16 %v1066_v17, %v1024_v30  ;;  %v15720_v55 = vpack.c.bf16 %v1072_v41, %v1030_v19  ;;  %v1150_v12 = vld [vmem:[%s19510_s10 + $0xf40] sm:$0xff]  ;;  %v1156_v17 = vld [vmem:[%s19510_s10 + $0xf70] sm:$0xff]  ;;  %v1193_v19 = vld [vmem:[%s19510_s10 + $0x1098] sm:$0xff] }
 0x36a   :  { %10332 = vmatprep.subr.bf16.mxu1 %v15658_v50  ;;  %10428 = vmatprep.subr.bf16.mxu0 %v15660_v15  ;;  %v1108_v15 = vld [vmem:[%s19510_s10 + $0xdf0] sm:$0xff]  ;;  %v15730_v50 = vpack.c.bf16 %v1151_v8, %v1109_v29  ;;  %v1114_v30 = vld [vmem:[%s19510_s10 + $0xe20] sm:$0xff]  ;;  %v1235_v41 = vld [vmem:[%s19510_s10 + $0x11e8] sm:$0xff] }
 0x36b   :  { %20498 = vst [vmem:[#allocation248_spill] sm:$0xff] %v15696_v9  ;;  %20499 = vst [vmem:[#allocation249_spill] sm:$0xff] %v15718_v58  ;;  %v1199_v29 = vld [vmem:[%s19510_s10 + $0x10c8] sm:$0xff]  ;;  %v1241_v8 = vld [vmem:[%s19510_s10 + $0x1218] sm:$0xff] }
 0x36c   :  { %20500 = vst [vmem:[#allocation250_spill] sm:$0xff] %v15720_v55  ;;  %20501 = vst [vmem:[#allocation251_spill] sm:$0xff] %v15730_v50 }
 0x36d   :  { %10334 = vmatpush1.bf16.msra.mxu1 %v15682_v2  ;;  %10430 = vmatpush1.bf16.msra.mxu0 %v15684_v4  ;;  %v15732_v2 = vpack.c.bf16 %v1157_v21, %v1115_v14  ;;  %v15754_v14 = vpack.c.bf16 %v1150_v12, %v1108_v15  ;;  %v15756_v21 = vpack.c.bf16 %v1156_v17, %v1114_v30  ;;  %v1234_v4 = vld [vmem:[%s19510_s10 + $0x11e0] sm:$0xff]  ;;  %v1240_v12 = vld [vmem:[%s19510_s10 + $0x1210] sm:$0xff]  ;;  %v1277_v30 = vld [vmem:[%s19510_s10 + $0x1338] sm:$0xff] }
 0x36e   :  { %10336 = vmatprep.subr.bf16.mxu1 %v15694_v6  ;;  %10432 = vmatprep.subr.bf16.mxu0 %v15696_v9  ;;  %v1192_v9 = vld [vmem:[%s19510_s10 + $0x1090] sm:$0xff]  ;;  %v15766_v6 = vpack.c.bf16 %v1235_v41, %v1193_v19  ;;  %v1198_v15 = vld [vmem:[%s19510_s10 + $0x10c0] sm:$0xff]  ;;  %v1319_v19 = vld [vmem:[%s19510_s10 + $0x1488] sm:$0xff] }
 0x36f   :  { %20502 = vst [vmem:[#allocation252_spill] sm:$0xff] %v15732_v2  ;;  %20503 = vst [vmem:[#allocation253_spill] sm:$0xff] %v15754_v14  ;;  %v1283_v41 = vld [vmem:[%s19510_s10 + $0x1368] sm:$0xff]  ;;  %v15800_v56 = vpack.c.bf16 %v1240_v12, %v1198_v15  ;;  %v15810_v43 = vpack.c.bf16 %v1319_v19, %v1277_v30  ;;  %v693_v15 = vld [vmem:[%s19510_s10 + $0xf8] sm:$0xff] }
 0x370   :  { %20504 = vst [vmem:[#allocation254_spill] sm:$0xff] %v15756_v21  ;;  %20505 = vst [vmem:[#allocation255_spill] sm:$0xff] %v15766_v6  ;;  %v735_v12 = vld [vmem:[%s19510_s10 + $0x248] sm:$0xff]  ;;  %v741_v19 = vld [vmem:[%s19510_s10 + $0x278] sm:$0xff] }
 0x371   :  { %10338 = vmatpush1.bf16.msra.mxu1 %v15718_v58  ;;  %10434 = vmatpush1.bf16.msra.mxu0 %v15720_v55  ;;  %v15768_v58 = vpack.c.bf16 %v1241_v8, %v1199_v29  ;;  %v1325_v29 = vld [vmem:[%s19510_s10 + $0x14b8] sm:$0xff]  ;;  %20508 = vst [vmem:[#allocation258_spill] sm:$0xff] %v15800_v56  ;;  %20509 = vst [vmem:[#allocation259_spill] sm:$0xff] %v15810_v43  ;;  %v699_v30 = vld [vmem:[%s19510_s10 + $0x128] sm:$0xff] }
 0x372   :  { %10340 = vmatprep.subr.bf16.mxu1 %v15730_v50  ;;  %10436 = vmatprep.subr.bf16.mxu0 %v15732_v2  ;;  %v15798_v50 = vpack.c.bf16 %v1234_v4, %v1192_v9  ;;  %v1282_v9 = vld [vmem:[%s19510_s10 + $0x1360] sm:$0xff]  ;;  %v1324_v4 = vld [vmem:[%s19510_s10 + $0x14b0] sm:$0xff] }
 0x373   :  { %20506 = vst [vmem:[#allocation256_spill] sm:$0xff] %v15768_v58  ;;  %v15779_v17 = vpop.f32.mrb[4].mxu1  ;;  %v15781_v55 = vpop.f32.mrb[4].mxu0 }
 0x374   :  { %v15792_v8 = vpop.f32.mrb[5].mxu1  ;;  %v15794_v2 = vpop.f32.mrb[5].mxu0  ;;  %20507 = vst [vmem:[#allocation257_spill] sm:$0xff] %v15798_v50 }
 0x375   :  { %10342 = vmatpush1.bf16.msra.mxu1 %v15754_v14  ;;  %10438 = vmatpush1.bf16.msra.mxu0 %v15756_v21  ;;  %v15812_v14 = vpack.c.bf16 %v1325_v29, %v1283_v41  ;;  %v15834_v41 = vpack.c.bf16 %v1318_v47, %v1276_v59  ;;  %v15836_v29 = vpack.c.bf16 %v1324_v4, %v1282_v9  ;;  %v734_v21 = vld [vmem:[%s19510_s10 + $0x240] sm:$0xff]  ;;  %v740_v47 = vld [vmem:[%s19510_s10 + $0x270] sm:$0xff]  ;;  %v777_v9 = vld [vmem:[%s19510_s10 + $0x398] sm:$0xff] }
 0x376   :  { %10344 = vmatprep.subr.bf16.mxu1 %v15766_v6  ;;  %10440 = vmatprep.subr.bf16.mxu0 %v15768_v58  ;;  %v692_v58 = vld [vmem:[%s19510_s10 + $0xf0] sm:$0xff]  ;;  %v15846_v6 = vpack.c.bf16 %v735_v12, %v693_v15  ;;  %v698_v59 = vld [vmem:[%s19510_s10 + $0x120] sm:$0xff]  ;;  %v819_v4 = vld [vmem:[%s19510_s10 + $0x4e8] sm:$0xff] }
 0x377   :  { %20510 = vst [vmem:[#allocation260_spill] sm:$0xff] %v15812_v14  ;;  %20511 = vst [vmem:[#allocation261_spill] sm:$0xff] %v15834_v41  ;;  %v783_v15 = vld [vmem:[%s19510_s10 + $0x3c8] sm:$0xff]  ;;  %v825_v12 = vld [vmem:[%s19510_s10 + $0x518] sm:$0xff] }
 0x378   :  { %20512 = vst [vmem:[#allocation262_spill] sm:$0xff] %v15836_v29  ;;  %20513 = vst [vmem:[#allocation263_spill] sm:$0xff] %v15846_v6 }
 0x379   :  { %10346 = vmatpush1.bf16.msra.mxu1 %v15798_v50  ;;  %10442 = vmatpush1.bf16.msra.mxu0 %v15800_v56  ;;  %v15848_v50 = vpack.c.bf16 %v741_v19, %v699_v30  ;;  %v15870_v30 = vpack.c.bf16 %v734_v21, %v692_v58  ;;  %v15872_v19 = vpack.c.bf16 %v740_v47, %v698_v59  ;;  %v818_v56 = vld [vmem:[%s19510_s10 + $0x4e0] sm:$0xff]  ;;  %v824_v21 = vld [vmem:[%s19510_s10 + $0x510] sm:$0xff]  ;;  %v861_v59 = vld [vmem:[%s19510_s10 + $0x638] sm:$0xff] }
 0x37a   :  { %10348 = vmatprep.subr.bf16.mxu1 %v15810_v43  ;;  %10444 = vmatprep.subr.bf16.mxu0 %v15812_v14  ;;  %v776_v14 = vld [vmem:[%s19510_s10 + $0x390] sm:$0xff]  ;;  %v15882_v43 = vpack.c.bf16 %v819_v4, %v777_v9  ;;  %v782_v58 = vld [vmem:[%s19510_s10 + $0x3c0] sm:$0xff]  ;;  %v903_v47 = vld [vmem:[%s19510_s10 + $0x788] sm:$0xff] }
 0x37b   :  { %20514 = vst [vmem:[#allocation264_spill] sm:$0xff] %v15848_v50  ;;  %20515 = vst [vmem:[#allocation265_spill] sm:$0xff] %v15870_v30  ;;  %v867_v9 = vld [vmem:[%s19510_s10 + $0x668] sm:$0xff]  ;;  %v909_v4 = vld [vmem:[%s19510_s10 + $0x7b8] sm:$0xff] }
 0x37c   :  { %20516 = vst [vmem:[#allocation266_spill] sm:$0xff] %v15872_v19  ;;  %20517 = vst [vmem:[#allocation267_spill] sm:$0xff] %v15882_v43 }
 0x37d   :  { %10350 = vmatpush1.bf16.msra.mxu1 %v15834_v41  ;;  %10446 = vmatpush1.bf16.msra.mxu0 %v15836_v29  ;;  %v15884_v41 = vpack.c.bf16 %v825_v12, %v783_v15  ;;  %v15908_v15 = vpack.c.bf16 %v818_v56, %v776_v14  ;;  %v15910_v12 = vpack.c.bf16 %v824_v21, %v782_v58  ;;  %v902_v29 = vld [vmem:[%s19510_s10 + $0x780] sm:$0xff]  ;;  %v908_v14 = vld [vmem:[%s19510_s10 + $0x7b0] sm:$0xff]  ;;  %v945_v58 = vld [vmem:[%s19510_s10 + $0x8d8] sm:$0xff] }
 0x37e   :  { %10384 = vmatprep.subr.bf16.mxu1 %v15846_v6  ;;  %10480 = vmatprep.subr.bf16.mxu0 %v15848_v50  ;;  %v860_v50 = vld [vmem:[%s19510_s10 + $0x630] sm:$0xff]  ;;  %v15920_v6 = vpack.c.bf16 %v903_v47, %v861_v59  ;;  %v866_v56 = vld [vmem:[%s19510_s10 + $0x660] sm:$0xff]  ;;  %v987_v21 = vld [vmem:[%s19510_s10 + $0xa28] sm:$0xff] }
 0x37f   :  { %20518 = vst [vmem:[#allocation268_spill] sm:$0xff] %v15884_v41  ;;  %20519 = vst [vmem:[#allocation269_spill] sm:$0xff] %v15908_v15  ;;  %v951_v59 = vld [vmem:[%s19510_s10 + $0x908] sm:$0xff]  ;;  %v993_v47 = vld [vmem:[%s19510_s10 + $0xa58] sm:$0xff] }
 0x380   :  { %2322 = vmatmul.mubr.f32.vlgmr.msra.gmra.mrb[18].mxu1 %v13818_v52  ;;  %2535 = vmatmul.mubr.f32.vlgmr.msra.gmra.mrb[18].mxu0 %v13818_v52  ;;  %20520 = vst [vmem:[#allocation270_spill] sm:$0xff] %v15910_v12  ;;  %20521 = vst [vmem:[#allocation271_spill] sm:$0xff] %v15920_v6 }
 0x381   :  { %10386 = vmatpush1.bf16.msra.mxu1 %v15870_v30  ;;  %10482 = vmatpush1.bf16.msra.mxu0 %v15872_v19  ;;  %v15922_v30 = vpack.c.bf16 %v909_v4, %v867_v9  ;;  %v15946_v9 = vpack.c.bf16 %v902_v29, %v860_v50  ;;  %v15948_v4 = vpack.c.bf16 %v908_v14, %v866_v56  ;;  %v986_v19 = vld [vmem:[%s19510_s10 + $0xa20] sm:$0xff]  ;;  %v992_v29 = vld [vmem:[%s19510_s10 + $0xa50] sm:$0xff]  ;;  %v1029_v56 = vld [vmem:[%s19510_s10 + $0xb78] sm:$0xff] }
 0x382   :  { %10388 = vmatprep.subr.bf16.mxu1 %v15882_v43  ;;  %10484 = vmatprep.subr.bf16.mxu0 %v15884_v41  ;;  %v944_v41 = vld [vmem:[%s19510_s10 + $0x8d0] sm:$0xff]  ;;  %v15958_v43 = vpack.c.bf16 %v987_v21, %v945_v58  ;;  %v950_v50 = vld [vmem:[%s19510_s10 + $0x900] sm:$0xff]  ;;  %v1071_v14 = vld [vmem:[%s19510_s10 + $0xcc8] sm:$0xff] }
 0x383   :  { %20522 = vst [vmem:[#allocation272_spill] sm:$0xff] %v15922_v30  ;;  %2463 = vmatprep.mubr.f32.mxu1 %v20330_v63  ;;  %2676 = vmatprep.mubr.f32.mxu0 %v20330_v63  ;;  %20523 = vst [vmem:[#allocation273_spill] sm:$0xff] %v15946_v9  ;;  %v1035_v58 = vld [vmem:[%s19510_s10 + $0xba8] sm:$0xff]  ;;  %v1077_v21 = vld [vmem:[%s19510_s10 + $0xcf8] sm:$0xff] }
 0x384   :  { %20524 = vst [vmem:[#allocation274_spill] sm:$0xff] %v15948_v4  ;;  %20525 = vst [vmem:[#allocation275_spill] sm:$0xff] %v15958_v43 }
 0x385   :  { %10390 = vmatpush1.bf16.msra.mxu1 %v15908_v15  ;;  %10486 = vmatpush1.bf16.msra.mxu0 %v15910_v12  ;;  %v15960_v15 = vpack.c.bf16 %v993_v47, %v951_v59  ;;  %v15982_v59 = vpack.c.bf16 %v986_v19, %v944_v41  ;;  %v15984_v47 = vpack.c.bf16 %v992_v29, %v950_v50  ;;  %v1070_v12 = vld [vmem:[%s19510_s10 + $0xcc0] sm:$0xff]  ;;  %v1076_v19 = vld [vmem:[%s19510_s10 + $0xcf0] sm:$0xff]  ;;  %v1113_v50 = vld [vmem:[%s19510_s10 + $0xe18] sm:$0xff] }
 0x386   :  { %10392 = vmatprep.subr.bf16.mxu1 %v15920_v6  ;;  %10488 = vmatprep.subr.bf16.mxu0 %v15922_v30  ;;  %v1028_v30 = vld [vmem:[%s19510_s10 + $0xb70] sm:$0xff]  ;;  %v15994_v6 = vpack.c.bf16 %v1071_v14, %v1029_v56  ;;  %v1034_v41 = vld [vmem:[%s19510_s10 + $0xba0] sm:$0xff]  ;;  %v1155_v29 = vld [vmem:[%s19510_s10 + $0xf68] sm:$0xff] }
 0x387   :  { %20526 = vst [vmem:[#allocation276_spill] sm:$0xff] %v15960_v15  ;;  %20527 = vst [vmem:[#allocation277_spill] sm:$0xff] %v15982_v59  ;;  %v1119_v56 = vld [vmem:[%s19510_s10 + $0xe48] sm:$0xff]  ;;  %v1161_v14 = vld [vmem:[%s19510_s10 + $0xf98] sm:$0xff] }
 0x388   :  { %20528 = vst [vmem:[#allocation278_spill] sm:$0xff] %v15984_v47  ;;  %20529 = vst [vmem:[#allocation279_spill] sm:$0xff] %v15994_v6 }
 0x389   :  { %10394 = vmatpush1.bf16.msra.mxu1 %v15946_v9  ;;  %10490 = vmatpush1.bf16.msra.mxu0 %v15948_v4  ;;  %v15996_v9 = vpack.c.bf16 %v1077_v21, %v1035_v58  ;;  %v16018_v58 = vpack.c.bf16 %v1070_v12, %v1028_v30  ;;  %v16020_v21 = vpack.c.bf16 %v1076_v19, %v1034_v41  ;;  %v1154_v4 = vld [vmem:[%s19510_s10 + $0xf60] sm:$0xff]  ;;  %v1160_v12 = vld [vmem:[%s19510_s10 + $0xf90] sm:$0xff]  ;;  %v1197_v41 = vld [vmem:[%s19510_s10 + $0x10b8] sm:$0xff] }
 0x38a   :  { %10396 = vmatprep.subr.bf16.mxu1 %v15958_v43  ;;  %10492 = vmatprep.subr.bf16.mxu0 %v15960_v15  ;;  %v1112_v15 = vld [vmem:[%s19510_s10 + $0xe10] sm:$0xff]  ;;  %v16030_v43 = vpack.c.bf16 %v1155_v29, %v1113_v50  ;;  %v1118_v30 = vld [vmem:[%s19510_s10 + $0xe40] sm:$0xff]  ;;  %v1239_v19 = vld [vmem:[%s19510_s10 + $0x1208] sm:$0xff] }
 0x38b   :  { %20530 = vst [vmem:[#allocation280_spill] sm:$0xff] %v15996_v9  ;;  %20531 = vst [vmem:[#allocation281_spill] sm:$0xff] %v16018_v58  ;;  %v1203_v50 = vld [vmem:[%s19510_s10 + $0x10e8] sm:$0xff]  ;;  %v1245_v29 = vld [vmem:[%s19510_s10 + $0x1238] sm:$0xff] }
 0x38c   :  { %20532 = vst [vmem:[#allocation282_spill] sm:$0xff] %v16020_v21  ;;  %20533 = vst [vmem:[#allocation283_spill] sm:$0xff] %v16030_v43 }
 0x38d   :  { %10398 = vmatpush1.bf16.msra.mxu1 %v15982_v59  ;;  %10494 = vmatpush1.bf16.msra.mxu0 %v15984_v47  ;;  %v16032_v59 = vpack.c.bf16 %v1161_v14, %v1119_v56  ;;  %v16054_v56 = vpack.c.bf16 %v1154_v4, %v1112_v15  ;;  %v16056_v14 = vpack.c.bf16 %v1160_v12, %v1118_v30  ;;  %v1238_v47 = vld [vmem:[%s19510_s10 + $0x1200] sm:$0xff]  ;;  %v1244_v4 = vld [vmem:[%s19510_s10 + $0x1230] sm:$0xff]  ;;  %v1281_v30 = vld [vmem:[%s19510_s10 + $0x1358] sm:$0xff] }
 0x38e   :  { %10400 = vmatprep.subr.bf16.mxu1 %v15994_v6  ;;  %10496 = vmatprep.subr.bf16.mxu0 %v15996_v9  ;;  %v1196_v9 = vld [vmem:[%s19510_s10 + $0x10b0] sm:$0xff]  ;;  %v16066_v6 = vpack.c.bf16 %v1239_v19, %v1197_v41  ;;  %v1202_v15 = vld [vmem:[%s19510_s10 + $0x10e0] sm:$0xff]  ;;  %v1323_v41 = vld [vmem:[%s19510_s10 + $0x14a8] sm:$0xff] }
 0x38f   :  { %20534 = vst [vmem:[#allocation284_spill] sm:$0xff] %v16032_v59  ;;  %20535 = vst [vmem:[#allocation285_spill] sm:$0xff] %v16054_v56  ;;  %v1287_v19 = vld [vmem:[%s19510_s10 + $0x1388] sm:$0xff]  ;;  %v16097_v3 = vpack.c.bf16 %v1238_v47, %v1196_v9  ;;  %v16099_v26 = vpack.c.bf16 %v1244_v4, %v1202_v15  ;;  %v1286_v9 = vld [vmem:[%s19510_s10 + $0x1380] sm:$0xff] }
 0x390   :  { %20536 = vst [vmem:[#allocation286_spill] sm:$0xff] %v16056_v14  ;;  %20537 = vst [vmem:[#allocation287_spill] sm:$0xff] %v16066_v6  ;;  %v1328_v47 = vld [vmem:[%s19510_s10 + $0x14d0] sm:$0xff]  ;;  %v697_v15 = vld [vmem:[%s19510_s10 + $0x118] sm:$0xff] }
 0x391   :  { %10402 = vmatpush1.bf16.msra.mxu1 %v16018_v58  ;;  %10498 = vmatpush1.bf16.msra.mxu0 %v16020_v21  ;;  %v16068_v58 = vpack.c.bf16 %v1245_v29, %v1203_v50  ;;  %v1329_v50 = vld [vmem:[%s19510_s10 + $0x14d8] sm:$0xff]  ;;  %20540 = vst [vmem:[#allocation290_spill] sm:$0xff] %v16097_v3  ;;  %20541 = vst [vmem:[#allocation291_spill] sm:$0xff] %v16099_v26  ;;  %v739_v4 = vld [vmem:[%s19510_s10 + $0x268] sm:$0xff] }
 0x392   :  { %10404 = vmatprep.subr.bf16.mxu1 %v16030_v43  ;;  %10500 = vmatprep.subr.bf16.mxu0 %v16032_v59 }
 0x393   :  { %20538 = vst [vmem:[#allocation288_spill] sm:$0xff] %v16068_v58  ;;  %v1471_v12 = vpop.f32.mrb[6].mxu1  ;;  %v1684_v21 = vpop.f32.mrb[6].mxu0 }
 0x394   :  { %v16089_v29 = vmul.f32 %v1684_v21, %v15792_v8  ;;  %v16091_v59 = vpop.f32.mrb[7].mxu1  ;;  %v1686_v43 = vpop.f32.mrb[7].mxu0  ;;  %v1322_v8 = vld [vmem:[%s19510_s10 + $0x14a0] sm:$0xff]  ;;  %v16111_v21 = vpack.c.bf16 %v1329_v50, %v1287_v19  ;;  %v16135_v19 = vpack.c.bf16 %v1328_v47, %v1286_v9  ;;  %v696_v50 = vld [vmem:[%s19510_s10 + $0x110] sm:$0xff]  ;;  %v781_v9 = vld [vmem:[%s19510_s10 + $0x3b8] sm:$0xff] }
 0x395   :  { %v16093_v38 = vmul.f32 %v1686_v43, %v1471_v12  ;;  %10406 = vmatpush1.bf16.msra.mxu1 %v16054_v56  ;;  %10502 = vmatpush1.bf16.msra.mxu0 %v16056_v14  ;;  %v16109_v43 = vpack.c.bf16 %v1323_v41, %v1281_v30  ;;  %v703_v30 = vld [vmem:[%s19510_s10 + $0x148] sm:$0xff]  ;;  %v745_v12 = vld [vmem:[%s19510_s10 + $0x298] sm:$0xff]  ;;  %v16133_v41 = vpack.c.bf16 %v1322_v8, %v1280_v24  ;;  %v702_v24 = vld [vmem:[%s19510_s10 + $0x140] sm:$0xff] }
 0x396   :  { %20539 = vst [vmem:[#allocation289_spill] sm:$0xff] %v16089_v29  ;;  %10408 = vmatprep.subr.bf16.mxu1 %v16066_v6  ;;  %10504 = vmatprep.subr.bf16.mxu0 %v16068_v58  ;;  %20543 = vst [vmem:[#allocation293_spill] sm:$0xff] %v16111_v21  ;;  %v738_v58 = vld [vmem:[%s19510_s10 + $0x260] sm:$0xff]  ;;  %v16145_v14 = vpack.c.bf16 %v739_v4, %v697_v15  ;;  %v744_v8 = vld [vmem:[%s19510_s10 + $0x290] sm:$0xff] }
 0x397   :  { %20542 = vst [vmem:[#allocation292_spill] sm:$0xff] %v16109_v43  ;;  %20544 = vst [vmem:[#allocation294_spill] sm:$0xff] %v16133_v41  ;;  %v823_v47 = vld [vmem:[%s19510_s10 + $0x508] sm:$0xff]  ;;  %v829_v4 = vld [vmem:[%s19510_s10 + $0x538] sm:$0xff] }
 0x398   :  { %20545 = vst [vmem:[#allocation295_spill] sm:$0xff] %v16135_v19  ;;  %20546 = vst [vmem:[#allocation296_spill] sm:$0xff] %v16145_v14  ;;  %v787_v15 = vld [vmem:[%s19510_s10 + $0x3e8] sm:$0xff] }
 0x399   :  { %10410 = vmatpush1.bf16.msra.mxu1 %v16097_v3  ;;  %10506 = vmatpush1.bf16.msra.mxu0 %v16099_v26  ;;  %v16147_v3 = vpack.c.bf16 %v745_v12, %v703_v30  ;;  %v16169_v30 = vpack.c.bf16 %v738_v58, %v696_v50  ;;  %v16171_v12 = vpack.c.bf16 %v744_v8, %v702_v24  ;;  %v822_v26 = vld [vmem:[%s19510_s10 + $0x500] sm:$0xff]  ;;  %v828_v50 = vld [vmem:[%s19510_s10 + $0x530] sm:$0xff]  ;;  %v865_v24 = vld [vmem:[%s19510_s10 + $0x658] sm:$0xff] }
 0x39a   :  { %10412 = vmatprep.subr.bf16.mxu1 %v16109_v43  ;;  %10508 = vmatprep.subr.bf16.mxu0 %v16111_v21  ;;  %v780_v21 = vld [vmem:[%s19510_s10 + $0x3b0] sm:$0xff]  ;;  %v16181_v43 = vpack.c.bf16 %v823_v47, %v781_v9  ;;  %v786_v58 = vld [vmem:[%s19510_s10 + $0x3e0] sm:$0xff]  ;;  %v907_v8 = vld [vmem:[%s19510_s10 + $0x7a8] sm:$0xff] }
 0x39b   :  { %20547 = vst [vmem:[#allocation297_spill] sm:$0xff] %v16147_v3  ;;  %20548 = vst [vmem:[#allocation298_spill] sm:$0xff] %v16169_v30  ;;  %v871_v9 = vld [vmem:[%s19510_s10 + $0x688] sm:$0xff]  ;;  %v913_v47 = vld [vmem:[%s19510_s10 + $0x7d8] sm:$0xff] }
 0x39c   :  { %20549 = vst [vmem:[#allocation299_spill] sm:$0xff] %v16171_v12  ;;  %20550 = vst [vmem:[#allocation300_spill] sm:$0xff] %v16181_v43 }
 0x39d   :  { %10414 = vmatpush1.bf16.msra.mxu1 %v16133_v41  ;;  %10510 = vmatpush1.bf16.msra.mxu0 %v16135_v19  ;;  %v16183_v41 = vpack.c.bf16 %v829_v4, %v787_v15  ;;  %v16207_v15 = vpack.c.bf16 %v822_v26, %v780_v21  ;;  %v16209_v4 = vpack.c.bf16 %v828_v50, %v786_v58  ;;  %v906_v19 = vld [vmem:[%s19510_s10 + $0x7a0] sm:$0xff]  ;;  %v912_v21 = vld [vmem:[%s19510_s10 + $0x7d0] sm:$0xff]  ;;  %v949_v58 = vld [vmem:[%s19510_s10 + $0x8f8] sm:$0xff] }
 0x39e   :  { %10448 = vmatprep.subr.bf16.mxu1 %v16145_v14  ;;  %10544 = vmatprep.subr.bf16.mxu0 %v16147_v3  ;;  %v864_v3 = vld [vmem:[%s19510_s10 + $0x650] sm:$0xff]  ;;  %v16219_v14 = vpack.c.bf16 %v907_v8, %v865_v24  ;;  %v870_v26 = vld [vmem:[%s19510_s10 + $0x680] sm:$0xff]  ;;  %v991_v50 = vld [vmem:[%s19510_s10 + $0xa48] sm:$0xff] }
 0x39f   :  { %20551 = vst [vmem:[#allocation301_spill] sm:$0xff] %v16183_v41  ;;  %20552 = vst [vmem:[#allocation302_spill] sm:$0xff] %v16207_v15  ;;  %v955_v24 = vld [vmem:[%s19510_s10 + $0x928] sm:$0xff]  ;;  %v997_v8 = vld [vmem:[%s19510_s10 + $0xa78] sm:$0xff] }
 0x3a0   :  { %2464 = vmatmul.mubr.f32.vlgmr.msra.gmra.mrb[20].mxu1 %v13818_v52  ;;  %2677 = vmatmul.mubr.f32.vlgmr.msra.gmra.mrb[20].mxu0 %v13818_v52  ;;  %20553 = vst [vmem:[#allocation303_spill] sm:$0xff] %v16209_v4  ;;  %20554 = vst [vmem:[#allocation304_spill] sm:$0xff] %v16219_v14 }
 0x3a1   :  { %10450 = vmatpush1.bf16.msra.mxu1 %v16169_v30  ;;  %10546 = vmatpush1.bf16.msra.mxu0 %v16171_v12  ;;  %v16221_v30 = vpack.c.bf16 %v913_v47, %v871_v9  ;;  %v16245_v9 = vpack.c.bf16 %v906_v19, %v864_v3  ;;  %v16247_v47 = vpack.c.bf16 %v912_v21, %v870_v26  ;;  %v990_v12 = vld [vmem:[%s19510_s10 + $0xa40] sm:$0xff]  ;;  %v996_v19 = vld [vmem:[%s19510_s10 + $0xa70] sm:$0xff]  ;;  %v1033_v26 = vld [vmem:[%s19510_s10 + $0xb98] sm:$0xff] }
 0x3a2   :  { %10452 = vmatprep.subr.bf16.mxu1 %v16181_v43  ;;  %10548 = vmatprep.subr.bf16.mxu0 %v16183_v41  ;;  %v948_v41 = vld [vmem:[%s19510_s10 + $0x8f0] sm:$0xff]  ;;  %v16257_v43 = vpack.c.bf16 %v991_v50, %v949_v58  ;;  %v954_v3 = vld [vmem:[%s19510_s10 + $0x920] sm:$0xff]  ;;  %v1075_v21 = vld [vmem:[%s19510_s10 + $0xce8] sm:$0xff] }
 0x3a3   :  { %20555 = vst [vmem:[#allocation305_spill] sm:$0xff] %v16221_v30  ;;  %2605 = vmatprep.mubr.f32.mxu1 %v20330_v63  ;;  %2818 = vmatprep.mubr.f32.mxu0 %v20330_v63  ;;  %20556 = vst [vmem:[#allocation306_spill] sm:$0xff] %v16245_v9  ;;  %v1039_v58 = vld [vmem:[%s19510_s10 + $0xbc8] sm:$0xff]  ;;  %v1081_v50 = vld [vmem:[%s19510_s10 + $0xd18] sm:$0xff] }
 0x3a4   :  { %20557 = vst [vmem:[#allocation307_spill] sm:$0xff] %v16247_v47  ;;  %20558 = vst [vmem:[#allocation308_spill] sm:$0xff] %v16257_v43 }
 0x3a5   :  { %10454 = vmatpush1.bf16.msra.mxu1 %v16207_v15  ;;  %10550 = vmatpush1.bf16.msra.mxu0 %v16209_v4  ;;  %v16259_v15 = vpack.c.bf16 %v997_v8, %v955_v24  ;;  %v16281_v24 = vpack.c.bf16 %v990_v12, %v948_v41  ;;  %v16283_v8 = vpack.c.bf16 %v996_v19, %v954_v3  ;;  %v1074_v4 = vld [vmem:[%s19510_s10 + $0xce0] sm:$0xff]  ;;  %v1080_v12 = vld [vmem:[%s19510_s10 + $0xd10] sm:$0xff]  ;;  %v1117_v3 = vld [vmem:[%s19510_s10 + $0xe38] sm:$0xff] }
 0x3a6   :  { %10456 = vmatprep.subr.bf16.mxu1 %v16219_v14  ;;  %10552 = vmatprep.subr.bf16.mxu0 %v16221_v30  ;;  %v1032_v30 = vld [vmem:[%s19510_s10 + $0xb90] sm:$0xff]  ;;  %v16293_v14 = vpack.c.bf16 %v1075_v21, %v1033_v26  ;;  %v1038_v41 = vld [vmem:[%s19510_s10 + $0xbc0] sm:$0xff]  ;;  %v1159_v19 = vld [vmem:[%s19510_s10 + $0xf88] sm:$0xff] }
 0x3a7   :  { %20559 = vst [vmem:[#allocation309_spill] sm:$0xff] %v16259_v15  ;;  %20560 = vst [vmem:[#allocation310_spill] sm:$0xff] %v16281_v24  ;;  %v1123_v26 = vld [vmem:[%s19510_s10 + $0xe68] sm:$0xff]  ;;  %v1165_v21 = vld [vmem:[%s19510_s10 + $0xfb8] sm:$0xff] }
 0x3a8   :  { %20561 = vst [vmem:[#allocation311_spill] sm:$0xff] %v16283_v8  ;;  %20562 = vst [vmem:[#allocation312_spill] sm:$0xff] %v16293_v14 }
 0x3a9   :  { %10458 = vmatpush1.bf16.msra.mxu1 %v16245_v9  ;;  %10554 = vmatpush1.bf16.msra.mxu0 %v16247_v47  ;;  %v16295_v9 = vpack.c.bf16 %v1081_v50, %v1039_v58  ;;  %v16317_v58 = vpack.c.bf16 %v1074_v4, %v1032_v30  ;;  %v16319_v50 = vpack.c.bf16 %v1080_v12, %v1038_v41  ;;  %v1158_v47 = vld [vmem:[%s19510_s10 + $0xf80] sm:$0xff]  ;;  %v1164_v4 = vld [vmem:[%s19510_s10 + $0xfb0] sm:$0xff]  ;;  %v1201_v41 = vld [vmem:[%s19510_s10 + $0x10d8] sm:$0xff] }
 0x3aa   :  { %10460 = vmatprep.subr.bf16.mxu1 %v16257_v43  ;;  %10556 = vmatprep.subr.bf16.mxu0 %v16259_v15  ;;  %v1116_v15 = vld [vmem:[%s19510_s10 + $0xe30] sm:$0xff]  ;;  %v16329_v43 = vpack.c.bf16 %v1159_v19, %v1117_v3  ;;  %v1122_v30 = vld [vmem:[%s19510_s10 + $0xe60] sm:$0xff]  ;;  %v1243_v12 = vld [vmem:[%s19510_s10 + $0x1228] sm:$0xff] }
 0x3ab   :  { %20563 = vst [vmem:[#allocation313_spill] sm:$0xff] %v16295_v9  ;;  %20564 = vst [vmem:[#allocation314_spill] sm:$0xff] %v16317_v58  ;;  %v1207_v3 = vld [vmem:[%s19510_s10 + $0x1108] sm:$0xff]  ;;  %v1249_v19 = vld [vmem:[%s19510_s10 + $0x1258] sm:$0xff] }
 0x3ac   :  { %20565 = vst [vmem:[#allocation315_spill] sm:$0xff] %v16319_v50  ;;  %20566 = vst [vmem:[#allocation316_spill] sm:$0xff] %v16329_v43 }
 0x3ad   :  { %10462 = vmatpush1.bf16.msra.mxu1 %v16281_v24  ;;  %10558 = vmatpush1.bf16.msra.mxu0 %v16283_v8  ;;  %v16331_v24 = vpack.c.bf16 %v1165_v21, %v1123_v26  ;;  %v16353_v26 = vpack.c.bf16 %v1158_v47, %v1116_v15  ;;  %v16355_v21 = vpack.c.bf16 %v1164_v4, %v1122_v30  ;;  %v1242_v8 = vld [vmem:[%s19510_s10 + $0x1220] sm:$0xff]  ;;  %v1248_v47 = vld [vmem:[%s19510_s10 + $0x1250] sm:$0xff]  ;;  %v1285_v30 = vld [vmem:[%s19510_s10 + $0x1378] sm:$0xff] }
 0x3ae   :  { %10464 = vmatprep.subr.bf16.mxu1 %v16293_v14  ;;  %10560 = vmatprep.subr.bf16.mxu0 %v16295_v9  ;;  %v1200_v9 = vld [vmem:[%s19510_s10 + $0x10d0] sm:$0xff]  ;;  %v16365_v14 = vpack.c.bf16 %v1243_v12, %v1201_v41  ;;  %v1206_v15 = vld [vmem:[%s19510_s10 + $0x1100] sm:$0xff]  ;;  %v1327_v41 = vld [vmem:[%s19510_s10 + $0x14c8] sm:$0xff] }
 0x3af   :  { %20567 = vst [vmem:[#allocation317_spill] sm:$0xff] %v16331_v24  ;;  %20568 = vst [vmem:[#allocation318_spill] sm:$0xff] %v16353_v26  ;;  %v1291_v12 = vld [vmem:[%s19510_s10 + $0x13a8] sm:$0xff]  ;;  %v16390_v6 = vpack.c.bf16 %v1242_v8, %v1200_v9  ;;  %v16399_v60 = vpack.c.bf16 %v1248_v47, %v1206_v15  ;;  %v16406_v9 = vpack.c.bf16 %v1327_v41, %v1285_v30  ;;  %v1332_v8 = vld [vmem:[%s19510_s10 + $0x14f0] sm:$0xff] }
 0x3b0   :  { %20569 = vst [vmem:[#allocation319_spill] sm:$0xff] %v16355_v21  ;;  %20570 = vst [vmem:[#allocation320_spill] sm:$0xff] %v16365_v14  ;;  %v743_v15 = vld [vmem:[%s19510_s10 + $0x288] sm:$0xff]  ;;  %v700_v41 = vld [vmem:[%s19510_s10 + $0x130] sm:$0xff] }
 0x3b1   :  { %10466 = vmatpush1.bf16.msra.mxu1 %v16317_v58  ;;  %10562 = vmatpush1.bf16.msra.mxu0 %v16319_v50  ;;  %v16367_v58 = vpack.c.bf16 %v1249_v19, %v1207_v3  ;;  %v1333_v3 = vld [vmem:[%s19510_s10 + $0x14f8] sm:$0xff]  ;;  %20572 = vst [vmem:[#allocation322_spill] sm:$0xff] %v16390_v6  ;;  %20573 = vst [vmem:[#allocation323_spill] sm:$0xff] %v16399_v60 }
 0x3b2   :  { %10468 = vmatprep.subr.bf16.mxu1 %v16329_v43  ;;  %10564 = vmatprep.subr.bf16.mxu0 %v16331_v24  ;;  %20574 = vst [vmem:[#allocation324_spill] sm:$0xff] %v16406_v9 }
 0x3b3   :  { %20571 = vst [vmem:[#allocation321_spill] sm:$0xff] %v16367_v58  ;;  %v1613_v4 = vpop.f32.mrb[8].mxu1  ;;  %v1826_v50 = vpop.f32.mrb[8].mxu0 }
 0x3b4   :  { %v16388_v19 = vmul.f32 %v1826_v50, %v15794_v2  ;;  %v1615_v24 = vpop.f32.mrb[9].mxu1  ;;  %v1828_v43 = vpop.f32.mrb[9].mxu0  ;;  %v1284_v2 = vld [vmem:[%s19510_s10 + $0x1370] sm:$0xff]  ;;  %v701_v50 = vld [vmem:[%s19510_s10 + $0x138] sm:$0xff] }
 0x3b5   :  { %v16393_v56 = vmul.f32 %v1615_v24, %v15779_v17  ;;  %v16395_v29 = vmul.f32 %v1828_v43, %v1613_v4  ;;  %10470 = vmatpush1.bf16.msra.mxu1 %v16353_v26  ;;  %10566 = vmatpush1.bf16.msra.mxu0 %v16355_v21  ;;  %v16408_v17 = vpack.c.bf16 %v1333_v3, %v1291_v12  ;;  %v1326_v43 = vld [vmem:[%s19510_s10 + $0x14c0] sm:$0xff]  ;;  %v785_v3 = vld [vmem:[%s19510_s10 + $0x3d8] sm:$0xff] }
 0x3b6   :  { %10472 = vmatprep.subr.bf16.mxu1 %v16365_v14  ;;  %10568 = vmatprep.subr.bf16.mxu0 %v16367_v58  ;;  %v1290_v24 = vld [vmem:[%s19510_s10 + $0x13a0] sm:$0xff]  ;;  %v16427_v47 = vpack.c.bf16 %v1326_v43, %v1284_v2  ;;  %v16433_v4 = vpack.c.bf16 %v743_v15, %v701_v50  ;;  %v827_v2 = vld [vmem:[%s19510_s10 + $0x528] sm:$0xff]  ;;  %v869_v15 = vld [vmem:[%s19510_s10 + $0x678] sm:$0xff] }
 0x3b7   :  { %20575 = vst [vmem:[#allocation325_spill] sm:$0xff] %v16408_v17  ;;  %v16429_v30 = vpack.c.bf16 %v1332_v8, %v1290_v24  ;;  %v742_v12 = vld [vmem:[%s19510_s10 + $0x280] sm:$0xff]  ;;  %v16453_v24 = vpack.c.bf16 %v827_v2, %v785_v3  ;;  %v784_v8 = vld [vmem:[%s19510_s10 + $0x3d0] sm:$0xff] }
 0x3b8   :  { %20576 = vst [vmem:[#allocation326_spill] sm:$0xff] %v16427_v47  ;;  %20578 = vst [vmem:[#allocation328_spill] sm:$0xff] %v16433_v4  ;;  %v16449_v43 = vpack.c.bf16 %v742_v12, %v700_v41  ;;  %v826_v50 = vld [vmem:[%s19510_s10 + $0x520] sm:$0xff]  ;;  %v911_v41 = vld [vmem:[%s19510_s10 + $0x7c8] sm:$0xff] }
 0x3b9   :  { %10474 = vmatpush1.bf16.msra.mxu1 %v16390_v6  ;;  %10570 = vmatpush1.bf16.msra.mxu0 %v16399_v60  ;;  %20577 = vst [vmem:[#allocation327_spill] sm:$0xff] %v16429_v30  ;;  %20580 = vst [vmem:[#allocation330_spill] sm:$0xff] %v16453_v24  ;;  %v16471_v12 = vpack.c.bf16 %v826_v50, %v784_v8  ;;  %v16475_v3 = vpack.c.bf16 %v911_v41, %v869_v15  ;;  %v868_v2 = vld [vmem:[%s19510_s10 + $0x670] sm:$0xff]  ;;  %v995_v8 = vld [vmem:[%s19510_s10 + $0xa68] sm:$0xff] }
 0x3ba   :  { %10476 = vmatprep.subr.bf16.mxu1 %v16406_v9  ;;  %10572 = vmatprep.subr.bf16.mxu0 %v16408_v17  ;;  %20579 = vst [vmem:[#allocation329_spill] sm:$0xff] %v16449_v43  ;;  %v952_v41 = vld [vmem:[%s19510_s10 + $0x910] sm:$0xff] }
 0x3bb   :  { %20581 = vst [vmem:[#allocation331_spill] sm:$0xff] %v16471_v12  ;;  %20582 = vst [vmem:[#allocation332_spill] sm:$0xff] %v16475_v3 }
 0x3bd   :  { %10478 = vmatpush1.bf16.msra.mxu1 %v16427_v47  ;;  %10574 = vmatpush1.bf16.msra.mxu0 %v16429_v30  ;;  %v1204_v30 = vld [vmem:[%s19510_s10 + $0x10f0] sm:$0xff] }
 0x3be   :  { %10512 = vmatprep.subr.bf16.mxu1 %v16433_v4  ;;  %10608 = vmatprep.subr.bf16.mxu0 %v13757_v27  ;;  %v910_v27 = vld [vmem:[%s19510_s10 + $0x7c0] sm:$0xff] }
 0x3bf   :  { %v16493_v50 = vpack.c.bf16 %v910_v27, %v868_v2  ;;  %v1079_v27 = vld [vmem:[%s19510_s10 + $0xd08] sm:$0xff] }
 0x3c0   :  { %2606 = vmatmul.mubr.f32.vlgmr.msra.gmra.mrb[22].mxu1 %v13818_v52  ;;  %2819 = vmatmul.mubr.f32.vlgmr.msra.gmra.mrb[22].mxu0 %v13818_v52 }
 0x3c1   :  { %10514 = vmatpush1.bf16.msra.mxu1 %v16449_v43  ;;  %10610 = vmatpush1.bf16.msra.mxu0 %v13808_v28  ;;  %v953_v28 = vld [vmem:[%s19510_s10 + $0x918] sm:$0xff]  ;;  %20583 = vst [vmem:[#allocation333_spill] sm:$0xff] %v16493_v50 }
 0x3c2   :  { %10516 = vmatprep.subr.bf16.mxu1 %v16453_v24  ;;  %10612 = vmatprep.subr.bf16.mxu0 %v13820_v53  ;;  %v16497_v15 = vpack.c.bf16 %v995_v8, %v953_v28  ;;  %v994_v53 = vld [vmem:[%s19510_s10 + $0xa60] sm:$0xff]  ;;  %v1036_v8 = vld [vmem:[%s19510_s10 + $0xbb0] sm:$0xff] }
 0x3c3   :  { %2747 = vmatprep.mubr.f32.mxu1 %v20330_v63  ;;  %3002 = vmatprep.mubr.f32.mxu0 %v20330_v63  ;;  %v16513_v28 = vpack.c.bf16 %v994_v53, %v952_v41  ;;  %v1163_v53 = vld [vmem:[%s19510_s10 + $0xfa8] sm:$0xff] }
 0x3c4   :  { %20584 = vst [vmem:[#allocation334_spill] sm:$0xff] %v16497_v15 }
 0x3c5   :  { %10518 = vmatpush1.bf16.msra.mxu1 %v16471_v12  ;;  %10614 = vmatpush1.bf16.msra.mxu0 %v13846_v25  ;;  %v1037_v25 = vld [vmem:[%s19510_s10 + $0xbb8] sm:$0xff]  ;;  %20585 = vst [vmem:[#allocation335_spill] sm:$0xff] %v16513_v28 }
 0x3c6   :  { %10520 = vmatprep.subr.bf16.mxu1 %v16475_v3  ;;  %10616 = vmatprep.subr.bf16.mxu0 %v13858_v18  ;;  %v16517_v2 = vpack.c.bf16 %v1079_v27, %v1037_v25  ;;  %v1078_v18 = vld [vmem:[%s19510_s10 + $0xd00] sm:$0xff]  ;;  %v1120_v27 = vld [vmem:[%s19510_s10 + $0xe50] sm:$0xff] }
 0x3c7   :  { %v16533_v25 = vpack.c.bf16 %v1078_v18, %v1036_v8  ;;  %v1247_v18 = vld [vmem:[%s19510_s10 + $0x1248] sm:$0xff]  ;;  %v20590_v8 = vsub.f32 %v13780_v5, %v13681_v46  ;;  %v1289_v46 = vld [vmem:[%s19510_s10 + $0x1398] sm:$0xff] }
 0x3c8   :  { %20586 = vst [vmem:[#allocation336_spill] sm:$0xff] %v16517_v2  ;;  %v1331_v5 = vld [vmem:[%s19510_s10 + $0x14e8] sm:$0xff] }
 0x3c9   :  { %10522 = vmatpush1.bf16.msra.mxu1 %v16493_v50  ;;  %10618 = vmatpush1.bf16.msra.mxu0 %v13884_v7  ;;  %v1121_v7 = vld [vmem:[%s19510_s10 + $0xe58] sm:$0xff]  ;;  %20587 = vst [vmem:[#allocation337_spill] sm:$0xff] %v16533_v25 }
 0x3ca   :  { %10524 = vmatprep.subr.bf16.mxu1 %v16497_v15  ;;  %10620 = vmatprep.subr.bf16.mxu0 %v13896_v0  ;;  %v16537_v41 = vpack.c.bf16 %v1163_v53, %v1121_v7  ;;  %v1162_v0 = vld [vmem:[%s19510_s10 + $0xfa0] sm:$0xff]  ;;  %v647_v53 = vmul.f32 0.5, %v20590_v8 }
 0x3cb   :  { %v16553_v7 = vpack.c.bf16 %v1162_v0, %v1120_v27 }
 0x3cc   :  { %20588 = vst [vmem:[#allocation338_spill] sm:$0xff] %v16537_v41  ;;  %v651_v58 = vsub.f32 0.5, %v647_v53  ;;  %v20597_v53 = vld [vmem:[#allocation23_spill] sm:$0xff] }
 0x3cd   :  { %10526 = vmatpush1.bf16.msra.mxu1 %v16513_v28  ;;  %10622 = vmatpush1.bf16.msra.mxu0 %v13920_v62  ;;  %v1205_v62 = vld [vmem:[%s19510_s10 + $0x10f8] sm:$0xff]  ;;  %20589 = vst [vmem:[#allocation339_spill] sm:$0xff] %v16553_v7 }
 0x3ce   :  { %10528 = vmatprep.subr.bf16.mxu1 %v16517_v2  ;;  %10624 = vmatprep.subr.bf16.mxu0 %v13932_v35  ;;  %v16560_v35 = vpack.c.bf16 %v1247_v18, %v1205_v62 }
 0x3d0   :  { %20591 = vst [vmem:[#allocation340_spill] sm:$0xff] %v16560_v35 }
 0x3d1   :  { %10530 = vmatpush1.bf16.msra.mxu1 %v16533_v25  ;;  %10626 = vmatpush1.bf16.msra.mxu0 %v13956_v32  ;;  %v1246_v32 = vld [vmem:[%s19510_s10 + $0x1240] sm:$0xff] }
 0x3d2   :  { %10532 = vmatprep.subr.bf16.mxu1 %v16537_v41  ;;  %10628 = vmatprep.subr.bf16.mxu0 %v13968_v31  ;;  %v16583_v60 = vpack.c.bf16 %v1246_v32, %v1204_v30  ;;  %v655_v32 = vmax.f32 %v651_v58, 0.0  ;;  %v20596_v58 = vld [vmem:[#allocation89_spill] sm:$0xff] }
 0x3d3   :  { %v1755_v0 = vpop.f32.mrb[10].mxu1  ;;  %v1968_v27 = vpop.f32.mrb[10].mxu0 }
 0x3d4   :  { %v2828_v62 = vmul.f32 %v1755_v0, %v16091_v59  ;;  %v16576_v18 = vmul.f32 %v16093_v38, %v1968_v27  ;;  %v1757_v8 = vpop.f32.mrb[11].mxu1  ;;  %v1970_v31 = vpop.f32.mrb[11].mxu0  ;;  %20592 = vst [vmem:[#allocation341_spill] sm:$0xff] %v16583_v60  ;;  %v16589_v38 = vpack.c.bf16 %v1331_v5, %v1289_v46  ;;  %v1330_v59 = vld [vmem:[%s19510_s10 + $0x14e0] sm:$0xff]  ;;  %v16605_v30 = vmin.f32 %v655_v32, 1.0 }
 0x3d5   :  { %v16579_v17 = vmul.f32 %v1757_v8, %v15781_v55  ;;  %10534 = vmatpush1.bf16.msra.mxu1 %v16553_v7  ;;  %10630 = vmatpush1.bf16.msra.mxu0 %v13998_v20  ;;  %v1288_v55 = vld [vmem:[%s19510_s10 + $0x1390] sm:$0xff]  ;;  %v20598_v0 = vld [vmem:[#allocation91_spill] sm:$0xff] }
 0x3d6   :  { %v16585_v21 = vmul.f32 %v2828_v62, %v1970_v31  ;;  %10536 = vmatprep.subr.bf16.mxu1 %v16560_v35  ;;  %10632 = vmatprep.subr.bf16.mxu0 %v14012_v61  ;;  %20593 = vst [vmem:[#allocation342_spill] sm:$0xff] %v16589_v38  ;;  %v16599_v31 = vpack.c.bf16 %v1330_v59, %v1288_v55  ;;  %v20599_v59 = vld [vmem:[#allocation289_spill] sm:$0xff]  ;;  %v20631_v61 = vld [vmem:[#allocation123_spill] sm:$0xff] }
 0x3d8   :  { %20594 = vst [vmem:[#allocation343_spill] sm:$0xff] %v16599_v31 }
 0x3d9   :  { %10538 = vmatpush1.bf16.msra.mxu1 %v16583_v60  ;;  %10634 = vmatpush1.bf16.msra.mxu0 %v14038_v23  ;;  %v20629_v23 = vld [vmem:[#allocation121_spill] sm:$0xff] }
 0x3da   :  { %10540 = vmatprep.subr.bf16.mxu1 %v16589_v38  ;;  %10636 = vmatprep.subr.bf16.mxu0 %v14050_v1  ;;  %v20627_v1 = vld [vmem:[#allocation119_spill] sm:$0xff] }
 0x3dd   :  { %10542 = vmatpush1.bf16.msra.mxu1 %v16599_v31  ;;  %10638 = vmatpush1.bf16.msra.mxu0 %v14074_v37  ;;  %v20626_v37 = vld [vmem:[#allocation21_spill] sm:$0xff] }
 0x3de   :  { %10576 = vmatprep.subr.bf16.mxu1 %v13363_v33  ;;  %10672 = vmatprep.subr.bf16.mxu0 %v14086_v13  ;;  %v20625_v13 = vld [vmem:[#allocation117_spill] sm:$0xff] }
 0x3e0   :  { %2748 = vmatmul.mubr.f32.vlgmr.msra.gmra.mrb[24].mxu1 %v13818_v52  ;;  %3003 = vmatmul.mubr.f32.vlgmr.msra.gmra.mrb[24].mxu0 %v16605_v30  ;;  %v20595_v52 = vld [vmem:[#allocation12_spill] sm:$0xff] }
 0x3e1   :  { %10578 = vmatpush1.bf16.msra.mxu1 %v13371_v36  ;;  %10674 = vmatpush1.bf16.msra.mxu0 %v14110_v22  ;;  %v20623_v22 = vld [vmem:[#allocation115_spill] sm:$0xff] }
 0x3e2   :  { %10580 = vmatprep.subr.bf16.mxu1 %v13381_v39  ;;  %10676 = vmatprep.subr.bf16.mxu0 %v14122_v49  ;;  %v20621_v49 = vld [vmem:[#allocation113_spill] sm:$0xff] }
 0x3e3   :  { %2931 = vmatprep.mubr.f32.mxu1 %v20330_v63  ;;  %3144 = vmatprep.mubr.f32.mxu0 %v20330_v63 }
 0x3e5   :  { %10582 = vmatpush1.bf16.msra.mxu1 %v13389_v42  ;;  %10678 = vmatpush1.bf16.msra.mxu0 %v14148_v11  ;;  %v20620_v11 = vld [vmem:[#allocation18_spill] sm:$0xff] }
 0x3e6   :  { %10584 = vmatprep.subr.bf16.mxu1 %v13398_v45  ;;  %10680 = vmatprep.subr.bf16.mxu0 %v14160_v40  ;;  %v20619_v40 = vld [vmem:[#allocation111_spill] sm:$0xff] }
 0x3e9   :  { %10586 = vmatpush1.bf16.msra.mxu1 %v13407_v48  ;;  %10682 = vmatpush1.bf16.msra.mxu0 %v14186_v34  ;;  %v20604_v34 = vld [vmem:[#allocation29_spill] sm:$0xff] }
 0x3ea   :  { %10588 = vmatprep.subr.bf16.mxu1 %v13416_v51  ;;  %10684 = vmatprep.subr.bf16.mxu0 %v14198_v16  ;;  %v20602_v16 = vld [vmem:[#allocation27_spill] sm:$0xff] }
 0x3ed   :  { %10590 = vmatpush1.bf16.msra.mxu1 %v13425_v54  ;;  %10686 = vmatpush1.bf16.msra.mxu0 %v14222_v44  ;;  %v20601_v44 = vld [vmem:[#allocation93_spill] sm:$0xff] }
 0x3ee   :  { %10592 = vmatprep.subr.bf16.mxu1 %v13434_v57  ;;  %10688 = vmatprep.subr.bf16.mxu0 %v14234_v10  ;;  %v20600_v10 = vld [vmem:[#allocation25_spill] sm:$0xff] }
 0x3f1   :  { %10594 = vmatpush1.bf16.msra.mxu1 %v20595_v52  ;;  %10690 = vmatpush1.bf16.msra.mxu0 %v20596_v58 }
 0x3f2   :  { %10596 = vmatprep.subr.bf16.mxu1 %v20597_v53  ;;  %10692 = vmatprep.subr.bf16.mxu0 %v20598_v0  ;;  %v20603_v0 = vld [vmem:[#allocation95_spill] sm:$0xff] }
 0x3f3   :  { %v1897_v27 = vpop.f32.mrb[12].mxu1  ;;  %v2110_v46 = vpop.f32.mrb[12].mxu0 }
 0x3f4   :  { %v2832_v5 = vmul.f32 %v16393_v56, %v1897_v27  ;;  %v16635_v62 = vmul.f32 %v16395_v29, %v2110_v46  ;;  %v1899_v8 = vpop.f32.mrb[13].mxu1  ;;  %v2112_v55 = vpop.f32.mrb[13].mxu0  ;;  %v20605_v56 = vld [vmem:[#allocation97_spill] sm:$0xff]  ;;  %v20606_v29 = vld [vmem:[#allocation31_spill] sm:$0xff] }
 0x3f5   :  { %v16638_v32 = vmul.f32 %v20599_v59, %v1899_v8  ;;  %10598 = vmatpush1.bf16.msra.mxu1 %v20600_v10  ;;  %10694 = vmatpush1.bf16.msra.mxu0 %v20601_v44  ;;  %v20607_v27 = vld [vmem:[#allocation99_spill] sm:$0xff]  ;;  %v20608_v46 = vld [vmem:[#allocation33_spill] sm:$0xff] }
 0x3f6   :  { %v16642_v58 = vmul.f32 %v2832_v5, %v2112_v55  ;;  %10600 = vmatprep.subr.bf16.mxu1 %v20602_v16  ;;  %10696 = vmatprep.subr.bf16.mxu0 %v20603_v0  ;;  %v20609_v8 = vld [vmem:[#allocation101_spill] sm:$0xff]  ;;  %v20611_v5 = vld [vmem:[#allocation103_spill] sm:$0xff]  ;;  %v20612_v55 = vld [vmem:[#allocation14_spill] sm:$0xff] }
 0x3f7   :  { %v20610_v59 = vld [vmem:[#allocation13_spill] sm:$0xff]  ;;  %v20615_v44 = vld [vmem:[#allocation107_spill] sm:$0xff] }
 0x3f8   :  { %v20613_v0 = vld [vmem:[#allocation105_spill] sm:$0xff] }
 0x3f9   :  { %10602 = vmatpush1.bf16.msra.mxu1 %v20604_v34  ;;  %10698 = vmatpush1.bf16.msra.mxu0 %v20605_v56  ;;  %v20614_v56 = vld [vmem:[#allocation15_spill] sm:$0xff] }
 0x3fa   :  { %10604 = vmatprep.subr.bf16.mxu1 %v20606_v29  ;;  %10700 = vmatprep.subr.bf16.mxu0 %v20607_v27  ;;  %v20617_v27 = vld [vmem:[#allocation109_spill] sm:$0xff] }
 0x3fd   :  { %10606 = vmatpush1.bf16.msra.mxu1 %v20608_v46  ;;  %10702 = vmatpush1.bf16.msra.mxu0 %v20609_v8  ;;  %v20616_v8 = vld [vmem:[#allocation16_spill] sm:$0xff] }
 0x3fe   :  { %10640 = vmatprep.subr.bf16.mxu1 %v20610_v59  ;;  %10736 = vmatprep.subr.bf16.mxu0 %v20611_v5  ;;  %v20618_v5 = vld [vmem:[#allocation17_spill] sm:$0xff] }
 0x400   :  { %2932 = vmatmul.mubr.f32.vlgmr.msra.gmra.mrb[26].mxu1 %v16605_v30  ;;  %3145 = vmatmul.mubr.f32.vlgmr.msra.gmra.mrb[26].mxu0 %v16605_v30 }
 0x401   :  { %10642 = vmatpush1.bf16.msra.mxu1 %v20612_v55  ;;  %10738 = vmatpush1.bf16.msra.mxu0 %v20613_v0  ;;  %v20622_v0 = vld [vmem:[#allocation19_spill] sm:$0xff] }
 0x402   :  { %10644 = vmatprep.subr.bf16.mxu1 %v20614_v56  ;;  %10740 = vmatprep.subr.bf16.mxu0 %v20615_v44  ;;  %v20624_v44 = vld [vmem:[#allocation20_spill] sm:$0xff] }
 0x403   :  { %3073 = vmatprep.mubr.f32.mxu1 %v20330_v63  ;;  %3286 = vmatprep.mubr.f32.mxu0 %v20330_v63 }
 0x405   :  { %10646 = vmatpush1.bf16.msra.mxu1 %v20616_v8  ;;  %10742 = vmatpush1.bf16.msra.mxu0 %v20617_v27  ;;  %v20628_v27 = vld [vmem:[#allocation22_spill] sm:$0xff] }
 0x406   :  { %10648 = vmatprep.subr.bf16.mxu1 %v20618_v5  ;;  %10744 = vmatprep.subr.bf16.mxu0 %v20619_v40  ;;  %v20630_v40 = vld [vmem:[#allocation24_spill] sm:$0xff] }
 0x409   :  { %10650 = vmatpush1.bf16.msra.mxu1 %v20620_v11  ;;  %10746 = vmatpush1.bf16.msra.mxu0 %v20621_v49  ;;  %v20636_v11 = vld [vmem:[#allocation30_spill] sm:$0xff] }
 0x40a   :  { %10652 = vmatprep.subr.bf16.mxu1 %v20622_v0  ;;  %10748 = vmatprep.subr.bf16.mxu0 %v20623_v22 }
 0x40d   :  { %10654 = vmatpush1.bf16.msra.mxu1 %v20624_v44  ;;  %10750 = vmatpush1.bf16.msra.mxu0 %v20625_v13 }
 0x40e   :  { %10656 = vmatprep.subr.bf16.mxu1 %v20626_v37  ;;  %10752 = vmatprep.subr.bf16.mxu0 %v20627_v1  ;;  %v20632_v1 = vld [vmem:[#allocation26_spill] sm:$0xff] }
 0x411   :  { %10658 = vmatpush1.bf16.msra.mxu1 %v20628_v27  ;;  %10754 = vmatpush1.bf16.msra.mxu0 %v20629_v23  ;;  %v20633_v27 = vld [vmem:[#allocation125_spill] sm:$0xff] }
 0x412   :  { %10660 = vmatprep.subr.bf16.mxu1 %v20630_v40  ;;  %10756 = vmatprep.subr.bf16.mxu0 %v20631_v61  ;;  %v20634_v40 = vld [vmem:[#allocation28_spill] sm:$0xff]  ;;  %v20635_v61 = vld [vmem:[#allocation127_spill] sm:$0xff] }
 0x413   :  { %v2039_v49 = vpop.f32.mrb[14].mxu1  ;;  %v2252_v20 = vpop.f32.mrb[14].mxu0 }
 0x414   :  { %v2836_v22 = vmul.f32 %v16579_v17, %v2039_v49  ;;  %v16680_v44 = vmul.f32 %v16585_v21, %v2252_v20  ;;  %v2041_v13 = vpop.f32.mrb[15].mxu1  ;;  %v2254_v0 = vpop.f32.mrb[15].mxu0  ;;  %v20637_v49 = vld [vmem:[#allocation129_spill] sm:$0xff]  ;;  %v20638_v20 = vld [vmem:[#allocation32_spill] sm:$0xff]  ;;  %v20639_v21 = vld [vmem:[#allocation131_spill] sm:$0xff] }
 0x415   :  { %v16683_v37 = vmul.f32 %v16388_v19, %v2041_v13  ;;  %10662 = vmatpush1.bf16.msra.mxu1 %v20632_v1  ;;  %10758 = vmatpush1.bf16.msra.mxu0 %v20633_v27  ;;  %v20640_v13 = vld [vmem:[#allocation34_spill] sm:$0xff]  ;;  %v20641_v19 = vld [vmem:[#allocation133_spill] sm:$0xff]  ;;  %v20642_v17 = vld [vmem:[#allocation36_spill] sm:$0xff] }
 0x416   :  { %v16687_v23 = vmul.f32 %v2836_v22, %v2254_v0  ;;  %10664 = vmatprep.subr.bf16.mxu1 %v20634_v40  ;;  %10760 = vmatprep.subr.bf16.mxu0 %v20635_v61  ;;  %v20643_v22 = vld [vmem:[#allocation135_spill] sm:$0xff]  ;;  %v20644_v0 = vld [vmem:[#allocation40_spill] sm:$0xff]  ;;  %v20645_v61 = vld [vmem:[#allocation137_spill] sm:$0xff] }
 0x417   :  { %v20647_v27 = vld [vmem:[#allocation139_spill] sm:$0xff]  ;;  %v20668_v1 = vld [vmem:[#allocation66_spill] sm:$0xff] }
 0x419   :  { %10666 = vmatpush1.bf16.msra.mxu1 %v20636_v11  ;;  %10762 = vmatpush1.bf16.msra.mxu0 %v20637_v49  ;;  %v20646_v49 = vld [vmem:[#allocation42_spill] sm:$0xff] }
 0x41a   :  { %10668 = vmatprep.subr.bf16.mxu1 %v20638_v20  ;;  %10764 = vmatprep.subr.bf16.mxu0 %v20639_v21  ;;  %v20649_v21 = vld [vmem:[#allocation141_spill] sm:$0xff]  ;;  %v20658_v11 = vld [vmem:[#allocation54_spill] sm:$0xff] }
 0x41b   :  { %v20657_v20 = vld [vmem:[#allocation149_spill] sm:$0xff] }
 0x41d   :  { %10670 = vmatpush1.bf16.msra.mxu1 %v20640_v13  ;;  %10766 = vmatpush1.bf16.msra.mxu0 %v20641_v19  ;;  %v20648_v19 = vld [vmem:[#allocation44_spill] sm:$0xff] }
 0x41e   :  { %10704 = vmatprep.subr.bf16.mxu1 %v20642_v17  ;;  %10800 = vmatprep.subr.bf16.mxu0 %v20643_v22  ;;  %v20650_v22 = vld [vmem:[#allocation46_spill] sm:$0xff]  ;;  %v20651_v17 = vld [vmem:[#allocation143_spill] sm:$0xff]  ;;  %v20652_v13 = vld [vmem:[#allocation48_spill] sm:$0xff] }
 0x420   :  { %3074 = vmatmul.mubr.f32.vlgmr.msra.gmra.mrb[28].mxu1 %v16605_v30  ;;  %3287 = vmatmul.mubr.f32.vlgmr.msra.gmra.mrb[28].mxu0 %v16605_v30 }
 0x421   :  { %10706 = vmatpush1.bf16.msra.mxu1 %v20644_v0  ;;  %10802 = vmatpush1.bf16.msra.mxu0 %v20645_v61  ;;  %v20653_v0 = vld [vmem:[#allocation145_spill] sm:$0xff]  ;;  %v20654_v61 = vld [vmem:[#allocation50_spill] sm:$0xff] }
 0x422   :  { %10708 = vmatprep.subr.bf16.mxu1 %v20646_v49  ;;  %10804 = vmatprep.subr.bf16.mxu0 %v20647_v27  ;;  %v20655_v49 = vld [vmem:[#allocation147_spill] sm:$0xff]  ;;  %v20656_v27 = vld [vmem:[#allocation52_spill] sm:$0xff] }
 0x423   :  { %3215 = vmatprep.mubr.f32.mxu1 %v20330_v63  ;;  %3428 = vmatprep.mubr.f32.mxu0 %v20330_v63 }
 0x425   :  { %10710 = vmatpush1.bf16.msra.mxu1 %v20648_v19  ;;  %10806 = vmatpush1.bf16.msra.mxu0 %v20649_v21  ;;  %v20659_v19 = vld [vmem:[#allocation151_spill] sm:$0xff]  ;;  %v20660_v21 = vld [vmem:[#allocation56_spill] sm:$0xff] }
 0x426   :  { %10712 = vmatprep.subr.bf16.mxu1 %v20650_v22  ;;  %10808 = vmatprep.subr.bf16.mxu0 %v20651_v17  ;;  %v20661_v22 = vld [vmem:[#allocation153_spill] sm:$0xff]  ;;  %v20662_v17 = vld [vmem:[#allocation58_spill] sm:$0xff] }
 0x429   :  { %10714 = vmatpush1.bf16.msra.mxu1 %v20652_v13  ;;  %10810 = vmatpush1.bf16.msra.mxu0 %v20653_v0  ;;  %v20663_v13 = vld [vmem:[#allocation155_spill] sm:$0xff] }
 0x42a   :  { %10716 = vmatprep.subr.bf16.mxu1 %v20654_v61  ;;  %10812 = vmatprep.subr.bf16.mxu0 %v20655_v49 }
 0x42d   :  { %10718 = vmatpush1.bf16.msra.mxu1 %v20656_v27  ;;  %10814 = vmatpush1.bf16.msra.mxu0 %v20657_v20 }
 0x42e   :  { %10720 = vmatprep.subr.bf16.mxu1 %v20658_v11  ;;  %10816 = vmatprep.subr.bf16.mxu0 %v20659_v19  ;;  %v20664_v19 = vld [vmem:[#allocation62_spill] sm:$0xff] }
 0x431   :  { %10722 = vmatpush1.bf16.msra.mxu1 %v20660_v21  ;;  %10818 = vmatpush1.bf16.msra.mxu0 %v20661_v22  ;;  %v20665_v21 = vld [vmem:[#allocation157_spill] sm:$0xff] }
 0x432   :  { %10724 = vmatprep.subr.bf16.mxu1 %v20662_v17  ;;  %10820 = vmatprep.subr.bf16.mxu0 %v20663_v13  ;;  %v20666_v17 = vld [vmem:[#allocation64_spill] sm:$0xff]  ;;  %v20667_v13 = vld [vmem:[#allocation159_spill] sm:$0xff] }
 0x433   :  { %v2181_v0 = vpop.f32.mrb[16].mxu1  ;;  %v2394_v61 = vpop.f32.mrb[16].mxu0 }
 0x434   :  { %v2840_v49 = vmul.f32 %v16638_v32, %v2181_v0  ;;  %v16725_v27 = vmul.f32 %v16642_v58, %v2394_v61  ;;  %v2183_v20 = vpop.f32.mrb[17].mxu1  ;;  %v2396_v40 = vpop.f32.mrb[17].mxu0  ;;  %v20669_v32 = vld [vmem:[#allocation161_spill] sm:$0xff]  ;;  %v20670_v61 = vld [vmem:[#allocation68_spill] sm:$0xff]  ;;  %v20671_v58 = vld [vmem:[#allocation163_spill] sm:$0xff] }
 0x435   :  { %v16728_v11 = vmul.f32 %v16576_v18, %v2183_v20  ;;  %10726 = vmatpush1.bf16.msra.mxu1 %v20664_v19  ;;  %10822 = vmatpush1.bf16.msra.mxu0 %v20665_v21  ;;  %v20672_v18 = vld [vmem:[#allocation70_spill] sm:$0xff]  ;;  %v20673_v20 = vld [vmem:[#allocation165_spill] sm:$0xff]  ;;  %v20674_v0 = vld [vmem:[#allocation72_spill] sm:$0xff] }
 0x436   :  { %v16732_v22 = vmul.f32 %v2840_v49, %v2396_v40  ;;  %10728 = vmatprep.subr.bf16.mxu1 %v20666_v17  ;;  %10824 = vmatprep.subr.bf16.mxu0 %v20667_v13  ;;  %v20675_v40 = vld [vmem:[#allocation167_spill] sm:$0xff]  ;;  %v20676_v49 = vld [vmem:[#allocation74_spill] sm:$0xff]  ;;  %v20677_v13 = vld [vmem:[#allocation169_spill] sm:$0xff] }
 0x437   :  { %v20679_v21 = vld [vmem:[#allocation171_spill] sm:$0xff]  ;;  %v20700_v19 = vld [vmem:[#allocation98_spill] sm:$0xff] }
 0x439   :  { %10730 = vmatpush1.bf16.msra.mxu1 %v20668_v1  ;;  %10826 = vmatpush1.bf16.msra.mxu0 %v20669_v32  ;;  %v20678_v32 = vld [vmem:[#allocation76_spill] sm:$0xff] }
 0x43a   :  { %10732 = vmatprep.subr.bf16.mxu1 %v20670_v61  ;;  %10828 = vmatprep.subr.bf16.mxu0 %v20671_v58  ;;  %v20681_v58 = vld [vmem:[#allocation173_spill] sm:$0xff]  ;;  %v20690_v1 = vld [vmem:[#allocation88_spill] sm:$0xff] }
 0x43b   :  { %v20689_v61 = vld [vmem:[#allocation181_spill] sm:$0xff] }
 0x43d   :  { %10734 = vmatpush1.bf16.msra.mxu1 %v20672_v18  ;;  %10830 = vmatpush1.bf16.msra.mxu0 %v20673_v20  ;;  %v20680_v20 = vld [vmem:[#allocation78_spill] sm:$0xff] }
 0x43e   :  { %10768 = vmatprep.subr.bf16.mxu1 %v20674_v0  ;;  %10864 = vmatprep.subr.bf16.mxu0 %v20675_v40  ;;  %v20682_v40 = vld [vmem:[#allocation80_spill] sm:$0xff]  ;;  %v20683_v0 = vld [vmem:[#allocation175_spill] sm:$0xff]  ;;  %v20684_v18 = vld [vmem:[#allocation82_spill] sm:$0xff] }
 0x440   :  { %3216 = vmatmul.mubr.f32.vlgmr.msra.gmra.mrb[30].mxu1 %v16605_v30  ;;  %3429 = vmatmul.mubr.f32.vlgmr.msra.gmra.mrb[30].mxu0 %v16605_v30 }
 0x441   :  { %10770 = vmatpush1.bf16.msra.mxu1 %v20676_v49  ;;  %10866 = vmatpush1.bf16.msra.mxu0 %v20677_v13  ;;  %v20685_v49 = vld [vmem:[#allocation177_spill] sm:$0xff]  ;;  %v20686_v13 = vld [vmem:[#allocation84_spill] sm:$0xff] }
 0x442   :  { %10772 = vmatprep.subr.bf16.mxu1 %v20678_v32  ;;  %10868 = vmatprep.subr.bf16.mxu0 %v20679_v21  ;;  %v20687_v32 = vld [vmem:[#allocation179_spill] sm:$0xff]  ;;  %v20688_v21 = vld [vmem:[#allocation86_spill] sm:$0xff] }
 0x443   :  { %3357 = vmatprep.mubr.f32.mxu1 %v20330_v63  ;;  %3570 = vmatprep.mubr.f32.mxu0 %v20330_v63 }
 0x445   :  { %10774 = vmatpush1.bf16.msra.mxu1 %v20680_v20  ;;  %10870 = vmatpush1.bf16.msra.mxu0 %v20681_v58  ;;  %v20691_v20 = vld [vmem:[#allocation183_spill] sm:$0xff]  ;;  %v20692_v58 = vld [vmem:[#allocation90_spill] sm:$0xff] }
 0x446   :  { %10776 = vmatprep.subr.bf16.mxu1 %v20682_v40  ;;  %10872 = vmatprep.subr.bf16.mxu0 %v20683_v0  ;;  %v20693_v40 = vld [vmem:[#allocation185_spill] sm:$0xff]  ;;  %v20694_v0 = vld [vmem:[#allocation92_spill] sm:$0xff] }
 0x449   :  { %10778 = vmatpush1.bf16.msra.mxu1 %v20684_v18  ;;  %10874 = vmatpush1.bf16.msra.mxu0 %v20685_v49  ;;  %v20695_v18 = vld [vmem:[#allocation187_spill] sm:$0xff] }
 0x44a   :  { %10780 = vmatprep.subr.bf16.mxu1 %v20686_v13  ;;  %10876 = vmatprep.subr.bf16.mxu0 %v20687_v32 }
 0x44d   :  { %10782 = vmatpush1.bf16.msra.mxu1 %v20688_v21  ;;  %10878 = vmatpush1.bf16.msra.mxu0 %v20689_v61 }
 0x44e   :  { %10784 = vmatprep.subr.bf16.mxu1 %v20690_v1  ;;  %10880 = vmatprep.subr.bf16.mxu0 %v20691_v20  ;;  %v20696_v20 = vld [vmem:[#allocation94_spill] sm:$0xff] }
 0x451   :  { %10786 = vmatpush1.bf16.msra.mxu1 %v20692_v58  ;;  %10882 = vmatpush1.bf16.msra.mxu0 %v20693_v40  ;;  %v20697_v58 = vld [vmem:[#allocation189_spill] sm:$0xff] }
 0x452   :  { %10788 = vmatprep.subr.bf16.mxu1 %v20694_v0  ;;  %10884 = vmatprep.subr.bf16.mxu0 %v20695_v18  ;;  %v20698_v0 = vld [vmem:[#allocation96_spill] sm:$0xff]  ;;  %v20699_v18 = vld [vmem:[#allocation191_spill] sm:$0xff] }
 0x453   :  { %v2323_v49 = vpop.f32.mrb[18].mxu1  ;;  %v2536_v13 = vpop.f32.mrb[18].mxu0 }
 0x454   :  { %v2844_v32 = vmul.f32 %v16683_v37, %v2323_v49  ;;  %v16770_v21 = vmul.f32 %v16687_v23, %v2536_v13  ;;  %v2325_v61 = vpop.f32.mrb[19].mxu1  ;;  %v2538_v17 = vpop.f32.mrb[19].mxu0  ;;  %v20701_v37 = vld [vmem:[#allocation193_spill] sm:$0xff]  ;;  %v20702_v23 = vld [vmem:[#allocation100_spill] sm:$0xff]  ;;  %v20703_v13 = vld [vmem:[#allocation195_spill] sm:$0xff] }
 0x455   :  { %v16773_v1 = vmul.f32 %v16635_v62, %v2325_v61  ;;  %10790 = vmatpush1.bf16.msra.mxu1 %v20696_v20  ;;  %10886 = vmatpush1.bf16.msra.mxu0 %v20697_v58  ;;  %v20704_v62 = vld [vmem:[#allocation102_spill] sm:$0xff]  ;;  %v20705_v61 = vld [vmem:[#allocation197_spill] sm:$0xff]  ;;  %v20706_v49 = vld [vmem:[#allocation104_spill] sm:$0xff] }
 0x456   :  { %v16777_v40 = vmul.f32 %v2844_v32, %v2538_v17  ;;  %10792 = vmatprep.subr.bf16.mxu1 %v20698_v0  ;;  %10888 = vmatprep.subr.bf16.mxu0 %v20699_v18  ;;  %v20707_v17 = vld [vmem:[#allocation199_spill] sm:$0xff]  ;;  %v20708_v32 = vld [vmem:[#allocation106_spill] sm:$0xff]  ;;  %v20709_v18 = vld [vmem:[#allocation201_spill] sm:$0xff] }
 0x457   :  { %v20711_v58 = vld [vmem:[#allocation203_spill] sm:$0xff]  ;;  %v20734_v20 = vld [vmem:[#allocation130_spill] sm:$0xff] }
 0x459   :  { %10794 = vmatpush1.bf16.msra.mxu1 %v20700_v19  ;;  %10890 = vmatpush1.bf16.msra.mxu0 %v20701_v37  ;;  %v20710_v37 = vld [vmem:[#allocation108_spill] sm:$0xff] }
 0x45a   :  { %10796 = vmatprep.subr.bf16.mxu1 %v20702_v23  ;;  %10892 = vmatprep.subr.bf16.mxu0 %v20703_v13  ;;  %v20713_v13 = vld [vmem:[#allocation205_spill] sm:$0xff]  ;;  %v20722_v19 = vld [vmem:[#allocation120_spill] sm:$0xff] }
 0x45b   :  { %v20721_v23 = vld [vmem:[#allocation213_spill] sm:$0xff] }
 0x45d   :  { %10798 = vmatpush1.bf16.msra.mxu1 %v20704_v62  ;;  %10894 = vmatpush1.bf16.msra.mxu0 %v20705_v61  ;;  %v20712_v61 = vld [vmem:[#allocation110_spill] sm:$0xff] }
 0x45e   :  { %10832 = vmatprep.subr.bf16.mxu1 %v20706_v49  ;;  %10928 = vmatprep.subr.bf16.mxu0 %v20707_v17  ;;  %v20714_v17 = vld [vmem:[#allocation112_spill] sm:$0xff]  ;;  %v20715_v49 = vld [vmem:[#allocation207_spill] sm:$0xff]  ;;  %v20716_v62 = vld [vmem:[#allocation114_spill] sm:$0xff] }
 0x460   :  { %3358 = vmatmul.mubr.f32.vlgmr.msra.gmra.mrb[32].mxu1 %v16605_v30  ;;  %3571 = vmatmul.mubr.f32.vlgmr.msra.gmra.mrb[32].mxu0 %v16605_v30 }
 0x461   :  { %10834 = vmatpush1.bf16.msra.mxu1 %v20708_v32  ;;  %10930 = vmatpush1.bf16.msra.mxu0 %v20709_v18  ;;  %v20717_v32 = vld [vmem:[#allocation209_spill] sm:$0xff]  ;;  %v20718_v18 = vld [vmem:[#allocation116_spill] sm:$0xff] }
 0x462   :  { %10836 = vmatprep.subr.bf16.mxu1 %v20710_v37  ;;  %10932 = vmatprep.subr.bf16.mxu0 %v20711_v58  ;;  %v20719_v37 = vld [vmem:[#allocation211_spill] sm:$0xff]  ;;  %v20720_v58 = vld [vmem:[#allocation118_spill] sm:$0xff] }
 0x463   :  { %3499 = vmatprep.mubr.f32.mxu1 %v20330_v63  ;;  %3712 = vmatprep.mubr.f32.mxu0 %v20330_v63 }
 0x465   :  { %10838 = vmatpush1.bf16.msra.mxu1 %v20712_v61  ;;  %10934 = vmatpush1.bf16.msra.mxu0 %v20713_v13  ;;  %v20723_v61 = vld [vmem:[#allocation215_spill] sm:$0xff]  ;;  %v20724_v13 = vld [vmem:[#allocation122_spill] sm:$0xff] }
 0x466   :  { %10840 = vmatprep.subr.bf16.mxu1 %v20714_v17  ;;  %10936 = vmatprep.subr.bf16.mxu0 %v20715_v49  ;;  %v20725_v17 = vld [vmem:[#allocation217_spill] sm:$0xff]  ;;  %v20726_v49 = vld [vmem:[#allocation124_spill] sm:$0xff] }
 0x469   :  { %10842 = vmatpush1.bf16.msra.mxu1 %v20716_v62  ;;  %10938 = vmatpush1.bf16.msra.mxu0 %v20717_v32  ;;  %v20727_v62 = vld [vmem:[#allocation219_spill] sm:$0xff] }
 0x46a   :  { %10844 = vmatprep.subr.bf16.mxu1 %v20718_v18  ;;  %10940 = vmatprep.subr.bf16.mxu0 %v20719_v37 }
 0x46d   :  { %10846 = vmatpush1.bf16.msra.mxu1 %v20720_v58  ;;  %10942 = vmatpush1.bf16.msra.mxu0 %v20721_v23 }
 0x46e   :  { %10848 = vmatprep.subr.bf16.mxu1 %v20722_v19  ;;  %10944 = vmatprep.subr.bf16.mxu0 %v20723_v61  ;;  %v20729_v61 = vld [vmem:[#allocation126_spill] sm:$0xff] }
 0x471   :  { %10850 = vmatpush1.bf16.msra.mxu1 %v20724_v13  ;;  %10946 = vmatpush1.bf16.msra.mxu0 %v20725_v17  ;;  %v20730_v13 = vld [vmem:[#allocation221_spill] sm:$0xff] }
 0x472   :  { %10852 = vmatprep.subr.bf16.mxu1 %v20726_v49  ;;  %10948 = vmatprep.subr.bf16.mxu0 %v20727_v62  ;;  %v20732_v49 = vld [vmem:[#allocation128_spill] sm:$0xff]  ;;  %v20733_v62 = vld [vmem:[#allocation223_spill] sm:$0xff] }
 0x473   :  { %v2465_v32 = vpop.f32.mrb[20].mxu1  ;;  %v2678_v18 = vpop.f32.mrb[20].mxu0 }
 0x474   :  { %v2848_v37 = vmul.f32 %v16728_v11, %v2465_v32  ;;  %v16815_v58 = vmul.f32 %v16732_v22, %v2678_v18  ;;  %v2467_v23 = vpop.f32.mrb[21].mxu1  ;;  %v2680_v0 = vpop.f32.mrb[21].mxu0  ;;  %v20735_v11 = vld [vmem:[#allocation225_spill] sm:$0xff]  ;;  %v20736_v22 = vld [vmem:[#allocation132_spill] sm:$0xff]  ;;  %v20737_v18 = vld [vmem:[#allocation227_spill] sm:$0xff] }
 0x475   :  { %v16818_v19 = vmul.f32 %v16680_v44, %v2467_v23  ;;  %10854 = vmatpush1.bf16.msra.mxu1 %v20729_v61  ;;  %10950 = vmatpush1.bf16.msra.mxu0 %v20730_v13  ;;  %v20738_v44 = vld [vmem:[#allocation134_spill] sm:$0xff]  ;;  %v20739_v23 = vld [vmem:[#allocation229_spill] sm:$0xff]  ;;  %v20740_v32 = vld [vmem:[#allocation136_spill] sm:$0xff] }
 0x476   :  { %20728 = vst [vmem:[#allocation289_spill] sm:$0xff] %v16815_v58  ;;  %v16822_v17 = vmul.f32 %v2848_v37, %v2680_v0  ;;  %10856 = vmatprep.subr.bf16.mxu1 %v20732_v49  ;;  %10952 = vmatprep.subr.bf16.mxu0 %v20733_v62  ;;  %v20741_v0 = vld [vmem:[#allocation231_spill] sm:$0xff]  ;;  %v20742_v37 = vld [vmem:[#allocation138_spill] sm:$0xff]  ;;  %v20744_v58 = vld [vmem:[#allocation140_spill] sm:$0xff] }
 0x477   :  { %v20749_v62 = vld [vmem:[#allocation239_spill] sm:$0xff]  ;;  %v20750_v13 = vld [vmem:[#allocation146_spill] sm:$0xff] }
 0x478   :  { %20731 = vst [vmem:[#allocation344_spill] sm:$0xff] %v16822_v17  ;;  %v20743_v17 = vld [vmem:[#allocation233_spill] sm:$0xff] }
 0x479   :  { %10858 = vmatpush1.bf16.msra.mxu1 %v20734_v20  ;;  %10954 = vmatpush1.bf16.msra.mxu0 %v20735_v11  ;;  %v20745_v11 = vld [vmem:[#allocation235_spill] sm:$0xff]  ;;  %v20769_v20 = vld [vmem:[#allocation162_spill] sm:$0xff] }
 0x47a   :  { %10860 = vmatprep.subr.bf16.mxu1 %v20736_v22  ;;  %10956 = vmatprep.subr.bf16.mxu0 %v20737_v18  ;;  %v20747_v18 = vld [vmem:[#allocation237_spill] sm:$0xff] }
 0x47d   :  { %10862 = vmatpush1.bf16.msra.mxu1 %v20738_v44  ;;  %10958 = vmatpush1.bf16.msra.mxu0 %v20739_v23  ;;  %v20746_v23 = vld [vmem:[#allocation142_spill] sm:$0xff]  ;;  %v20756_v44 = vld [vmem:[#allocation152_spill] sm:$0xff] }
 0x47e   :  { %10896 = vmatprep.subr.bf16.mxu1 %v20740_v32  ;;  %10992 = vmatprep.subr.bf16.mxu0 %v20741_v0  ;;  %v20748_v0 = vld [vmem:[#allocation144_spill] sm:$0xff]  ;;  %v20755_v32 = vld [vmem:[#allocation245_spill] sm:$0xff] }
 0x480   :  { %3500 = vmatmul.mubr.f32.vlgmr.msra.gmra.mrb[34].mxu1 %v16605_v30  ;;  %3713 = vmatmul.mubr.f32.vlgmr.msra.gmra.mrb[34].mxu0 %v16605_v30 }
 0x481   :  { %10898 = vmatpush1.bf16.msra.mxu1 %v20742_v37  ;;  %10994 = vmatpush1.bf16.msra.mxu0 %v20743_v17  ;;  %v20751_v37 = vld [vmem:[#allocation241_spill] sm:$0xff]  ;;  %v20752_v17 = vld [vmem:[#allocation148_spill] sm:$0xff] }
 0x482   :  { %10900 = vmatprep.subr.bf16.mxu1 %v20744_v58  ;;  %10996 = vmatprep.subr.bf16.mxu0 %v20745_v11  ;;  %v20753_v58 = vld [vmem:[#allocation243_spill] sm:$0xff]  ;;  %v20754_v11 = vld [vmem:[#allocation150_spill] sm:$0xff] }
 0x483   :  { %3641 = vmatprep.mubr.f32.mxu1 %v20330_v63  ;;  %3854 = vmatprep.mubr.f32.mxu0 %v20330_v63 }
 0x485   :  { %10902 = vmatpush1.bf16.msra.mxu1 %v20746_v23  ;;  %10998 = vmatpush1.bf16.msra.mxu0 %v20747_v18  ;;  %v20757_v23 = vld [vmem:[#allocation247_spill] sm:$0xff]  ;;  %v20758_v18 = vld [vmem:[#allocation154_spill] sm:$0xff] }
 0x486   :  { %10904 = vmatprep.subr.bf16.mxu1 %v20748_v0  ;;  %11000 = vmatprep.subr.bf16.mxu0 %v20749_v62  ;;  %v20759_v0 = vld [vmem:[#allocation249_spill] sm:$0xff]  ;;  %v20760_v62 = vld [vmem:[#allocation156_spill] sm:$0xff] }
 0x489   :  { %10906 = vmatpush1.bf16.msra.mxu1 %v20750_v13  ;;  %11002 = vmatpush1.bf16.msra.mxu0 %v20751_v37  ;;  %v20761_v13 = vld [vmem:[#allocation251_spill] sm:$0xff] }
 0x48a   :  { %10908 = vmatprep.subr.bf16.mxu1 %v20752_v17  ;;  %11004 = vmatprep.subr.bf16.mxu0 %v20753_v58 }
 0x48d   :  { %10910 = vmatpush1.bf16.msra.mxu1 %v20754_v11  ;;  %11006 = vmatpush1.bf16.msra.mxu0 %v20755_v32 }
 0x48e   :  { %10912 = vmatprep.subr.bf16.mxu1 %v20756_v44  ;;  %11008 = vmatprep.subr.bf16.mxu0 %v20757_v23  ;;  %v20764_v23 = vld [vmem:[#allocation158_spill] sm:$0xff] }
 0x491   :  { %10914 = vmatpush1.bf16.msra.mxu1 %v20758_v18  ;;  %11010 = vmatpush1.bf16.msra.mxu0 %v20759_v0  ;;  %v20765_v18 = vld [vmem:[#allocation253_spill] sm:$0xff] }
 0x492   :  { %10916 = vmatprep.subr.bf16.mxu1 %v20760_v62  ;;  %11012 = vmatprep.subr.bf16.mxu0 %v20761_v13  ;;  %v20767_v62 = vld [vmem:[#allocation160_spill] sm:$0xff]  ;;  %v20768_v13 = vld [vmem:[#allocation255_spill] sm:$0xff] }
 0x493   :  { %v2607_v37 = vpop.f32.mrb[22].mxu1  ;;  %v2820_v17 = vpop.f32.mrb[22].mxu0 }
 0x494   :  { %v2852_v58 = vmul.f32 %v16773_v1, %v2607_v37  ;;  %v16860_v11 = vmul.f32 %v16777_v40, %v2820_v17  ;;  %v2609_v32 = vpop.f32.mrb[23].mxu1  ;;  %v2822_v22 = vpop.f32.mrb[23].mxu0  ;;  %v20770_v1 = vld [vmem:[#allocation257_spill] sm:$0xff]  ;;  %v20771_v40 = vld [vmem:[#allocation164_spill] sm:$0xff]  ;;  %v20772_v17 = vld [vmem:[#allocation259_spill] sm:$0xff] }
 0x495   :  { %v16863_v44 = vmul.f32 %v16725_v27, %v2609_v32  ;;  %10918 = vmatpush1.bf16.msra.mxu1 %v20764_v23  ;;  %11014 = vmatpush1.bf16.msra.mxu0 %v20765_v18  ;;  %v20773_v27 = vld [vmem:[#allocation166_spill] sm:$0xff]  ;;  %v20774_v32 = vld [vmem:[#allocation261_spill] sm:$0xff]  ;;  %v20775_v37 = vld [vmem:[#allocation168_spill] sm:$0xff] }
 0x496   :  { %20762 = vst [vmem:[#allocation345_spill] sm:$0xff] %v16860_v11  ;;  %v16867_v0 = vmul.f32 %v2852_v58, %v2822_v22  ;;  %10920 = vmatprep.subr.bf16.mxu1 %v20767_v62  ;;  %11016 = vmatprep.subr.bf16.mxu0 %v20768_v13  ;;  %v20776_v58 = vld [vmem:[#allocation263_spill] sm:$0xff]  ;;  %v20777_v22 = vld [vmem:[#allocation170_spill] sm:$0xff]  ;;  %v20779_v11 = vld [vmem:[#allocation172_spill] sm:$0xff] }
 0x497   :  { %20763 = vst [vmem:[#allocation346_spill] sm:$0xff] %v16863_v44  ;;  %v20780_v44 = vld [vmem:[#allocation267_spill] sm:$0xff]  ;;  %v20785_v13 = vld [vmem:[#allocation178_spill] sm:$0xff]  ;;  %v20786_v18 = vld [vmem:[#allocation273_spill] sm:$0xff] }
 0x498   :  { %20766 = vst [vmem:[#allocation347_spill] sm:$0xff] %v16867_v0  ;;  %v20778_v0 = vld [vmem:[#allocation265_spill] sm:$0xff] }
 0x499   :  { %10922 = vmatpush1.bf16.msra.mxu1 %v20769_v20  ;;  %11018 = vmatpush1.bf16.msra.mxu0 %v20770_v1  ;;  %v20784_v1 = vld [vmem:[#allocation271_spill] sm:$0xff] }
 0x49a   :  { %10924 = vmatprep.subr.bf16.mxu1 %v20771_v40  ;;  %11020 = vmatprep.subr.bf16.mxu0 %v20772_v17  ;;  %v20782_v17 = vld [vmem:[#allocation269_spill] sm:$0xff] }
 0x49d   :  { %10926 = vmatpush1.bf16.msra.mxu1 %v20773_v27  ;;  %11022 = vmatpush1.bf16.msra.mxu0 %v20774_v32  ;;  %v20781_v32 = vld [vmem:[#allocation174_spill] sm:$0xff] }
 0x49e   :  { %10960 = vmatprep.subr.bf16.mxu1 %v20775_v37  ;;  %11056 = vmatprep.subr.bf16.mxu0 %v20776_v58  ;;  %v20783_v58 = vld [vmem:[#allocation176_spill] sm:$0xff]  ;;  %v20804_v27 = vld [vmem:[#allocation290_spill] sm:$0xff] }
 0x49f   :  { %v20791_v37 = vld [vmem:[#allocation184_spill] sm:$0xff] }
 0x4a0   :  { %3642 = vmatmul.mubr.f32.vlgmr.msra.gmra.mrb[36].mxu1 %v16605_v30  ;;  %3855 = vmatmul.mubr.f32.vlgmr.msra.gmra.mrb[36].mxu0 %v16605_v30 }
 0x4a1   :  { %10962 = vmatpush1.bf16.msra.mxu1 %v20777_v22  ;;  %11058 = vmatpush1.bf16.msra.mxu0 %v20778_v0  ;;  %v20787_v0 = vld [vmem:[#allocation180_spill] sm:$0xff]  ;;  %v20790_v22 = vld [vmem:[#allocation277_spill] sm:$0xff] }
 0x4a2   :  { %10964 = vmatprep.subr.bf16.mxu1 %v20779_v11  ;;  %11060 = vmatprep.subr.bf16.mxu0 %v20780_v44  ;;  %v20788_v11 = vld [vmem:[#allocation275_spill] sm:$0xff]  ;;  %v20789_v44 = vld [vmem:[#allocation182_spill] sm:$0xff] }
 0x4a3   :  { %3783 = vmatprep.mubr.f32.mxu1 %v20330_v63  ;;  %3996 = vmatprep.mubr.f32.mxu0 %v20330_v63 }
 0x4a5   :  { %10966 = vmatpush1.bf16.msra.mxu1 %v20781_v32  ;;  %11062 = vmatpush1.bf16.msra.mxu0 %v20782_v17  ;;  %v20792_v32 = vld [vmem:[#allocation279_spill] sm:$0xff]  ;;  %v20793_v17 = vld [vmem:[#allocation186_spill] sm:$0xff] }
 0x4a6   :  { %10968 = vmatprep.subr.bf16.mxu1 %v20783_v58  ;;  %11064 = vmatprep.subr.bf16.mxu0 %v20784_v1  ;;  %v20794_v58 = vld [vmem:[#allocation281_spill] sm:$0xff]  ;;  %v20795_v1 = vld [vmem:[#allocation188_spill] sm:$0xff] }
 0x4a9   :  { %10970 = vmatpush1.bf16.msra.mxu1 %v20785_v13  ;;  %11066 = vmatpush1.bf16.msra.mxu0 %v20786_v18  ;;  %v20796_v13 = vld [vmem:[#allocation283_spill] sm:$0xff] }
 0x4aa   :  { %10972 = vmatprep.subr.bf16.mxu1 %v20787_v0  ;;  %11068 = vmatprep.subr.bf16.mxu0 %v20788_v11 }
 0x4ad   :  { %10974 = vmatpush1.bf16.msra.mxu1 %v20789_v44  ;;  %11070 = vmatpush1.bf16.msra.mxu0 %v20790_v22 }
 0x4ae   :  { %10976 = vmatprep.subr.bf16.mxu1 %v20791_v37  ;;  %11072 = vmatprep.subr.bf16.mxu0 %v20792_v32  ;;  %v20799_v32 = vld [vmem:[#allocation190_spill] sm:$0xff] }
 0x4b1   :  { %10978 = vmatpush1.bf16.msra.mxu1 %v20793_v17  ;;  %11074 = vmatpush1.bf16.msra.mxu0 %v20794_v58  ;;  %v20800_v17 = vld [vmem:[#allocation285_spill] sm:$0xff]  ;;  %v20801_v58 = vld [vmem:[#allocation192_spill] sm:$0xff] }
 0x4b2   :  { %10980 = vmatprep.subr.bf16.mxu1 %v20795_v1  ;;  %11076 = vmatprep.subr.bf16.mxu0 %v20796_v13  ;;  %v20802_v1 = vld [vmem:[#allocation287_spill] sm:$0xff]  ;;  %v20803_v13 = vld [vmem:[#allocation194_spill] sm:$0xff] }
 0x4b3   :  { %v2749_v18 = vpop.f32.mrb[24].mxu1  ;;  %v16903_v0 = vpop.f32.mrb[24].mxu0 }
 0x4b4   :  { %v16906_v11 = vmul.f32 %v16818_v19, %v2749_v18  ;;  %v2751_v44 = vpop.f32.mrb[25].mxu1  ;;  %v16908_v22 = vpop.f32.mrb[25].mxu0  ;;  %v20805_v19 = vld [vmem:[#allocation196_spill] sm:$0xff] }
 0x4b5   :  { %v16911_v37 = vmul.f32 %v16770_v21, %v2751_v44  ;;  %10982 = vmatpush1.bf16.msra.mxu1 %v20799_v32  ;;  %11078 = vmatpush1.bf16.msra.mxu0 %v20800_v17  ;;  %v20806_v18 = vld [vmem:[#allocation292_spill] sm:$0xff]  ;;  %v20808_v21 = vld [vmem:[#allocation294_spill] sm:$0xff] }
 0x4b6   :  { %20797 = vst [vmem:[#allocation348_spill] sm:$0xff] %v16906_v11  ;;  %10984 = vmatprep.subr.bf16.mxu1 %v20801_v58  ;;  %11080 = vmatprep.subr.bf16.mxu0 %v20802_v1  ;;  %v20807_v11 = vld [vmem:[#allocation198_spill] sm:$0xff]  ;;  %v20809_v44 = vld [vmem:[#allocation200_spill] sm:$0xff] }
 0x4b7   :  { %20798 = vst [vmem:[#allocation349_spill] sm:$0xff] %v16911_v37  ;;  %v20810_v37 = vld [vmem:[#allocation296_spill] sm:$0xff]  ;;  %v20811_v1 = vld [vmem:[#allocation202_spill] sm:$0xff] }
 0x4b8   :  { %v20812_v17 = vld [vmem:[#allocation298_spill] sm:$0xff]  ;;  %v20825_v58 = vld [vmem:[#allocation216_spill] sm:$0xff] }
 0x4b9   :  { %10986 = vmatpush1.bf16.msra.mxu1 %v20803_v13  ;;  %11082 = vmatpush1.bf16.msra.mxu0 %v20804_v27  ;;  %v20813_v27 = vld [vmem:[#allocation204_spill] sm:$0xff]  ;;  %v20824_v13 = vld [vmem:[#allocation310_spill] sm:$0xff] }
 0x4ba   :  { %10988 = vmatprep.subr.bf16.mxu1 %v20805_v19  ;;  %11084 = vmatprep.subr.bf16.mxu0 %v20806_v18  ;;  %v20814_v19 = vld [vmem:[#allocation300_spill] sm:$0xff]  ;;  %v20816_v18 = vld [vmem:[#allocation302_spill] sm:$0xff] }
 0x4bd   :  { %10990 = vmatpush1.bf16.msra.mxu1 %v20807_v11  ;;  %11086 = vmatpush1.bf16.msra.mxu0 %v20808_v21  ;;  %v20815_v21 = vld [vmem:[#allocation206_spill] sm:$0xff] }
 0x4be   :  { %11024 = vmatprep.subr.bf16.mxu1 %v20809_v44  ;;  %11120 = vmatprep.subr.bf16.mxu0 %v20810_v37  ;;  %v20817_v37 = vld [vmem:[#allocation208_spill] sm:$0xff]  ;;  %v20819_v11 = vld [vmem:[#allocation210_spill] sm:$0xff] }
 0x4bf   :  { %v20818_v44 = vld [vmem:[#allocation304_spill] sm:$0xff] }
 0x4c0   :  { %3784 = vmatmul.mubr.f32.vlgmr.msra.gmra.mrb[38].mxu1 %v16605_v30  ;;  %3997 = vmatmul.mubr.f32.vlgmr.msra.gmra.mrb[38].mxu0 %v16605_v30 }
 0x4c1   :  { %11026 = vmatpush1.bf16.msra.mxu1 %v20811_v1  ;;  %11122 = vmatpush1.bf16.msra.mxu0 %v20812_v17  ;;  %v20820_v1 = vld [vmem:[#allocation306_spill] sm:$0xff]  ;;  %v20821_v17 = vld [vmem:[#allocation212_spill] sm:$0xff] }
 0x4c2   :  { %11028 = vmatprep.subr.bf16.mxu1 %v20813_v27  ;;  %11124 = vmatprep.subr.bf16.mxu0 %v20814_v19  ;;  %v20822_v27 = vld [vmem:[#allocation308_spill] sm:$0xff]  ;;  %v20823_v19 = vld [vmem:[#allocation214_spill] sm:$0xff] }
 0x4c3   :  { %3925 = vmatprep.mubr.f32.mxu1 %v20330_v63  ;;  %4138 = vmatprep.mubr.f32.mxu0 %v20330_v63 }
 0x4c5   :  { %11030 = vmatpush1.bf16.msra.mxu1 %v20815_v21  ;;  %11126 = vmatpush1.bf16.msra.mxu0 %v20816_v18  ;;  %v20826_v21 = vld [vmem:[#allocation312_spill] sm:$0xff]  ;;  %v20827_v18 = vld [vmem:[#allocation218_spill] sm:$0xff] }
 0x4c6   :  { %11032 = vmatprep.subr.bf16.mxu1 %v20817_v37  ;;  %11128 = vmatprep.subr.bf16.mxu0 %v20818_v44  ;;  %v20828_v37 = vld [vmem:[#allocation314_spill] sm:$0xff]  ;;  %v20829_v44 = vld [vmem:[#allocation220_spill] sm:$0xff] }
 0x4c9   :  { %11034 = vmatpush1.bf16.msra.mxu1 %v20819_v11  ;;  %11130 = vmatpush1.bf16.msra.mxu0 %v20820_v1  ;;  %v20830_v11 = vld [vmem:[#allocation316_spill] sm:$0xff] }
 0x4ca   :  { %11036 = vmatprep.subr.bf16.mxu1 %v20821_v17  ;;  %11132 = vmatprep.subr.bf16.mxu0 %v20822_v27 }
 0x4cd   :  { %11038 = vmatpush1.bf16.msra.mxu1 %v20823_v19  ;;  %11134 = vmatpush1.bf16.msra.mxu0 %v20824_v13  ;;  %v20831_v13 = vld [vmem:[#allocation222_spill] sm:$0xff] }
 0x4ce   :  { %11040 = vmatprep.subr.bf16.mxu1 %v20825_v58  ;;  %11136 = vmatprep.subr.bf16.mxu0 %v20826_v21  ;;  %v20832_v21 = vld [vmem:[#allocation224_spill] sm:$0xff] }
 0x4d1   :  { %11042 = vmatpush1.bf16.msra.mxu1 %v20827_v18  ;;  %11138 = vmatpush1.bf16.msra.mxu0 %v20828_v37  ;;  %v20833_v37 = vld [vmem:[#allocation226_spill] sm:$0xff] }
 0x4d2   :  { %11044 = vmatprep.subr.bf16.mxu1 %v20829_v44  ;;  %11140 = vmatprep.subr.bf16.mxu0 %v20830_v11  ;;  %v20834_v11 = vld [vmem:[#allocation228_spill] sm:$0xff]  ;;  %v20835_v44 = vld [vmem:[#allocation230_spill] sm:$0xff] }
 0x4d3   :  { %v2933_v1 = vpop.f32.mrb[26].mxu1  ;;  %v16949_v17 = vpop.f32.mrb[26].mxu0 }
 0x4d4   :  { %v16951_v27 = vpop.f32.mrb[27].mxu1  ;;  %v3148_v19 = vpop.f32.mrb[27].mxu0 }
 0x4d5   :  { %v16953_v32 = vmul.f32 %v3148_v19, %v2933_v1  ;;  %11046 = vmatpush1.bf16.msra.mxu1 %v20831_v13  ;;  %11142 = vmatpush1.bf16.msra.mxu0 %v16353_v26  ;;  %v20836_v1 = vld [vmem:[#allocation232_spill] sm:$0xff]  ;;  %v20837_v19 = vld [vmem:[#allocation234_spill] sm:$0xff] }
 0x4d6   :  { %11048 = vmatprep.subr.bf16.mxu1 %v20832_v21  ;;  %11144 = vmatprep.subr.bf16.mxu0 %v16365_v14  ;;  %v20844_v14 = vld [vmem:[#allocation248_spill] sm:$0xff] }
 0x4d9   :  { %11050 = vmatpush1.bf16.msra.mxu1 %v20833_v37  ;;  %11146 = vmatpush1.bf16.msra.mxu0 %v16390_v6  ;;  %v20838_v6 = vld [vmem:[#allocation236_spill] sm:$0xff] }
 0x4da   :  { %11052 = vmatprep.subr.bf16.mxu1 %v20834_v11  ;;  %11148 = vmatprep.subr.bf16.mxu0 %v16406_v9  ;;  %v20841_v9 = vld [vmem:[#allocation242_spill] sm:$0xff] }
 0x4dd   :  { %11054 = vmatpush1.bf16.msra.mxu1 %v20835_v44  ;;  %11150 = vmatpush1.bf16.msra.mxu0 %v16427_v47  ;;  %v20839_v47 = vld [vmem:[#allocation238_spill] sm:$0xff] }
 0x4de   :  { %11088 = vmatprep.subr.bf16.mxu1 %v20836_v1  ;;  %11184 = vmatprep.subr.bf16.mxu0 %v16433_v4  ;;  %v20840_v4 = vld [vmem:[#allocation240_spill] sm:$0xff] }
 0x4e0   :  { %3926 = vmatmul.mubr.f32.vlgmr.msra.gmra.mrb[40].mxu1 %v16605_v30  ;;  %4139 = vmatmul.mubr.f32.vlgmr.msra.gmra.mrb[40].mxu0 %v16605_v30 }
 0x4e1   :  { %11090 = vmatpush1.bf16.msra.mxu1 %v20837_v19  ;;  %11186 = vmatpush1.bf16.msra.mxu0 %v16449_v43  ;;  %v20842_v43 = vld [vmem:[#allocation244_spill] sm:$0xff] }
 0x4e2   :  { %11092 = vmatprep.subr.bf16.mxu1 %v20838_v6  ;;  %11188 = vmatprep.subr.bf16.mxu0 %v16453_v24  ;;  %v20843_v24 = vld [vmem:[#allocation246_spill] sm:$0xff] }
 0x4e3   :  { %4067 = vmatprep.mubr.f32.mxu1 %v20330_v63  ;;  %4280 = vmatprep.mubr.f32.mxu0 %v20330_v63 }
 0x4e5   :  { %11094 = vmatpush1.bf16.msra.mxu1 %v20839_v47  ;;  %11190 = vmatpush1.bf16.msra.mxu0 %v16471_v12  ;;  %v20845_v12 = vld [vmem:[#allocation250_spill] sm:$0xff] }
 0x4e6   :  { %11096 = vmatprep.subr.bf16.mxu1 %v20840_v4  ;;  %11192 = vmatprep.subr.bf16.mxu0 %v16475_v3  ;;  %v20846_v3 = vld [vmem:[#allocation252_spill] sm:$0xff] }
 0x4e9   :  { %11098 = vmatpush1.bf16.msra.mxu1 %v20841_v9  ;;  %11194 = vmatpush1.bf16.msra.mxu0 %v16493_v50 }
 0x4ea   :  { %11100 = vmatprep.subr.bf16.mxu1 %v20842_v43  ;;  %11196 = vmatprep.subr.bf16.mxu0 %v16497_v15 }
 0x4ed   :  { %11102 = vmatpush1.bf16.msra.mxu1 %v20843_v24  ;;  %11198 = vmatpush1.bf16.msra.mxu0 %v16513_v28 }
 0x4ee   :  { %11104 = vmatprep.subr.bf16.mxu1 %v20844_v14  ;;  %11200 = vmatprep.subr.bf16.mxu0 %v16517_v2  ;;  %v20847_v14 = vld [vmem:[#allocation254_spill] sm:$0xff]  ;;  %v20848_v2 = vld [vmem:[#allocation256_spill] sm:$0xff] }
 0x4f1   :  { %11106 = vmatpush1.bf16.msra.mxu1 %v20845_v12  ;;  %11202 = vmatpush1.bf16.msra.mxu0 %v16533_v25  ;;  %v20849_v25 = vld [vmem:[#allocation258_spill] sm:$0xff] }
 0x4f2   :  { %11108 = vmatprep.subr.bf16.mxu1 %v20846_v3  ;;  %11204 = vmatprep.subr.bf16.mxu0 %v16537_v41  ;;  %v20850_v41 = vld [vmem:[#allocation260_spill] sm:$0xff] }
 0x4f3   :  { %v3075_v50 = vpop.f32.mrb[28].mxu1  ;;  %v3288_v26 = vpop.f32.mrb[28].mxu0 }
 0x4f4   :  { %v16992_v15 = vmul.f32 %v3288_v26, %v16908_v22  ;;  %v16994_v24 = vpop.f32.mrb[29].mxu1  ;;  %v3290_v28 = vpop.f32.mrb[29].mxu0  ;;  %v20851_v26 = vld [vmem:[#allocation262_spill] sm:$0xff]  ;;  %v20854_v22 = vld [vmem:[#allocation268_spill] sm:$0xff] }
 0x4f5   :  { %v16996_v43 = vmul.f32 %v3290_v28, %v3075_v50  ;;  %11110 = vmatpush1.bf16.msra.mxu1 %v20847_v14  ;;  %11206 = vmatpush1.bf16.msra.mxu0 %v16553_v7  ;;  %v20852_v50 = vld [vmem:[#allocation264_spill] sm:$0xff]  ;;  %v20853_v28 = vld [vmem:[#allocation266_spill] sm:$0xff] }
 0x4f6   :  { %11112 = vmatprep.subr.bf16.mxu1 %v20848_v2  ;;  %11208 = vmatprep.subr.bf16.mxu0 %v16560_v35  ;;  %v20863_v35 = vld [vmem:[#allocation37_spill] sm:$0xff] }
 0x4f9   :  { %11114 = vmatpush1.bf16.msra.mxu1 %v20849_v25  ;;  %11210 = vmatpush1.bf16.msra.mxu0 %v16583_v60  ;;  %v20860_v60 = vld [vmem:[#allocation280_spill] sm:$0xff] }
 0x4fa   :  { %11116 = vmatprep.subr.bf16.mxu1 %v20850_v41  ;;  %11212 = vmatprep.subr.bf16.mxu0 %v16589_v38  ;;  %v20857_v38 = vld [vmem:[#allocation274_spill] sm:$0xff] }
 0x4fd   :  { %11118 = vmatpush1.bf16.msra.mxu1 %v20851_v26  ;;  %11214 = vmatpush1.bf16.msra.mxu0 %v16599_v31  ;;  %v20855_v31 = vld [vmem:[#allocation270_spill] sm:$0xff] }
 0x4fe   :  { %11152 = vmatprep.subr.bf16.mxu1 %v20852_v50  ;;  %11248 = vmatprep.subr.bf16.mxu0 %v13363_v33  ;;  %v20856_v33 = vld [vmem:[#allocation272_spill] sm:$0xff] }
 0x500   :  { %4068 = vmatmul.mubr.f32.vlgmr.msra.gmra.mrb[42].mxu1 %v16605_v30  ;;  %4281 = vmatmul.mubr.f32.vlgmr.msra.gmra.mrb[42].mxu0 %v16605_v30 }
 0x501   :  { %11154 = vmatpush1.bf16.msra.mxu1 %v20853_v28  ;;  %11250 = vmatpush1.bf16.msra.mxu0 %v13371_v36  ;;  %v20858_v36 = vld [vmem:[#allocation276_spill] sm:$0xff] }
 0x502   :  { %11156 = vmatprep.subr.bf16.mxu1 %v20854_v22  ;;  %11252 = vmatprep.subr.bf16.mxu0 %v13381_v39  ;;  %v20859_v39 = vld [vmem:[#allocation278_spill] sm:$0xff] }
 0x503   :  { %4209 = vmatprep.mubr.f32.mxu1 %v20330_v63  ;;  %4464 = vmatprep.mubr.f32.mxu0 %v20330_v63 }
 0x505   :  { %11158 = vmatpush1.bf16.msra.mxu1 %v20855_v31  ;;  %11254 = vmatpush1.bf16.msra.mxu0 %v13389_v42  ;;  %v20861_v42 = vld [vmem:[#allocation282_spill] sm:$0xff] }
 0x506   :  { %11160 = vmatprep.subr.bf16.mxu1 %v20856_v33  ;;  %11256 = vmatprep.subr.bf16.mxu0 %v13398_v45  ;;  %v20862_v45 = vld [vmem:[#allocation59_spill] sm:$0xff] }
 0x507   :  { %v20864_v7 = vsub.f32 %v20862_v45, %v20863_v35 }
 0x509   :  { %11162 = vmatpush1.bf16.msra.mxu1 %v20857_v38  ;;  %11258 = vmatpush1.bf16.msra.mxu0 %v13407_v48  ;;  %v648_v48 = vmul.f32 0.5, %v20864_v7  ;;  %v20865_v38 = vld [vmem:[#allocation284_spill] sm:$0xff] }
 0x50a   :  { %11164 = vmatprep.subr.bf16.mxu1 %v20858_v36  ;;  %11260 = vmatprep.subr.bf16.mxu0 %v13416_v51  ;;  %v20867_v7 = vld [vmem:[#allocation288_spill] sm:$0xff] }
 0x50b   :  { %v652_v45 = vsub.f32 0.5, %v648_v48 }
 0x50d   :  { %11166 = vmatpush1.bf16.msra.mxu1 %v20859_v39  ;;  %11262 = vmatpush1.bf16.msra.mxu0 %v13425_v54 }
 0x50e   :  { %11168 = vmatprep.subr.bf16.mxu1 %v20860_v60  ;;  %11264 = vmatprep.subr.bf16.mxu0 %v13434_v57 }
 0x511   :  { %11170 = vmatpush1.bf16.msra.mxu1 %v20861_v42  ;;  %11266 = vmatpush1.bf16.msra.mxu0 %v20595_v52  ;;  %v20866_v52 = vld [vmem:[#allocation286_spill] sm:$0xff] }
 0x512   :  { %11172 = vmatprep.subr.bf16.mxu1 %v20865_v38  ;;  %11268 = vmatprep.subr.bf16.mxu0 %v20597_v53  ;;  %v20887_v53 = vld [vmem:[#allocation24_spill] sm:$0xff] }
 0x513   :  { %v3217_v51 = vpop.f32.mrb[30].mxu1  ;;  %v3430_v39 = vpop.f32.mrb[30].mxu0 }
 0x514   :  { %v4359_v54 = vmul.f32 %v3217_v51, %v16951_v27  ;;  %v17039_v60 = vmul.f32 %v16953_v32, %v3430_v39  ;;  %v3219_v57 = vpop.f32.mrb[31].mxu1  ;;  %v3432_v36 = vpop.f32.mrb[31].mxu0  ;;  %v20868_v51 = vld [vmem:[#allocation291_spill] sm:$0xff]  ;;  %v656_v39 = vmax.f32 %v652_v45, 0.0  ;;  %v20869_v27 = vld [vmem:[#allocation293_spill] sm:$0xff] }
 0x515   :  { %v17042_v42 = vmul.f32 %v3219_v57, %v16903_v0  ;;  %11174 = vmatpush1.bf16.msra.mxu1 %v20866_v52  ;;  %11270 = vmatpush1.bf16.msra.mxu0 %v20600_v10  ;;  %v20870_v57 = vld [vmem:[#allocation295_spill] sm:$0xff]  ;;  %v20873_v0 = vld [vmem:[#allocation301_spill] sm:$0xff]  ;;  %v20885_v10 = vld [vmem:[#allocation22_spill] sm:$0xff] }
 0x516   :  { %v17046_v35 = vmul.f32 %v4359_v54, %v3432_v36  ;;  %11176 = vmatprep.subr.bf16.mxu1 %v20867_v7  ;;  %11272 = vmatprep.subr.bf16.mxu0 %v20602_v16  ;;  %v17056_v48 = vmin.f32 %v656_v39, 1.0  ;;  %v20871_v36 = vld [vmem:[#allocation297_spill] sm:$0xff]  ;;  %v20872_v54 = vld [vmem:[#allocation299_spill] sm:$0xff] }
 0x517   :  { %v20874_v32 = vld [vmem:[#allocation303_spill] sm:$0xff]  ;;  %v20875_v45 = vld [vmem:[#allocation305_spill] sm:$0xff] }
 0x518   :  { %v20876_v39 = vld [vmem:[#allocation307_spill] sm:$0xff]  ;;  %v20883_v16 = vld [vmem:[#allocation21_spill] sm:$0xff] }
 0x519   :  { %11178 = vmatpush1.bf16.msra.mxu1 %v20868_v51  ;;  %11274 = vmatpush1.bf16.msra.mxu0 %v20604_v34  ;;  %v20882_v34 = vld [vmem:[#allocation313_spill] sm:$0xff] }
 0x51a   :  { %11180 = vmatprep.subr.bf16.mxu1 %v20869_v27  ;;  %11276 = vmatprep.subr.bf16.mxu0 %v20606_v29  ;;  %v20881_v29 = vld [vmem:[#allocation20_spill] sm:$0xff] }
 0x51d   :  { %11182 = vmatpush1.bf16.msra.mxu1 %v20870_v57  ;;  %11278 = vmatpush1.bf16.msra.mxu0 %v20608_v46  ;;  %v20879_v46 = vld [vmem:[#allocation19_spill] sm:$0xff] }
 0x51e   :  { %11216 = vmatprep.subr.bf16.mxu1 %v20871_v36  ;;  %11312 = vmatprep.subr.bf16.mxu0 %v20610_v59  ;;  %v20877_v59 = vld [vmem:[#allocation18_spill] sm:$0xff] }
 0x520   :  { %4210 = vmatmul.mubr.f32.vlgmr.msra.gmra.mrb[44].mxu1 %v16605_v30  ;;  %4465 = vmatmul.mubr.f32.vlgmr.msra.gmra.mrb[44].mxu0 %v17056_v48 }
 0x521   :  { %11218 = vmatpush1.bf16.msra.mxu1 %v20872_v54  ;;  %11314 = vmatpush1.bf16.msra.mxu0 %v20612_v55  ;;  %v20878_v55 = vld [vmem:[#allocation309_spill] sm:$0xff] }
 0x522   :  { %11220 = vmatprep.subr.bf16.mxu1 %v20873_v0  ;;  %11316 = vmatprep.subr.bf16.mxu0 %v20614_v56  ;;  %v20880_v56 = vld [vmem:[#allocation311_spill] sm:$0xff] }
 0x523   :  { %4351 = vmatprep.mubr.f32.mxu1 %v20330_v63  ;;  %4606 = vmatprep.mubr.f32.mxu0 %v20330_v63 }
 0x525   :  { %11222 = vmatpush1.bf16.msra.mxu1 %v20874_v32  ;;  %11318 = vmatpush1.bf16.msra.mxu0 %v20616_v8  ;;  %v20884_v8 = vld [vmem:[#allocation315_spill] sm:$0xff] }
 0x526   :  { %11224 = vmatprep.subr.bf16.mxu1 %v20875_v45  ;;  %11320 = vmatprep.subr.bf16.mxu0 %v20618_v5  ;;  %v20886_v5 = vld [vmem:[#allocation317_spill] sm:$0xff]  ;;  %v20892_v45 = vld [vmem:[#allocation323_spill] sm:$0xff] }
 0x529   :  { %11226 = vmatpush1.bf16.msra.mxu1 %v20876_v39  ;;  %11322 = vmatpush1.bf16.msra.mxu0 %v20877_v59 }
 0x52a   :  { %11228 = vmatprep.subr.bf16.mxu1 %v20878_v55  ;;  %11324 = vmatprep.subr.bf16.mxu0 %v20879_v46 }
 0x52d   :  { %11230 = vmatpush1.bf16.msra.mxu1 %v20880_v56  ;;  %11326 = vmatpush1.bf16.msra.mxu0 %v20881_v29 }
 0x52e   :  { %11232 = vmatprep.subr.bf16.mxu1 %v20882_v34  ;;  %11328 = vmatprep.subr.bf16.mxu0 %v20883_v16  ;;  %v20888_v16 = vld [vmem:[#allocation319_spill] sm:$0xff] }
 0x531   :  { %11234 = vmatpush1.bf16.msra.mxu1 %v20884_v8  ;;  %11330 = vmatpush1.bf16.msra.mxu0 %v20885_v10  ;;  %v20889_v8 = vld [vmem:[#allocation26_spill] sm:$0xff] }
 0x532   :  { %11236 = vmatprep.subr.bf16.mxu1 %v20886_v5  ;;  %11332 = vmatprep.subr.bf16.mxu0 %v20887_v53  ;;  %v20890_v5 = vld [vmem:[#allocation321_spill] sm:$0xff]  ;;  %v20891_v53 = vld [vmem:[#allocation28_spill] sm:$0xff] }
 0x533   :  { %v3359_v59 = vpop.f32.mrb[32].mxu1  ;;  %v3572_v55 = vpop.f32.mrb[32].mxu0 }
 0x534   :  { %v4363_v46 = vmul.f32 %v3359_v59, %v16994_v24  ;;  %v17086_v56 = vmul.f32 %v16996_v43, %v3572_v55  ;;  %v3361_v29 = vpop.f32.mrb[33].mxu1  ;;  %v3574_v39 = vpop.f32.mrb[33].mxu0  ;;  %v20893_v24 = vld [vmem:[#allocation30_spill] sm:$0xff]  ;;  %v20894_v43 = vld [vmem:[#allocation325_spill] sm:$0xff]  ;;  %v20895_v59 = vld [vmem:[#allocation32_spill] sm:$0xff] }
 0x535   :  { %v17089_v34 = vmul.f32 %v3361_v29, %v16949_v17  ;;  %11238 = vmatpush1.bf16.msra.mxu1 %v20888_v16  ;;  %11334 = vmatpush1.bf16.msra.mxu0 %v20889_v8  ;;  %v20896_v29 = vld [vmem:[#allocation327_spill] sm:$0xff]  ;;  %v20897_v55 = vld [vmem:[#allocation34_spill] sm:$0xff] }
 0x536   :  { %v17093_v10 = vmul.f32 %v4363_v46, %v3574_v39  ;;  %11240 = vmatprep.subr.bf16.mxu1 %v20890_v5  ;;  %11336 = vmatprep.subr.bf16.mxu0 %v20891_v53  ;;  %v20898_v17 = vld [vmem:[#allocation35_spill] sm:$0xff]  ;;  %v20899_v46 = vld [vmem:[#allocation36_spill] sm:$0xff]  ;;  %v20903_v8 = vld [vmem:[#allocation42_spill] sm:$0xff] }
 0x537   :  { %v20900_v39 = vld [vmem:[#allocation39_spill] sm:$0xff]  ;;  %v20901_v53 = vld [vmem:[#allocation40_spill] sm:$0xff]  ;;  %v20924_v5 = vld [vmem:[#allocation65_spill] sm:$0xff] }
 0x539   :  { %11242 = vmatpush1.bf16.msra.mxu1 %v20892_v45  ;;  %11338 = vmatpush1.bf16.msra.mxu0 %v20893_v24  ;;  %v20902_v24 = vld [vmem:[#allocation41_spill] sm:$0xff] }
 0x53a   :  { %11244 = vmatprep.subr.bf16.mxu1 %v20894_v43  ;;  %11340 = vmatprep.subr.bf16.mxu0 %v20895_v59  ;;  %v20905_v59 = vld [vmem:[#allocation44_spill] sm:$0xff]  ;;  %v20914_v43 = vld [vmem:[#allocation53_spill] sm:$0xff] }
 0x53d   :  { %11246 = vmatpush1.bf16.msra.mxu1 %v20896_v29  ;;  %11342 = vmatpush1.bf16.msra.mxu0 %v20897_v55  ;;  %v20904_v55 = vld [vmem:[#allocation43_spill] sm:$0xff]  ;;  %v20913_v29 = vld [vmem:[#allocation52_spill] sm:$0xff] }
 0x53e   :  { %11280 = vmatprep.subr.bf16.mxu1 %v20898_v17  ;;  %11376 = vmatprep.subr.bf16.mxu0 %v20899_v46  ;;  %v20906_v46 = vld [vmem:[#allocation45_spill] sm:$0xff]  ;;  %v20908_v17 = vld [vmem:[#allocation47_spill] sm:$0xff] }
 0x540   :  { %4352 = vmatmul.mubr.f32.vlgmr.msra.gmra.mrb[46].mxu1 %v16605_v30  ;;  %4607 = vmatmul.mubr.f32.vlgmr.msra.gmra.mrb[46].mxu0 %v17056_v48  ;;  %v20907_v30 = vld [vmem:[#allocation46_spill] sm:$0xff] }
 0x541   :  { %11282 = vmatpush1.bf16.msra.mxu1 %v20900_v39  ;;  %11378 = vmatpush1.bf16.msra.mxu0 %v20901_v53  ;;  %v20909_v39 = vld [vmem:[#allocation48_spill] sm:$0xff]  ;;  %v20910_v53 = vld [vmem:[#allocation49_spill] sm:$0xff] }
 0x542   :  { %11284 = vmatprep.subr.bf16.mxu1 %v20902_v24  ;;  %11380 = vmatprep.subr.bf16.mxu0 %v20903_v8  ;;  %v20911_v24 = vld [vmem:[#allocation50_spill] sm:$0xff]  ;;  %v20912_v8 = vld [vmem:[#allocation51_spill] sm:$0xff] }
 0x543   :  { %4535 = vmatprep.mubr.f32.mxu1 %v20330_v63  ;;  %4748 = vmatprep.mubr.f32.mxu0 %v20330_v63 }
 0x545   :  { %11286 = vmatpush1.bf16.msra.mxu1 %v20904_v55  ;;  %11382 = vmatpush1.bf16.msra.mxu0 %v20905_v59  ;;  %v20915_v55 = vld [vmem:[#allocation54_spill] sm:$0xff]  ;;  %v20916_v59 = vld [vmem:[#allocation55_spill] sm:$0xff] }
 0x546   :  { %11288 = vmatprep.subr.bf16.mxu1 %v20906_v46  ;;  %11384 = vmatprep.subr.bf16.mxu0 %v20907_v30  ;;  %v20917_v46 = vld [vmem:[#allocation56_spill] sm:$0xff]  ;;  %v20918_v30 = vld [vmem:[#allocation57_spill] sm:$0xff] }
 0x549   :  { %11290 = vmatpush1.bf16.msra.mxu1 %v20908_v17  ;;  %11386 = vmatpush1.bf16.msra.mxu0 %v20909_v39  ;;  %v20919_v17 = vld [vmem:[#allocation58_spill] sm:$0xff] }
 0x54a   :  { %11292 = vmatprep.subr.bf16.mxu1 %v20910_v53  ;;  %11388 = vmatprep.subr.bf16.mxu0 %v20911_v24 }
 0x54d   :  { %11294 = vmatpush1.bf16.msra.mxu1 %v20912_v8  ;;  %11390 = vmatpush1.bf16.msra.mxu0 %v20913_v29 }
 0x54e   :  { %11296 = vmatprep.subr.bf16.mxu1 %v20914_v43  ;;  %11392 = vmatprep.subr.bf16.mxu0 %v20915_v55  ;;  %v20920_v55 = vld [vmem:[#allocation61_spill] sm:$0xff] }
 0x551   :  { %11298 = vmatpush1.bf16.msra.mxu1 %v20916_v59  ;;  %11394 = vmatpush1.bf16.msra.mxu0 %v20917_v46  ;;  %v20921_v59 = vld [vmem:[#allocation62_spill] sm:$0xff] }
 0x552   :  { %11300 = vmatprep.subr.bf16.mxu1 %v20918_v30  ;;  %11396 = vmatprep.subr.bf16.mxu0 %v20919_v17  ;;  %v20922_v30 = vld [vmem:[#allocation63_spill] sm:$0xff]  ;;  %v20923_v17 = vld [vmem:[#allocation64_spill] sm:$0xff] }
 0x553   :  { %v3501_v39 = vpop.f32.mrb[34].mxu1  ;;  %v3714_v53 = vpop.f32.mrb[34].mxu0 }
 0x554   :  { %v4367_v24 = vmul.f32 %v17042_v42, %v3501_v39  ;;  %v17131_v8 = vmul.f32 %v17046_v35, %v3714_v53  ;;  %v3503_v29 = vpop.f32.mrb[35].mxu1  ;;  %v3716_v45 = vpop.f32.mrb[35].mxu0  ;;  %v20925_v42 = vld [vmem:[#allocation66_spill] sm:$0xff]  ;;  %v20926_v53 = vld [vmem:[#allocation67_spill] sm:$0xff]  ;;  %v20927_v35 = vld [vmem:[#allocation68_spill] sm:$0xff] }
 0x555   :  { %v17134_v43 = vmul.f32 %v16992_v15, %v3503_v29  ;;  %11302 = vmatpush1.bf16.msra.mxu1 %v20920_v55  ;;  %11398 = vmatpush1.bf16.msra.mxu0 %v20921_v59  ;;  %v20928_v15 = vld [vmem:[#allocation69_spill] sm:$0xff]  ;;  %v20929_v29 = vld [vmem:[#allocation70_spill] sm:$0xff]  ;;  %v20930_v39 = vld [vmem:[#allocation71_spill] sm:$0xff] }
 0x556   :  { %v17138_v46 = vmul.f32 %v4367_v24, %v3716_v45  ;;  %11304 = vmatprep.subr.bf16.mxu1 %v20922_v30  ;;  %11400 = vmatprep.subr.bf16.mxu0 %v20923_v17  ;;  %v20931_v45 = vld [vmem:[#allocation72_spill] sm:$0xff]  ;;  %v20932_v24 = vld [vmem:[#allocation73_spill] sm:$0xff]  ;;  %v20933_v17 = vld [vmem:[#allocation74_spill] sm:$0xff] }
 0x557   :  { %v20935_v59 = vld [vmem:[#allocation76_spill] sm:$0xff]  ;;  %v20956_v55 = vld [vmem:[#allocation97_spill] sm:$0xff] }
 0x559   :  { %11306 = vmatpush1.bf16.msra.mxu1 %v20924_v5  ;;  %11402 = vmatpush1.bf16.msra.mxu0 %v20925_v42  ;;  %v20934_v42 = vld [vmem:[#allocation75_spill] sm:$0xff] }
 0x55a   :  { %11308 = vmatprep.subr.bf16.mxu1 %v20926_v53  ;;  %11404 = vmatprep.subr.bf16.mxu0 %v20927_v35  ;;  %v20937_v35 = vld [vmem:[#allocation78_spill] sm:$0xff]  ;;  %v20946_v5 = vld [vmem:[#allocation87_spill] sm:$0xff] }
 0x55b   :  { %v20945_v53 = vld [vmem:[#allocation86_spill] sm:$0xff] }
 0x55d   :  { %11310 = vmatpush1.bf16.msra.mxu1 %v20928_v15  ;;  %11406 = vmatpush1.bf16.msra.mxu0 %v20929_v29  ;;  %v20936_v29 = vld [vmem:[#allocation77_spill] sm:$0xff] }
 0x55e   :  { %11344 = vmatprep.subr.bf16.mxu1 %v20930_v39  ;;  %11440 = vmatprep.subr.bf16.mxu0 %v20931_v45  ;;  %v20938_v45 = vld [vmem:[#allocation79_spill] sm:$0xff]  ;;  %v20939_v39 = vld [vmem:[#allocation80_spill] sm:$0xff]  ;;  %v20940_v15 = vld [vmem:[#allocation81_spill] sm:$0xff] }
 0x560   :  { %4536 = vmatmul.mubr.f32.vlgmr.msra.gmra.mrb[48].mxu1 %v17056_v48  ;;  %4749 = vmatmul.mubr.f32.vlgmr.msra.gmra.mrb[48].mxu0 %v17056_v48 }
 0x561   :  { %11346 = vmatpush1.bf16.msra.mxu1 %v20932_v24  ;;  %11442 = vmatpush1.bf16.msra.mxu0 %v20933_v17  ;;  %v20941_v24 = vld [vmem:[#allocation82_spill] sm:$0xff]  ;;  %v20942_v17 = vld [vmem:[#allocation83_spill] sm:$0xff] }
 0x562   :  { %11348 = vmatprep.subr.bf16.mxu1 %v20934_v42  ;;  %11444 = vmatprep.subr.bf16.mxu0 %v20935_v59  ;;  %v20943_v42 = vld [vmem:[#allocation84_spill] sm:$0xff]  ;;  %v20944_v59 = vld [vmem:[#allocation85_spill] sm:$0xff] }
 0x563   :  { %4677 = vmatprep.mubr.f32.mxu1 %v20330_v63  ;;  %4890 = vmatprep.mubr.f32.mxu0 %v20330_v63 }
 0x565   :  { %11350 = vmatpush1.bf16.msra.mxu1 %v20936_v29  ;;  %11446 = vmatpush1.bf16.msra.mxu0 %v20937_v35  ;;  %v20947_v29 = vld [vmem:[#allocation88_spill] sm:$0xff]  ;;  %v20948_v35 = vld [vmem:[#allocation89_spill] sm:$0xff] }
 0x566   :  { %11352 = vmatprep.subr.bf16.mxu1 %v20938_v45  ;;  %11448 = vmatprep.subr.bf16.mxu0 %v20939_v39  ;;  %v20949_v45 = vld [vmem:[#allocation90_spill] sm:$0xff]  ;;  %v20950_v39 = vld [vmem:[#allocation91_spill] sm:$0xff] }
 0x569   :  { %11354 = vmatpush1.bf16.msra.mxu1 %v20940_v15  ;;  %11450 = vmatpush1.bf16.msra.mxu0 %v20941_v24  ;;  %v20951_v15 = vld [vmem:[#allocation92_spill] sm:$0xff] }
 0x56a   :  { %11356 = vmatprep.subr.bf16.mxu1 %v20942_v17  ;;  %11452 = vmatprep.subr.bf16.mxu0 %v20943_v42 }
 0x56d   :  { %11358 = vmatpush1.bf16.msra.mxu1 %v20944_v59  ;;  %11454 = vmatpush1.bf16.msra.mxu0 %v20945_v53 }
 0x56e   :  { %11360 = vmatprep.subr.bf16.mxu1 %v20946_v5  ;;  %11456 = vmatprep.subr.bf16.mxu0 %v20947_v29  ;;  %v20952_v29 = vld [vmem:[#allocation93_spill] sm:$0xff] }
 0x571   :  { %11362 = vmatpush1.bf16.msra.mxu1 %v20948_v35  ;;  %11458 = vmatpush1.bf16.msra.mxu0 %v20949_v45  ;;  %v20953_v35 = vld [vmem:[#allocation94_spill] sm:$0xff] }
 0x572   :  { %11364 = vmatprep.subr.bf16.mxu1 %v20950_v39  ;;  %11460 = vmatprep.subr.bf16.mxu0 %v20951_v15  ;;  %v20954_v39 = vld [vmem:[#allocation95_spill] sm:$0xff]  ;;  %v20955_v15 = vld [vmem:[#allocation96_spill] sm:$0xff] }
 0x573   :  { %v3643_v24 = vpop.f32.mrb[36].mxu1  ;;  %v3856_v17 = vpop.f32.mrb[36].mxu0 }
 0x574   :  { %v4371_v42 = vmul.f32 %v17089_v34, %v3643_v24  ;;  %v17176_v59 = vmul.f32 %v17093_v10, %v3856_v17  ;;  %v3645_v53 = vpop.f32.mrb[37].mxu1  ;;  %v3858_v30 = vpop.f32.mrb[37].mxu0  ;;  %v20957_v34 = vld [vmem:[#allocation98_spill] sm:$0xff]  ;;  %v20958_v10 = vld [vmem:[#allocation99_spill] sm:$0xff]  ;;  %v20959_v17 = vld [vmem:[#allocation100_spill] sm:$0xff] }
 0x575   :  { %v17179_v5 = vmul.f32 %v17039_v60, %v3645_v53  ;;  %11366 = vmatpush1.bf16.msra.mxu1 %v20952_v29  ;;  %11462 = vmatpush1.bf16.msra.mxu0 %v20953_v35  ;;  %v20960_v60 = vld [vmem:[#allocation101_spill] sm:$0xff]  ;;  %v20961_v53 = vld [vmem:[#allocation102_spill] sm:$0xff]  ;;  %v20962_v24 = vld [vmem:[#allocation103_spill] sm:$0xff] }
 0x576   :  { %v17183_v45 = vmul.f32 %v4371_v42, %v3858_v30  ;;  %11368 = vmatprep.subr.bf16.mxu1 %v20954_v39  ;;  %11464 = vmatprep.subr.bf16.mxu0 %v20955_v15  ;;  %v20963_v30 = vld [vmem:[#allocation104_spill] sm:$0xff]  ;;  %v20964_v42 = vld [vmem:[#allocation105_spill] sm:$0xff]  ;;  %v20965_v15 = vld [vmem:[#allocation106_spill] sm:$0xff] }
 0x577   :  { %v20967_v35 = vld [vmem:[#allocation108_spill] sm:$0xff] }
 0x579   :  { %11370 = vmatpush1.bf16.msra.mxu1 %v20956_v55  ;;  %11466 = vmatpush1.bf16.msra.mxu0 %v20957_v34  ;;  %v20966_v34 = vld [vmem:[#allocation107_spill] sm:$0xff] }
 0x57a   :  { %11372 = vmatprep.subr.bf16.mxu1 %v20958_v10  ;;  %11468 = vmatprep.subr.bf16.mxu0 %v20959_v17  ;;  %v20969_v17 = vld [vmem:[#allocation110_spill] sm:$0xff]  ;;  %v20978_v55 = vld [vmem:[#allocation119_spill] sm:$0xff] }
 0x57b   :  { %v20977_v10 = vld [vmem:[#allocation118_spill] sm:$0xff] }
 0x57d   :  { %11374 = vmatpush1.bf16.msra.mxu1 %v20960_v60  ;;  %11470 = vmatpush1.bf16.msra.mxu0 %v20961_v53  ;;  %v20968_v53 = vld [vmem:[#allocation109_spill] sm:$0xff] }
 0x57e   :  { %11408 = vmatprep.subr.bf16.mxu1 %v20962_v24  ;;  %11504 = vmatprep.subr.bf16.mxu0 %v20963_v30  ;;  %v20970_v30 = vld [vmem:[#allocation111_spill] sm:$0xff]  ;;  %v20971_v24 = vld [vmem:[#allocation112_spill] sm:$0xff]  ;;  %v20972_v60 = vld [vmem:[#allocation113_spill] sm:$0xff] }
 0x580   :  { %4678 = vmatmul.mubr.f32.vlgmr.msra.gmra.mrb[50].mxu1 %v17056_v48  ;;  %4891 = vmatmul.mubr.f32.vlgmr.msra.gmra.mrb[50].mxu0 %v17056_v48 }
 0x581   :  { %11410 = vmatpush1.bf16.msra.mxu1 %v20964_v42  ;;  %11506 = vmatpush1.bf16.msra.mxu0 %v20965_v15  ;;  %v20973_v42 = vld [vmem:[#allocation114_spill] sm:$0xff]  ;;  %v20974_v15 = vld [vmem:[#allocation115_spill] sm:$0xff] }
 0x582   :  { %11412 = vmatprep.subr.bf16.mxu1 %v20966_v34  ;;  %11508 = vmatprep.subr.bf16.mxu0 %v20967_v35  ;;  %v20975_v34 = vld [vmem:[#allocation116_spill] sm:$0xff]  ;;  %v20976_v35 = vld [vmem:[#allocation117_spill] sm:$0xff] }
 0x583   :  { %4819 = vmatprep.mubr.f32.mxu1 %v20330_v63  ;;  %5032 = vmatprep.mubr.f32.mxu0 %v20330_v63 }
 0x585   :  { %11414 = vmatpush1.bf16.msra.mxu1 %v20968_v53  ;;  %11510 = vmatpush1.bf16.msra.mxu0 %v20969_v17  ;;  %v20979_v53 = vld [vmem:[#allocation120_spill] sm:$0xff]  ;;  %v20980_v17 = vld [vmem:[#allocation121_spill] sm:$0xff] }
 0x586   :  { %11416 = vmatprep.subr.bf16.mxu1 %v20970_v30  ;;  %11512 = vmatprep.subr.bf16.mxu0 %v20971_v24  ;;  %v20981_v30 = vld [vmem:[#allocation122_spill] sm:$0xff]  ;;  %v20982_v24 = vld [vmem:[#allocation123_spill] sm:$0xff] }
 0x589   :  { %11418 = vmatpush1.bf16.msra.mxu1 %v20972_v60  ;;  %11514 = vmatpush1.bf16.msra.mxu0 %v20973_v42  ;;  %v20983_v60 = vld [vmem:[#allocation124_spill] sm:$0xff] }
 0x58a   :  { %11420 = vmatprep.subr.bf16.mxu1 %v20974_v15  ;;  %11516 = vmatprep.subr.bf16.mxu0 %v20975_v34 }
 0x58d   :  { %11422 = vmatpush1.bf16.msra.mxu1 %v20976_v35  ;;  %11518 = vmatpush1.bf16.msra.mxu0 %v20977_v10 }
 0x58e   :  { %11424 = vmatprep.subr.bf16.mxu1 %v20978_v55  ;;  %11520 = vmatprep.subr.bf16.mxu0 %v20979_v53  ;;  %v20984_v53 = vld [vmem:[#allocation125_spill] sm:$0xff] }
 0x591   :  { %11426 = vmatpush1.bf16.msra.mxu1 %v20980_v17  ;;  %11522 = vmatpush1.bf16.msra.mxu0 %v20981_v30 }
 0x592   :  { %11428 = vmatprep.subr.bf16.mxu1 %v20982_v24  ;;  %11524 = vmatprep.subr.bf16.mxu0 %v20983_v60  ;;  %v20985_v24 = vld [vmem:[#allocation127_spill] sm:$0xff]  ;;  %v20986_v60 = vld [vmem:[#allocation129_spill] sm:$0xff] }
 0x593   :  { %v3785_v42 = vpop.f32.mrb[38].mxu1  ;;  %v3998_v15 = vpop.f32.mrb[38].mxu0 }
 0x594   :  { %v4375_v34 = vmul.f32 %v17134_v43, %v3785_v42  ;;  %v17221_v35 = vmul.f32 %v17138_v46, %v3998_v15  ;;  %v3787_v10 = vpop.f32.mrb[39].mxu1  ;;  %v4000_v39 = vpop.f32.mrb[39].mxu0  ;;  %v20987_v43 = vld [vmem:[#allocation130_spill] sm:$0xff]  ;;  %v20988_v46 = vld [vmem:[#allocation131_spill] sm:$0xff]  ;;  %v20989_v15 = vld [vmem:[#allocation132_spill] sm:$0xff] }
 0x595   :  { %v17224_v55 = vmul.f32 %v17086_v56, %v3787_v10  ;;  %11430 = vmatpush1.bf16.msra.mxu1 %v20984_v53  ;;  %11526 = vmatpush1.bf16.msra.mxu0 %v20729_v61  ;;  %v20990_v56 = vld [vmem:[#allocation133_spill] sm:$0xff]  ;;  %v20991_v10 = vld [vmem:[#allocation134_spill] sm:$0xff]  ;;  %v20992_v42 = vld [vmem:[#allocation135_spill] sm:$0xff] }
 0x596   :  { %v17228_v30 = vmul.f32 %v4375_v34, %v4000_v39  ;;  %11432 = vmatprep.subr.bf16.mxu1 %v20985_v24  ;;  %11528 = vmatprep.subr.bf16.mxu0 %v20732_v49  ;;  %v20993_v39 = vld [vmem:[#allocation136_spill] sm:$0xff]  ;;  %v20994_v34 = vld [vmem:[#allocation137_spill] sm:$0xff]  ;;  %v20995_v49 = vld [vmem:[#allocation138_spill] sm:$0xff] }
 0x597   :  { %v20997_v61 = vld [vmem:[#allocation140_spill] sm:$0xff] }
 0x599   :  { %11434 = vmatpush1.bf16.msra.mxu1 %v20986_v60  ;;  %11530 = vmatpush1.bf16.msra.mxu0 %v20987_v43  ;;  %v20996_v43 = vld [vmem:[#allocation139_spill] sm:$0xff] }
 0x59a   :  { %11436 = vmatprep.subr.bf16.mxu1 %v20988_v46  ;;  %11532 = vmatprep.subr.bf16.mxu0 %v20989_v15  ;;  %v20999_v15 = vld [vmem:[#allocation142_spill] sm:$0xff]  ;;  %v21008_v60 = vld [vmem:[#allocation151_spill] sm:$0xff] }
 0x59b   :  { %v21007_v46 = vld [vmem:[#allocation150_spill] sm:$0xff] }
 0x59d   :  { %11438 = vmatpush1.bf16.msra.mxu1 %v20990_v56  ;;  %11534 = vmatpush1.bf16.msra.mxu0 %v20991_v10  ;;  %v20998_v10 = vld [vmem:[#allocation141_spill] sm:$0xff] }
 0x59e   :  { %11472 = vmatprep.subr.bf16.mxu1 %v20992_v42  ;;  %11568 = vmatprep.subr.bf16.mxu0 %v20993_v39  ;;  %v21000_v39 = vld [vmem:[#allocation143_spill] sm:$0xff]  ;;  %v21001_v42 = vld [vmem:[#allocation144_spill] sm:$0xff]  ;;  %v21002_v56 = vld [vmem:[#allocation145_spill] sm:$0xff] }
 0x5a0   :  { %4820 = vmatmul.mubr.f32.vlgmr.msra.gmra.mrb[52].mxu1 %v17056_v48  ;;  %5033 = vmatmul.mubr.f32.vlgmr.msra.gmra.mrb[52].mxu0 %v17056_v48 }
 0x5a1   :  { %11474 = vmatpush1.bf16.msra.mxu1 %v20994_v34  ;;  %11570 = vmatpush1.bf16.msra.mxu0 %v20995_v49  ;;  %v21003_v34 = vld [vmem:[#allocation146_spill] sm:$0xff]  ;;  %v21004_v49 = vld [vmem:[#allocation147_spill] sm:$0xff] }
 0x5a2   :  { %11476 = vmatprep.subr.bf16.mxu1 %v20996_v43  ;;  %11572 = vmatprep.subr.bf16.mxu0 %v20997_v61  ;;  %v21005_v43 = vld [vmem:[#allocation148_spill] sm:$0xff]  ;;  %v21006_v61 = vld [vmem:[#allocation149_spill] sm:$0xff] }
 0x5a3   :  { %4961 = vmatprep.mubr.f32.mxu1 %v20330_v63  ;;  %5174 = vmatprep.mubr.f32.mxu0 %v20330_v63 }
 0x5a5   :  { %11478 = vmatpush1.bf16.msra.mxu1 %v20998_v10  ;;  %11574 = vmatpush1.bf16.msra.mxu0 %v20999_v15  ;;  %v21009_v10 = vld [vmem:[#allocation152_spill] sm:$0xff]  ;;  %v21010_v15 = vld [vmem:[#allocation153_spill] sm:$0xff] }
 0x5a6   :  { %11480 = vmatprep.subr.bf16.mxu1 %v21000_v39  ;;  %11576 = vmatprep.subr.bf16.mxu0 %v21001_v42  ;;  %v21011_v39 = vld [vmem:[#allocation154_spill] sm:$0xff]  ;;  %v21012_v42 = vld [vmem:[#allocation155_spill] sm:$0xff] }
 0x5a9   :  { %11482 = vmatpush1.bf16.msra.mxu1 %v21002_v56  ;;  %11578 = vmatpush1.bf16.msra.mxu0 %v21003_v34  ;;  %v21013_v56 = vld [vmem:[#allocation156_spill] sm:$0xff] }
 0x5aa   :  { %11484 = vmatprep.subr.bf16.mxu1 %v21004_v49  ;;  %11580 = vmatprep.subr.bf16.mxu0 %v21005_v43 }
 0x5ad   :  { %11486 = vmatpush1.bf16.msra.mxu1 %v21006_v61  ;;  %11582 = vmatpush1.bf16.msra.mxu0 %v21007_v46 }
 0x5ae   :  { %11488 = vmatprep.subr.bf16.mxu1 %v21008_v60  ;;  %11584 = vmatprep.subr.bf16.mxu0 %v21009_v10  ;;  %v21014_v10 = vld [vmem:[#allocation157_spill] sm:$0xff] }
 0x5b1   :  { %11490 = vmatpush1.bf16.msra.mxu1 %v21010_v15  ;;  %11586 = vmatpush1.bf16.msra.mxu0 %v21011_v39 }
 0x5b2   :  { %11492 = vmatprep.subr.bf16.mxu1 %v21012_v42  ;;  %11588 = vmatprep.subr.bf16.mxu0 %v21013_v56  ;;  %v21016_v42 = vld [vmem:[#allocation159_spill] sm:$0xff]  ;;  %v21017_v56 = vld [vmem:[#allocation161_spill] sm:$0xff] }
 0x5b3   :  { %v3927_v34 = vpop.f32.mrb[40].mxu1  ;;  %v4140_v49 = vpop.f32.mrb[40].mxu0 }
 0x5b4   :  { %v4379_v43 = vmul.f32 %v17179_v5, %v3927_v34  ;;  %v17266_v61 = vmul.f32 %v17183_v45, %v4140_v49  ;;  %v3929_v46 = vpop.f32.mrb[41].mxu1  ;;  %v4142_v24 = vpop.f32.mrb[41].mxu0  ;;  %v21018_v5 = vld [vmem:[#allocation163_spill] sm:$0xff]  ;;  %v21020_v49 = vld [vmem:[#allocation166_spill] sm:$0xff] }
 0x5b5   :  { %v17269_v60 = vmul.f32 %v17131_v8, %v3929_v46  ;;  %11494 = vmatpush1.bf16.msra.mxu1 %v21014_v10  ;;  %11590 = vmatpush1.bf16.msra.mxu0 %v20764_v23  ;;  %v21019_v8 = vld [vmem:[#allocation165_spill] sm:$0xff]  ;;  %v21021_v45 = vld [vmem:[#allocation167_spill] sm:$0xff]  ;;  %v21024_v46 = vld [vmem:[#allocation170_spill] sm:$0xff] }
 0x5b6   :  { %v17273_v39 = vmul.f32 %v4379_v43, %v4142_v24  ;;  %11496 = vmatprep.subr.bf16.mxu1 %v21016_v42  ;;  %11592 = vmatprep.subr.bf16.mxu0 %v20767_v62  ;;  %v21022_v24 = vld [vmem:[#allocation168_spill] sm:$0xff]  ;;  %v21023_v43 = vld [vmem:[#allocation169_spill] sm:$0xff]  ;;  %v21025_v34 = vld [vmem:[#allocation171_spill] sm:$0xff] }
 0x5b7   :  { %v21031_v62 = vld [vmem:[#allocation177_spill] sm:$0xff]  ;;  %v21032_v23 = vld [vmem:[#allocation178_spill] sm:$0xff] }
 0x5b8   :  { %21015 = vst [vmem:[#allocation59_spill] sm:$0xff] %v17273_v39  ;;  %v21026_v39 = vld [vmem:[#allocation172_spill] sm:$0xff] }
 0x5b9   :  { %11498 = vmatpush1.bf16.msra.mxu1 %v21017_v56  ;;  %11594 = vmatpush1.bf16.msra.mxu0 %v20769_v20  ;;  %v21030_v20 = vld [vmem:[#allocation176_spill] sm:$0xff] }
 0x5ba   :  { %11500 = vmatprep.subr.bf16.mxu1 %v21018_v5  ;;  %11596 = vmatprep.subr.bf16.mxu0 %v20771_v40  ;;  %v21028_v40 = vld [vmem:[#allocation174_spill] sm:$0xff]  ;;  %v21049_v5 = vld [vmem:[#allocation193_spill] sm:$0xff] }
 0x5bd   :  { %11502 = vmatpush1.bf16.msra.mxu1 %v21019_v8  ;;  %11598 = vmatpush1.bf16.msra.mxu0 %v21020_v49  ;;  %v21027_v49 = vld [vmem:[#allocation173_spill] sm:$0xff] }
 0x5be   :  { %11536 = vmatprep.subr.bf16.mxu1 %v21021_v45  ;;  %11632 = vmatprep.subr.bf16.mxu0 %v21022_v24  ;;  %v21029_v24 = vld [vmem:[#allocation175_spill] sm:$0xff] }
 0x5bf   :  { %v21037_v45 = vld [vmem:[#allocation183_spill] sm:$0xff] }
 0x5c0   :  { %4962 = vmatmul.mubr.f32.vlgmr.msra.gmra.mrb[54].mxu1 %v17056_v48  ;;  %5175 = vmatmul.mubr.f32.vlgmr.msra.gmra.mrb[54].mxu0 %v17056_v48 }
 0x5c1   :  { %11538 = vmatpush1.bf16.msra.mxu1 %v21023_v43  ;;  %11634 = vmatpush1.bf16.msra.mxu0 %v21024_v46  ;;  %v21033_v46 = vld [vmem:[#allocation179_spill] sm:$0xff]  ;;  %v21036_v43 = vld [vmem:[#allocation182_spill] sm:$0xff] }
 0x5c2   :  { %11540 = vmatprep.subr.bf16.mxu1 %v21025_v34  ;;  %11636 = vmatprep.subr.bf16.mxu0 %v21026_v39  ;;  %v21034_v34 = vld [vmem:[#allocation180_spill] sm:$0xff]  ;;  %v21035_v39 = vld [vmem:[#allocation181_spill] sm:$0xff] }
 0x5c3   :  { %5103 = vmatprep.mubr.f32.mxu1 %v20330_v63  ;;  %5316 = vmatprep.mubr.f32.mxu0 %v20330_v63 }
 0x5c5   :  { %11542 = vmatpush1.bf16.msra.mxu1 %v21027_v49  ;;  %11638 = vmatpush1.bf16.msra.mxu0 %v21028_v40  ;;  %v21038_v49 = vld [vmem:[#allocation184_spill] sm:$0xff]  ;;  %v21039_v40 = vld [vmem:[#allocation185_spill] sm:$0xff] }
 0x5c6   :  { %11544 = vmatprep.subr.bf16.mxu1 %v21029_v24  ;;  %11640 = vmatprep.subr.bf16.mxu0 %v21030_v20  ;;  %v21040_v24 = vld [vmem:[#allocation186_spill] sm:$0xff]  ;;  %v21041_v20 = vld [vmem:[#allocation187_spill] sm:$0xff] }
 0x5c9   :  { %11546 = vmatpush1.bf16.msra.mxu1 %v21031_v62  ;;  %11642 = vmatpush1.bf16.msra.mxu0 %v21032_v23  ;;  %v21042_v62 = vld [vmem:[#allocation188_spill] sm:$0xff] }
 0x5ca   :  { %11548 = vmatprep.subr.bf16.mxu1 %v21033_v46  ;;  %11644 = vmatprep.subr.bf16.mxu0 %v21034_v34 }
 0x5cd   :  { %11550 = vmatpush1.bf16.msra.mxu1 %v21035_v39  ;;  %11646 = vmatpush1.bf16.msra.mxu0 %v21036_v43 }
 0x5ce   :  { %11552 = vmatprep.subr.bf16.mxu1 %v21037_v45  ;;  %11648 = vmatprep.subr.bf16.mxu0 %v21038_v49  ;;  %v21044_v49 = vld [vmem:[#allocation189_spill] sm:$0xff] }
 0x5d1   :  { %11554 = vmatpush1.bf16.msra.mxu1 %v21039_v40  ;;  %11650 = vmatpush1.bf16.msra.mxu0 %v21040_v24  ;;  %v21045_v40 = vld [vmem:[#allocation190_spill] sm:$0xff] }
 0x5d2   :  { %11556 = vmatprep.subr.bf16.mxu1 %v21041_v20  ;;  %11652 = vmatprep.subr.bf16.mxu0 %v21042_v62  ;;  %v21047_v20 = vld [vmem:[#allocation191_spill] sm:$0xff]  ;;  %v21048_v62 = vld [vmem:[#allocation192_spill] sm:$0xff] }
 0x5d3   :  { %v4069_v23 = vpop.f32.mrb[42].mxu1  ;;  %v4282_v46 = vpop.f32.mrb[42].mxu0 }
 0x5d4   :  { %v4383_v34 = vmul.f32 %v17224_v55, %v4069_v23  ;;  %v17311_v39 = vmul.f32 %v17228_v30, %v4282_v46  ;;  %v4071_v43 = vpop.f32.mrb[43].mxu1  ;;  %v4284_v8 = vpop.f32.mrb[43].mxu0  ;;  %v21050_v23 = vld [vmem:[#allocation194_spill] sm:$0xff]  ;;  %v21051_v55 = vld [vmem:[#allocation195_spill] sm:$0xff]  ;;  %v21052_v30 = vld [vmem:[#allocation196_spill] sm:$0xff] }
 0x5d5   :  { %v17314_v45 = vmul.f32 %v17176_v59, %v4071_v43  ;;  %11558 = vmatpush1.bf16.msra.mxu1 %v21044_v49  ;;  %11654 = vmatpush1.bf16.msra.mxu0 %v21045_v40  ;;  %v21053_v59 = vld [vmem:[#allocation197_spill] sm:$0xff]  ;;  %v21054_v43 = vld [vmem:[#allocation198_spill] sm:$0xff]  ;;  %v21055_v46 = vld [vmem:[#allocation199_spill] sm:$0xff] }
 0x5d6   :  { %21043 = vst [vmem:[#allocation37_spill] sm:$0xff] %v17311_v39  ;;  %v17318_v24 = vmul.f32 %v4383_v34, %v4284_v8  ;;  %11560 = vmatprep.subr.bf16.mxu1 %v21047_v20  ;;  %11656 = vmatprep.subr.bf16.mxu0 %v21048_v62  ;;  %v21056_v8 = vld [vmem:[#allocation200_spill] sm:$0xff]  ;;  %v21057_v34 = vld [vmem:[#allocation201_spill] sm:$0xff]  ;;  %v21058_v39 = vld [vmem:[#allocation202_spill] sm:$0xff] }
 0x5d7   :  { %v21064_v62 = vld [vmem:[#allocation208_spill] sm:$0xff]  ;;  %v21065_v40 = vld [vmem:[#allocation209_spill] sm:$0xff] }
 0x5d8   :  { %21046 = vst [vmem:[#allocation93_spill] sm:$0xff] %v17318_v24  ;;  %v21059_v24 = vld [vmem:[#allocation203_spill] sm:$0xff] }
 0x5d9   :  { %11562 = vmatpush1.bf16.msra.mxu1 %v21049_v5  ;;  %11658 = vmatpush1.bf16.msra.mxu0 %v21050_v23  ;;  %v21060_v23 = vld [vmem:[#allocation204_spill] sm:$0xff] }
 0x5da   :  { %11564 = vmatprep.subr.bf16.mxu1 %v21051_v55  ;;  %11660 = vmatprep.subr.bf16.mxu0 %v21052_v30  ;;  %v21062_v30 = vld [vmem:[#allocation206_spill] sm:$0xff] }
 0x5dd   :  { %11566 = vmatpush1.bf16.msra.mxu1 %v21053_v59  ;;  %11662 = vmatpush1.bf16.msra.mxu0 %v21054_v43  ;;  %v21061_v43 = vld [vmem:[#allocation205_spill] sm:$0xff]  ;;  %v21071_v59 = vld [vmem:[#allocation215_spill] sm:$0xff] }
 0x5de   :  { %11600 = vmatprep.subr.bf16.mxu1 %v21055_v46  ;;  %11696 = vmatprep.subr.bf16.mxu0 %v21056_v8  ;;  %v21063_v8 = vld [vmem:[#allocation207_spill] sm:$0xff]  ;;  %v21070_v46 = vld [vmem:[#allocation214_spill] sm:$0xff] }
 0x5e0   :  { %5104 = vmatmul.mubr.f32.vlgmr.msra.gmra.mrb[56].mxu1 %v17056_v48  ;;  %5317 = vmatmul.mubr.f32.vlgmr.msra.gmra.mrb[56].mxu0 %v17056_v48 }
 0x5e1   :  { %11602 = vmatpush1.bf16.msra.mxu1 %v21057_v34  ;;  %11698 = vmatpush1.bf16.msra.mxu0 %v21058_v39  ;;  %v21066_v34 = vld [vmem:[#allocation210_spill] sm:$0xff]  ;;  %v21067_v39 = vld [vmem:[#allocation211_spill] sm:$0xff] }
 0x5e2   :  { %11604 = vmatprep.subr.bf16.mxu1 %v21059_v24  ;;  %11700 = vmatprep.subr.bf16.mxu0 %v21060_v23  ;;  %v21068_v24 = vld [vmem:[#allocation212_spill] sm:$0xff]  ;;  %v21069_v23 = vld [vmem:[#allocation213_spill] sm:$0xff] }
 0x5e3   :  { %5245 = vmatprep.mubr.f32.mxu1 %v20330_v63  ;;  %5458 = vmatprep.mubr.f32.mxu0 %v20330_v63 }
 0x5e5   :  { %11606 = vmatpush1.bf16.msra.mxu1 %v21061_v43  ;;  %11702 = vmatpush1.bf16.msra.mxu0 %v21062_v30  ;;  %v21072_v30 = vld [vmem:[#allocation217_spill] sm:$0xff] }
 0x5e6   :  { %11608 = vmatprep.subr.bf16.mxu1 %v21063_v8  ;;  %11704 = vmatprep.subr.bf16.mxu0 %v21064_v62  ;;  %v21073_v62 = vld [vmem:[#allocation219_spill] sm:$0xff] }
 0x5e9   :  { %11610 = vmatpush1.bf16.msra.mxu1 %v21065_v40  ;;  %11706 = vmatpush1.bf16.msra.mxu0 %v21066_v34  ;;  %v21074_v40 = vld [vmem:[#allocation220_spill] sm:$0xff] }
 0x5ea   :  { %11612 = vmatprep.subr.bf16.mxu1 %v21067_v39  ;;  %11708 = vmatprep.subr.bf16.mxu0 %v21068_v24 }
 0x5ed   :  { %11614 = vmatpush1.bf16.msra.mxu1 %v21069_v23  ;;  %11710 = vmatpush1.bf16.msra.mxu0 %v21070_v46 }
 0x5ee   :  { %11616 = vmatprep.subr.bf16.mxu1 %v21071_v59  ;;  %11712 = vmatprep.subr.bf16.mxu0 %v20825_v58  ;;  %v21077_v58 = vld [vmem:[#allocation221_spill] sm:$0xff] }
 0x5f1   :  { %11618 = vmatpush1.bf16.msra.mxu1 %v21072_v30  ;;  %11714 = vmatpush1.bf16.msra.mxu0 %v20827_v18  ;;  %v21078_v18 = vld [vmem:[#allocation223_spill] sm:$0xff] }
 0x5f2   :  { %11620 = vmatprep.subr.bf16.mxu1 %v21073_v62  ;;  %11716 = vmatprep.subr.bf16.mxu0 %v21074_v40  ;;  %v21079_v40 = vld [vmem:[#allocation225_spill] sm:$0xff] }
 0x5f3   :  { %v4211_v34 = vpop.f32.mrb[44].mxu1  ;;  %v17354_v39 = vpop.f32.mrb[44].mxu0 }
 0x5f4   :  { %v17357_v24 = vmul.f32 %v17269_v60, %v4211_v34  ;;  %v4213_v23 = vpop.f32.mrb[45].mxu1  ;;  %v17359_v46 = vpop.f32.mrb[45].mxu0  ;;  %v21080_v60 = vld [vmem:[#allocation227_spill] sm:$0xff]  ;;  %v21081_v34 = vld [vmem:[#allocation229_spill] sm:$0xff] }
 0x5f5   :  { %v17362_v59 = vmul.f32 %v17221_v35, %v4213_v23  ;;  %11622 = vmatpush1.bf16.msra.mxu1 %v21077_v58  ;;  %11718 = vmatpush1.bf16.msra.mxu0 %v20831_v13  ;;  %v21082_v35 = vld [vmem:[#allocation231_spill] sm:$0xff]  ;;  %v21083_v23 = vld [vmem:[#allocation233_spill] sm:$0xff]  ;;  %v21093_v13 = vld [vmem:[#allocation248_spill] sm:$0xff] }
 0x5f6   :  { %21075 = vst [vmem:[#allocation121_spill] sm:$0xff] %v17357_v24  ;;  %11624 = vmatprep.subr.bf16.mxu1 %v21078_v18  ;;  %11720 = vmatprep.subr.bf16.mxu0 %v20832_v21  ;;  %v21084_v24 = vld [vmem:[#allocation235_spill] sm:$0xff] }
 0x5f7   :  { %21076 = vst [vmem:[#allocation125_spill] sm:$0xff] %v17362_v59  ;;  %v21085_v59 = vld [vmem:[#allocation237_spill] sm:$0xff]  ;;  %v21092_v21 = vld [vmem:[#allocation247_spill] sm:$0xff] }
 0x5f9   :  { %11626 = vmatpush1.bf16.msra.mxu1 %v21079_v40  ;;  %11722 = vmatpush1.bf16.msra.mxu0 %v20833_v37  ;;  %v21091_v37 = vld [vmem:[#allocation246_spill] sm:$0xff] }
 0x5fa   :  { %11628 = vmatprep.subr.bf16.mxu1 %v21080_v60  ;;  %11724 = vmatprep.subr.bf16.mxu0 %v20834_v11  ;;  %v21089_v11 = vld [vmem:[#allocation244_spill] sm:$0xff] }
 0x5fd   :  { %11630 = vmatpush1.bf16.msra.mxu1 %v21081_v34  ;;  %11726 = vmatpush1.bf16.msra.mxu0 %v20835_v44  ;;  %v21087_v44 = vld [vmem:[#allocation241_spill] sm:$0xff] }
 0x5fe   :  { %11664 = vmatprep.subr.bf16.mxu1 %v21082_v35  ;;  %11760 = vmatprep.subr.bf16.mxu0 %v20836_v1  ;;  %v21086_v1 = vld [vmem:[#allocation239_spill] sm:$0xff] }
 0x600   :  { %5246 = vmatmul.mubr.f32.vlgmr.msra.gmra.mrb[58].mxu1 %v17056_v48  ;;  %5459 = vmatmul.mubr.f32.vlgmr.msra.gmra.mrb[58].mxu0 %v17056_v48 }
 0x601   :  { %11666 = vmatpush1.bf16.msra.mxu1 %v21083_v23  ;;  %11762 = vmatpush1.bf16.msra.mxu0 %v20837_v19  ;;  %v21088_v19 = vld [vmem:[#allocation243_spill] sm:$0xff] }
 0x602   :  { %11668 = vmatprep.subr.bf16.mxu1 %v21084_v24  ;;  %11764 = vmatprep.subr.bf16.mxu0 %v20838_v6  ;;  %v21090_v6 = vld [vmem:[#allocation245_spill] sm:$0xff] }
 0x603   :  { %5387 = vmatprep.mubr.f32.mxu1 %v20330_v63  ;;  %5600 = vmatprep.mubr.f32.mxu0 %v20330_v63 }
 0x605   :  { %11670 = vmatpush1.bf16.msra.mxu1 %v21085_v59  ;;  %11766 = vmatpush1.bf16.msra.mxu0 %v20839_v47  ;;  %v21094_v47 = vld [vmem:[#allocation249_spill] sm:$0xff] }
 0x606   :  { %11672 = vmatprep.subr.bf16.mxu1 %v21086_v1  ;;  %11768 = vmatprep.subr.bf16.mxu0 %v20840_v4  ;;  %v21095_v4 = vld [vmem:[#allocation251_spill] sm:$0xff] }
 0x609   :  { %11674 = vmatpush1.bf16.msra.mxu1 %v21087_v44  ;;  %11770 = vmatpush1.bf16.msra.mxu0 %v20841_v9 }
 0x60a   :  { %11676 = vmatprep.subr.bf16.mxu1 %v21088_v19  ;;  %11772 = vmatprep.subr.bf16.mxu0 %v21089_v11 }
 0x60d   :  { %11678 = vmatpush1.bf16.msra.mxu1 %v21090_v6  ;;  %11774 = vmatpush1.bf16.msra.mxu0 %v21091_v37 }
 0x60e   :  { %11680 = vmatprep.subr.bf16.mxu1 %v21092_v21  ;;  %11776 = vmatprep.subr.bf16.mxu0 %v21093_v13  ;;  %v21098_v13 = vld [vmem:[#allocation253_spill] sm:$0xff] }
 0x611   :  { %11682 = vmatpush1.bf16.msra.mxu1 %v21094_v47  ;;  %11778 = vmatpush1.bf16.msra.mxu0 %v20845_v12  ;;  %v21099_v12 = vld [vmem:[#allocation255_spill] sm:$0xff] }
 0x612   :  { %11684 = vmatprep.subr.bf16.mxu1 %v21095_v4  ;;  %11780 = vmatprep.subr.bf16.mxu0 %v20846_v3  ;;  %v21100_v3 = vld [vmem:[#allocation257_spill] sm:$0xff] }
 0x613   :  { %v4353_v9 = vpop.f32.mrb[46].mxu1  ;;  %v17400_v19 = vpop.f32.mrb[46].mxu0 }
 0x614   :  { %v17403_v11 = vmul.f32 %v17314_v45, %v4353_v9  ;;  %v4355_v6 = vpop.f32.mrb[47].mxu1  ;;  %v17405_v37 = vpop.f32.mrb[47].mxu0  ;;  %v21101_v9 = vld [vmem:[#allocation259_spill] sm:$0xff]  ;;  %v21102_v45 = vld [vmem:[#allocation261_spill] sm:$0xff] }
 0x615   :  { %v17408_v21 = vmul.f32 %v17266_v61, %v4355_v6  ;;  %11686 = vmatpush1.bf16.msra.mxu1 %v21098_v13  ;;  %11782 = vmatpush1.bf16.msra.mxu0 %v20847_v14  ;;  %v21103_v6 = vld [vmem:[#allocation263_spill] sm:$0xff]  ;;  %v21104_v61 = vld [vmem:[#allocation265_spill] sm:$0xff] }
 0x616   :  { %21096 = vst [vmem:[#allocation153_spill] sm:$0xff] %v17403_v11  ;;  %11688 = vmatprep.subr.bf16.mxu1 %v21099_v12  ;;  %11784 = vmatprep.subr.bf16.mxu0 %v20848_v2  ;;  %v21105_v11 = vld [vmem:[#allocation267_spill] sm:$0xff]  ;;  %v21113_v2 = vld [vmem:[#allocation278_spill] sm:$0xff] }
 0x617   :  { %21097 = vst [vmem:[#allocation157_spill] sm:$0xff] %v17408_v21  ;;  %v21106_v21 = vld [vmem:[#allocation269_spill] sm:$0xff]  ;;  %v21114_v14 = vld [vmem:[#allocation279_spill] sm:$0xff] }
 0x619   :  { %11690 = vmatpush1.bf16.msra.mxu1 %v21100_v3  ;;  %11786 = vmatpush1.bf16.msra.mxu0 %v20849_v25  ;;  %v21111_v25 = vld [vmem:[#allocation276_spill] sm:$0xff] }
 0x61a   :  { %11692 = vmatprep.subr.bf16.mxu1 %v21101_v9  ;;  %11788 = vmatprep.subr.bf16.mxu0 %v20850_v41  ;;  %v21109_v41 = vld [vmem:[#allocation274_spill] sm:$0xff] }
 0x61d   :  { %11694 = vmatpush1.bf16.msra.mxu1 %v21102_v45  ;;  %11790 = vmatpush1.bf16.msra.mxu0 %v20851_v26  ;;  %v21108_v26 = vld [vmem:[#allocation273_spill] sm:$0xff] }
 0x61e   :  { %11728 = vmatprep.subr.bf16.mxu1 %v21103_v6  ;;  %11824 = vmatprep.subr.bf16.mxu0 %v20852_v50  ;;  %v21107_v50 = vld [vmem:[#allocation271_spill] sm:$0xff] }
 0x620   :  { %5388 = vmatmul.mubr.f32.vlgmr.msra.gmra.mrb[60].mxu1 %v17056_v48  ;;  %5601 = vmatmul.mubr.f32.vlgmr.msra.gmra.mrb[60].mxu0 %v17056_v48 }
 0x621   :  { %11730 = vmatpush1.bf16.msra.mxu1 %v21104_v61  ;;  %11826 = vmatpush1.bf16.msra.mxu0 %v20853_v28  ;;  %v21110_v28 = vld [vmem:[#allocation275_spill] sm:$0xff] }
 0x622   :  { %11732 = vmatprep.subr.bf16.mxu1 %v21105_v11  ;;  %11828 = vmatprep.subr.bf16.mxu0 %v20854_v22  ;;  %v21112_v22 = vld [vmem:[#allocation277_spill] sm:$0xff] }
 0x623   :  { %5529 = vmatprep.mubr.f32.mxu1 %v20330_v63  ;;  %5742 = vmatprep.mubr.f32.mxu0 %v20330_v63 }
 0x625   :  { %11734 = vmatpush1.bf16.msra.mxu1 %v21106_v21  ;;  %11830 = vmatpush1.bf16.msra.mxu0 %v20855_v31  ;;  %v21115_v21 = vld [vmem:[#allocation280_spill] sm:$0xff]  ;;  %v21116_v31 = vld [vmem:[#allocation281_spill] sm:$0xff] }
 0x626   :  { %11736 = vmatprep.subr.bf16.mxu1 %v21107_v50  ;;  %11832 = vmatprep.subr.bf16.mxu0 %v20856_v33  ;;  %v21117_v50 = vld [vmem:[#allocation282_spill] sm:$0xff]  ;;  %v21118_v33 = vld [vmem:[#allocation283_spill] sm:$0xff] }
 0x629   :  { %11738 = vmatpush1.bf16.msra.mxu1 %v21108_v26  ;;  %11834 = vmatpush1.bf16.msra.mxu0 %v21109_v41 }
 0x62a   :  { %11740 = vmatprep.subr.bf16.mxu1 %v21110_v28  ;;  %11836 = vmatprep.subr.bf16.mxu0 %v21111_v25 }
 0x62d   :  { %11742 = vmatpush1.bf16.msra.mxu1 %v21112_v22  ;;  %11838 = vmatpush1.bf16.msra.mxu0 %v21113_v2 }
 0x62e   :  { %11744 = vmatprep.subr.bf16.mxu1 %v21114_v14  ;;  %11840 = vmatprep.subr.bf16.mxu0 %v21115_v21  ;;  %v21119_v14 = vld [vmem:[#allocation285_spill] sm:$0xff]  ;;  %v21120_v21 = vld [vmem:[#allocation287_spill] sm:$0xff] }
 0x631   :  { %11746 = vmatpush1.bf16.msra.mxu1 %v21116_v31  ;;  %11842 = vmatpush1.bf16.msra.mxu0 %v21117_v50  ;;  %v21121_v50 = vld [vmem:[#allocation290_spill] sm:$0xff] }
 0x632   :  { %11748 = vmatprep.subr.bf16.mxu1 %v21118_v33  ;;  %11844 = vmatprep.subr.bf16.mxu0 %v20865_v38  ;;  %v21122_v38 = vld [vmem:[#allocation292_spill] sm:$0xff] }
 0x633   :  { %v4537_v41 = vpop.f32.mrb[48].mxu1  ;;  %v4750_v28 = vpop.f32.mrb[48].mxu0 }
 0x634   :  { %v17447_v25 = vmul.f32 %v4750_v28, %v17359_v46  ;;  %v17449_v22 = vpop.f32.mrb[49].mxu1  ;;  %v4752_v2 = vpop.f32.mrb[49].mxu0  ;;  %v21123_v28 = vld [vmem:[#allocation294_spill] sm:$0xff]  ;;  %v21126_v46 = vld [vmem:[#allocation300_spill] sm:$0xff] }
 0x635   :  { %v17451_v26 = vmul.f32 %v4752_v2, %v4537_v41  ;;  %11750 = vmatpush1.bf16.msra.mxu1 %v21119_v14  ;;  %11846 = vmatpush1.bf16.msra.mxu0 %v20866_v52  ;;  %v21124_v2 = vld [vmem:[#allocation296_spill] sm:$0xff]  ;;  %v21125_v41 = vld [vmem:[#allocation298_spill] sm:$0xff]  ;;  %v21133_v52 = vld [vmem:[#allocation309_spill] sm:$0xff] }
 0x636   :  { %11752 = vmatprep.subr.bf16.mxu1 %v21120_v21  ;;  %11848 = vmatprep.subr.bf16.mxu0 %v20867_v7  ;;  %v21131_v7 = vld [vmem:[#allocation307_spill] sm:$0xff] }
 0x639   :  { %11754 = vmatpush1.bf16.msra.mxu1 %v21121_v50  ;;  %11850 = vmatpush1.bf16.msra.mxu0 %v20868_v51  ;;  %v21130_v51 = vld [vmem:[#allocation306_spill] sm:$0xff] }
 0x63a   :  { %11756 = vmatprep.subr.bf16.mxu1 %v21122_v38  ;;  %11852 = vmatprep.subr.bf16.mxu0 %v20869_v27  ;;  %v21129_v27 = vld [vmem:[#allocation305_spill] sm:$0xff] }
 0x63d   :  { %11758 = vmatpush1.bf16.msra.mxu1 %v21123_v28  ;;  %11854 = vmatpush1.bf16.msra.mxu0 %v20870_v57  ;;  %v21127_v57 = vld [vmem:[#allocation302_spill] sm:$0xff] }
 0x63e   :  { %11792 = vmatprep.subr.bf16.mxu1 %v21124_v2  ;;  %11888 = vmatprep.subr.bf16.mxu0 %v20871_v36  ;;  %v21128_v36 = vld [vmem:[#allocation304_spill] sm:$0xff]  ;;  %v21174_v28 = vld [vmem:[#allocation338_spill] sm:$0xff] }
 0x640   :  { %5530 = vmatmul.mubr.f32.vlgmr.msra.gmra.mrb[62].mxu1 %v17056_v48  ;;  %5743 = vmatmul.mubr.f32.vlgmr.msra.gmra.mrb[62].mxu0 %v17056_v48 }
 0x641   :  { %11794 = vmatpush1.bf16.msra.mxu1 %v21125_v41  ;;  %11890 = vmatpush1.bf16.msra.mxu0 %v20872_v54  ;;  %v21132_v54 = vld [vmem:[#allocation308_spill] sm:$0xff] }
 0x642   :  { %11796 = vmatprep.subr.bf16.mxu1 %v21126_v46  ;;  %11892 = vmatprep.subr.bf16.mxu0 %v20873_v0  ;;  %v21134_v0 = vld [vmem:[#allocation310_spill] sm:$0xff]  ;;  %v21135_v46 = vld [vmem:[#allocation311_spill] sm:$0xff]  ;;  %v21136_v41 = vld [vmem:[#allocation312_spill] sm:$0xff] }
 0x643   :  { %5671 = vmatprep.mubr.f32.mxu1 %v20330_v63  ;;  %5884 = vmatprep.mubr.f32.mxu0 %v20330_v63 }
 0x645   :  { %11798 = vmatpush1.bf16.msra.mxu1 %v21127_v57  ;;  %11894 = vmatpush1.bf16.msra.mxu0 %v20874_v32  ;;  %v21137_v57 = vld [vmem:[#allocation313_spill] sm:$0xff]  ;;  %v21138_v32 = vld [vmem:[#allocation314_spill] sm:$0xff] }
 0x646   :  { %11800 = vmatprep.subr.bf16.mxu1 %v21128_v36  ;;  %11896 = vmatprep.subr.bf16.mxu0 %v21129_v27  ;;  %v21139_v36 = vld [vmem:[#allocation315_spill] sm:$0xff]  ;;  %v21140_v27 = vld [vmem:[#allocation316_spill] sm:$0xff] }
 0x649   :  { %11802 = vmatpush1.bf16.msra.mxu1 %v21130_v51  ;;  %11898 = vmatpush1.bf16.msra.mxu0 %v21131_v7  ;;  %v21141_v51 = vld [vmem:[#allocation317_spill] sm:$0xff] }
 0x64a   :  { %11804 = vmatprep.subr.bf16.mxu1 %v21132_v54  ;;  %11900 = vmatprep.subr.bf16.mxu0 %v21133_v52 }
 0x64d   :  { %11806 = vmatpush1.bf16.msra.mxu1 %v21134_v0  ;;  %11902 = vmatpush1.bf16.msra.mxu0 %v21135_v46 }
 0x64e   :  { %11808 = vmatprep.subr.bf16.mxu1 %v21136_v41  ;;  %11904 = vmatprep.subr.bf16.mxu0 %v21137_v57  ;;  %v21142_v57 = vld [vmem:[#allocation318_spill] sm:$0xff] }
 0x651   :  { %11810 = vmatpush1.bf16.msra.mxu1 %v21138_v32  ;;  %11906 = vmatpush1.bf16.msra.mxu0 %v21139_v36  ;;  %v21143_v36 = vld [vmem:[#allocation320_spill] sm:$0xff]  ;;  %v21146_v32 = vld [vmem:[#allocation323_spill] sm:$0xff] }
 0x652   :  { %11812 = vmatprep.subr.bf16.mxu1 %v21140_v27  ;;  %11908 = vmatprep.subr.bf16.mxu0 %v21141_v51  ;;  %v21144_v27 = vld [vmem:[#allocation321_spill] sm:$0xff]  ;;  %v21145_v51 = vld [vmem:[#allocation322_spill] sm:$0xff] }
 0x653   :  { %v4679_v7 = vpop.f32.mrb[50].mxu1  ;;  %v4892_v54 = vpop.f32.mrb[50].mxu0 }
 0x654   :  { %v17490_v52 = vmul.f32 %v4892_v54, %v17405_v37  ;;  %v4681_v0 = vpop.f32.mrb[51].mxu1  ;;  %v4894_v2 = vpop.f32.mrb[51].mxu0  ;;  %v21147_v37 = vld [vmem:[#allocation324_spill] sm:$0xff]  ;;  %v21148_v54 = vld [vmem:[#allocation325_spill] sm:$0xff] }
 0x655   :  { %v17493_v46 = vmul.f32 %v4681_v0, %v17354_v39  ;;  %v17495_v41 = vmul.f32 %v4894_v2, %v4679_v7  ;;  %11814 = vmatpush1.bf16.msra.mxu1 %v21142_v57  ;;  %11910 = vmatpush1.bf16.msra.mxu0 %v20888_v16  ;;  %v21149_v0 = vld [vmem:[#allocation326_spill] sm:$0xff]  ;;  %v21150_v7 = vld [vmem:[#allocation327_spill] sm:$0xff]  ;;  %v21151_v39 = vld [vmem:[#allocation328_spill] sm:$0xff] }
 0x656   :  { %11816 = vmatprep.subr.bf16.mxu1 %v21143_v36  ;;  %11912 = vmatprep.subr.bf16.mxu0 %v21144_v27  ;;  %v21152_v2 = vld [vmem:[#allocation35_spill] sm:$0xff]  ;;  %v21153_v27 = vld [vmem:[#allocation329_spill] sm:$0xff]  ;;  %v21167_v36 = vld [vmem:[#allocation336_spill] sm:$0xff] }
 0x657   :  { %v21154_v16 = vld [vmem:[#allocation39_spill] sm:$0xff] }
 0x659   :  { %11818 = vmatpush1.bf16.msra.mxu1 %v21145_v51  ;;  %11914 = vmatpush1.bf16.msra.mxu0 %v21146_v32  ;;  %v21155_v32 = vld [vmem:[#allocation330_spill] sm:$0xff]  ;;  %v21166_v51 = vld [vmem:[#allocation51_spill] sm:$0xff] }
 0x65a   :  { %11820 = vmatprep.subr.bf16.mxu1 %v21147_v37  ;;  %11916 = vmatprep.subr.bf16.mxu0 %v21148_v54  ;;  %v21156_v37 = vld [vmem:[#allocation41_spill] sm:$0xff]  ;;  %v21158_v54 = vld [vmem:[#allocation43_spill] sm:$0xff] }
 0x65d   :  { %11822 = vmatpush1.bf16.msra.mxu1 %v21149_v0  ;;  %11918 = vmatpush1.bf16.msra.mxu0 %v21150_v7  ;;  %v21157_v7 = vld [vmem:[#allocation331_spill] sm:$0xff]  ;;  %v21161_v0 = vld [vmem:[#allocation333_spill] sm:$0xff] }
 0x65e   :  { %11856 = vmatprep.subr.bf16.mxu1 %v21151_v39  ;;  %11952 = vmatprep.subr.bf16.mxu0 %v21152_v2  ;;  %v21159_v2 = vld [vmem:[#allocation332_spill] sm:$0xff]  ;;  %v21160_v39 = vld [vmem:[#allocation45_spill] sm:$0xff] }
 0x660   :  { %5672 = vmatmul.mubr.f32.vlgmr.msra.gmra.mrb[64].mxu1 %v17056_v48  ;;  %5885 = vmatmul.mubr.f32.vlgmr.msra.gmra.mrb[64].mxu0 %v17056_v48 }
 0x661   :  { %11858 = vmatpush1.bf16.msra.mxu1 %v21153_v27  ;;  %11954 = vmatpush1.bf16.msra.mxu0 %v21154_v16  ;;  %v21162_v27 = vld [vmem:[#allocation47_spill] sm:$0xff]  ;;  %v21163_v16 = vld [vmem:[#allocation334_spill] sm:$0xff] }
 0x662   :  { %11860 = vmatprep.subr.bf16.mxu1 %v21155_v32  ;;  %11956 = vmatprep.subr.bf16.mxu0 %v21156_v37  ;;  %v21164_v32 = vld [vmem:[#allocation49_spill] sm:$0xff]  ;;  %v21165_v37 = vld [vmem:[#allocation335_spill] sm:$0xff] }
 0x663   :  { %5813 = vmatprep.mubr.f32.mxu1 %v20330_v63  ;;  %6068 = vmatprep.mubr.f32.mxu0 %v20330_v63 }
 0x665   :  { %11862 = vmatpush1.bf16.msra.mxu1 %v21157_v7  ;;  %11958 = vmatpush1.bf16.msra.mxu0 %v21158_v54  ;;  %v21168_v7 = vld [vmem:[#allocation53_spill] sm:$0xff] }
 0x666   :  { %11864 = vmatprep.subr.bf16.mxu1 %v21159_v2  ;;  %11960 = vmatprep.subr.bf16.mxu0 %v21160_v39  ;;  %v21169_v54 = vld [vmem:[#allocation337_spill] sm:$0xff]  ;;  %v21170_v2 = vld [vmem:[#allocation55_spill] sm:$0xff]  ;;  %v21171_v39 = vld [vmem:[#allocation60_spill] sm:$0xff] }
 0x669   :  { %11866 = vmatpush1.bf16.msra.mxu1 %v21161_v0  ;;  %11962 = vmatpush1.bf16.msra.mxu0 %v21162_v27  ;;  %v21172_v0 = vld [vmem:[#allocation38_spill] sm:$0xff] }
 0x66a   :  { %11868 = vmatprep.subr.bf16.mxu1 %v21163_v16  ;;  %11964 = vmatprep.subr.bf16.mxu0 %v21164_v32  ;;  %v21173_v57 = vsub.f32 %v21171_v39, %v21172_v0  ;;  %v21175_v16 = vld [vmem:[#allocation57_spill] sm:$0xff] }
 0x66b   :  { %v21177_v0 = vld [vmem:[#allocation61_spill] sm:$0xff] }
 0x66c   :  { %v649_v27 = vmul.f32 0.5, %v21173_v57 }
 0x66d   :  { %11870 = vmatpush1.bf16.msra.mxu1 %v21165_v37  ;;  %11966 = vmatpush1.bf16.msra.mxu0 %v21166_v51 }
 0x66e   :  { %11872 = vmatprep.subr.bf16.mxu1 %v21167_v36  ;;  %11968 = vmatprep.subr.bf16.mxu0 %v21168_v7  ;;  %v653_v57 = vsub.f32 0.5, %v649_v27 }
 0x671   :  { %11874 = vmatpush1.bf16.msra.mxu1 %v21169_v54  ;;  %11970 = vmatpush1.bf16.msra.mxu0 %v21170_v2  ;;  %v21176_v2 = vld [vmem:[#allocation339_spill] sm:$0xff] }
 0x672   :  { %11876 = vmatprep.subr.bf16.mxu1 %v21174_v28  ;;  %11972 = vmatprep.subr.bf16.mxu0 %v21175_v16  ;;  %v21178_v16 = vld [vmem:[#allocation340_spill] sm:$0xff]  ;;  %v21179_v28 = vld [vmem:[#allocation63_spill] sm:$0xff] }
 0x673   :  { %v4821_v32 = vpop.f32.mrb[52].mxu1  ;;  %v5034_v37 = vpop.f32.mrb[52].mxu0 }
 0x674   :  { %v5894_v51 = vmul.f32 %v4821_v32, %v17449_v22  ;;  %v17538_v36 = vmul.f32 %v17451_v26, %v5034_v37  ;;  %v4823_v7 = vpop.f32.mrb[53].mxu1  ;;  %v5036_v38 = vpop.f32.mrb[53].mxu0  ;;  %v21180_v22 = vld [vmem:[#allocation341_spill] sm:$0xff]  ;;  %v657_v37 = vmax.f32 %v653_v57, 0.0  ;;  %v21182_v32 = vld [vmem:[#allocation342_spill] sm:$0xff] }
 0x675   :  { %v17541_v54 = vmul.f32 %v4823_v7, %v17400_v19  ;;  %11878 = vmatpush1.bf16.msra.mxu1 %v21176_v2  ;;  %11974 = vmatpush1.bf16.msra.mxu0 %v21177_v0  ;;  %v21181_v26 = vld [vmem:[#allocation65_spill] sm:$0xff]  ;;  %v21183_v19 = vld [vmem:[#allocation67_spill] sm:$0xff] }
 0x676   :  { %v17545_v39 = vmul.f32 %v5894_v51, %v5036_v38  ;;  %11880 = vmatprep.subr.bf16.mxu1 %v21178_v16  ;;  %11976 = vmatprep.subr.bf16.mxu0 %v21179_v28  ;;  %v21184_v7 = vld [vmem:[#allocation343_spill] sm:$0xff]  ;;  %v21185_v2 = vld [vmem:[#allocation69_spill] sm:$0xff]  ;;  %v17555_v27 = vmin.f32 %v657_v37, 1.0  ;;  %v21188_v28 = vld [vmem:[#allocation4_spill] sm:$0xff] }
 0x677   :  { %v21186_v38 = vld [vmem:[#allocation3_spill] sm:$0xff]  ;;  %v21189_v0 = vld [vmem:[#allocation73_spill] sm:$0xff] }
 0x678   :  { %v21187_v51 = vld [vmem:[#allocation71_spill] sm:$0xff]  ;;  %v21190_v57 = vld [vmem:[#allocation5_spill] sm:$0xff] }
 0x679   :  { %11882 = vmatpush1.bf16.msra.mxu1 %v21180_v22  ;;  %11978 = vmatpush1.bf16.msra.mxu0 %v21181_v26  ;;  %v21191_v26 = vld [vmem:[#allocation75_spill] sm:$0xff]  ;;  %v21193_v37 = vld [vmem:[#allocation77_spill] sm:$0xff] }
 0x67a   :  { %11884 = vmatprep.subr.bf16.mxu1 %v21182_v32  ;;  %11980 = vmatprep.subr.bf16.mxu0 %v21183_v19  ;;  %v21194_v19 = vld [vmem:[#allocation7_spill] sm:$0xff] }
 0x67d   :  { %11886 = vmatpush1.bf16.msra.mxu1 %v21184_v7  ;;  %11982 = vmatpush1.bf16.msra.mxu0 %v21185_v2  ;;  %v21192_v2 = vld [vmem:[#allocation6_spill] sm:$0xff]  ;;  %v21202_v7 = vld [vmem:[#allocation11_spill] sm:$0xff] }
 0x67e   :  { %11920 = vmatprep.subr.bf16.mxu1 %v21186_v38  ;;  %12016 = vmatprep.subr.bf16.mxu0 %v21187_v51  ;;  %v21196_v38 = vld [vmem:[#allocation8_spill] sm:$0xff]  ;;  %v21197_v51 = vld [vmem:[#allocation81_spill] sm:$0xff] }
 0x680   :  { %5814 = vmatmul.mubr.f32.vlgmr.msra.gmra.mrb[66].mxu1 %v17056_v48  ;;  %6069 = vmatmul.mubr.f32.vlgmr.msra.gmra.mrb[66].mxu0 %v17555_v27  ;;  %v21195_v48 = vld [vmem:[#allocation79_spill] sm:$0xff] }
 0x681   :  { %11922 = vmatpush1.bf16.msra.mxu1 %v21188_v28  ;;  %12018 = vmatpush1.bf16.msra.mxu0 %v21189_v0  ;;  %v21198_v28 = vld [vmem:[#allocation9_spill] sm:$0xff]  ;;  %v21199_v0 = vld [vmem:[#allocation83_spill] sm:$0xff] }
 0x682   :  { %11924 = vmatprep.subr.bf16.mxu1 %v21190_v57  ;;  %12020 = vmatprep.subr.bf16.mxu0 %v21191_v26  ;;  %v21200_v57 = vld [vmem:[#allocation10_spill] sm:$0xff]  ;;  %v21201_v26 = vld [vmem:[#allocation85_spill] sm:$0xff] }
 0x683   :  { %5997 = vmatprep.mubr.f32.mxu1 %v20330_v63  ;;  %6210 = vmatprep.mubr.f32.mxu0 %v20330_v63 }
 0x685   :  { %11926 = vmatpush1.bf16.msra.mxu1 %v21192_v2  ;;  %12022 = vmatpush1.bf16.msra.mxu0 %v21193_v37  ;;  %v21203_v2 = vld [vmem:[#allocation87_spill] sm:$0xff]  ;;  %v21204_v37 = vld [vmem:[#allocation12_spill] sm:$0xff] }
 0x686   :  { %11928 = vmatprep.subr.bf16.mxu1 %v21194_v19  ;;  %12024 = vmatprep.subr.bf16.mxu0 %v21195_v48  ;;  %v21205_v19 = vld [vmem:[#allocation89_spill] sm:$0xff]  ;;  %v21206_v48 = vld [vmem:[#allocation23_spill] sm:$0xff] }
 0x689   :  { %11930 = vmatpush1.bf16.msra.mxu1 %v21196_v38  ;;  %12026 = vmatpush1.bf16.msra.mxu0 %v21197_v51  ;;  %v21207_v38 = vld [vmem:[#allocation91_spill] sm:$0xff] }
 0x68a   :  { %11932 = vmatprep.subr.bf16.mxu1 %v21198_v28  ;;  %12028 = vmatprep.subr.bf16.mxu0 %v21199_v0 }
 0x68d   :  { %11934 = vmatpush1.bf16.msra.mxu1 %v21200_v57  ;;  %12030 = vmatpush1.bf16.msra.mxu0 %v21201_v26 }
 0x68e   :  { %11936 = vmatprep.subr.bf16.mxu1 %v21202_v7  ;;  %12032 = vmatprep.subr.bf16.mxu0 %v21203_v2  ;;  %v21208_v2 = vld [vmem:[#allocation25_spill] sm:$0xff] }
 0x691   :  { %11938 = vmatpush1.bf16.msra.mxu1 %v21204_v37  ;;  %12034 = vmatpush1.bf16.msra.mxu0 %v21205_v19  ;;  %v21209_v19 = vld [vmem:[#allocation27_spill] sm:$0xff] }
 0x692   :  { %11940 = vmatprep.subr.bf16.mxu1 %v21206_v48  ;;  %12036 = vmatprep.subr.bf16.mxu0 %v21207_v38  ;;  %v21210_v48 = vld [vmem:[#allocation95_spill] sm:$0xff]  ;;  %v21211_v38 = vld [vmem:[#allocation29_spill] sm:$0xff] }
 0x693   :  { %v4963_v51 = vpop.f32.mrb[54].mxu1  ;;  %v5176_v28 = vpop.f32.mrb[54].mxu0 }
 0x694   :  { %v5898_v0 = vmul.f32 %v17493_v46, %v4963_v51  ;;  %v17585_v57 = vmul.f32 %v17495_v41, %v5176_v28  ;;  %v4965_v26 = vpop.f32.mrb[55].mxu1  ;;  %v5178_v32 = vpop.f32.mrb[55].mxu0  ;;  %v21212_v46 = vld [vmem:[#allocation97_spill] sm:$0xff]  ;;  %v21213_v41 = vld [vmem:[#allocation31_spill] sm:$0xff] }
 0x695   :  { %v17588_v7 = vmul.f32 %v17447_v25, %v4965_v26  ;;  %11942 = vmatpush1.bf16.msra.mxu1 %v21208_v2  ;;  %12038 = vmatpush1.bf16.msra.mxu0 %v20952_v29  ;;  %v21214_v51 = vld [vmem:[#allocation99_spill] sm:$0xff]  ;;  %v21215_v25 = vld [vmem:[#allocation33_spill] sm:$0xff] }
 0x696   :  { %v17592_v37 = vmul.f32 %v5898_v0, %v5178_v32  ;;  %11944 = vmatprep.subr.bf16.mxu1 %v21209_v19  ;;  %12040 = vmatprep.subr.bf16.mxu0 %v21210_v48  ;;  %v21216_v28 = vld [vmem:[#allocation101_spill] sm:$0xff]  ;;  %v21218_v29 = vld [vmem:[#allocation103_spill] sm:$0xff]  ;;  %v21219_v32 = vld [vmem:[#allocation14_spill] sm:$0xff] }
 0x697   :  { %v21217_v26 = vld [vmem:[#allocation13_spill] sm:$0xff]  ;;  %v21221_v2 = vld [vmem:[#allocation15_spill] sm:$0xff]  ;;  %v21223_v48 = vld [vmem:[#allocation16_spill] sm:$0xff] }
 0x698   :  { %v21220_v0 = vld [vmem:[#allocation105_spill] sm:$0xff]  ;;  %v21222_v19 = vld [vmem:[#allocation107_spill] sm:$0xff] }
 0x699   :  { %11946 = vmatpush1.bf16.msra.mxu1 %v21211_v38  ;;  %12042 = vmatpush1.bf16.msra.mxu0 %v21212_v46  ;;  %v21224_v38 = vld [vmem:[#allocation109_spill] sm:$0xff] }
 0x69a   :  { %11948 = vmatprep.subr.bf16.mxu1 %v21213_v41  ;;  %12044 = vmatprep.subr.bf16.mxu0 %v21214_v51  ;;  %v21225_v46 = vld [vmem:[#allocation17_spill] sm:$0xff]  ;;  %v21226_v41 = vld [vmem:[#allocation111_spill] sm:$0xff]  ;;  %v21227_v51 = vld [vmem:[#allocation18_spill] sm:$0xff] }
 0x69d   :  { %11950 = vmatpush1.bf16.msra.mxu1 %v21215_v25  ;;  %12046 = vmatpush1.bf16.msra.mxu0 %v21216_v28  ;;  %v21228_v25 = vld [vmem:[#allocation113_spill] sm:$0xff]  ;;  %v21229_v28 = vld [vmem:[#allocation19_spill] sm:$0xff] }
 0x69e   :  { %11984 = vmatprep.subr.bf16.mxu1 %v21217_v26  ;;  %12080 = vmatprep.subr.bf16.mxu0 %v21218_v29  ;;  %v21230_v26 = vld [vmem:[#allocation115_spill] sm:$0xff]  ;;  %v21231_v29 = vld [vmem:[#allocation20_spill] sm:$0xff] }
 0x6a0   :  { %5998 = vmatmul.mubr.f32.vlgmr.msra.gmra.mrb[68].mxu1 %v17555_v27  ;;  %6211 = vmatmul.mubr.f32.vlgmr.msra.gmra.mrb[68].mxu0 %v17555_v27 }
 0x6a1   :  { %11986 = vmatpush1.bf16.msra.mxu1 %v21219_v32  ;;  %12082 = vmatpush1.bf16.msra.mxu0 %v21220_v0  ;;  %v21232_v32 = vld [vmem:[#allocation117_spill] sm:$0xff] }
 0x6a2   :  { %11988 = vmatprep.subr.bf16.mxu1 %v21221_v2  ;;  %12084 = vmatprep.subr.bf16.mxu0 %v21222_v19  ;;  %v21233_v0 = vld [vmem:[#allocation21_spill] sm:$0xff]  ;;  %v21234_v2 = vld [vmem:[#allocation119_spill] sm:$0xff]  ;;  %v21235_v19 = vld [vmem:[#allocation22_spill] sm:$0xff] }
 0x6a3   :  { %6139 = vmatprep.mubr.f32.mxu1 %v20330_v63  ;;  %6352 = vmatprep.mubr.f32.mxu0 %v20330_v63 }
 0x6a5   :  { %11990 = vmatpush1.bf16.msra.mxu1 %v21223_v48  ;;  %12086 = vmatpush1.bf16.msra.mxu0 %v21224_v38  ;;  %v21236_v48 = vld [vmem:[#allocation24_spill] sm:$0xff]  ;;  %v21237_v38 = vld [vmem:[#allocation123_spill] sm:$0xff] }
 0x6a6   :  { %11992 = vmatprep.subr.bf16.mxu1 %v21225_v46  ;;  %12088 = vmatprep.subr.bf16.mxu0 %v21226_v41 }
 0x6a9   :  { %11994 = vmatpush1.bf16.msra.mxu1 %v21227_v51  ;;  %12090 = vmatpush1.bf16.msra.mxu0 %v21228_v25 }
 0x6aa   :  { %11996 = vmatprep.subr.bf16.mxu1 %v21229_v28  ;;  %12092 = vmatprep.subr.bf16.mxu0 %v21230_v26 }
 0x6ad   :  { %11998 = vmatpush1.bf16.msra.mxu1 %v21231_v29  ;;  %12094 = vmatpush1.bf16.msra.mxu0 %v21232_v32  ;;  %v21238_v32 = vld [vmem:[#allocation26_spill] sm:$0xff] }
 0x6ae   :  { %12000 = vmatprep.subr.bf16.mxu1 %v21233_v0  ;;  %12096 = vmatprep.subr.bf16.mxu0 %v21234_v2  ;;  %v21239_v0 = vld [vmem:[#allocation28_spill] sm:$0xff]  ;;  %v21240_v2 = vld [vmem:[#allocation127_spill] sm:$0xff] }
 0x6b1   :  { %12002 = vmatpush1.bf16.msra.mxu1 %v21235_v19  ;;  %12098 = vmatpush1.bf16.msra.mxu0 %v20980_v17  ;;  %v21241_v19 = vld [vmem:[#allocation30_spill] sm:$0xff] }
 0x6b2   :  { %12004 = vmatprep.subr.bf16.mxu1 %v21236_v48  ;;  %12100 = vmatprep.subr.bf16.mxu0 %v21237_v38  ;;  %v21244_v48 = vld [vmem:[#allocation131_spill] sm:$0xff]  ;;  %v21246_v38 = vld [vmem:[#allocation133_spill] sm:$0xff] }
 0x6b3   :  { %v5105_v46 = vpop.f32.mrb[56].mxu1  ;;  %v5318_v41 = vpop.f32.mrb[56].mxu0 }
 0x6b4   :  { %v5902_v51 = vmul.f32 %v17541_v54, %v5105_v46  ;;  %v17630_v25 = vmul.f32 %v17545_v39, %v5318_v41  ;;  %v5107_v28 = vpop.f32.mrb[57].mxu1  ;;  %v5320_v26 = vpop.f32.mrb[57].mxu0  ;;  %v21242_v54 = vld [vmem:[#allocation129_spill] sm:$0xff]  ;;  %v21243_v39 = vld [vmem:[#allocation32_spill] sm:$0xff] }
 0x6b5   :  { %v17633_v29 = vmul.f32 %v17490_v52, %v5107_v28  ;;  %12006 = vmatpush1.bf16.msra.mxu1 %v21238_v32  ;;  %12102 = vmatpush1.bf16.msra.mxu0 %v20984_v53  ;;  %v21245_v52 = vld [vmem:[#allocation34_spill] sm:$0xff]  ;;  %v21247_v46 = vld [vmem:[#allocation36_spill] sm:$0xff]  ;;  %v21248_v53 = vld [vmem:[#allocation135_spill] sm:$0xff] }
 0x6b6   :  { %v17637_v17 = vmul.f32 %v5902_v51, %v5320_v26  ;;  %12008 = vmatprep.subr.bf16.mxu1 %v21239_v0  ;;  %12104 = vmatprep.subr.bf16.mxu0 %v21240_v2  ;;  %v21249_v41 = vld [vmem:[#allocation40_spill] sm:$0xff]  ;;  %v21250_v51 = vld [vmem:[#allocation137_spill] sm:$0xff]  ;;  %v21251_v28 = vld [vmem:[#allocation42_spill] sm:$0xff] }
 0x6b7   :  { %v21252_v26 = vld [vmem:[#allocation139_spill] sm:$0xff]  ;;  %v21253_v32 = vld [vmem:[#allocation44_spill] sm:$0xff]  ;;  %v21254_v0 = vld [vmem:[#allocation141_spill] sm:$0xff] }
 0x6b8   :  { %v21255_v2 = vld [vmem:[#allocation46_spill] sm:$0xff] }
 0x6b9   :  { %12010 = vmatpush1.bf16.msra.mxu1 %v21241_v19  ;;  %12106 = vmatpush1.bf16.msra.mxu0 %v21242_v54  ;;  %v21256_v19 = vld [vmem:[#allocation143_spill] sm:$0xff]  ;;  %v21257_v54 = vld [vmem:[#allocation48_spill] sm:$0xff] }
 0x6ba   :  { %12012 = vmatprep.subr.bf16.mxu1 %v21243_v39  ;;  %12108 = vmatprep.subr.bf16.mxu0 %v21244_v48  ;;  %v21258_v39 = vld [vmem:[#allocation145_spill] sm:$0xff]  ;;  %v21259_v48 = vld [vmem:[#allocation50_spill] sm:$0xff] }
 0x6bd   :  { %12014 = vmatpush1.bf16.msra.mxu1 %v21245_v52  ;;  %12110 = vmatpush1.bf16.msra.mxu0 %v21246_v38  ;;  %v21260_v52 = vld [vmem:[#allocation147_spill] sm:$0xff]  ;;  %v21261_v38 = vld [vmem:[#allocation52_spill] sm:$0xff] }
 0x6be   :  { %12048 = vmatprep.subr.bf16.mxu1 %v21247_v46  ;;  %12144 = vmatprep.subr.bf16.mxu0 %v21248_v53  ;;  %v21262_v46 = vld [vmem:[#allocation149_spill] sm:$0xff]  ;;  %v21263_v53 = vld [vmem:[#allocation54_spill] sm:$0xff] }
 0x6c0   :  { %6140 = vmatmul.mubr.f32.vlgmr.msra.gmra.mrb[70].mxu1 %v17555_v27  ;;  %6353 = vmatmul.mubr.f32.vlgmr.msra.gmra.mrb[70].mxu0 %v17555_v27 }
 0x6c1   :  { %12050 = vmatpush1.bf16.msra.mxu1 %v21249_v41  ;;  %12146 = vmatpush1.bf16.msra.mxu0 %v21250_v51  ;;  %v21264_v41 = vld [vmem:[#allocation151_spill] sm:$0xff]  ;;  %v21265_v51 = vld [vmem:[#allocation56_spill] sm:$0xff] }
 0x6c2   :  { %12052 = vmatprep.subr.bf16.mxu1 %v21251_v28  ;;  %12148 = vmatprep.subr.bf16.mxu0 %v21252_v26  ;;  %v21266_v28 = vld [vmem:[#allocation58_spill] sm:$0xff]  ;;  %v21267_v26 = vld [vmem:[#allocation155_spill] sm:$0xff] }
 0x6c3   :  { %6281 = vmatprep.mubr.f32.mxu1 %v20330_v63  ;;  %6494 = vmatprep.mubr.f32.mxu0 %v20330_v63 }
 0x6c5   :  { %12054 = vmatpush1.bf16.msra.mxu1 %v21253_v32  ;;  %12150 = vmatpush1.bf16.msra.mxu0 %v21254_v0 }
 0x6c6   :  { %12056 = vmatprep.subr.bf16.mxu1 %v21255_v2  ;;  %12152 = vmatprep.subr.bf16.mxu0 %v21256_v19 }
 0x6c9   :  { %12058 = vmatpush1.bf16.msra.mxu1 %v21257_v54  ;;  %12154 = vmatpush1.bf16.msra.mxu0 %v21258_v39 }
 0x6ca   :  { %12060 = vmatprep.subr.bf16.mxu1 %v21259_v48  ;;  %12156 = vmatprep.subr.bf16.mxu0 %v21260_v52  ;;  %v21268_v52 = vld [vmem:[#allocation62_spill] sm:$0xff] }
 0x6cd   :  { %12062 = vmatpush1.bf16.msra.mxu1 %v21261_v38  ;;  %12158 = vmatpush1.bf16.msra.mxu0 %v21262_v46  ;;  %v21269_v38 = vld [vmem:[#allocation64_spill] sm:$0xff]  ;;  %v21270_v46 = vld [vmem:[#allocation66_spill] sm:$0xff] }
 0x6ce   :  { %12064 = vmatprep.subr.bf16.mxu1 %v21263_v53  ;;  %12160 = vmatprep.subr.bf16.mxu0 %v21264_v41  ;;  %v21274_v53 = vld [vmem:[#allocation165_spill] sm:$0xff]  ;;  %v21275_v41 = vld [vmem:[#allocation72_spill] sm:$0xff] }
 0x6d1   :  { %12066 = vmatpush1.bf16.msra.mxu1 %v21265_v51  ;;  %12162 = vmatpush1.bf16.msra.mxu0 %v21010_v15  ;;  %v21278_v51 = vld [vmem:[#allocation169_spill] sm:$0xff] }
 0x6d2   :  { %12068 = vmatprep.subr.bf16.mxu1 %v21266_v28  ;;  %12164 = vmatprep.subr.bf16.mxu0 %v21267_v26  ;;  %v21280_v28 = vld [vmem:[#allocation171_spill] sm:$0xff]  ;;  %v21281_v26 = vld [vmem:[#allocation78_spill] sm:$0xff] }
 0x6d3   :  { %v5247_v32 = vpop.f32.mrb[58].mxu1  ;;  %v5460_v0 = vpop.f32.mrb[58].mxu0 }
 0x6d4   :  { %v5906_v2 = vmul.f32 %v17588_v7, %v5247_v32  ;;  %v17675_v19 = vmul.f32 %v17592_v37, %v5460_v0  ;;  %v5249_v54 = vpop.f32.mrb[59].mxu1  ;;  %v5462_v39 = vpop.f32.mrb[59].mxu0  ;;  %v21271_v7 = vld [vmem:[#allocation68_spill] sm:$0xff]  ;;  %v21272_v37 = vld [vmem:[#allocation163_spill] sm:$0xff]  ;;  %v21282_v32 = vld [vmem:[#allocation173_spill] sm:$0xff] }
 0x6d5   :  { %v17678_v48 = vmul.f32 %v17538_v36, %v5249_v54  ;;  %12070 = vmatpush1.bf16.msra.mxu1 %v21268_v52  ;;  %12166 = vmatpush1.bf16.msra.mxu0 %v21014_v10  ;;  %v21273_v36 = vld [vmem:[#allocation70_spill] sm:$0xff]  ;;  %v21276_v10 = vld [vmem:[#allocation167_spill] sm:$0xff]  ;;  %v21283_v0 = vld [vmem:[#allocation80_spill] sm:$0xff] }
 0x6d6   :  { %v17682_v15 = vmul.f32 %v5906_v2, %v5462_v39  ;;  %12072 = vmatprep.subr.bf16.mxu1 %v21269_v38  ;;  %12168 = vmatprep.subr.bf16.mxu0 %v21016_v42  ;;  %v21277_v42 = vld [vmem:[#allocation74_spill] sm:$0xff]  ;;  %v21284_v2 = vld [vmem:[#allocation175_spill] sm:$0xff]  ;;  %v21286_v39 = vld [vmem:[#allocation177_spill] sm:$0xff] }
 0x6d7   :  { %v21285_v54 = vld [vmem:[#allocation82_spill] sm:$0xff]  ;;  %v21287_v52 = vld [vmem:[#allocation84_spill] sm:$0xff]  ;;  %v21288_v38 = vld [vmem:[#allocation179_spill] sm:$0xff] }
 0x6d9   :  { %12074 = vmatpush1.bf16.msra.mxu1 %v21270_v46  ;;  %12170 = vmatpush1.bf16.msra.mxu0 %v21017_v56  ;;  %v21279_v56 = vld [vmem:[#allocation76_spill] sm:$0xff]  ;;  %v21289_v46 = vld [vmem:[#allocation86_spill] sm:$0xff] }
 0x6da   :  { %12076 = vmatprep.subr.bf16.mxu1 %v21271_v7  ;;  %12172 = vmatprep.subr.bf16.mxu0 %v21272_v37  ;;  %v21290_v7 = vld [vmem:[#allocation181_spill] sm:$0xff]  ;;  %v21291_v37 = vld [vmem:[#allocation88_spill] sm:$0xff] }
 0x6dd   :  { %12078 = vmatpush1.bf16.msra.mxu1 %v21273_v36  ;;  %12174 = vmatpush1.bf16.msra.mxu0 %v21274_v53  ;;  %v21292_v36 = vld [vmem:[#allocation183_spill] sm:$0xff]  ;;  %v21293_v53 = vld [vmem:[#allocation90_spill] sm:$0xff] }
 0x6de   :  { %12112 = vmatprep.subr.bf16.mxu1 %v21275_v41  ;;  %12208 = vmatprep.subr.bf16.mxu0 %v21276_v10  ;;  %v21294_v41 = vld [vmem:[#allocation185_spill] sm:$0xff]  ;;  %v21295_v10 = vld [vmem:[#allocation92_spill] sm:$0xff] }
 0x6e0   :  { %6282 = vmatmul.mubr.f32.vlgmr.msra.gmra.mrb[72].mxu1 %v17555_v27  ;;  %6495 = vmatmul.mubr.f32.vlgmr.msra.gmra.mrb[72].mxu0 %v17555_v27 }
 0x6e1   :  { %12114 = vmatpush1.bf16.msra.mxu1 %v21277_v42  ;;  %12210 = vmatpush1.bf16.msra.mxu0 %v21278_v51  ;;  %v21296_v42 = vld [vmem:[#allocation187_spill] sm:$0xff] }
 0x6e2   :  { %12116 = vmatprep.subr.bf16.mxu1 %v21279_v56  ;;  %12212 = vmatprep.subr.bf16.mxu0 %v21280_v28 }
 0x6e3   :  { %6423 = vmatprep.mubr.f32.mxu1 %v20330_v63  ;;  %6636 = vmatprep.mubr.f32.mxu0 %v20330_v63 }
 0x6e5   :  { %12118 = vmatpush1.bf16.msra.mxu1 %v21281_v26  ;;  %12214 = vmatpush1.bf16.msra.mxu0 %v21282_v32 }
 0x6e6   :  { %12120 = vmatprep.subr.bf16.mxu1 %v21283_v0  ;;  %12216 = vmatprep.subr.bf16.mxu0 %v21284_v2 }
 0x6e9   :  { %12122 = vmatpush1.bf16.msra.mxu1 %v21285_v54  ;;  %12218 = vmatpush1.bf16.msra.mxu0 %v21286_v39  ;;  %v21297_v54 = vld [vmem:[#allocation94_spill] sm:$0xff] }
 0x6ea   :  { %12124 = vmatprep.subr.bf16.mxu1 %v21287_v52  ;;  %12220 = vmatprep.subr.bf16.mxu0 %v21288_v38  ;;  %v21298_v52 = vld [vmem:[#allocation96_spill] sm:$0xff]  ;;  %v21299_v38 = vld [vmem:[#allocation98_spill] sm:$0xff] }
 0x6ed   :  { %12126 = vmatpush1.bf16.msra.mxu1 %v21289_v46  ;;  %12222 = vmatpush1.bf16.msra.mxu0 %v21290_v7  ;;  %v21303_v46 = vld [vmem:[#allocation104_spill] sm:$0xff]  ;;  %v21306_v7 = vld [vmem:[#allocation201_spill] sm:$0xff] }
 0x6ee   :  { %12128 = vmatprep.subr.bf16.mxu1 %v21291_v37  ;;  %12224 = vmatprep.subr.bf16.mxu0 %v21292_v36  ;;  %v21308_v37 = vld [vmem:[#allocation203_spill] sm:$0xff]  ;;  %v21310_v36 = vld [vmem:[#allocation112_spill] sm:$0xff] }
 0x6f1   :  { %12130 = vmatpush1.bf16.msra.mxu1 %v21293_v53  ;;  %12226 = vmatpush1.bf16.msra.mxu0 %v21294_v41  ;;  %v21311_v53 = vld [vmem:[#allocation114_spill] sm:$0xff]  ;;  %v21312_v41 = vld [vmem:[#allocation209_spill] sm:$0xff] }
 0x6f2   :  { %12132 = vmatprep.subr.bf16.mxu1 %v21295_v10  ;;  %12228 = vmatprep.subr.bf16.mxu0 %v21296_v42  ;;  %v21313_v10 = vld [vmem:[#allocation116_spill] sm:$0xff]  ;;  %v21314_v42 = vld [vmem:[#allocation211_spill] sm:$0xff] }
 0x6f3   :  { %v5389_v51 = vpop.f32.mrb[60].mxu1  ;;  %v5602_v56 = vpop.f32.mrb[60].mxu0 }
 0x6f4   :  { %v5910_v28 = vmul.f32 %v17633_v29, %v5389_v51  ;;  %v17720_v26 = vmul.f32 %v17637_v17, %v5602_v56  ;;  %v5391_v32 = vpop.f32.mrb[61].mxu1  ;;  %v5604_v0 = vpop.f32.mrb[61].mxu0  ;;  %v21300_v29 = vld [vmem:[#allocation100_spill] sm:$0xff]  ;;  %v21302_v17 = vld [vmem:[#allocation197_spill] sm:$0xff]  ;;  %v21315_v51 = vld [vmem:[#allocation118_spill] sm:$0xff] }
 0x6f5   :  { %v17723_v2 = vmul.f32 %v17585_v57, %v5391_v32  ;;  %12134 = vmatpush1.bf16.msra.mxu1 %v21297_v54  ;;  %12230 = vmatpush1.bf16.msra.mxu0 %v21044_v49  ;;  %v21301_v57 = vld [vmem:[#allocation102_spill] sm:$0xff]  ;;  %v21304_v49 = vld [vmem:[#allocation199_spill] sm:$0xff]  ;;  %v21316_v56 = vld [vmem:[#allocation213_spill] sm:$0xff] }
 0x6f6   :  { %v17727_v39 = vmul.f32 %v5910_v28, %v5604_v0  ;;  %12136 = vmatprep.subr.bf16.mxu1 %v21298_v52  ;;  %12232 = vmatprep.subr.bf16.mxu0 %v21047_v20  ;;  %v21305_v20 = vld [vmem:[#allocation106_spill] sm:$0xff]  ;;  %v21317_v28 = vld [vmem:[#allocation120_spill] sm:$0xff]  ;;  %v21318_v32 = vld [vmem:[#allocation215_spill] sm:$0xff] }
 0x6f9   :  { %12138 = vmatpush1.bf16.msra.mxu1 %v21299_v38  ;;  %12234 = vmatpush1.bf16.msra.mxu0 %v21049_v5  ;;  %v21307_v5 = vld [vmem:[#allocation108_spill] sm:$0xff] }
 0x6fa   :  { %12140 = vmatprep.subr.bf16.mxu1 %v21300_v29  ;;  %12236 = vmatprep.subr.bf16.mxu0 %v21051_v55  ;;  %v21309_v55 = vld [vmem:[#allocation110_spill] sm:$0xff] }
 0x6fd   :  { %12142 = vmatpush1.bf16.msra.mxu1 %v21301_v57  ;;  %12238 = vmatpush1.bf16.msra.mxu0 %v21302_v17 }
 0x6fe   :  { %12176 = vmatprep.subr.bf16.mxu1 %v21303_v46  ;;  %12272 = vmatprep.subr.bf16.mxu0 %v21304_v49  ;;  %v21321_v46 = vld [vmem:[#allocation126_spill] sm:$0xff]  ;;  %v21322_v49 = vld [vmem:[#allocation128_spill] sm:$0xff] }
 0x700   :  { %6424 = vmatmul.mubr.f32.vlgmr.msra.gmra.mrb[74].mxu1 %v17555_v27  ;;  %6637 = vmatmul.mubr.f32.vlgmr.msra.gmra.mrb[74].mxu0 %v17555_v27 }
 0x701   :  { %12178 = vmatpush1.bf16.msra.mxu1 %v21305_v20  ;;  %12274 = vmatpush1.bf16.msra.mxu0 %v21306_v7  ;;  %v21335_v20 = vld [vmem:[#allocation245_spill] sm:$0xff]  ;;  %v21336_v7 = vld [vmem:[#allocation152_spill] sm:$0xff] }
 0x702   :  { %12180 = vmatprep.subr.bf16.mxu1 %v21307_v5  ;;  %12276 = vmatprep.subr.bf16.mxu0 %v21308_v37  ;;  %v21337_v5 = vld [vmem:[#allocation247_spill] sm:$0xff] }
 0x703   :  { %6565 = vmatprep.mubr.f32.mxu1 %v20330_v63  ;;  %6778 = vmatprep.mubr.f32.mxu0 %v20330_v63 }
 0x705   :  { %12182 = vmatpush1.bf16.msra.mxu1 %v21309_v55  ;;  %12278 = vmatpush1.bf16.msra.mxu0 %v21061_v43  ;;  %v21319_v43 = vld [vmem:[#allocation122_spill] sm:$0xff] }
 0x706   :  { %12184 = vmatprep.subr.bf16.mxu1 %v21310_v36  ;;  %12280 = vmatprep.subr.bf16.mxu0 %v21063_v8  ;;  %v21320_v8 = vld [vmem:[#allocation124_spill] sm:$0xff] }
 0x709   :  { %12186 = vmatpush1.bf16.msra.mxu1 %v21311_v53  ;;  %12282 = vmatpush1.bf16.msra.mxu0 %v21312_v41 }
 0x70a   :  { %12188 = vmatprep.subr.bf16.mxu1 %v21313_v10  ;;  %12284 = vmatprep.subr.bf16.mxu0 %v21314_v42  ;;  %v21340_v42 = vld [vmem:[#allocation158_spill] sm:$0xff] }
 0x70d   :  { %12190 = vmatpush1.bf16.msra.mxu1 %v21315_v51  ;;  %12286 = vmatpush1.bf16.msra.mxu0 %v21316_v56  ;;  %v21341_v51 = vld [vmem:[#allocation160_spill] sm:$0xff]  ;;  %v21352_v56 = vld [vmem:[#allocation178_spill] sm:$0xff] }
 0x70e   :  { %12192 = vmatprep.subr.bf16.mxu1 %v21317_v28  ;;  %12288 = vmatprep.subr.bf16.mxu0 %v21318_v32  ;;  %v21353_v28 = vld [vmem:[#allocation273_spill] sm:$0xff]  ;;  %v21355_v32 = vld [vmem:[#allocation275_spill] sm:$0xff] }
 0x711   :  { %12194 = vmatpush1.bf16.msra.mxu1 %v21319_v43  ;;  %12290 = vmatpush1.bf16.msra.mxu0 %v21072_v30  ;;  %v21357_v43 = vld [vmem:[#allocation277_spill] sm:$0xff] }
 0x712   :  { %12196 = vmatprep.subr.bf16.mxu1 %v21320_v8  ;;  %12292 = vmatprep.subr.bf16.mxu0 %v21073_v62  ;;  %v21323_v62 = vld [vmem:[#allocation130_spill] sm:$0xff]  ;;  %v21358_v8 = vld [vmem:[#allocation184_spill] sm:$0xff] }
 0x713   :  { %v5531_v0 = vpop.f32.mrb[62].mxu1  ;;  %v5744_v54 = vpop.f32.mrb[62].mxu0 }
 0x714   :  { %v5914_v52 = vmul.f32 %v17678_v48, %v5531_v0  ;;  %v17765_v38 = vmul.f32 %v17682_v15, %v5744_v54  ;;  %v5533_v29 = vpop.f32.mrb[63].mxu1  ;;  %v5746_v57 = vpop.f32.mrb[63].mxu0  ;;  %v21324_v48 = vld [vmem:[#allocation132_spill] sm:$0xff]  ;;  %v21359_v0 = vld [vmem:[#allocation279_spill] sm:$0xff]  ;;  %v21360_v54 = vld [vmem:[#allocation186_spill] sm:$0xff] }
 0x715   :  { %v17768_v17 = vmul.f32 %v17630_v25, %v5533_v29  ;;  %12198 = vmatpush1.bf16.msra.mxu1 %v21321_v46  ;;  %12294 = vmatpush1.bf16.msra.mxu0 %v21077_v58  ;;  %v21325_v25 = vld [vmem:[#allocation134_spill] sm:$0xff]  ;;  %v21326_v15 = vld [vmem:[#allocation136_spill] sm:$0xff] }
 0x716   :  { %v17772_v30 = vmul.f32 %v5914_v52, %v5746_v57  ;;  %12200 = vmatprep.subr.bf16.mxu1 %v21322_v49  ;;  %12296 = vmatprep.subr.bf16.mxu0 %v21078_v18  ;;  %v21327_v58 = vld [vmem:[#allocation138_spill] sm:$0xff]  ;;  %v21361_v52 = vld [vmem:[#allocation188_spill] sm:$0xff] }
 0x717   :  { %v21329_v18 = vld [vmem:[#allocation142_spill] sm:$0xff] }
 0x719   :  { %12202 = vmatpush1.bf16.msra.mxu1 %v21323_v62  ;;  %12298 = vmatpush1.bf16.msra.mxu0 %v21079_v40  ;;  %v21328_v40 = vld [vmem:[#allocation140_spill] sm:$0xff] }
 0x71a   :  { %12204 = vmatprep.subr.bf16.mxu1 %v21324_v48  ;;  %12300 = vmatprep.subr.bf16.mxu0 %v21080_v60  ;;  %v21330_v60 = vld [vmem:[#allocation144_spill] sm:$0xff] }
 0x71d   :  { %12206 = vmatpush1.bf16.msra.mxu1 %v21325_v25  ;;  %12302 = vmatpush1.bf16.msra.mxu0 %v21081_v34  ;;  %v21331_v34 = vld [vmem:[#allocation146_spill] sm:$0xff] }
 0x71e   :  { %12240 = vmatprep.subr.bf16.mxu1 %v21326_v15  ;;  %12336 = vmatprep.subr.bf16.mxu0 %v21082_v35  ;;  %v21332_v35 = vld [vmem:[#allocation148_spill] sm:$0xff]  ;;  %v21362_v25 = vld [vmem:[#allocation190_spill] sm:$0xff] }
 0x71f   :  { %v21366_v15 = vld [vmem:[#allocation292_spill] sm:$0xff] }
 0x720   :  { %6566 = vmatmul.mubr.f32.vlgmr.msra.gmra.mrb[76].mxu1 %v17555_v27  ;;  %6779 = vmatmul.mubr.f32.vlgmr.msra.gmra.mrb[76].mxu0 %v17555_v27 }
 0x721   :  { %12242 = vmatpush1.bf16.msra.mxu1 %v21327_v58  ;;  %12338 = vmatpush1.bf16.msra.mxu0 %v21083_v23  ;;  %v21333_v23 = vld [vmem:[#allocation243_spill] sm:$0xff]  ;;  %v21367_v58 = vld [vmem:[#allocation198_spill] sm:$0xff] }
 0x722   :  { %12244 = vmatprep.subr.bf16.mxu1 %v21328_v40  ;;  %12340 = vmatprep.subr.bf16.mxu0 %v21084_v24  ;;  %v21334_v24 = vld [vmem:[#allocation150_spill] sm:$0xff]  ;;  %v21369_v40 = vld [vmem:[#allocation200_spill] sm:$0xff] }
 0x723   :  { %6707 = vmatprep.mubr.f32.mxu1 %v20330_v63  ;;  %6920 = vmatprep.mubr.f32.mxu0 %v20330_v63 }
 0x725   :  { %12246 = vmatpush1.bf16.msra.mxu1 %v21329_v18  ;;  %12342 = vmatpush1.bf16.msra.mxu0 %v21085_v59  ;;  %v21338_v59 = vld [vmem:[#allocation154_spill] sm:$0xff]  ;;  %v21370_v18 = vld [vmem:[#allocation296_spill] sm:$0xff] }
 0x726   :  { %12248 = vmatprep.subr.bf16.mxu1 %v21330_v60  ;;  %12344 = vmatprep.subr.bf16.mxu0 %v21086_v1  ;;  %v21339_v1 = vld [vmem:[#allocation156_spill] sm:$0xff] }
 0x727   :  { %v21374_v60 = vld [vmem:[#allocation300_spill] sm:$0xff] }
 0x729   :  { %12250 = vmatpush1.bf16.msra.mxu1 %v21331_v34  ;;  %12346 = vmatpush1.bf16.msra.mxu0 %v21087_v44  ;;  %v21375_v34 = vld [vmem:[#allocation206_spill] sm:$0xff] }
 0x72a   :  { %12252 = vmatprep.subr.bf16.mxu1 %v21332_v35  ;;  %12348 = vmatprep.subr.bf16.mxu0 %v21333_v23  ;;  %v21376_v35 = vld [vmem:[#allocation302_spill] sm:$0xff]  ;;  %v21377_v23 = vld [vmem:[#allocation208_spill] sm:$0xff] }
 0x72d   :  { %12254 = vmatpush1.bf16.msra.mxu1 %v21334_v24  ;;  %12350 = vmatpush1.bf16.msra.mxu0 %v21335_v20  ;;  %v21378_v24 = vld [vmem:[#allocation304_spill] sm:$0xff]  ;;  %v21379_v20 = vld [vmem:[#allocation210_spill] sm:$0xff] }
 0x72e   :  { %12256 = vmatprep.subr.bf16.mxu1 %v21336_v7  ;;  %12352 = vmatprep.subr.bf16.mxu0 %v21337_v5  ;;  %v21380_v7 = vld [vmem:[#allocation306_spill] sm:$0xff]  ;;  %v21381_v5 = vld [vmem:[#allocation212_spill] sm:$0xff] }
 0x731   :  { %12258 = vmatpush1.bf16.msra.mxu1 %v21338_v59  ;;  %12354 = vmatpush1.bf16.msra.mxu0 %v21094_v47  ;;  %v21382_v59 = vld [vmem:[#allocation308_spill] sm:$0xff] }
 0x732   :  { %12260 = vmatprep.subr.bf16.mxu1 %v21339_v1  ;;  %12356 = vmatprep.subr.bf16.mxu0 %v21095_v4  ;;  %v21342_v4 = vld [vmem:[#allocation162_spill] sm:$0xff] }
 0x733   :  { %v5673_v44 = vpop.f32.mrb[64].mxu1  ;;  %v5886_v37 = vpop.f32.mrb[64].mxu0  ;;  %v21383_v1 = vld [vmem:[#allocation214_spill] sm:$0xff] }
 0x734   :  { %v5918_v55 = vmul.f32 %v17723_v2, %v5673_v44  ;;  %v17810_v36 = vmul.f32 %v17727_v39, %v5886_v37  ;;  %v5675_v53 = vpop.f32.mrb[65].mxu1  ;;  %v5888_v41 = vpop.f32.mrb[65].mxu0  ;;  %v21343_v2 = vld [vmem:[#allocation164_spill] sm:$0xff]  ;;  %v21384_v44 = vld [vmem:[#allocation310_spill] sm:$0xff] }
 0x735   :  { %v17813_v10 = vmul.f32 %v17675_v19, %v5675_v53  ;;  %12262 = vmatpush1.bf16.msra.mxu1 %v21340_v42  ;;  %12358 = vmatpush1.bf16.msra.mxu0 %v21098_v13  ;;  %v21344_v19 = vld [vmem:[#allocation166_spill] sm:$0xff]  ;;  %v21345_v39 = vld [vmem:[#allocation168_spill] sm:$0xff] }
 0x736   :  { %v17817_v47 = vmul.f32 %v5918_v55, %v5888_v41  ;;  %12264 = vmatprep.subr.bf16.mxu1 %v21341_v51  ;;  %12360 = vmatprep.subr.bf16.mxu0 %v21099_v12  ;;  %v21346_v12 = vld [vmem:[#allocation170_spill] sm:$0xff]  ;;  %v21385_v37 = vld [vmem:[#allocation216_spill] sm:$0xff] }
 0x737   :  { %v21348_v13 = vld [vmem:[#allocation174_spill] sm:$0xff]  ;;  %v21386_v55 = vld [vmem:[#allocation312_spill] sm:$0xff] }
 0x738   :  { %v21387_v53 = vld [vmem:[#allocation218_spill] sm:$0xff]  ;;  %v21389_v42 = vld [vmem:[#allocation220_spill] sm:$0xff] }
 0x739   :  { %12266 = vmatpush1.bf16.msra.mxu1 %v21342_v4  ;;  %12362 = vmatpush1.bf16.msra.mxu0 %v21100_v3  ;;  %v21347_v3 = vld [vmem:[#allocation172_spill] sm:$0xff]  ;;  %v21388_v41 = vld [vmem:[#allocation314_spill] sm:$0xff] }
 0x73a   :  { %12268 = vmatprep.subr.bf16.mxu1 %v21343_v2  ;;  %12364 = vmatprep.subr.bf16.mxu0 %v21101_v9  ;;  %v21349_v9 = vld [vmem:[#allocation269_spill] sm:$0xff]  ;;  %v21390_v51 = vld [vmem:[#allocation316_spill] sm:$0xff] }
 0x73d   :  { %12270 = vmatpush1.bf16.msra.mxu1 %v21344_v19  ;;  %12366 = vmatpush1.bf16.msra.mxu0 %v21102_v45  ;;  %v21350_v45 = vld [vmem:[#allocation176_spill] sm:$0xff] }
 0x73e   :  { %12304 = vmatprep.subr.bf16.mxu1 %v21345_v39  ;;  %12400 = vmatprep.subr.bf16.mxu0 %v21103_v6  ;;  %v21351_v6 = vld [vmem:[#allocation271_spill] sm:$0xff] }
 0x740   :  { %6708 = vmatmul.mubr.f32.vlgmr.msra.gmra.mrb[78].mxu1 %v17555_v27  ;;  %6921 = vmatmul.mubr.f32.vlgmr.msra.gmra.mrb[78].mxu0 %v17555_v27 }
 0x741   :  { %12306 = vmatpush1.bf16.msra.mxu1 %v21346_v12  ;;  %12402 = vmatpush1.bf16.msra.mxu0 %v21104_v61  ;;  %v21354_v61 = vld [vmem:[#allocation180_spill] sm:$0xff] }
 0x742   :  { %12308 = vmatprep.subr.bf16.mxu1 %v21347_v3  ;;  %12404 = vmatprep.subr.bf16.mxu0 %v21105_v11  ;;  %v21356_v11 = vld [vmem:[#allocation182_spill] sm:$0xff] }
 0x743   :  { %6849 = vmatprep.mubr.f32.mxu1 %v20330_v63  ;;  %7062 = vmatprep.mubr.f32.mxu0 %v20330_v63  ;;  %v21391_v3 = vld [vmem:[#allocation222_spill] sm:$0xff] }
 0x745   :  { %12310 = vmatpush1.bf16.msra.mxu1 %v21348_v13  ;;  %12406 = vmatpush1.bf16.msra.mxu0 %v21349_v9  ;;  %v21392_v13 = vld [vmem:[#allocation318_spill] sm:$0xff]  ;;  %v21393_v9 = vld [vmem:[#allocation224_spill] sm:$0xff] }
 0x746   :  { %12312 = vmatprep.subr.bf16.mxu1 %v21350_v45  ;;  %12408 = vmatprep.subr.bf16.mxu0 %v21351_v6  ;;  %v21394_v45 = vld [vmem:[#allocation320_spill] sm:$0xff]  ;;  %v21395_v6 = vld [vmem:[#allocation226_spill] sm:$0xff] }
 0x749   :  { %12314 = vmatpush1.bf16.msra.mxu1 %v21352_v56  ;;  %12410 = vmatpush1.bf16.msra.mxu0 %v21353_v28  ;;  %v21396_v56 = vld [vmem:[#allocation322_spill] sm:$0xff]  ;;  %v21397_v28 = vld [vmem:[#allocation228_spill] sm:$0xff] }
 0x74a   :  { %12316 = vmatprep.subr.bf16.mxu1 %v21354_v61  ;;  %12412 = vmatprep.subr.bf16.mxu0 %v21355_v32  ;;  %v21398_v61 = vld [vmem:[#allocation324_spill] sm:$0xff]  ;;  %v21399_v32 = vld [vmem:[#allocation230_spill] sm:$0xff] }
 0x74d   :  { %12318 = vmatpush1.bf16.msra.mxu1 %v21356_v11  ;;  %12414 = vmatpush1.bf16.msra.mxu0 %v21357_v43  ;;  %v21400_v11 = vld [vmem:[#allocation326_spill] sm:$0xff]  ;;  %v21401_v43 = vld [vmem:[#allocation232_spill] sm:$0xff] }
 0x74e   :  { %12320 = vmatprep.subr.bf16.mxu1 %v21358_v8  ;;  %12416 = vmatprep.subr.bf16.mxu0 %v21359_v0  ;;  %v21402_v8 = vld [vmem:[#allocation328_spill] sm:$0xff]  ;;  %v21403_v0 = vld [vmem:[#allocation234_spill] sm:$0xff] }
 0x751   :  { %12322 = vmatpush1.bf16.msra.mxu1 %v21360_v54  ;;  %12418 = vmatpush1.bf16.msra.mxu0 %v21116_v31  ;;  %v21363_v31 = vld [vmem:[#allocation192_spill] sm:$0xff]  ;;  %v21404_v54 = vld [vmem:[#allocation329_spill] sm:$0xff] }
 0x752   :  { %12324 = vmatprep.subr.bf16.mxu1 %v21361_v52  ;;  %12420 = vmatprep.subr.bf16.mxu0 %v21118_v33  ;;  %v21364_v33 = vld [vmem:[#allocation194_spill] sm:$0xff]  ;;  %v21405_v52 = vld [vmem:[#allocation236_spill] sm:$0xff] }
 0x753   :  { %v5815_v29 = vpop.f32.mrb[66].mxu1  ;;  %v17853_v57 = vpop.f32.mrb[66].mxu0 }
 0x754   :  { %v17856_v46 = vmul.f32 %v17768_v17, %v5815_v29  ;;  %v5817_v49 = vpop.f32.mrb[67].mxu1  ;;  %v17858_v62 = vpop.f32.mrb[67].mxu0  ;;  %v21365_v17 = vld [vmem:[#allocation196_spill] sm:$0xff]  ;;  %v21406_v29 = vld [vmem:[#allocation330_spill] sm:$0xff] }
 0x755   :  { %v17861_v48 = vmul.f32 %v17720_v26, %v5817_v49  ;;  %12326 = vmatpush1.bf16.msra.mxu1 %v21362_v25  ;;  %12422 = vmatpush1.bf16.msra.mxu0 %v21119_v14  ;;  %v21368_v26 = vld [vmem:[#allocation294_spill] sm:$0xff]  ;;  %v21408_v25 = vld [vmem:[#allocation331_spill] sm:$0xff] }
 0x756   :  { %12328 = vmatprep.subr.bf16.mxu1 %v21363_v31  ;;  %12424 = vmatprep.subr.bf16.mxu0 %v21120_v21  ;;  %v21371_v14 = vld [vmem:[#allocation202_spill] sm:$0xff]  ;;  %v21409_v31 = vld [vmem:[#allocation240_spill] sm:$0xff] }
 0x757   :  { %v21372_v21 = vld [vmem:[#allocation298_spill] sm:$0xff] }
 0x758   :  { %v21407_v49 = vld [vmem:[#allocation238_spill] sm:$0xff] }
 0x759   :  { %12330 = vmatpush1.bf16.msra.mxu1 %v21364_v33  ;;  %12426 = vmatpush1.bf16.msra.mxu0 %v21121_v50  ;;  %v21373_v50 = vld [vmem:[#allocation204_spill] sm:$0xff] }
 0x75a   :  { %12332 = vmatprep.subr.bf16.mxu1 %v21365_v17  ;;  %12428 = vmatprep.subr.bf16.mxu0 %v21366_v15  ;;  %v21410_v33 = vld [vmem:[#allocation332_spill] sm:$0xff]  ;;  %v21411_v17 = vld [vmem:[#allocation242_spill] sm:$0xff]  ;;  %v21412_v15 = vld [vmem:[#allocation333_spill] sm:$0xff] }
 0x75d   :  { %12334 = vmatpush1.bf16.msra.mxu1 %v21367_v58  ;;  %12430 = vmatpush1.bf16.msra.mxu0 %v21368_v26  ;;  %v21413_v58 = vld [vmem:[#allocation244_spill] sm:$0xff]  ;;  %v21414_v26 = vld [vmem:[#allocation334_spill] sm:$0xff] }
 0x75e   :  { %12368 = vmatprep.subr.bf16.mxu1 %v21369_v40  ;;  %12464 = vmatprep.subr.bf16.mxu0 %v21370_v18  ;;  %v21415_v40 = vld [vmem:[#allocation246_spill] sm:$0xff]  ;;  %v21416_v18 = vld [vmem:[#allocation335_spill] sm:$0xff] }
 0x760   :  { %6850 = vmatmul.mubr.f32.vlgmr.msra.gmra.mrb[80].mxu1 %v17555_v27  ;;  %7063 = vmatmul.mubr.f32.vlgmr.msra.gmra.mrb[80].mxu0 %v17555_v27 }
 0x761   :  { %12370 = vmatpush1.bf16.msra.mxu1 %v21371_v14  ;;  %12466 = vmatpush1.bf16.msra.mxu0 %v21372_v21  ;;  %v21417_v14 = vld [vmem:[#allocation248_spill] sm:$0xff] }
 0x762   :  { %12372 = vmatprep.subr.bf16.mxu1 %v21373_v50  ;;  %12468 = vmatprep.subr.bf16.mxu0 %v21374_v60  ;;  %v21418_v21 = vld [vmem:[#allocation336_spill] sm:$0xff]  ;;  %v21419_v50 = vld [vmem:[#allocation250_spill] sm:$0xff]  ;;  %v21420_v60 = vld [vmem:[#allocation337_spill] sm:$0xff] }
 0x763   :  { %6991 = vmatprep.mubr.f32.mxu1 %v20330_v63  ;;  %7204 = vmatprep.mubr.f32.mxu0 %v20330_v63 }
 0x765   :  { %12374 = vmatpush1.bf16.msra.mxu1 %v21375_v34  ;;  %12470 = vmatpush1.bf16.msra.mxu0 %v21376_v35  ;;  %v21421_v34 = vld [vmem:[#allocation252_spill] sm:$0xff]  ;;  %v21422_v35 = vld [vmem:[#allocation338_spill] sm:$0xff] }
 0x766   :  { %12376 = vmatprep.subr.bf16.mxu1 %v21377_v23  ;;  %12472 = vmatprep.subr.bf16.mxu0 %v21378_v24 }
 0x769   :  { %12378 = vmatpush1.bf16.msra.mxu1 %v21379_v20  ;;  %12474 = vmatpush1.bf16.msra.mxu0 %v21380_v7 }
 0x76a   :  { %12380 = vmatprep.subr.bf16.mxu1 %v21381_v5  ;;  %12476 = vmatprep.subr.bf16.mxu0 %v21382_v59 }
 0x76d   :  { %12382 = vmatpush1.bf16.msra.mxu1 %v21383_v1  ;;  %12478 = vmatpush1.bf16.msra.mxu0 %v21384_v44  ;;  %v21423_v1 = vld [vmem:[#allocation254_spill] sm:$0xff]  ;;  %v21424_v44 = vld [vmem:[#allocation339_spill] sm:$0xff] }
 0x76e   :  { %12384 = vmatprep.subr.bf16.mxu1 %v21385_v37  ;;  %12480 = vmatprep.subr.bf16.mxu0 %v21386_v55  ;;  %v21425_v37 = vld [vmem:[#allocation256_spill] sm:$0xff]  ;;  %v7510_v55 = vld [vmem:[%s19514_s11 + $0x80] sm:$0xff] }
 0x771   :  { %12386 = vmatpush1.bf16.msra.mxu1 %v21387_v53  ;;  %12482 = vmatpush1.bf16.msra.mxu0 %v21388_v41  ;;  %v21426_v53 = vld [vmem:[#allocation258_spill] sm:$0xff]  ;;  %v21427_v41 = vld [vmem:[#allocation260_spill] sm:$0xff] }
 0x772   :  { %12388 = vmatprep.subr.bf16.mxu1 %v21389_v42  ;;  %12484 = vmatprep.subr.bf16.mxu0 %v21390_v51  ;;  %v21428_v42 = vld [vmem:[#allocation342_spill] sm:$0xff] }
 0x773   :  { %v5999_v4 = vpop.f32.mrb[68].mxu1  ;;  %v17899_v2 = vpop.f32.mrb[68].mxu0 }
 0x774   :  { %v17901_v19 = vpop.f32.mrb[69].mxu1  ;;  %v6214_v39 = vpop.f32.mrb[69].mxu0 }
 0x775   :  { %v17903_v12 = vmul.f32 %v6214_v39, %v5999_v4  ;;  %12390 = vmatpush1.bf16.msra.mxu1 %v21391_v3  ;;  %12486 = vmatpush1.bf16.msra.mxu0 %v21392_v13  ;;  %v7495_v4 = vld [vmem:[%s19514_s11 + $0x8] sm:$0xff]  ;;  %v7512_v39 = vld [vmem:[%s19514_s11 + $0x90] sm:$0xff]  ;;  %v21429_v3 = vld [vmem:[#allocation262_spill] sm:$0xff] }
 0x776   :  { %12392 = vmatprep.subr.bf16.mxu1 %v21393_v9  ;;  %12488 = vmatprep.subr.bf16.mxu0 %v21394_v45  ;;  %v21430_v13 = vld [vmem:[#allocation343_spill] sm:$0xff]  ;;  %v21431_v45 = vld [vmem:[#allocation264_spill] sm:$0xff] }
 0x779   :  { %12394 = vmatpush1.bf16.msra.mxu1 %v21395_v6  ;;  %12490 = vmatpush1.bf16.msra.mxu0 %v21396_v56  ;;  %v7496_v6 = vld [vmem:[%s19514_s11 + $0x10] sm:$0xff]  ;;  %v7497_v56 = vld [vmem:[%s19514_s11 + $0x18] sm:$0xff] }
 0x77a   :  { %12396 = vmatprep.subr.bf16.mxu1 %v21397_v28  ;;  %12492 = vmatprep.subr.bf16.mxu0 %v21398_v61  ;;  %v7514_v61 = vld [vmem:[%s19514_s11 + $0xa0] sm:$0xff] }
 0x77d   :  { %12398 = vmatpush1.bf16.msra.mxu1 %v21399_v32  ;;  %12494 = vmatpush1.bf16.msra.mxu0 %v21400_v11  ;;  %v7515_v32 = vld [vmem:[%s19514_s11 + $0xa8] sm:$0xff]  ;;  %v21432_v11 = vld [vmem:[#allocation266_spill] sm:$0xff] }
 0x77e   :  { %12432 = vmatprep.subr.bf16.mxu1 %v21401_v43  ;;  %12528 = vmatprep.subr.bf16.mxu0 %v21402_v8  ;;  %v12597_v43 = vpack.c.bf16 %v7497_v56, %v7496_v6  ;;  %v21433_v8 = vld [vmem:[#allocation289_spill] sm:$0xff] }
 0x780   :  { %6992 = vmatmul.mubr.f32.vlgmr.msra.gmra.mrb[82].mxu1 %v17555_v27  ;;  %7205 = vmatmul.mubr.f32.vlgmr.msra.gmra.mrb[82].mxu0 %v17555_v27 }
 0x781   :  { %12434 = vmatpush1.bf16.msra.mxu1 %v21403_v0  ;;  %12530 = vmatpush1.bf16.msra.mxu0 %v21404_v54  ;;  %v21434_v0 = vld [vmem:[#allocation268_spill] sm:$0xff]  ;;  %v12599_v54 = vpack.c.bf16 %v7515_v32, %v7514_v61 }
 0x782   :  { %12436 = vmatprep.subr.bf16.mxu1 %v21405_v52  ;;  %12532 = vmatprep.subr.bf16.mxu0 %v21406_v29  ;;  %v7498_v52 = vld [vmem:[%s19514_s11 + $0x20] sm:$0xff]  ;;  %v7499_v29 = vld [vmem:[%s19514_s11 + $0x28] sm:$0xff] }
 0x783   :  { %7133 = vmatprep.mubr.f32.mxu1 %v20330_v63  ;;  %7346 = vmatprep.mubr.f32.mxu0 %v20330_v63 }
 0x785   :  { %12438 = vmatpush1.bf16.msra.mxu1 %v21407_v49  ;;  %12534 = vmatpush1.bf16.msra.mxu0 %v21408_v25  ;;  %v7516_v49 = vld [vmem:[%s19514_s11 + $0xb0] sm:$0xff]  ;;  %v7517_v25 = vld [vmem:[%s19514_s11 + $0xb8] sm:$0xff] }
 0x786   :  { %12440 = vmatprep.subr.bf16.mxu1 %v21409_v31  ;;  %12536 = vmatprep.subr.bf16.mxu0 %v21410_v33  ;;  %v21435_v31 = vld [vmem:[#allocation270_spill] sm:$0xff]  ;;  %v12601_v33 = vpack.c.bf16 %v7499_v29, %v7498_v52  ;;  %v7575_v52 = vld [vmem:[%s19514_s11 + $0x288] sm:$0xff]  ;;  %v21445_v29 = vld [vmem:[#allocation291_spill] sm:$0xff] }
 0x789   :  { %12442 = vmatpush1.bf16.msra.mxu1 %v21411_v17  ;;  %12538 = vmatpush1.bf16.msra.mxu0 %v21412_v15  ;;  %v21436_v17 = vld [vmem:[#allocation272_spill] sm:$0xff]  ;;  %v12603_v15 = vpack.c.bf16 %v7517_v25, %v7516_v49  ;;  %v21446_v25 = vld [vmem:[#allocation293_spill] sm:$0xff] }
 0x78a   :  { %12444 = vmatprep.subr.bf16.mxu1 %v21413_v58  ;;  %12540 = vmatprep.subr.bf16.mxu0 %v21414_v26  ;;  %v7500_v58 = vld [vmem:[%s19514_s11 + $0x30] sm:$0xff]  ;;  %v7501_v26 = vld [vmem:[%s19514_s11 + $0x38] sm:$0xff] }
 0x78d   :  { %12446 = vmatpush1.bf16.msra.mxu1 %v21415_v40  ;;  %12542 = vmatpush1.bf16.msra.mxu0 %v21416_v18  ;;  %v7518_v40 = vld [vmem:[%s19514_s11 + $0xc0] sm:$0xff]  ;;  %v7519_v18 = vld [vmem:[%s19514_s11 + $0xc8] sm:$0xff] }
 0x78e   :  { %12448 = vmatprep.subr.bf16.mxu1 %v21417_v14  ;;  %12544 = vmatprep.subr.bf16.mxu0 %v21418_v21  ;;  %v21437_v14 = vld [vmem:[#allocation274_spill] sm:$0xff]  ;;  %v12605_v21 = vpack.c.bf16 %v7501_v26, %v7500_v58  ;;  %v21447_v26 = vld [vmem:[#allocation295_spill] sm:$0xff] }
 0x78f   :  { %v7577_v58 = vld [vmem:[%s19514_s11 + $0x298] sm:$0xff] }
 0x791   :  { %12450 = vmatpush1.bf16.msra.mxu1 %v21419_v50  ;;  %12546 = vmatpush1.bf16.msra.mxu0 %v21420_v60  ;;  %v21438_v50 = vld [vmem:[#allocation276_spill] sm:$0xff]  ;;  %v12607_v60 = vpack.c.bf16 %v7519_v18, %v7518_v40  ;;  %v21448_v18 = vld [vmem:[#allocation297_spill] sm:$0xff] }
 0x792   :  { %12452 = vmatprep.subr.bf16.mxu1 %v21421_v34  ;;  %12548 = vmatprep.subr.bf16.mxu0 %v21422_v35  ;;  %v7502_v34 = vld [vmem:[%s19514_s11 + $0x40] sm:$0xff]  ;;  %v7503_v35 = vld [vmem:[%s19514_s11 + $0x48] sm:$0xff] }
 0x793   :  { %v6141_v23 = vpop.f32.mrb[70].mxu1  ;;  %v6354_v24 = vpop.f32.mrb[70].mxu0 }
 0x794   :  { %v17942_v20 = vmul.f32 %v6354_v24, %v17858_v62  ;;  %v17944_v7 = vpop.f32.mrb[71].mxu1  ;;  %v6356_v5 = vpop.f32.mrb[71].mxu0  ;;  %v7511_v62 = vld [vmem:[%s19514_s11 + $0x88] sm:$0xff]  ;;  %v7521_v24 = vld [vmem:[%s19514_s11 + $0xd8] sm:$0xff] }
 0x795   :  { %v17946_v59 = vmul.f32 %v6356_v5, %v6141_v23  ;;  %12454 = vmatpush1.bf16.msra.mxu1 %v21423_v1  ;;  %12550 = vmatpush1.bf16.msra.mxu0 %v21424_v44  ;;  %v12591_v51 = vpack.c.bf16 %v7511_v62, %v7510_v55  ;;  %v7520_v23 = vld [vmem:[%s19514_s11 + $0xd0] sm:$0xff]  ;;  %v21439_v5 = vld [vmem:[#allocation278_spill] sm:$0xff]  ;;  %v12609_v1 = vpack.c.bf16 %v7503_v35, %v7502_v34  ;;  %v21440_v44 = vld [vmem:[#allocation280_spill] sm:$0xff] }
 0x796   :  { %12456 = vmatprep.subr.bf16.mxu1 %v21425_v37  ;;  %12552 = vmatprep.subr.bf16.mxu0 %v21178_v16  ;;  %v7494_v16 = vld [vmem:[%s19514_s11] sm:$0xff]  ;;  %v12611_v37 = vpack.c.bf16 %v7521_v24, %v7520_v23  ;;  %v7504_v55 = vld [vmem:[%s19514_s11 + $0x50] sm:$0xff]  ;;  %v7505_v62 = vld [vmem:[%s19514_s11 + $0x58] sm:$0xff] }
 0x797   :  { %v12593_v9 = vpack.c.bf16 %v7495_v4, %v7494_v16  ;;  %v21442_v16 = vld [vmem:[#allocation284_spill] sm:$0xff]  ;;  %v21449_v35 = vld [vmem:[#allocation346_spill] sm:$0xff]  ;;  %v21450_v23 = vld [vmem:[#allocation299_spill] sm:$0xff] }
 0x798   :  { %v7579_v34 = vld [vmem:[%s19514_s11 + $0x2a8] sm:$0xff] }
 0x799   :  { %12458 = vmatpush1.bf16.msra.mxu1 %v21426_v53  ;;  %12554 = vmatpush1.bf16.msra.mxu0 %v21180_v22  ;;  %v7513_v22 = vld [vmem:[%s19514_s11 + $0x98] sm:$0xff]  ;;  %v7522_v53 = vld [vmem:[%s19514_s11 + $0xe0] sm:$0xff] }
 0x79a   :  { %12460 = vmatprep.subr.bf16.mxu1 %v21427_v41  ;;  %12556 = vmatprep.subr.bf16.mxu0 %v21428_v42  ;;  %v12595_v28 = vpack.c.bf16 %v7513_v22, %v7512_v39  ;;  %v7523_v41 = vld [vmem:[%s19514_s11 + $0xe8] sm:$0xff]  ;;  %v21441_v42 = vld [vmem:[#allocation282_spill] sm:$0xff]  ;;  %v7506_v39 = vld [vmem:[%s19514_s11 + $0x60] sm:$0xff] }
 0x79b   :  { %v12615_v4 = vpack.c.bf16 %v7523_v41, %v7522_v53  ;;  %v7507_v22 = vld [vmem:[%s19514_s11 + $0x68] sm:$0xff]  ;;  %v7581_v53 = vld [vmem:[%s19514_s11 + $0x2b8] sm:$0xff]  ;;  %v21453_v41 = vld [vmem:[#allocation303_spill] sm:$0xff] }
 0x79d   :  { %12462 = vmatpush1.bf16.msra.mxu1 %v21429_v3  ;;  %12558 = vmatpush1.bf16.msra.mxu0 %v21430_v13 }
 0x79e   :  { %12496 = vmatprep.subr.bf16.mxu1 %v21431_v45  ;;  %12592 = vmatprep.subr.bf16.mxu0 %v12591_v51  ;;  %v12613_v51 = vpack.c.bf16 %v7505_v62, %v7504_v55  ;;  %v7525_v45 = vld [vmem:[%s19514_s11 + $0xf8] sm:$0xff]  ;;  %v7563_v55 = vld [vmem:[%s19514_s11 + $0x228] sm:$0xff]  ;;  %v7580_v62 = vld [vmem:[%s19514_s11 + $0x2b0] sm:$0xff] }
 0x7a0   :  { %7134 = vmatmul.mubr.f32.vlgmr.msra.gmra.mrb[84].mxu1 %v17555_v27  ;;  %7347 = vmatmul.mubr.f32.vlgmr.msra.gmra.mrb[84].mxu0 %v17555_v27 }
 0x7a1   :  { %12498 = vmatpush1.bf16.msra.mxu1 %v21432_v11  ;;  %12594 = vmatpush3.bf16.msra.mxu0 %v12593_v9  ;;  %v7524_v9 = vld [vmem:[%s19514_s11 + $0xf0] sm:$0xff]  ;;  %v21443_v11 = vld [vmem:[#allocation286_spill] sm:$0xff] }
 0x7a2   :  { %8006 = vmatprep.mubr.f32.mxu0 %v21433_v8  ;;  %12500 = vmatprep.subr.bf16.mxu1 %v21434_v0  ;;  %v21444_v0 = vld [vmem:[#allocation288_spill] sm:$0xff] }
 0x7a3   :  { %12596 = vmatprep.subr.bf16.mxu0 %v12595_v28  ;;  %7275 = vmatprep.mubr.f32.mxu1 %v20330_v63 }
 0x7a5   :  { %12502 = vmatpush1.bf16.msra.mxu1 %v21435_v31  ;;  %12598 = vmatpush3.bf16.msra.mxu0 %v12597_v43  ;;  %v12617_v43 = vpack.c.bf16 %v7507_v22, %v7506_v39  ;;  %v7565_v39 = vld [vmem:[%s19514_s11 + $0x238] sm:$0xff]  ;;  %v7582_v22 = vld [vmem:[%s19514_s11 + $0x2c0] sm:$0xff] }
 0x7a6   :  { %12504 = vmatprep.subr.bf16.mxu1 %v21436_v17  ;;  %12600 = vmatprep.subr.bf16.mxu0 %v12599_v54  ;;  %v12619_v54 = vpack.c.bf16 %v7525_v45, %v7524_v9  ;;  %v7559_v17 = vld [vmem:[%s19514_s11 + $0x208] sm:$0xff]  ;;  %v21456_v45 = vld [vmem:[#allocation309_spill] sm:$0xff] }
 0x7a9   :  { %12506 = vmatpush1.bf16.msra.mxu1 %v21437_v14  ;;  %12602 = vmatpush3.bf16.msra.mxu0 %v12601_v33  ;;  %v7558_v33 = vld [vmem:[%s19514_s11 + $0x200] sm:$0xff]  ;;  %v7560_v14 = vld [vmem:[%s19514_s11 + $0x210] sm:$0xff] }
 0x7aa   :  { %12508 = vmatprep.subr.bf16.mxu1 %v21438_v50  ;;  %12604 = vmatprep.subr.bf16.mxu0 %v12603_v15  ;;  %v7576_v15 = vld [vmem:[%s19514_s11 + $0x290] sm:$0xff]  ;;  %v12657_v40 = vpack.c.bf16 %v7559_v17, %v7558_v33 }
 0x7ab   :  { %v12659_v50 = vpack.c.bf16 %v7577_v58, %v7576_v15  ;;  %v21460_v33 = vld [vmem:[#allocation317_spill] sm:$0xff]  ;;  %v7570_v15 = vld [vmem:[%s19514_s11 + $0x260] sm:$0xff]  ;;  %v7571_v58 = vld [vmem:[%s19514_s11 + $0x268] sm:$0xff] }
 0x7ad   :  { %12510 = vmatpush1.bf16.msra.mxu1 %v21439_v5  ;;  %12606 = vmatpush3.bf16.msra.mxu0 %v12605_v21  ;;  %v7561_v21 = vld [vmem:[%s19514_s11 + $0x218] sm:$0xff]  ;;  %v21451_v5 = vld [vmem:[#allocation345_spill] sm:$0xff] }
 0x7ae   :  { %12512 = vmatprep.subr.bf16.mxu1 %v21440_v44  ;;  %12608 = vmatprep.subr.bf16.mxu0 %v12607_v60  ;;  %v7578_v60 = vld [vmem:[%s19514_s11 + $0x2a0] sm:$0xff]  ;;  %v12661_v24 = vpack.c.bf16 %v7561_v21, %v7560_v14  ;;  %v7589_v14 = vld [vmem:[%s19514_s11 + $0x2f8] sm:$0xff] }
 0x7af   :  { %v12663_v44 = vpack.c.bf16 %v7579_v34, %v7578_v60 }
 0x7b1   :  { %12514 = vmatpush1.bf16.msra.mxu1 %v21441_v42  ;;  %12610 = vmatpush3.bf16.msra.mxu0 %v12609_v1  ;;  %v21452_v1 = vld [vmem:[#allocation301_spill] sm:$0xff] }
 0x7b2   :  { %12516 = vmatprep.subr.bf16.mxu1 %v21442_v16  ;;  %12612 = vmatprep.subr.bf16.mxu0 %v12611_v37  ;;  %v7562_v37 = vld [vmem:[%s19514_s11 + $0x220] sm:$0xff]  ;;  %v12667_v16 = vpack.c.bf16 %v7581_v53, %v7580_v62  ;;  %v7639_v62 = vld [vmem:[%s19514_s11 + $0x488] sm:$0xff] }
 0x7b3   :  { %v6283_v3 = vpop.f32.mrb[72].mxu1  ;;  %v6496_v13 = vpop.f32.mrb[72].mxu0  ;;  %v12665_v42 = vpack.c.bf16 %v7563_v55, %v7562_v37  ;;  %v7543_v37 = vld [vmem:[%s19514_s11 + $0x188] sm:$0xff]  ;;  %v7638_v55 = vld [vmem:[%s19514_s11 + $0x480] sm:$0xff] }
 0x7b4   :  { %v7425_v6 = vmul.f32 %v6283_v3, %v17901_v19  ;;  %v18065_v56 = vmul.f32 %v17903_v12, %v6496_v13  ;;  %v6285_v28 = vpop.f32.mrb[73].mxu1  ;;  %v6498_v61 = vpop.f32.mrb[73].mxu0  ;;  %v7508_v19 = vld [vmem:[%s19514_s11 + $0x70] sm:$0xff]  ;;  %v7509_v12 = vld [vmem:[%s19514_s11 + $0x78] sm:$0xff]  ;;  %v7583_v3 = vld [vmem:[%s19514_s11 + $0x2c8] sm:$0xff] }
 0x7b5   :  { %v18068_v32 = vmul.f32 %v6285_v28, %v17853_v57  ;;  %12518 = vmatpush1.bf16.msra.mxu1 %v21443_v11  ;;  %12614 = vmatpush3.bf16.msra.mxu0 %v12613_v51  ;;  %v7574_v57 = vld [vmem:[%s19514_s11 + $0x280] sm:$0xff]  ;;  %v12621_v49 = vpack.c.bf16 %v7509_v12, %v7508_v19  ;;  %v21454_v51 = vld [vmem:[#allocation305_spill] sm:$0xff] }
 0x7b6   :  { %v18071_v8 = vmul.f32 %v7425_v6, %v6498_v61  ;;  %12520 = vmatprep.subr.bf16.mxu1 %v21444_v0  ;;  %12616 = vmatprep.subr.bf16.mxu0 %v12615_v4  ;;  %v12655_v31 = vpack.c.bf16 %v7575_v52, %v7574_v57  ;;  %v7564_v4 = vld [vmem:[%s19514_s11 + $0x230] sm:$0xff]  ;;  %v21455_v13 = vld [vmem:[#allocation307_spill] sm:$0xff]  ;;  %v12671_v6 = vpack.c.bf16 %v7583_v3, %v7582_v22  ;;  %v7567_v61 = vld [vmem:[%s19514_s11 + $0x248] sm:$0xff] }
 0x7b7   :  { %v12669_v9 = vpack.c.bf16 %v7565_v39, %v7564_v4  ;;  %v7566_v28 = vld [vmem:[%s19514_s11 + $0x240] sm:$0xff]  ;;  %v7584_v11 = vld [vmem:[%s19514_s11 + $0x2d0] sm:$0xff]  ;;  %v7569_v52 = vld [vmem:[%s19514_s11 + $0x258] sm:$0xff] }
 0x7b8   :  { %v21457_v0 = vld [vmem:[#allocation311_spill] sm:$0xff]  ;;  %v21458_v19 = vld [vmem:[#allocation313_spill] sm:$0xff]  ;;  %v7527_v39 = vld [vmem:[%s19514_s11 + $0x108] sm:$0xff] }
 0x7b9   :  { %12522 = vmatpush1.bf16.msra.mxu1 %v21445_v29  ;;  %12618 = vmatpush3.bf16.msra.mxu0 %v12617_v43  ;;  %v7585_v43 = vld [vmem:[%s19514_s11 + $0x2d8] sm:$0xff]  ;;  %v7568_v57 = vld [vmem:[%s19514_s11 + $0x250] sm:$0xff]  ;;  %v7586_v29 = vld [vmem:[%s19514_s11 + $0x2e0] sm:$0xff] }
 0x7ba   :  { %12524 = vmatprep.subr.bf16.mxu1 %v21446_v25  ;;  %12620 = vmatprep.subr.bf16.mxu0 %v12619_v54  ;;  %v12673_v54 = vpack.c.bf16 %v7567_v61, %v7566_v28  ;;  %v12675_v12 = vpack.c.bf16 %v7585_v43, %v7584_v11  ;;  %v21459_v25 = vld [vmem:[#allocation315_spill] sm:$0xff]  ;;  %v7623_v3 = vld [vmem:[%s19514_s11 + $0x408] sm:$0xff]  ;;  %v7528_v43 = vld [vmem:[%s19514_s11 + $0x110] sm:$0xff] }
 0x7bb   :  { %v21463_v53 = vld [vmem:[#allocation323_spill] sm:$0xff] }
 0x7bc   :  { %v7526_v4 = vld [vmem:[%s19514_s11 + $0x100] sm:$0xff] }
 0x7bd   :  { %12526 = vmatpush1.bf16.msra.mxu1 %v21447_v26  ;;  %12622 = vmatpush3.bf16.msra.mxu0 %v12621_v49  ;;  %v7587_v49 = vld [vmem:[%s19514_s11 + $0x2e8] sm:$0xff]  ;;  %v7622_v22 = vld [vmem:[%s19514_s11 + $0x400] sm:$0xff]  ;;  %v12625_v61 = vpack.c.bf16 %v7527_v39, %v7526_v4 }
 0x7be   :  { %12560 = vmatprep.subr.bf16.mxu1 %v21448_v18  ;;  %12656 = vmatprep.subr.bf16.mxu0 %v12655_v31  ;;  %v12677_v31 = vpack.c.bf16 %v7569_v52, %v7568_v57  ;;  %v12679_v17 = vpack.c.bf16 %v7587_v49, %v7586_v29  ;;  %v7588_v18 = vld [vmem:[%s19514_s11 + $0x2f0] sm:$0xff]  ;;  %v21465_v28 = vld [vmem:[#allocation327_spill] sm:$0xff]  ;;  %v12721_v11 = vpack.c.bf16 %v7623_v3, %v7622_v22  ;;  %v7625_v57 = vld [vmem:[%s19514_s11 + $0x418] sm:$0xff] }
 0x7bf   :  { %v7546_v52 = vld [vmem:[%s19514_s11 + $0x1a0] sm:$0xff]  ;;  %v7547_v29 = vld [vmem:[%s19514_s11 + $0x1a8] sm:$0xff]  ;;  %v21466_v49 = vld [vmem:[#allocation349_spill] sm:$0xff] }
 0x7c0   :  { %7276 = vmatmul.mubr.f32.vlgmr.msra.gmra.mrb[86].mxu1 %v17555_v27  ;;  %8007 = vmatmul.mubr.f32.vlgmr.msra.gmra.mrb[86].mxu0 %v21449_v35  ;;  %v7534_v22 = vld [vmem:[%s19514_s11 + $0x140] sm:$0xff]  ;;  %v7535_v3 = vld [vmem:[%s19514_s11 + $0x148] sm:$0xff] }
 0x7c1   :  { %12562 = vmatpush1.bf16.msra.mxu1 %v21450_v23  ;;  %12658 = vmatpush3.bf16.msra.mxu0 %v12657_v40  ;;  %v21461_v23 = vld [vmem:[#allocation319_spill] sm:$0xff] }
 0x7c2   :  { %8146 = vmatprep.mubr.f32.mxu0 %v21451_v5  ;;  %12564 = vmatprep.subr.bf16.mxu1 %v21452_v1  ;;  %v21462_v1 = vld [vmem:[#allocation321_spill] sm:$0xff] }
 0x7c3   :  { %12660 = vmatprep.subr.bf16.mxu0 %v12659_v50  ;;  %7417 = vmatprep.mubr.f32.mxu1 %v20330_v63 }
 0x7c5   :  { %12566 = vmatpush1.bf16.msra.mxu1 %v21453_v41  ;;  %12662 = vmatpush3.bf16.msra.mxu0 %v12661_v24  ;;  %v12681_v24 = vpack.c.bf16 %v7571_v58, %v7570_v15  ;;  %v21468_v15 = vld [vmem:[#allocation125_spill] sm:$0xff] }
 0x7c6   :  { %12568 = vmatprep.subr.bf16.mxu1 %v21454_v51  ;;  %12664 = vmatprep.subr.bf16.mxu0 %v12663_v44  ;;  %v12683_v44 = vpack.c.bf16 %v7589_v14, %v7588_v18  ;;  %v7626_v18 = vld [vmem:[%s19514_s11 + $0x420] sm:$0xff] }
 0x7c9   :  { %12570 = vmatpush1.bf16.msra.mxu1 %v21455_v13  ;;  %12666 = vmatpush3.bf16.msra.mxu0 %v12665_v42  ;;  %v21464_v42 = vld [vmem:[#allocation325_spill] sm:$0xff] }
 0x7ca   :  { %12572 = vmatprep.subr.bf16.mxu1 %v21456_v45  ;;  %12668 = vmatprep.subr.bf16.mxu0 %v12667_v16  ;;  %v12719_v16 = vpack.c.bf16 %v7639_v62, %v7638_v55  ;;  %v7544_v13 = vld [vmem:[%s19514_s11 + $0x190] sm:$0xff]  ;;  %v7629_v62 = vld [vmem:[%s19514_s11 + $0x438] sm:$0xff] }
 0x7cb   :  { %v7640_v45 = vld [vmem:[%s19514_s11 + $0x490] sm:$0xff] }
 0x7cd   :  { %12574 = vmatpush1.bf16.msra.mxu1 %v21457_v0  ;;  %12670 = vmatpush3.bf16.msra.mxu0 %v12669_v9  ;;  %v7545_v9 = vld [vmem:[%s19514_s11 + $0x198] sm:$0xff] }
 0x7ce   :  { %12576 = vmatprep.subr.bf16.mxu1 %v21458_v19  ;;  %12672 = vmatprep.subr.bf16.mxu0 %v12671_v6  ;;  %v7641_v6 = vld [vmem:[%s19514_s11 + $0x498] sm:$0xff]  ;;  %v12627_v19 = vpack.c.bf16 %v7545_v9, %v7544_v13  ;;  %v7630_v13 = vld [vmem:[%s19514_s11 + $0x440] sm:$0xff] }
 0x7cf   :  { %v7529_v0 = vld [vmem:[%s19514_s11 + $0x118] sm:$0xff] }
 0x7d1   :  { %12578 = vmatpush1.bf16.msra.mxu1 %v21459_v25  ;;  %12674 = vmatpush3.bf16.msra.mxu0 %v12673_v54  ;;  %v7624_v54 = vld [vmem:[%s19514_s11 + $0x410] sm:$0xff]  ;;  %v7642_v25 = vld [vmem:[%s19514_s11 + $0x4a0] sm:$0xff] }
 0x7d2   :  { %12580 = vmatprep.subr.bf16.mxu1 %v21460_v33  ;;  %12676 = vmatprep.subr.bf16.mxu0 %v12675_v12  ;;  %v12723_v12 = vpack.c.bf16 %v7641_v6, %v7640_v45  ;;  %v21467_v33 = vld [vmem:[#allocation348_spill] sm:$0xff]  ;;  %v12725_v58 = vpack.c.bf16 %v7625_v57, %v7624_v54  ;;  %v7552_v6 = vld [vmem:[%s19514_s11 + $0x1d0] sm:$0xff] }
 0x7d3   :  { %v6425_v26 = vpop.f32.mrb[74].mxu1  ;;  %v6638_v40 = vpop.f32.mrb[74].mxu0  ;;  %v7631_v45 = vld [vmem:[%s19514_s11 + $0x448] sm:$0xff]  ;;  %v7632_v57 = vld [vmem:[%s19514_s11 + $0x450] sm:$0xff] }
 0x7d4   :  { %v7429_v21 = vmul.f32 %v6425_v26, %v17944_v7  ;;  %v18190_v50 = vmul.f32 %v17946_v59, %v6638_v40  ;;  %v6427_v60 = vpop.f32.mrb[75].mxu1  ;;  %v6640_v34 = vpop.f32.mrb[75].mxu0  ;;  %v7572_v7 = vld [vmem:[%s19514_s11 + $0x270] sm:$0xff]  ;;  %v7573_v59 = vld [vmem:[%s19514_s11 + $0x278] sm:$0xff]  ;;  %v12631_v26 = vpack.c.bf16 %v7547_v29, %v7546_v52  ;;  %v7531_v40 = vld [vmem:[%s19514_s11 + $0x128] sm:$0xff] }
 0x7d5   :  { %v18193_v35 = vmul.f32 %v6427_v60, %v17899_v2  ;;  %12582 = vmatpush1.bf16.msra.mxu1 %v21461_v23  ;;  %12678 = vmatpush3.bf16.msra.mxu0 %v12677_v31  ;;  %v7542_v2 = vld [vmem:[%s19514_s11 + $0x180] sm:$0xff]  ;;  %v12685_v41 = vpack.c.bf16 %v7573_v59, %v7572_v7  ;;  %v7643_v31 = vld [vmem:[%s19514_s11 + $0x4a8] sm:$0xff]  ;;  %v7548_v60 = vld [vmem:[%s19514_s11 + $0x1b0] sm:$0xff] }
 0x7d6   :  { %v18196_v5 = vmul.f32 %v7429_v21, %v6640_v34  ;;  %12584 = vmatprep.subr.bf16.mxu1 %v21462_v1  ;;  %12680 = vmatprep.subr.bf16.mxu0 %v12679_v17  ;;  %v12623_v51 = vpack.c.bf16 %v7543_v37, %v7542_v2  ;;  %v12629_v17 = vpack.c.bf16 %v7529_v0, %v7528_v43  ;;  %v7627_v21 = vld [vmem:[%s19514_s11 + $0x428] sm:$0xff]  ;;  %v7549_v34 = vld [vmem:[%s19514_s11 + $0x1b8] sm:$0xff]  ;;  %v7644_v23 = vld [vmem:[%s19514_s11 + $0x4b0] sm:$0xff] }
 0x7d7   :  { %v12727_v14 = vpack.c.bf16 %v7643_v31, %v7642_v25  ;;  %v12635_v7 = vpack.c.bf16 %v7549_v34, %v7548_v60  ;;  %v7532_v59 = vld [vmem:[%s19514_s11 + $0x130] sm:$0xff]  ;;  %v7533_v2 = vld [vmem:[%s19514_s11 + $0x138] sm:$0xff]  ;;  %v12641_v43 = vpack.c.bf16 %v7535_v3, %v7534_v22  ;;  %v12737_v0 = vpack.c.bf16 %v7631_v45, %v7630_v13  ;;  %v7555_v25 = vld [vmem:[%s19514_s11 + $0x1e8] sm:$0xff] }
 0x7d8   :  { %v7628_v37 = vld [vmem:[%s19514_s11 + $0x430] sm:$0xff]  ;;  %v7633_v29 = vld [vmem:[%s19514_s11 + $0x458] sm:$0xff]  ;;  %v7650_v31 = vld [vmem:[%s19514_s11 + $0x4e0] sm:$0xff] }
 0x7d9   :  { %12586 = vmatpush1.bf16.msra.mxu1 %v21463_v53  ;;  %12682 = vmatpush3.bf16.msra.mxu0 %v12681_v24  ;;  %v7645_v24 = vld [vmem:[%s19514_s11 + $0x4b8] sm:$0xff]  ;;  %v7550_v53 = vld [vmem:[%s19514_s11 + $0x1c0] sm:$0xff]  ;;  %v12733_v4 = vpack.c.bf16 %v7629_v62, %v7628_v37  ;;  %v7635_v60 = vld [vmem:[%s19514_s11 + $0x468] sm:$0xff] }
 0x7da   :  { %12588 = vmatprep.subr.bf16.mxu1 %v21464_v42  ;;  %12684 = vmatprep.subr.bf16.mxu0 %v12683_v44  ;;  %v12729_v44 = vpack.c.bf16 %v7627_v21, %v7626_v18  ;;  %v12731_v55 = vpack.c.bf16 %v7645_v24, %v7644_v23  ;;  %v7646_v42 = vld [vmem:[%s19514_s11 + $0x4c0] sm:$0xff]  ;;  %v7556_v34 = vld [vmem:[%s19514_s11 + $0x1f0] sm:$0xff]  ;;  %v7557_v23 = vld [vmem:[%s19514_s11 + $0x1f8] sm:$0xff] }
 0x7db   :  { %v7703_v22 = vld [vmem:[%s19514_s11 + $0x688] sm:$0xff]  ;;  %v7590_v45 = vld [vmem:[%s19514_s11 + $0x300] sm:$0xff] }
 0x7dd   :  { %12590 = vmatpush1.bf16.msra.mxu1 %v21465_v28  ;;  %12686 = vmatpush3.bf16.msra.mxu0 %v12685_v41  ;;  %v7551_v41 = vld [vmem:[%s19514_s11 + $0x1c8] sm:$0xff]  ;;  %v7553_v28 = vld [vmem:[%s19514_s11 + $0x1d8] sm:$0xff] }
 0x7de   :  { %12624 = vmatprep.subr.bf16.mxu1 %v12623_v51  ;;  %12720 = vmatprep.subr.bf16.mxu0 %v12719_v16  ;;  %v7647_v51 = vld [vmem:[%s19514_s11 + $0x4c8] sm:$0xff]  ;;  %v12637_v16 = vpack.c.bf16 %v7533_v2, %v7532_v59  ;;  %v12639_v39 = vpack.c.bf16 %v7551_v41, %v7550_v53  ;;  %v12643_v54 = vpack.c.bf16 %v7553_v28, %v7552_v6  ;;  %v7652_v59 = vld [vmem:[%s19514_s11 + $0x4f0] sm:$0xff]  ;;  %v7653_v2 = vld [vmem:[%s19514_s11 + $0x4f8] sm:$0xff] }
 0x7df   :  { %v12735_v9 = vpack.c.bf16 %v7647_v51, %v7646_v42  ;;  %v7540_v53 = vld [vmem:[%s19514_s11 + $0x170] sm:$0xff]  ;;  %v7541_v41 = vld [vmem:[%s19514_s11 + $0x178] sm:$0xff]  ;;  %v12747_v42 = vpack.c.bf16 %v7653_v2, %v7652_v59  ;;  %v7591_v6 = vld [vmem:[%s19514_s11 + $0x308] sm:$0xff] }
 0x7e0   :  { %7418 = vmatmul.mubr.f32.vlgmr.msra.gmra.mrb[88].mxu1 %v17555_v27  ;;  %8147 = vmatmul.mubr.f32.vlgmr.msra.gmra.mrb[88].mxu0 %v21466_v49  ;;  %v7530_v27 = vld [vmem:[%s19514_s11 + $0x120] sm:$0xff]  ;;  %v7637_v51 = vld [vmem:[%s19514_s11 + $0x478] sm:$0xff]  ;;  %v12653_v3 = vpack.c.bf16 %v7541_v41, %v7540_v53  ;;  %v7691_v59 = vld [vmem:[%s19514_s11 + $0x628] sm:$0xff] }
 0x7e1   :  { %12626 = vmatpush3.bf16.msra.mxu1 %v12625_v61  ;;  %8076 = vmatprep.mubr.f32.mxu1 %v21467_v33  ;;  %v12633_v1 = vpack.c.bf16 %v7531_v40, %v7530_v27  ;;  %v7648_v61 = vld [vmem:[%s19514_s11 + $0x4d0] sm:$0xff]  ;;  %v7554_v49 = vld [vmem:[%s19514_s11 + $0x1e0] sm:$0xff]  ;;  %v7651_v33 = vld [vmem:[%s19514_s11 + $0x4e8] sm:$0xff] }
 0x7e2   :  { %12722 = vmatpush3.bf16.msra.mxu0 %v12721_v11  ;;  %8286 = vmatprep.mubr.f32.mxu0 %v21468_v15  ;;  %v7649_v11 = vld [vmem:[%s19514_s11 + $0x4d8] sm:$0xff]  ;;  %v12741_v15 = vpack.c.bf16 %v7633_v29, %v7632_v57  ;;  %v7539_v27 = vld [vmem:[%s19514_s11 + $0x168] sm:$0xff]  ;;  %v7634_v40 = vld [vmem:[%s19514_s11 + $0x460] sm:$0xff]  ;;  %v12743_v21 = vpack.c.bf16 %v7651_v33, %v7650_v31 }
 0x7e3   :  { %12628 = vmatprep.subr.bf16.mxu1 %v12627_v19  ;;  %12724 = vmatprep.subr.bf16.mxu0 %v12723_v12  ;;  %v7536_v19 = vld [vmem:[%s19514_s11 + $0x150] sm:$0xff]  ;;  %v7537_v12 = vld [vmem:[%s19514_s11 + $0x158] sm:$0xff]  ;;  %v12739_v52 = vpack.c.bf16 %v7649_v11, %v7648_v61  ;;  %v7686_v61 = vld [vmem:[%s19514_s11 + $0x600] sm:$0xff] }
 0x7e4   :  { %v7687_v11 = vld [vmem:[%s19514_s11 + $0x608] sm:$0xff]  ;;  %v7593_v29 = vld [vmem:[%s19514_s11 + $0x318] sm:$0xff]  ;;  %v7610_v33 = vld [vmem:[%s19514_s11 + $0x3a0] sm:$0xff] }
 0x7e5   :  { %12630 = vmatpush3.bf16.msra.mxu1 %v12629_v17  ;;  %v12645_v17 = vpack.c.bf16 %v7537_v12, %v7536_v19  ;;  %v7704_v19 = vld [vmem:[%s19514_s11 + $0x690] sm:$0xff]  ;;  %v7705_v12 = vld [vmem:[%s19514_s11 + $0x698] sm:$0xff]  ;;  %v12785_v57 = vpack.c.bf16 %v7687_v11, %v7686_v61  ;;  %v7598_v61 = vld [vmem:[%s19514_s11 + $0x340] sm:$0xff] }
 0x7e6   :  { %12726 = vmatpush3.bf16.msra.mxu0 %v12725_v58  ;;  %12632 = vmatprep.subr.bf16.mxu1 %v12631_v26  ;;  %v12647_v58 = vpack.c.bf16 %v7555_v25, %v7554_v49  ;;  %v7538_v26 = vld [vmem:[%s19514_s11 + $0x160] sm:$0xff]  ;;  %v7688_v49 = vld [vmem:[%s19514_s11 + $0x610] sm:$0xff]  ;;  %v7689_v31 = vld [vmem:[%s19514_s11 + $0x618] sm:$0xff] }
 0x7e7   :  { %12728 = vmatprep.subr.bf16.mxu0 %v12727_v14  ;;  %v7612_v2 = vld [vmem:[%s19514_s11 + $0x3b0] sm:$0xff]  ;;  %v7599_v11 = vld [vmem:[%s19514_s11 + $0x348] sm:$0xff] }
 0x7e9   :  { %12634 = vmatpush3.bf16.msra.mxu1 %v12633_v1 }
 0x7ea   :  { %12730 = vmatpush3.bf16.msra.mxu0 %v12729_v44  ;;  %12636 = vmatprep.subr.bf16.mxu1 %v12635_v7 }
 0x7eb   :  { %12732 = vmatprep.subr.bf16.mxu0 %v12731_v55  ;;  %v12649_v55 = vpack.c.bf16 %v7539_v27, %v7538_v26  ;;  %v7706_v26 = vld [vmem:[%s19514_s11 + $0x6a0] sm:$0xff]  ;;  %v7707_v27 = vld [vmem:[%s19514_s11 + $0x6a8] sm:$0xff] }
 0x7ed   :  { %12638 = vmatpush3.bf16.msra.mxu1 %v12637_v16  ;;  %v7606_v16 = vld [vmem:[%s19514_s11 + $0x380] sm:$0xff] }
 0x7ee   :  { %12734 = vmatpush3.bf16.msra.mxu0 %v12733_v4  ;;  %12640 = vmatprep.subr.bf16.mxu1 %v12639_v39  ;;  %v7607_v4 = vld [vmem:[%s19514_s11 + $0x388] sm:$0xff]  ;;  %v7702_v39 = vld [vmem:[%s19514_s11 + $0x680] sm:$0xff] }
 0x7ef   :  { %12736 = vmatprep.subr.bf16.mxu0 %v12735_v9  ;;  %v12687_v9 = vpack.c.bf16 %v7607_v4, %v7606_v16  ;;  %v12783_v28 = vpack.c.bf16 %v7703_v22, %v7702_v39  ;;  %v7692_v16 = vld [vmem:[%s19514_s11 + $0x630] sm:$0xff]  ;;  %v7693_v39 = vld [vmem:[%s19514_s11 + $0x638] sm:$0xff]  ;;  %v7614_v22 = vld [vmem:[%s19514_s11 + $0x3c0] sm:$0xff] }
 0x7f1   :  { %12642 = vmatpush3.bf16.msra.mxu1 %v12641_v43  ;;  %v7608_v43 = vld [vmem:[%s19514_s11 + $0x390] sm:$0xff] }
 0x7f2   :  { %12738 = vmatpush3.bf16.msra.mxu0 %v12737_v0  ;;  %12644 = vmatprep.subr.bf16.mxu1 %v12643_v54  ;;  %v7609_v0 = vld [vmem:[%s19514_s11 + $0x398] sm:$0xff]  ;;  %v12689_v54 = vpack.c.bf16 %v7591_v6, %v7590_v45  ;;  %v12797_v6 = vpack.c.bf16 %v7693_v39, %v7692_v16 }
 0x7f3   :  { %v6567_v18 = vpop.f32.mrb[76].mxu1  ;;  %v6780_v14 = vpop.f32.mrb[76].mxu0  ;;  %12740 = vmatprep.subr.bf16.mxu0 %v12739_v52  ;;  %v7592_v52 = vld [vmem:[%s19514_s11 + $0x310] sm:$0xff]  ;;  %v12691_v25 = vpack.c.bf16 %v7609_v0, %v7608_v43  ;;  %v7694_v43 = vld [vmem:[%s19514_s11 + $0x640] sm:$0xff] }
 0x7f4   :  { %v7433_v24 = vmul.f32 %v18068_v32, %v6567_v18  ;;  %v18388_v1 = vmul.f32 %v18071_v8, %v6780_v14  ;;  %v6569_v44 = vpop.f32.mrb[77].mxu1  ;;  %v6782_v7 = vpop.f32.mrb[77].mxu0  ;;  %v12745_v32 = vpack.c.bf16 %v7635_v60, %v7634_v40  ;;  %v12651_v8 = vpack.c.bf16 %v7557_v23, %v7556_v34  ;;  %v21470_v40 = vld [vmem:[#allocation121_spill] sm:$0xff]  ;;  %v21471_v14 = vld [vmem:[#allocation59_spill] sm:$0xff]  ;;  %v7595_v23 = vld [vmem:[%s19514_s11 + $0x328] sm:$0xff] }
 0x7f5   :  { %v18397_v37 = vmul.f32 %v17942_v20, %v6569_v44  ;;  %12646 = vmatpush3.bf16.msra.mxu1 %v12645_v17  ;;  %v7636_v20 = vld [vmem:[%s19514_s11 + $0x470] sm:$0xff]  ;;  %v7611_v17 = vld [vmem:[%s19514_s11 + $0x3a8] sm:$0xff]  ;;  %v12693_v18 = vpack.c.bf16 %v7593_v29, %v7592_v52  ;;  %v7594_v34 = vld [vmem:[%s19514_s11 + $0x320] sm:$0xff]  ;;  %v12705_v29 = vpack.c.bf16 %v7599_v11, %v7598_v61 }
 0x7f6   :  { %v18399_v62 = vmul.f32 %v7433_v24, %v6782_v7  ;;  %12742 = vmatpush3.bf16.msra.mxu0 %v12741_v15  ;;  %12648 = vmatprep.subr.bf16.mxu1 %v12647_v58  ;;  %v12749_v13 = vpack.c.bf16 %v7637_v51, %v7636_v20  ;;  %v21469_v15 = vld [vmem:[#allocation344_spill] sm:$0xff]  ;;  %v12787_v58 = vpack.c.bf16 %v7705_v12, %v7704_v19  ;;  %v7690_v24 = vld [vmem:[%s19514_s11 + $0x620] sm:$0xff]  ;;  %v21472_v44 = vld [vmem:[#allocation157_spill] sm:$0xff] }
 0x7f7   :  { %12744 = vmatprep.subr.bf16.mxu0 %v12743_v21  ;;  %v12789_v21 = vpack.c.bf16 %v7689_v31, %v7688_v49  ;;  %v12695_v60 = vpack.c.bf16 %v7611_v17, %v7610_v33  ;;  %v12791_v7 = vpack.c.bf16 %v7707_v27, %v7706_v26  ;;  %v12697_v53 = vpack.c.bf16 %v7595_v23, %v7594_v34  ;;  %v7597_v51 = vld [vmem:[%s19514_s11 + $0x338] sm:$0xff]  ;;  %v7616_v19 = vld [vmem:[%s19514_s11 + $0x3d0] sm:$0xff]  ;;  %v7618_v26 = vld [vmem:[%s19514_s11 + $0x3e0] sm:$0xff] }
 0x7f8   :  { %v12793_v41 = vpack.c.bf16 %v7691_v59, %v7690_v24  ;;  %v7617_v12 = vld [vmem:[%s19514_s11 + $0x3d8] sm:$0xff]  ;;  %v7600_v31 = vld [vmem:[%s19514_s11 + $0x350] sm:$0xff]  ;;  %v7619_v27 = vld [vmem:[%s19514_s11 + $0x3e8] sm:$0xff] }
 0x7f9   :  { %12650 = vmatpush3.bf16.msra.mxu1 %v12649_v55  ;;  %v7613_v55 = vld [vmem:[%s19514_s11 + $0x3b8] sm:$0xff]  ;;  %v7696_v17 = vld [vmem:[%s19514_s11 + $0x650] sm:$0xff]  ;;  %v7602_v34 = vld [vmem:[%s19514_s11 + $0x360] sm:$0xff] }
 0x7fa   :  { %12746 = vmatpush3.bf16.msra.mxu0 %v12745_v32  ;;  %12652 = vmatprep.subr.bf16.mxu1 %v12651_v8  ;;  %v7708_v32 = vld [vmem:[%s19514_s11 + $0x6b0] sm:$0xff]  ;;  %v7709_v8 = vld [vmem:[%s19514_s11 + $0x6b8] sm:$0xff]  ;;  %v12699_v20 = vpack.c.bf16 %v7613_v55, %v7612_v2  ;;  %v7603_v23 = vld [vmem:[%s19514_s11 + $0x368] sm:$0xff] }
 0x7fb   :  { %12748 = vmatprep.subr.bf16.mxu0 %v12747_v42  ;;  %v7596_v42 = vld [vmem:[%s19514_s11 + $0x330] sm:$0xff]  ;;  %v12795_v4 = vpack.c.bf16 %v7709_v8, %v7708_v32  ;;  %v7713_v52 = vld [vmem:[%s19514_s11 + $0x6d8] sm:$0xff]  ;;  %v7698_v24 = vld [vmem:[%s19514_s11 + $0x660] sm:$0xff] }
 0x7fc   :  { %v12701_v45 = vpack.c.bf16 %v7597_v51, %v7596_v42  ;;  %v7601_v33 = vld [vmem:[%s19514_s11 + $0x358] sm:$0xff]  ;;  %v7699_v2 = vld [vmem:[%s19514_s11 + $0x668] sm:$0xff]  ;;  %v7620_v55 = vld [vmem:[%s19514_s11 + $0x3f0] sm:$0xff] }
 0x7fd   :  { %12654 = vmatpush3.bf16.msra.mxu1 %v12653_v3  ;;  %v7615_v3 = vld [vmem:[%s19514_s11 + $0x3c8] sm:$0xff]  ;;  %v7621_v32 = vld [vmem:[%s19514_s11 + $0x3f8] sm:$0xff]  ;;  %v7716_v42 = vld [vmem:[%s19514_s11 + $0x6f0] sm:$0xff] }
 0x7fe   :  { %12750 = vmatpush3.bf16.msra.mxu0 %v12749_v13  ;;  %12688 = vmatprep.subr.bf16.mxu1 %v12687_v9  ;;  %v7710_v13 = vld [vmem:[%s19514_s11 + $0x6c0] sm:$0xff]  ;;  %v7711_v9 = vld [vmem:[%s19514_s11 + $0x6c8] sm:$0xff]  ;;  %v7717_v51 = vld [vmem:[%s19514_s11 + $0x6f8] sm:$0xff] }
 0x7ff   :  { %12784 = vmatprep.subr.bf16.mxu0 %v12783_v28  ;;  %v12703_v28 = vpack.c.bf16 %v7615_v3, %v7614_v22  ;;  %v12799_v0 = vpack.c.bf16 %v7711_v9, %v7710_v13  ;;  %v7604_v22 = vld [vmem:[%s19514_s11 + $0x370] sm:$0xff]  ;;  %v7605_v3 = vld [vmem:[%s19514_s11 + $0x378] sm:$0xff]  ;;  %v12811_v13 = vpack.c.bf16 %v7717_v51, %v7716_v42  ;;  %v7767_v61 = vld [vmem:[%s19514_s11 + $0x888] sm:$0xff] }
 0x800   :  { %8077 = vmatmul.mubr.f32.vlgmr.msra.gmra.mrb[90].mxu1 %v21469_v15  ;;  %v7701_v9 = vld [vmem:[%s19514_s11 + $0x678] sm:$0xff]  ;;  %v12717_v11 = vpack.c.bf16 %v7605_v3, %v7604_v22  ;;  %v7676_v42 = vld [vmem:[%s19514_s11 + $0x5b0] sm:$0xff] }
 0x801   :  { %8287 = vmatmul.mubr.f32.vlgmr.msra.gmra.mrb[90].mxu0 %v21470_v40  ;;  %12690 = vmatpush3.bf16.msra.mxu1 %v12689_v54  ;;  %v7695_v54 = vld [vmem:[%s19514_s11 + $0x648] sm:$0xff]  ;;  %v7714_v40 = vld [vmem:[%s19514_s11 + $0x6e0] sm:$0xff]  ;;  %v7677_v51 = vld [vmem:[%s19514_s11 + $0x5b8] sm:$0xff] }
 0x802   :  { %8216 = vmatprep.mubr.f32.mxu1 %v21471_v14  ;;  %12786 = vmatpush3.bf16.msra.mxu0 %v12785_v57  ;;  %v7712_v57 = vld [vmem:[%s19514_s11 + $0x6d0] sm:$0xff]  ;;  %v12801_v49 = vpack.c.bf16 %v7695_v54, %v7694_v43  ;;  %v12709_v14 = vpack.c.bf16 %v7601_v33, %v7600_v31  ;;  %v7654_v54 = vld [vmem:[%s19514_s11 + $0x500] sm:$0xff]  ;;  %v7769_v33 = vld [vmem:[%s19514_s11 + $0x898] sm:$0xff]  ;;  %v12763_v22 = vpack.c.bf16 %v7677_v51, %v7676_v42 }
 0x803   :  { %8426 = vmatprep.mubr.f32.mxu0 %v21472_v44  ;;  %12692 = vmatprep.subr.bf16.mxu1 %v12691_v25  ;;  %v12707_v25 = vpack.c.bf16 %v7617_v12, %v7616_v19  ;;  %v12803_v15 = vpack.c.bf16 %v7713_v52, %v7712_v57  ;;  %v7655_v19 = vld [vmem:[%s19514_s11 + $0x508] sm:$0xff]  ;;  %v7750_v57 = vld [vmem:[%s19514_s11 + $0x800] sm:$0xff]  ;;  %v7768_v31 = vld [vmem:[%s19514_s11 + $0x890] sm:$0xff] }
 0x804   :  { %12788 = vmatprep.subr.bf16.mxu0 %v12787_v58  ;;  %v7697_v58 = vld [vmem:[%s19514_s11 + $0x658] sm:$0xff]  ;;  %v7751_v52 = vld [vmem:[%s19514_s11 + $0x808] sm:$0xff]  ;;  %v7660_v3 = vld [vmem:[%s19514_s11 + $0x530] sm:$0xff] }
 0x805   :  { %12694 = vmatpush3.bf16.msra.mxu1 %v12693_v18  ;;  %v7715_v18 = vld [vmem:[%s19514_s11 + $0x6e8] sm:$0xff]  ;;  %v7684_v42 = vld [vmem:[%s19514_s11 + $0x5f0] sm:$0xff]  ;;  %v7685_v51 = vld [vmem:[%s19514_s11 + $0x5f8] sm:$0xff] }
 0x806   :  { %12790 = vmatpush3.bf16.msra.mxu0 %v12789_v21  ;;  %12696 = vmatprep.subr.bf16.mxu1 %v12695_v60  ;;  %v12805_v21 = vpack.c.bf16 %v7697_v58, %v7696_v17  ;;  %v12711_v60 = vpack.c.bf16 %v7619_v27, %v7618_v26  ;;  %v12807_v59 = vpack.c.bf16 %v7715_v18, %v7714_v40  ;;  %v7657_v58 = vld [vmem:[%s19514_s11 + $0x518] sm:$0xff]  ;;  %v7752_v26 = vld [vmem:[%s19514_s11 + $0x810] sm:$0xff]  ;;  %v7674_v18 = vld [vmem:[%s19514_s11 + $0x5a0] sm:$0xff] }
 0x807   :  { %12792 = vmatprep.subr.bf16.mxu0 %v12791_v7  ;;  %v12849_v17 = vpack.c.bf16 %v7751_v52, %v7750_v57  ;;  %v7753_v40 = vld [vmem:[%s19514_s11 + $0x818] sm:$0xff]  ;;  %v7758_v57 = vld [vmem:[%s19514_s11 + $0x840] sm:$0xff] }
 0x809   :  { %12698 = vmatpush3.bf16.msra.mxu1 %v12697_v53 }
 0x80a   :  { %12794 = vmatpush3.bf16.msra.mxu0 %v12793_v41  ;;  %12700 = vmatprep.subr.bf16.mxu1 %v12699_v20 }
 0x80b   :  { %12796 = vmatprep.subr.bf16.mxu0 %v12795_v4  ;;  %v12713_v4 = vpack.c.bf16 %v7603_v23, %v7602_v34  ;;  %v7770_v34 = vld [vmem:[%s19514_s11 + $0x8a0] sm:$0xff]  ;;  %v7771_v23 = vld [vmem:[%s19514_s11 + $0x8a8] sm:$0xff] }
 0x80d   :  { %12702 = vmatpush3.bf16.msra.mxu1 %v12701_v45  ;;  %v7670_v45 = vld [vmem:[%s19514_s11 + $0x580] sm:$0xff] }
 0x80e   :  { %12798 = vmatpush3.bf16.msra.mxu0 %v12797_v6  ;;  %12704 = vmatprep.subr.bf16.mxu1 %v12703_v28  ;;  %v7671_v6 = vld [vmem:[%s19514_s11 + $0x588] sm:$0xff]  ;;  %v7766_v28 = vld [vmem:[%s19514_s11 + $0x880] sm:$0xff] }
 0x80f   :  { %12800 = vmatprep.subr.bf16.mxu0 %v12799_v0  ;;  %v12751_v0 = vpack.c.bf16 %v7671_v6, %v7670_v45  ;;  %v12847_v12 = vpack.c.bf16 %v7767_v61, %v7766_v28  ;;  %v7757_v45 = vld [vmem:[%s19514_s11 + $0x838] sm:$0xff]  ;;  %v7678_v6 = vld [vmem:[%s19514_s11 + $0x5c0] sm:$0xff]  ;;  %v7679_v28 = vld [vmem:[%s19514_s11 + $0x5c8] sm:$0xff] }
 0x810   :  { %v7774_v61 = vld [vmem:[%s19514_s11 + $0x8c0] sm:$0xff] }
 0x811   :  { %12706 = vmatpush3.bf16.msra.mxu1 %v12705_v29  ;;  %v7672_v29 = vld [vmem:[%s19514_s11 + $0x590] sm:$0xff] }
 0x812   :  { %12802 = vmatpush3.bf16.msra.mxu0 %v12801_v49  ;;  %12708 = vmatprep.subr.bf16.mxu1 %v12707_v25  ;;  %v7673_v49 = vld [vmem:[%s19514_s11 + $0x598] sm:$0xff]  ;;  %v12753_v25 = vpack.c.bf16 %v7655_v19, %v7654_v54  ;;  %v12767_v54 = vpack.c.bf16 %v7679_v28, %v7678_v6  ;;  %v7662_v19 = vld [vmem:[%s19514_s11 + $0x540] sm:$0xff] }
 0x813   :  { %v6709_v44 = vpop.f32.mrb[78].mxu1  ;;  %v6922_v7 = vpop.f32.mrb[78].mxu0  ;;  %12804 = vmatprep.subr.bf16.mxu0 %v12803_v15  ;;  %v7656_v15 = vld [vmem:[%s19514_s11 + $0x510] sm:$0xff]  ;;  %v12755_v27 = vpack.c.bf16 %v7673_v49, %v7672_v29  ;;  %v7759_v29 = vld [vmem:[%s19514_s11 + $0x848] sm:$0xff]  ;;  %v7669_v6 = vld [vmem:[%s19514_s11 + $0x578] sm:$0xff] }
 0x814   :  { %v7437_v8 = vmul.f32 %v18193_v35, %v6709_v44  ;;  %v18593_v53 = vmul.f32 %v18196_v5, %v6922_v7  ;;  %v6711_v41 = vpop.f32.mrb[79].mxu1  ;;  %v6924_v20 = vpop.f32.mrb[79].mxu0  ;;  %v12809_v35 = vpack.c.bf16 %v7699_v2, %v7698_v24  ;;  %v12715_v5 = vpack.c.bf16 %v7621_v32, %v7620_v55  ;;  %v21474_v24 = vld [vmem:[#allocation153_spill] sm:$0xff]  ;;  %v7658_v55 = vld [vmem:[%s19514_s11 + $0x520] sm:$0xff]  ;;  %v7659_v32 = vld [vmem:[%s19514_s11 + $0x528] sm:$0xff] }
 0x815   :  { %v18602_v16 = vmul.f32 %v18065_v56, %v6711_v41  ;;  %12710 = vmatpush3.bf16.msra.mxu1 %v12709_v14  ;;  %v7700_v56 = vld [vmem:[%s19514_s11 + $0x670] sm:$0xff]  ;;  %v7675_v14 = vld [vmem:[%s19514_s11 + $0x5a8] sm:$0xff]  ;;  %v12757_v44 = vpack.c.bf16 %v7657_v58, %v7656_v15  ;;  %v12855_v41 = vpack.c.bf16 %v7771_v23, %v7770_v34  ;;  %v12865_v15 = vpack.c.bf16 %v7759_v29, %v7758_v57  ;;  %v7778_v34 = vld [vmem:[%s19514_s11 + $0x8e0] sm:$0xff] }
 0x816   :  { %v18604_v39 = vmul.f32 %v7437_v8, %v6924_v20  ;;  %12806 = vmatpush3.bf16.msra.mxu0 %v12805_v21  ;;  %12712 = vmatprep.subr.bf16.mxu1 %v12711_v60  ;;  %v12813_v43 = vpack.c.bf16 %v7701_v9, %v7700_v56  ;;  %v21473_v21 = vld [vmem:[#allocation347_spill] sm:$0xff]  ;;  %v12851_v60 = vpack.c.bf16 %v7769_v33, %v7768_v31  ;;  %v21475_v7 = vld [vmem:[#allocation93_spill] sm:$0xff]  ;;  %v7755_v20 = vld [vmem:[%s19514_s11 + $0x828] sm:$0xff] }
 0x817   :  { %12808 = vmatprep.subr.bf16.mxu0 %v12807_v59  ;;  %v12853_v59 = vpack.c.bf16 %v7753_v40, %v7752_v26  ;;  %v12759_v2 = vpack.c.bf16 %v7675_v14, %v7674_v18  ;;  %v7754_v8 = vld [vmem:[%s19514_s11 + $0x820] sm:$0xff]  ;;  %v7661_v56 = vld [vmem:[%s19514_s11 + $0x538] sm:$0xff]  ;;  %v7680_v49 = vld [vmem:[%s19514_s11 + $0x5d0] sm:$0xff] }
 0x818   :  { %v7776_v31 = vld [vmem:[%s19514_s11 + $0x8d0] sm:$0xff]  ;;  %v7777_v33 = vld [vmem:[%s19514_s11 + $0x8d8] sm:$0xff]  ;;  %v7779_v23 = vld [vmem:[%s19514_s11 + $0x8e8] sm:$0xff] }
 0x819   :  { %12714 = vmatpush3.bf16.msra.mxu1 %v12713_v4  ;;  %v7772_v4 = vld [vmem:[%s19514_s11 + $0x8b0] sm:$0xff]  ;;  %v12867_v18 = vpack.c.bf16 %v7777_v33, %v7776_v31  ;;  %v7761_v14 = vld [vmem:[%s19514_s11 + $0x858] sm:$0xff]  ;;  %v7719_v29 = vld [vmem:[%s19514_s11 + $0x708] sm:$0xff] }
 0x81a   :  { %12810 = vmatpush3.bf16.msra.mxu0 %v12809_v35  ;;  %12716 = vmatprep.subr.bf16.mxu1 %v12715_v5  ;;  %v12761_v35 = vpack.c.bf16 %v7659_v32, %v7658_v55  ;;  %v12857_v5 = vpack.c.bf16 %v7755_v20, %v7754_v8  ;;  %v7664_v26 = vld [vmem:[%s19514_s11 + $0x550] sm:$0xff]  ;;  %v7762_v55 = vld [vmem:[%s19514_s11 + $0x860] sm:$0xff]  ;;  %v7763_v20 = vld [vmem:[%s19514_s11 + $0x868] sm:$0xff] }
 0x81b   :  { %12812 = vmatprep.subr.bf16.mxu0 %v12811_v13  ;;  %v7756_v13 = vld [vmem:[%s19514_s11 + $0x830] sm:$0xff]  ;;  %v7815_v31 = vld [vmem:[%s19514_s11 + $0xa08] sm:$0xff] }
 0x81c   :  { %v7760_v40 = vld [vmem:[%s19514_s11 + $0x850] sm:$0xff] }
 0x81d   :  { %12718 = vmatpush3.bf16.msra.mxu1 %v12717_v11  ;;  %v7775_v11 = vld [vmem:[%s19514_s11 + $0x8c8] sm:$0xff]  ;;  %v7736_v33 = vld [vmem:[%s19514_s11 + $0x790] sm:$0xff] }
 0x81e   :  { %12814 = vmatpush3.bf16.msra.mxu0 %v12813_v43  ;;  %12752 = vmatprep.subr.bf16.mxu1 %v12751_v0  ;;  %v12765_v43 = vpack.c.bf16 %v7661_v56, %v7660_v3  ;;  %v12861_v0 = vpack.c.bf16 %v7757_v45, %v7756_v13  ;;  %v12863_v52 = vpack.c.bf16 %v7775_v11, %v7774_v61  ;;  %v7781_v3 = vld [vmem:[%s19514_s11 + $0x8f8] sm:$0xff]  ;;  %v7668_v45 = vld [vmem:[%s19514_s11 + $0x570] sm:$0xff]  ;;  %v7734_v11 = vld [vmem:[%s19514_s11 + $0x780] sm:$0xff] }
 0x81f   :  { %12848 = vmatprep.subr.bf16.mxu0 %v12847_v12  ;;  %v7663_v12 = vld [vmem:[%s19514_s11 + $0x548] sm:$0xff]  ;;  %v7765_v61 = vld [vmem:[%s19514_s11 + $0x878] sm:$0xff] }
 0x820   :  { %8217 = vmatmul.mubr.f32.vlgmr.msra.gmra.mrb[92].mxu1 %v21473_v21  ;;  %v7682_v21 = vld [vmem:[%s19514_s11 + $0x5e0] sm:$0xff] }
 0x821   :  { %8427 = vmatmul.mubr.f32.vlgmr.msra.gmra.mrb[92].mxu0 %v21474_v24  ;;  %12754 = vmatpush3.bf16.msra.mxu1 %v12753_v25  ;;  %v7681_v25 = vld [vmem:[%s19514_s11 + $0x5d8] sm:$0xff] }
 0x822   :  { %8356 = vmatprep.mubr.f32.mxu1 %v21475_v7  ;;  %12850 = vmatpush3.bf16.msra.mxu0 %v12849_v17  ;;  %v12769_v17 = vpack.c.bf16 %v7663_v12, %v7662_v19  ;;  %v12771_v58 = vpack.c.bf16 %v7681_v25, %v7680_v49  ;;  %v12781_v19 = vpack.c.bf16 %v7669_v6, %v7668_v45  ;;  %v7814_v25 = vld [vmem:[%s19514_s11 + $0xa00] sm:$0xff]  ;;  %v7821_v6 = vld [vmem:[%s19514_s11 + $0xa38] sm:$0xff] }
 0x823   :  { %8566 = vmatprep.mubr.f32.mxu0 %v17856_v46  ;;  %12756 = vmatprep.subr.bf16.mxu1 %v12755_v27  ;;  %v7773_v46 = vld [vmem:[%s19514_s11 + $0x8b8] sm:$0xff] }
 0x824   :  { %12852 = vmatprep.subr.bf16.mxu0 %v12851_v60  ;;  %v12859_v9 = vpack.c.bf16 %v7773_v46, %v7772_v4  ;;  %v7665_v27 = vld [vmem:[%s19514_s11 + $0x558] sm:$0xff]  ;;  %v7683_v60 = vld [vmem:[%s19514_s11 + $0x5e8] sm:$0xff] }
 0x825   :  { %12758 = vmatpush3.bf16.msra.mxu1 %v12757_v44  ;;  %v12773_v24 = vpack.c.bf16 %v7665_v27, %v7664_v26  ;;  %v12869_v44 = vpack.c.bf16 %v7761_v14, %v7760_v40  ;;  %v12775_v7 = vpack.c.bf16 %v7683_v60, %v7682_v21  ;;  %v12913_v27 = vpack.c.bf16 %v7815_v31, %v7814_v25  ;;  %v7720_v40 = vld [vmem:[%s19514_s11 + $0x710] sm:$0xff]  ;;  %v7745_v25 = vld [vmem:[%s19514_s11 + $0x7d8] sm:$0xff] }
 0x826   :  { %12854 = vmatpush3.bf16.msra.mxu0 %v12853_v59  ;;  %12760 = vmatprep.subr.bf16.mxu1 %v12759_v2  ;;  %v7666_v59 = vld [vmem:[%s19514_s11 + $0x560] sm:$0xff]  ;;  %v7667_v2 = vld [vmem:[%s19514_s11 + $0x568] sm:$0xff]  ;;  %v7816_v14 = vld [vmem:[%s19514_s11 + $0xa10] sm:$0xff] }
 0x827   :  { %12856 = vmatprep.subr.bf16.mxu0 %v12855_v41  ;;  %v12871_v41 = vpack.c.bf16 %v7779_v23, %v7778_v34  ;;  %v12777_v13 = vpack.c.bf16 %v7667_v2, %v7666_v59  ;;  %v7817_v34 = vld [vmem:[%s19514_s11 + $0xa18] sm:$0xff]  ;;  %v7738_v23 = vld [vmem:[%s19514_s11 + $0x7a0] sm:$0xff]  ;;  %v7835_v59 = vld [vmem:[%s19514_s11 + $0xaa8] sm:$0xff] }
 0x828   :  { %v7840_v31 = vld [vmem:[%s19514_s11 + $0xad0] sm:$0xff] }
 0x829   :  { %12762 = vmatpush3.bf16.msra.mxu1 %v12761_v35 }
 0x82a   :  { %12858 = vmatpush3.bf16.msra.mxu0 %v12857_v5  ;;  %12764 = vmatprep.subr.bf16.mxu1 %v12763_v22  ;;  %v7780_v22 = vld [vmem:[%s19514_s11 + $0x8f0] sm:$0xff] }
 0x82b   :  { %12860 = vmatprep.subr.bf16.mxu0 %v12859_v9  ;;  %v12875_v28 = vpack.c.bf16 %v7781_v3, %v7780_v22 }
 0x82d   :  { %12766 = vmatpush3.bf16.msra.mxu1 %v12765_v43  ;;  %v7735_v43 = vld [vmem:[%s19514_s11 + $0x788] sm:$0xff] }
 0x82e   :  { %12862 = vmatpush3.bf16.msra.mxu0 %v12861_v0  ;;  %12768 = vmatprep.subr.bf16.mxu1 %v12767_v54  ;;  %v7830_v0 = vld [vmem:[%s19514_s11 + $0xa80] sm:$0xff]  ;;  %v7831_v54 = vld [vmem:[%s19514_s11 + $0xa88] sm:$0xff]  ;;  %v12815_v57 = vpack.c.bf16 %v7735_v43, %v7734_v11 }
 0x82f   :  { %12864 = vmatprep.subr.bf16.mxu0 %v12863_v52  ;;  %v7718_v52 = vld [vmem:[%s19514_s11 + $0x700] sm:$0xff]  ;;  %v12911_v49 = vpack.c.bf16 %v7831_v54, %v7830_v0  ;;  %v7839_v11 = vld [vmem:[%s19514_s11 + $0xac8] sm:$0xff] }
 0x830   :  { %v12817_v26 = vpack.c.bf16 %v7719_v29, %v7718_v52  ;;  %v7823_v29 = vld [vmem:[%s19514_s11 + $0xa48] sm:$0xff] }
 0x831   :  { %12770 = vmatpush3.bf16.msra.mxu1 %v12769_v17  ;;  %v7737_v17 = vld [vmem:[%s19514_s11 + $0x798] sm:$0xff] }
 0x832   :  { %12866 = vmatpush3.bf16.msra.mxu0 %v12865_v15  ;;  %12772 = vmatprep.subr.bf16.mxu1 %v12771_v58  ;;  %v7832_v15 = vld [vmem:[%s19514_s11 + $0xa90] sm:$0xff]  ;;  %v7833_v58 = vld [vmem:[%s19514_s11 + $0xa98] sm:$0xff]  ;;  %v12819_v21 = vpack.c.bf16 %v7737_v17, %v7736_v33 }
 0x833   :  { %v6851_v32 = vpop.f32.mrb[80].mxu1  ;;  %v7064_v8 = vpop.f32.mrb[80].mxu0  ;;  %12868 = vmatprep.subr.bf16.mxu0 %v12867_v18  ;;  %v7721_v18 = vld [vmem:[%s19514_s11 + $0x718] sm:$0xff]  ;;  %v12915_v60 = vpack.c.bf16 %v7833_v58, %v7832_v15 }
 0x834   :  { %v7441_v4 = vmul.f32 %v18397_v37, %v6851_v32  ;;  %v18798_v46 = vmul.f32 %v18399_v62, %v7064_v8  ;;  %v6853_v35 = vpop.f32.mrb[81].mxu1  ;;  %v7066_v5 = vpop.f32.mrb[81].mxu0  ;;  %v12873_v37 = vpack.c.bf16 %v7763_v20, %v7762_v55  ;;  %v12779_v62 = vpack.c.bf16 %v7685_v51, %v7684_v42  ;;  %v7722_v8 = vld [vmem:[%s19514_s11 + $0x720] sm:$0xff]  ;;  %v7740_v42 = vld [vmem:[%s19514_s11 + $0x7b0] sm:$0xff]  ;;  %v7741_v51 = vld [vmem:[%s19514_s11 + $0x7b8] sm:$0xff] }
 0x835   :  { %v18807_v56 = vmul.f32 %v18190_v50, %v6853_v35  ;;  %12774 = vmatpush3.bf16.msra.mxu1 %v12773_v24  ;;  %v7764_v50 = vld [vmem:[%s19514_s11 + $0x870] sm:$0xff]  ;;  %v7739_v24 = vld [vmem:[%s19514_s11 + $0x7a8] sm:$0xff]  ;;  %v12821_v2 = vpack.c.bf16 %v7721_v18, %v7720_v40  ;;  %v12917_v55 = vpack.c.bf16 %v7817_v34, %v7816_v14  ;;  %v7818_v20 = vld [vmem:[%s19514_s11 + $0xa20] sm:$0xff]  ;;  %v12827_v3 = vpack.c.bf16 %v7741_v51, %v7740_v42 }
 0x836   :  { %v18809_v9 = vmul.f32 %v7441_v4, %v7066_v5  ;;  %12870 = vmatpush3.bf16.msra.mxu0 %v12869_v44  ;;  %12776 = vmatprep.subr.bf16.mxu1 %v12775_v7  ;;  %v12877_v12 = vpack.c.bf16 %v7765_v61, %v7764_v50  ;;  %v21476_v44 = vld [vmem:[#allocation37_spill] sm:$0xff]  ;;  %v7834_v7 = vld [vmem:[%s19514_s11 + $0xaa0] sm:$0xff]  ;;  %v12823_v32 = vpack.c.bf16 %v7739_v24, %v7738_v23  ;;  %v7837_v35 = vld [vmem:[%s19514_s11 + $0xab8] sm:$0xff] }
 0x837   :  { %12872 = vmatprep.subr.bf16.mxu0 %v12871_v41  ;;  %v7723_v41 = vld [vmem:[%s19514_s11 + $0x728] sm:$0xff]  ;;  %v7836_v4 = vld [vmem:[%s19514_s11 + $0xab0] sm:$0xff]  ;;  %v7742_v50 = vld [vmem:[%s19514_s11 + $0x7c0] sm:$0xff] }
 0x838   :  { %v12825_v5 = vpack.c.bf16 %v7723_v41, %v7722_v8  ;;  %v12923_v45 = vpack.c.bf16 %v7837_v35, %v7836_v4  ;;  %v7838_v61 = vld [vmem:[%s19514_s11 + $0xac0] sm:$0xff]  ;;  %v7841_v33 = vld [vmem:[%s19514_s11 + $0xad8] sm:$0xff]  ;;  %v7824_v40 = vld [vmem:[%s19514_s11 + $0xa50] sm:$0xff] }
 0x839   :  { %12778 = vmatpush3.bf16.msra.mxu1 %v12777_v13  ;;  %v7724_v13 = vld [vmem:[%s19514_s11 + $0x730] sm:$0xff]  ;;  %v12927_v52 = vpack.c.bf16 %v7839_v11, %v7838_v61  ;;  %v12931_v18 = vpack.c.bf16 %v7841_v33, %v7840_v31  ;;  %v7825_v14 = vld [vmem:[%s19514_s11 + $0xa58] sm:$0xff]  ;;  %v7842_v34 = vld [vmem:[%s19514_s11 + $0xae0] sm:$0xff] }
 0x83a   :  { %12874 = vmatpush3.bf16.msra.mxu0 %v12873_v37  ;;  %12780 = vmatprep.subr.bf16.mxu1 %v12779_v62  ;;  %v7725_v37 = vld [vmem:[%s19514_s11 + $0x738] sm:$0xff]  ;;  %v7820_v62 = vld [vmem:[%s19514_s11 + $0xa30] sm:$0xff]  ;;  %v7843_v23 = vld [vmem:[%s19514_s11 + $0xae8] sm:$0xff] }
 0x83b   :  { %12876 = vmatprep.subr.bf16.mxu0 %v12875_v28  ;;  %v7743_v28 = vld [vmem:[%s19514_s11 + $0x7c8] sm:$0xff]  ;;  %v12829_v43 = vpack.c.bf16 %v7725_v37, %v7724_v13  ;;  %v12925_v0 = vpack.c.bf16 %v7821_v6, %v7820_v62  ;;  %v12935_v41 = vpack.c.bf16 %v7843_v23, %v7842_v34  ;;  %v7732_v62 = vld [vmem:[%s19514_s11 + $0x770] sm:$0xff]  ;;  %v7894_v11 = vld [vmem:[%s19514_s11 + $0xc80] sm:$0xff] }
 0x83c   :  { %v12831_v54 = vpack.c.bf16 %v7743_v28, %v7742_v50  ;;  %v7829_v50 = vld [vmem:[%s19514_s11 + $0xa78] sm:$0xff]  ;;  %v7798_v28 = vld [vmem:[%s19514_s11 + $0x980] sm:$0xff]  ;;  %v7799_v61 = vld [vmem:[%s19514_s11 + $0x988] sm:$0xff] }
 0x83d   :  { %12782 = vmatpush3.bf16.msra.mxu1 %v12781_v19  ;;  %v7726_v19 = vld [vmem:[%s19514_s11 + $0x740] sm:$0xff]  ;;  %v7801_v31 = vld [vmem:[%s19514_s11 + $0x998] sm:$0xff]  ;;  %v7896_v33 = vld [vmem:[%s19514_s11 + $0xc90] sm:$0xff] }
 0x83e   :  { %12878 = vmatpush3.bf16.msra.mxu0 %v12877_v12  ;;  %12816 = vmatprep.subr.bf16.mxu1 %v12815_v57  ;;  %v7727_v12 = vld [vmem:[%s19514_s11 + $0x748] sm:$0xff]  ;;  %v7822_v57 = vld [vmem:[%s19514_s11 + $0xa40] sm:$0xff] }
 0x83f   :  { %12912 = vmatprep.subr.bf16.mxu0 %v12911_v49  ;;  %v7744_v49 = vld [vmem:[%s19514_s11 + $0x7d0] sm:$0xff]  ;;  %v12833_v17 = vpack.c.bf16 %v7727_v12, %v7726_v19  ;;  %v12929_v15 = vpack.c.bf16 %v7823_v29, %v7822_v57  ;;  %v12879_v19 = vpack.c.bf16 %v7799_v61, %v7798_v28  ;;  %v7782_v12 = vld [vmem:[%s19514_s11 + $0x900] sm:$0xff]  ;;  %v7783_v57 = vld [vmem:[%s19514_s11 + $0x908] sm:$0xff] }
 0x840   :  { %8357 = vmatmul.mubr.f32.vlgmr.msra.gmra.mrb[94].mxu1 %v21476_v44  ;;  %v12835_v58 = vpack.c.bf16 %v7745_v25, %v7744_v49  ;;  %v12933_v44 = vpack.c.bf16 %v7825_v14, %v7824_v40  ;;  %v7878_v29 = vld [vmem:[%s19514_s11 + $0xc00] sm:$0xff]  ;;  %v7879_v49 = vld [vmem:[%s19514_s11 + $0xc08] sm:$0xff]  ;;  %v7800_v25 = vld [vmem:[%s19514_s11 + $0x990] sm:$0xff] }
 0x841   :  { %8567 = vmatmul.mubr.f32.vlgmr.msra.gmra.mrb[94].mxu0 %v17772_v30  ;;  %12818 = vmatpush3.bf16.msra.mxu1 %v12817_v26  ;;  %v12919_v30 = vpack.c.bf16 %v7835_v59, %v7834_v7  ;;  %v7728_v26 = vld [vmem:[%s19514_s11 + $0x750] sm:$0xff]  ;;  %v7730_v59 = vld [vmem:[%s19514_s11 + $0x760] sm:$0xff]  ;;  %v7803_v34 = vld [vmem:[%s19514_s11 + $0x9a8] sm:$0xff] }
 0x842   :  { %8496 = vmatprep.mubr.f32.mxu1 %v17765_v38  ;;  %12914 = vmatpush3.bf16.msra.mxu0 %v12913_v27  ;;  %v7819_v38 = vld [vmem:[%s19514_s11 + $0xa28] sm:$0xff]  ;;  %v7729_v27 = vld [vmem:[%s19514_s11 + $0x758] sm:$0xff]  ;;  %v7880_v40 = vld [vmem:[%s19514_s11 + $0xc10] sm:$0xff] }
 0x843   :  { %12820 = vmatprep.subr.bf16.mxu1 %v12819_v21  ;;  %12916 = vmatprep.subr.bf16.mxu0 %v12915_v60  ;;  %v12921_v22 = vpack.c.bf16 %v7819_v38, %v7818_v20  ;;  %v7746_v21 = vld [vmem:[%s19514_s11 + $0x7e0] sm:$0xff]  ;;  %v7747_v60 = vld [vmem:[%s19514_s11 + $0x7e8] sm:$0xff]  ;;  %v12837_v24 = vpack.c.bf16 %v7729_v27, %v7728_v26  ;;  %v7749_v38 = vld [vmem:[%s19514_s11 + $0x7f8] sm:$0xff] }
 0x844   :  { %v12839_v7 = vpack.c.bf16 %v7747_v60, %v7746_v21  ;;  %v7827_v20 = vld [vmem:[%s19514_s11 + $0xa68] sm:$0xff]  ;;  %v7784_v26 = vld [vmem:[%s19514_s11 + $0x910] sm:$0xff]  ;;  %v7785_v27 = vld [vmem:[%s19514_s11 + $0x918] sm:$0xff] }
 0x845   :  { %12822 = vmatpush3.bf16.msra.mxu1 %v12821_v2  ;;  %v7731_v2 = vld [vmem:[%s19514_s11 + $0x768] sm:$0xff]  ;;  %v7881_v21 = vld [vmem:[%s19514_s11 + $0xc18] sm:$0xff]  ;;  %v7802_v60 = vld [vmem:[%s19514_s11 + $0x9a0] sm:$0xff] }
 0x846   :  { %12918 = vmatpush3.bf16.msra.mxu0 %v12917_v55  ;;  %12824 = vmatprep.subr.bf16.mxu1 %v12823_v32  ;;  %v7826_v55 = vld [vmem:[%s19514_s11 + $0xa60] sm:$0xff]  ;;  %v12841_v13 = vpack.c.bf16 %v7731_v2, %v7730_v59  ;;  %v12887_v59 = vpack.c.bf16 %v7803_v34, %v7802_v60  ;;  %v7787_v2 = vld [vmem:[%s19514_s11 + $0x928] sm:$0xff] }
 0x847   :  { %12920 = vmatprep.subr.bf16.mxu0 %v12919_v30  ;;  %v7748_v30 = vld [vmem:[%s19514_s11 + $0x7f0] sm:$0xff]  ;;  %v7898_v23 = vld [vmem:[%s19514_s11 + $0xca0] sm:$0xff]  ;;  %v7791_v28 = vld [vmem:[%s19514_s11 + $0x948] sm:$0xff] }
 0x848   :  { %v7886_v61 = vld [vmem:[%s19514_s11 + $0xc40] sm:$0xff]  ;;  %v7795_v60 = vld [vmem:[%s19514_s11 + $0x968] sm:$0xff] }
 0x849   :  { %12826 = vmatpush3.bf16.msra.mxu1 %v12825_v5  ;;  %v7844_v5 = vld [vmem:[%s19514_s11 + $0xaf0] sm:$0xff]  ;;  %v7890_v34 = vld [vmem:[%s19514_s11 + $0xc60] sm:$0xff] }
 0x84a   :  { %12922 = vmatpush3.bf16.msra.mxu0 %v12921_v22  ;;  %12828 = vmatprep.subr.bf16.mxu1 %v12827_v3  ;;  %v7845_v22 = vld [vmem:[%s19514_s11 + $0xaf8] sm:$0xff] }
 0x84b   :  { %12924 = vmatprep.subr.bf16.mxu0 %v12923_v45  ;;  %v7733_v45 = vld [vmem:[%s19514_s11 + $0x778] sm:$0xff]  ;;  %v12939_v6 = vpack.c.bf16 %v7845_v22, %v7844_v5  ;;  %v7884_v5 = vld [vmem:[%s19514_s11 + $0xc30] sm:$0xff] }
 0x84d   :  { %12830 = vmatpush3.bf16.msra.mxu1 %v12829_v43  ;;  %v7895_v43 = vld [vmem:[%s19514_s11 + $0xc88] sm:$0xff] }
 0x84e   :  { %12926 = vmatpush3.bf16.msra.mxu0 %v12925_v0  ;;  %12832 = vmatprep.subr.bf16.mxu1 %v12831_v54  ;;  %v12845_v0 = vpack.c.bf16 %v7733_v45, %v7732_v62  ;;  %v7903_v62 = vld [vmem:[%s19514_s11 + $0xcc8] sm:$0xff] }
 0x84f   :  { %12928 = vmatprep.subr.bf16.mxu0 %v12927_v52  ;;  %v12975_v52 = vpack.c.bf16 %v7895_v43, %v7894_v11  ;;  %v7887_v43 = vld [vmem:[%s19514_s11 + $0xc48] sm:$0xff] }
 0x851   :  { %12834 = vmatpush3.bf16.msra.mxu1 %v12833_v17  ;;  %v7897_v17 = vld [vmem:[%s19514_s11 + $0xc98] sm:$0xff] }
 0x852   :  { %12930 = vmatpush3.bf16.msra.mxu0 %v12929_v15  ;;  %12836 = vmatprep.subr.bf16.mxu1 %v12835_v58  ;;  %v12881_v15 = vpack.c.bf16 %v7783_v57, %v7782_v12  ;;  %v12977_v58 = vpack.c.bf16 %v7879_v49, %v7878_v29  ;;  %v12979_v14 = vpack.c.bf16 %v7897_v17, %v7896_v33  ;;  %v7905_v12 = vld [vmem:[%s19514_s11 + $0xcd8] sm:$0xff]  ;;  %v7792_v49 = vld [vmem:[%s19514_s11 + $0x950] sm:$0xff] }
 0x853   :  { %v6993_v32 = vpop.f32.mrb[82].mxu1  ;;  %v7206_v8 = vpop.f32.mrb[82].mxu0  ;;  %12932 = vmatprep.subr.bf16.mxu0 %v12931_v18  ;;  %v12883_v18 = vpack.c.bf16 %v7801_v31, %v7800_v25  ;;  %v7793_v25 = vld [vmem:[%s19514_s11 + $0x958] sm:$0xff]  ;;  %v7888_v31 = vld [vmem:[%s19514_s11 + $0xc50] sm:$0xff] }
 0x854   :  { %v7445_v42 = vmul.f32 %v18602_v16, %v6993_v32  ;;  %v19002_v51 = vmul.f32 %v18604_v39, %v7206_v8  ;;  %v6995_v4 = vpop.f32.mrb[83].mxu1  ;;  %v7208_v35 = vpop.f32.mrb[83].mxu0  ;;  %v12937_v16 = vpack.c.bf16 %v7827_v20, %v7826_v55  ;;  %v12843_v39 = vpack.c.bf16 %v7749_v38, %v7748_v30  ;;  %v7882_v55 = vld [vmem:[%s19514_s11 + $0xc20] sm:$0xff]  ;;  %v7804_v32 = vld [vmem:[%s19514_s11 + $0x9b0] sm:$0xff]  ;;  %v7805_v8 = vld [vmem:[%s19514_s11 + $0x9b8] sm:$0xff] }
 0x855   :  { %v19011_v3 = vmul.f32 %v18388_v1, %v6995_v4  ;;  %12838 = vmatpush3.bf16.msra.mxu1 %v12837_v24  ;;  %v7828_v1 = vld [vmem:[%s19514_s11 + $0xa70] sm:$0xff]  ;;  %v7899_v24 = vld [vmem:[%s19514_s11 + $0xca8] sm:$0xff]  ;;  %v7901_v20 = vld [vmem:[%s19514_s11 + $0xcb8] sm:$0xff] }
 0x856   :  { %v7452_v37 = vmul.f32 %v7445_v42, %v7208_v35  ;;  %12934 = vmatpush3.bf16.msra.mxu0 %v12933_v44  ;;  %12840 = vmatprep.subr.bf16.mxu1 %v12839_v7  ;;  %v12941_v54 = vpack.c.bf16 %v7829_v50, %v7828_v1  ;;  %v12885_v44 = vpack.c.bf16 %v7785_v27, %v7784_v26  ;;  %v7788_v4 = vld [vmem:[%s19514_s11 + $0x930] sm:$0xff]  ;;  %v7789_v35 = vld [vmem:[%s19514_s11 + $0x938] sm:$0xff]  ;;  %v7790_v50 = vld [vmem:[%s19514_s11 + $0x940] sm:$0xff] }
 0x857   :  { %12936 = vmatprep.subr.bf16.mxu0 %v12935_v41  ;;  %v12981_v7 = vpack.c.bf16 %v7881_v21, %v7880_v40  ;;  %v7900_v41 = vld [vmem:[%s19514_s11 + $0xcb0] sm:$0xff]  ;;  %v12891_v42 = vpack.c.bf16 %v7805_v8, %v7804_v32  ;;  %v12893_v45 = vpack.c.bf16 %v7789_v35, %v7788_v4  ;;  %v12897_v57 = vpack.c.bf16 %v7791_v28, %v7790_v50  ;;  %v7889_v17 = vld [vmem:[%s19514_s11 + $0xc58] sm:$0xff]  ;;  %v7906_v26 = vld [vmem:[%s19514_s11 + $0xce0] sm:$0xff] }
 0x858   :  { %8706 = vmatprep.mubr.f32.mxu0 %v7452_v37  ;;  %v12987_v22 = vpack.c.bf16 %v7901_v20, %v7900_v41  ;;  %v7806_v37 = vld [vmem:[%s19514_s11 + $0x9c0] sm:$0xff]  ;;  %v7907_v27 = vld [vmem:[%s19514_s11 + $0xce8] sm:$0xff]  ;;  %v12901_v40 = vpack.c.bf16 %v7793_v25, %v7792_v49  ;;  %v7908_v32 = vld [vmem:[%s19514_s11 + $0xcf0] sm:$0xff] }
 0x859   :  { %12842 = vmatpush3.bf16.msra.mxu1 %v12841_v13  ;;  %v7885_v13 = vld [vmem:[%s19514_s11 + $0xc38] sm:$0xff]  ;;  %v7794_v21 = vld [vmem:[%s19514_s11 + $0x960] sm:$0xff]  ;;  %v7848_v28 = vld [vmem:[%s19514_s11 + $0xb10] sm:$0xff] }
 0x85a   :  { %12938 = vmatpush3.bf16.msra.mxu0 %v12937_v16  ;;  %12844 = vmatprep.subr.bf16.mxu1 %v12843_v39  ;;  %v7807_v16 = vld [vmem:[%s19514_s11 + $0x9c8] sm:$0xff]  ;;  %v7902_v39 = vld [vmem:[%s19514_s11 + $0xcc0] sm:$0xff]  ;;  %v12989_v1 = vpack.c.bf16 %v7885_v13, %v7884_v5  ;;  %v7909_v8 = vld [vmem:[%s19514_s11 + $0xcf8] sm:$0xff]  ;;  %v12905_v20 = vpack.c.bf16 %v7795_v60, %v7794_v21 }
 0x85b   :  { %12940 = vmatprep.subr.bf16.mxu0 %v12939_v6  ;;  %v12895_v6 = vpack.c.bf16 %v7807_v16, %v7806_v37  ;;  %v12991_v11 = vpack.c.bf16 %v7903_v62, %v7902_v39  ;;  %v13003_v4 = vpack.c.bf16 %v7909_v8, %v7908_v32  ;;  %v7893_v35 = vld [vmem:[%s19514_s11 + $0xc78] sm:$0xff]  ;;  %v7862_v5 = vld [vmem:[%s19514_s11 + $0xb80] sm:$0xff]  ;;  %v7847_v62 = vld [vmem:[%s19514_s11 + $0xb08] sm:$0xff] }
 0x85c   :  { %v7846_v39 = vld [vmem:[%s19514_s11 + $0xb00] sm:$0xff]  ;;  %v7852_v25 = vld [vmem:[%s19514_s11 + $0xb30] sm:$0xff] }
 0x85d   :  { %12846 = vmatpush3.bf16.msra.mxu1 %v12845_v0  ;;  %v7808_v0 = vld [vmem:[%s19514_s11 + $0x9d0] sm:$0xff] }
 0x85e   :  { %12942 = vmatpush3.bf16.msra.mxu0 %v12941_v54  ;;  %12880 = vmatprep.subr.bf16.mxu1 %v12879_v19  ;;  %v7809_v54 = vld [vmem:[%s19514_s11 + $0x9d8] sm:$0xff]  ;;  %v7904_v19 = vld [vmem:[%s19514_s11 + $0xcd0] sm:$0xff] }
 0x85f   :  { %12976 = vmatprep.subr.bf16.mxu0 %v12975_v52  ;;  %v12993_v52 = vpack.c.bf16 %v7887_v43, %v7886_v61  ;;  %v12899_v29 = vpack.c.bf16 %v7809_v54, %v7808_v0  ;;  %v12995_v33 = vpack.c.bf16 %v7905_v12, %v7904_v19  ;;  %v7849_v61 = vld [vmem:[%s19514_s11 + $0xb18] sm:$0xff]  ;;  %v7867_v43 = vld [vmem:[%s19514_s11 + $0xba8] sm:$0xff]  ;;  %v21477_v0 = vmov 0.0|0.0   ;;  %v7850_v12 = vld [vmem:[%s19514_s11 + $0xb20] sm:$0xff] }
 0x860   :  { %8497 = vmatmul.mubr.f32.vlgmr.msra.gmra.mrb[96].mxu1 %v17813_v10  ;;  %v7786_v10 = vld [vmem:[%s19514_s11 + $0x920] sm:$0xff]  ;;  %v12949_v54 = vpack.c.bf16 %v7849_v61, %v7848_v28  ;;  %v7856_v60 = vld [vmem:[%s19514_s11 + $0xb50] sm:$0xff] }
 0x861   :  { %8707 = vmatmul.mubr.f32.vlgmr.msra.gmra.mrb[96].mxu0 %v17817_v47  ;;  %12882 = vmatpush3.bf16.msra.mxu1 %v12881_v15  ;;  %v12983_v47 = vpack.c.bf16 %v7899_v24, %v7898_v23  ;;  %v12889_v30 = vpack.c.bf16 %v7787_v2, %v7786_v10  ;;  %v7810_v15 = vld [vmem:[%s19514_s11 + $0x9e0] sm:$0xff]  ;;  %v7813_v10 = vld [vmem:[%s19514_s11 + $0x9f8] sm:$0xff] }
 0x862   :  { %8636 = vmatprep.mubr.f32.mxu1 %v17810_v36  ;;  %12978 = vmatpush3.bf16.msra.mxu0 %v12977_v58  ;;  %v7883_v36 = vld [vmem:[%s19514_s11 + $0xc28] sm:$0xff]  ;;  %v7914_v61 = vld [vmem:[%s19514_s11 + $0xd20] sm:$0xff] }
 0x863   :  { %12884 = vmatprep.subr.bf16.mxu1 %v12883_v18  ;;  %12980 = vmatprep.subr.bf16.mxu0 %v12979_v14  ;;  %v12985_v38 = vpack.c.bf16 %v7883_v36, %v7882_v55  ;;  %v7811_v58 = vld [vmem:[%s19514_s11 + $0x9e8] sm:$0xff]  ;;  %v12997_v18 = vpack.c.bf16 %v7889_v17, %v7888_v31  ;;  %v7853_v31 = vld [vmem:[%s19514_s11 + $0xb38] sm:$0xff] }
 0x864   :  { %v12903_v14 = vpack.c.bf16 %v7811_v58, %v7810_v15  ;;  %v7871_v17 = vld [vmem:[%s19514_s11 + $0xbc8] sm:$0xff]  ;;  %v12957_v15 = vpack.c.bf16 %v7853_v31, %v7852_v25  ;;  %v7918_v31 = vld [vmem:[%s19514_s11 + $0xd40] sm:$0xff] }
 0x865   :  { %12886 = vmatpush3.bf16.msra.mxu1 %v12885_v44  ;;  %v12999_v44 = vpack.c.bf16 %v7907_v27, %v7906_v26  ;;  %v7854_v26 = vld [vmem:[%s19514_s11 + $0xb40] sm:$0xff]  ;;  %v7855_v27 = vld [vmem:[%s19514_s11 + $0xb48] sm:$0xff] }
 0x866   :  { %12982 = vmatpush3.bf16.msra.mxu0 %v12981_v7  ;;  %12888 = vmatprep.subr.bf16.mxu1 %v12887_v59  ;;  %v7891_v7 = vld [vmem:[%s19514_s11 + $0xc68] sm:$0xff]  ;;  %v7812_v59 = vld [vmem:[%s19514_s11 + $0x9f0] sm:$0xff] }
 0x867   :  { %12984 = vmatprep.subr.bf16.mxu0 %v12983_v47 }
 0x869   :  { %12890 = vmatpush3.bf16.msra.mxu1 %v12889_v30 }
 0x86a   :  { %12986 = vmatpush3.bf16.msra.mxu0 %v12985_v38  ;;  %12892 = vmatprep.subr.bf16.mxu1 %v12891_v42  ;;  %v7796_v38 = vld [vmem:[%s19514_s11 + $0x970] sm:$0xff]  ;;  %v7797_v42 = vld [vmem:[%s19514_s11 + $0x978] sm:$0xff] }
 0x86b   :  { %12988 = vmatprep.subr.bf16.mxu0 %v12987_v22  ;;  %v7863_v22 = vld [vmem:[%s19514_s11 + $0xb88] sm:$0xff]  ;;  %v12909_v13 = vpack.c.bf16 %v7797_v42, %v7796_v38  ;;  %v7860_v42 = vld [vmem:[%s19514_s11 + $0xb70] sm:$0xff] }
 0x86c   :  { %v12943_v16 = vpack.c.bf16 %v7863_v22, %v7862_v5  ;;  %v7910_v5 = vld [vmem:[%s19514_s11 + $0xd00] sm:$0xff]  ;;  %v7911_v22 = vld [vmem:[%s19514_s11 + $0xd08] sm:$0xff] }
 0x86d   :  { %12894 = vmatpush3.bf16.msra.mxu1 %v12893_v45  ;;  %v7864_v45 = vld [vmem:[%s19514_s11 + $0xb90] sm:$0xff] }
 0x86e   :  { %12990 = vmatpush3.bf16.msra.mxu0 %v12989_v1  ;;  %12896 = vmatprep.subr.bf16.mxu1 %v12895_v6  ;;  %v7865_v1 = vld [vmem:[%s19514_s11 + $0xb98] sm:$0xff]  ;;  %v12945_v6 = vpack.c.bf16 %v7847_v62, %v7846_v39  ;;  %v7912_v62 = vld [vmem:[%s19514_s11 + $0xd10] sm:$0xff] }
 0x86f   :  { %12992 = vmatprep.subr.bf16.mxu0 %v12991_v11  ;;  %v12947_v50 = vpack.c.bf16 %v7865_v1, %v7864_v45  ;;  %v7866_v11 = vld [vmem:[%s19514_s11 + $0xba0] sm:$0xff]  ;;  %v7913_v45 = vld [vmem:[%s19514_s11 + $0xd18] sm:$0xff] }
 0x870   :  { %v12951_v19 = vpack.c.bf16 %v7867_v43, %v7866_v11  ;;  %v7930_v1 = vld [vmem:[%s19514_s11 + $0xda0] sm:$0xff]  ;;  %v7915_v11 = vld [vmem:[%s19514_s11 + $0xd28] sm:$0xff]  ;;  %v7932_v43 = vld [vmem:[%s19514_s11 + $0xdb0] sm:$0xff] }
 0x871   :  { %12898 = vmatpush3.bf16.msra.mxu1 %v12897_v57  ;;  %v7851_v57 = vld [vmem:[%s19514_s11 + $0xb28] sm:$0xff] }
 0x872   :  { %12994 = vmatpush3.bf16.msra.mxu0 %v12993_v52  ;;  %12900 = vmatprep.subr.bf16.mxu1 %v12899_v29  ;;  %v7869_v52 = vld [vmem:[%s19514_s11 + $0xbb8] sm:$0xff]  ;;  %v12953_v29 = vpack.c.bf16 %v7851_v57, %v7850_v12  ;;  %v7916_v57 = vld [vmem:[%s19514_s11 + $0xd30] sm:$0xff] }
 0x873   :  { %v7135_v23 = vpop.f32.mrb[84].mxu1  ;;  %v7348_v24 = vpop.f32.mrb[84].mxu0  ;;  %12996 = vmatprep.subr.bf16.mxu0 %v12995_v33  ;;  %v7870_v33 = vld [vmem:[%s19514_s11 + $0xbc0] sm:$0xff] }
 0x874   :  { %v7449_v2 = vmul.f32 %v18807_v56, %v7135_v23  ;;  %v7455_v55 = vmul.f32 %v18809_v9, %v7348_v24  ;;  %v7137_v47 = vpop.f32.mrb[85].mxu1  ;;  %v7350_v36 = vpop.f32.mrb[85].mxu0  ;;  %v13001_v56 = vpack.c.bf16 %v7891_v7, %v7890_v34  ;;  %v12907_v9 = vpack.c.bf16 %v7813_v10, %v7812_v59  ;;  %v7857_v34 = vld [vmem:[%s19514_s11 + $0xb58] sm:$0xff]  ;;  %v7874_v23 = vld [vmem:[%s19514_s11 + $0xbe0] sm:$0xff]  ;;  %v7875_v24 = vld [vmem:[%s19514_s11 + $0xbe8] sm:$0xff] }
 0x875   :  { %v19211_v41 = vmul.f32 %v18593_v53, %v7137_v47  ;;  %12902 = vmatpush3.bf16.msra.mxu1 %v12901_v40  ;;  %v7892_v53 = vld [vmem:[%s19514_s11 + $0xc70] sm:$0xff]  ;;  %v12959_v58 = vpack.c.bf16 %v7871_v17, %v7870_v33  ;;  %v12967_v7 = vpack.c.bf16 %v7875_v24, %v7874_v23  ;;  %v7858_v59 = vld [vmem:[%s19514_s11 + $0xb60] sm:$0xff]  ;;  %v7859_v10 = vld [vmem:[%s19514_s11 + $0xb68] sm:$0xff] }
 0x876   :  { %v7456_v30 = vmul.f32 %v7449_v2, %v7350_v36  ;;  %12998 = vmatpush3.bf16.msra.mxu0 %v12997_v18  ;;  %12904 = vmatprep.subr.bf16.mxu1 %v12903_v14  ;;  %v13005_v37 = vpack.c.bf16 %v7893_v35, %v7892_v53  ;;  %v7872_v40 = vld [vmem:[%s19514_s11 + $0xbd0] sm:$0xff]  ;;  %v7873_v18 = vld [vmem:[%s19514_s11 + $0xbd8] sm:$0xff]  ;;  %v12961_v14 = vpack.c.bf16 %v7855_v27, %v7854_v26  ;;  %v7919_v33 = vld [vmem:[%s19514_s11 + $0xd48] sm:$0xff] }
 0x877   :  { %13000 = vmatprep.subr.bf16.mxu0 %v12999_v44  ;;  %v12963_v21 = vpack.c.bf16 %v7873_v18, %v7872_v40  ;;  %v12965_v44 = vpack.c.bf16 %v7857_v34, %v7856_v60  ;;  %v7876_v47 = vld [vmem:[%s19514_s11 + $0xbf0] sm:$0xff]  ;;  %v7877_v36 = vld [vmem:[%s19514_s11 + $0xbf8] sm:$0xff]  ;;  %v7938_v18 = vld [vmem:[%s19514_s11 + $0xde0] sm:$0xff] }
 0x878   :  { %8846 = vmatprep.mubr.f32.mxu0 %v7456_v30  ;;  %v12971_v38 = vpack.c.bf16 %v7877_v36, %v7876_v47  ;;  %v7861_v53 = vld [vmem:[%s19514_s11 + $0xb78] sm:$0xff]  ;;  %v7936_v17 = vld [vmem:[%s19514_s11 + $0xdd0] sm:$0xff]  ;;  %v7922_v34 = vld [vmem:[%s19514_s11 + $0xd60] sm:$0xff] }
 0x879   :  { %12906 = vmatpush3.bf16.msra.mxu1 %v12905_v20  ;;  %v7920_v27 = vld [vmem:[%s19514_s11 + $0xd50] sm:$0xff]  ;;  %v7921_v40 = vld [vmem:[%s19514_s11 + $0xd58] sm:$0xff]  ;;  %v7923_v23 = vld [vmem:[%s19514_s11 + $0xd68] sm:$0xff] }
 0x87a   :  { %13002 = vmatpush3.bf16.msra.mxu0 %v13001_v56  ;;  %12908 = vmatprep.subr.bf16.mxu1 %v12907_v9  ;;  %v12969_v9 = vpack.c.bf16 %v7859_v10, %v7858_v59  ;;  %v7941_v59 = vld [vmem:[%s19514_s11 + $0xdf8] sm:$0xff] }
 0x87b   :  { %13004 = vmatprep.subr.bf16.mxu0 %v13003_v4  ;;  %v12973_v4 = vpack.c.bf16 %v7861_v53, %v7860_v42 }
 0x87d   :  { %12910 = vmatpush3.bf16.msra.mxu1 %v12909_v13  ;;  %v7928_v13 = vld [vmem:[%s19514_s11 + $0xd90] sm:$0xff] }
 0x87e   :  { %13006 = vmatpush3.bf16.msra.mxu0 %v13005_v37  ;;  %12944 = vmatprep.subr.bf16.mxu1 %v12943_v16  ;;  %v7929_v37 = vld [vmem:[%s19514_s11 + $0xd98] sm:$0xff]  ;;  %v13009_v16 = vpack.c.bf16 %v7911_v22, %v7910_v5 }
 0x87f   :  { %13039 = vmatprep.subr.bf16.mxu0 %v21477_v0  ;;  %v13011_v39 = vpack.c.bf16 %v7929_v37, %v7928_v13 }
 0x880   :  { %8637 = vmatmul.mubr.f32.vlgmr.msra.gmra.mrb[98].mxu1 %v17861_v48  ;;  %v7868_v48 = vld [vmem:[%s19514_s11 + $0xbb0] sm:$0xff] }
 0x881   :  { %8847 = vmatmul.mubr.f32.vlgmr.msra.gmra.mrb[98].mxu0 %v7455_v55  ;;  %12946 = vmatpush3.bf16.msra.mxu1 %v12945_v6  ;;  %v12955_v49 = vpack.c.bf16 %v7869_v52, %v7868_v48  ;;  %v7931_v6 = vld [vmem:[%s19514_s11 + $0xda8] sm:$0xff]  ;;  %v7917_v48 = vld [vmem:[%s19514_s11 + $0xd38] sm:$0xff]  ;;  %v7934_v52 = vld [vmem:[%s19514_s11 + $0xdc0] sm:$0xff] }
 0x882   :  { %12948 = vmatprep.subr.bf16.mxu1 %v12947_v50  ;;  %9783 = vmatprep.mubr.msk.f32.mxu0 %vm13068_vm0, %v20330_v63  ;;  %v13013_v50 = vpack.c.bf16 %v7913_v45, %v7912_v62  ;;  %v13015_v28 = vpack.c.bf16 %v7931_v6, %v7930_v1  ;;  %v8922_v62 = vld [vmem:[%s19515_s13] sm:$0xff]  ;;  %v8923_v45 = vld [vmem:[%s19515_s13 + $0x8] sm:$0xff] }
 0x883   :  { %v13040_v6 = vpack.c.bf16 %v8923_v45, %v8922_v62  ;;  %v9017_v62 = vld [vmem:[%s19518_s12 + $0x30] sm:$0xff] }
 0x885   :  { %12950 = vmatpush3.bf16.msra.mxu1 %v12949_v54  ;;  %v7933_v54 = vld [vmem:[%s19514_s11 + $0xdb8] sm:$0xff]  ;;  %13041 = vmatpush3.bf16.msra.mxu0 %v13040_v6  ;;  %v9196_v6 = vld [vmem:[%s19519_s16] ss:$0 sm:$0xff] }
 0x886   :  { %12952 = vmatprep.subr.bf16.mxu1 %v12951_v19  ;;  %v13017_v19 = vpack.c.bf16 %v7915_v11, %v7914_v61  ;;  %v13019_v12 = vpack.c.bf16 %v7933_v54, %v7932_v43  ;;  %13042 = vmatprep.subr.bf16.mxu0 %v21477_v0  ;;  %v8926_v11 = vld [vmem:[%s19515_s13 + $0x20] sm:$0xff]  ;;  %v8927_v43 = vld [vmem:[%s19515_s13 + $0x28] sm:$0xff] }
 0x889   :  { %12954 = vmatpush3.bf16.msra.mxu1 %v12953_v29  ;;  %v7935_v29 = vld [vmem:[%s19514_s11 + $0xdc8] sm:$0xff] }
 0x88a   :  { %12956 = vmatprep.subr.bf16.mxu1 %v12955_v49  ;;  %v13021_v49 = vpack.c.bf16 %v7917_v48, %v7916_v57  ;;  %v13023_v25 = vpack.c.bf16 %v7935_v29, %v7934_v52 }
 0x88d   :  { %12958 = vmatpush3.bf16.msra.mxu1 %v12957_v15  ;;  %v7937_v15 = vld [vmem:[%s19514_s11 + $0xdd8] sm:$0xff] }
 0x88e   :  { %12960 = vmatprep.subr.bf16.mxu1 %v12959_v58  ;;  %v13025_v58 = vpack.c.bf16 %v7919_v33, %v7918_v31  ;;  %v13027_v26 = vpack.c.bf16 %v7937_v15, %v7936_v17 }
 0x891   :  { %12962 = vmatpush3.bf16.msra.mxu1 %v12961_v14  ;;  %v7939_v14 = vld [vmem:[%s19514_s11 + $0xde8] sm:$0xff] }
 0x892   :  { %12964 = vmatprep.subr.bf16.mxu1 %v12963_v21  ;;  %v13029_v21 = vpack.c.bf16 %v7921_v40, %v7920_v27  ;;  %v13031_v60 = vpack.c.bf16 %v7939_v14, %v7938_v18 }
 0x893   :  { %v7277_v2 = vpop.f32.mrb[86].mxu1  ;;  %v9249_v55 = vpop.f32.mrb[86].mxu0 }
 0x894   :  { %v7453_v32 = vmul.f32 %v19011_v3, %v7277_v2  ;;  %v7279_v8 = vpop.f32.mrb[87].mxu1  ;;  %v9250_v20 = vpop.f32.mrb[87].mxu0  ;;  %v7926_v3 = vld [vmem:[%s19514_s11 + $0xd80] sm:$0xff] }
 0x895   :  { %v7454_v30 = vmul.f32 %v18798_v46, %v7279_v8  ;;  %v19321_v56 = vadd.f32 %v9250_v20, %v9249_v55  ;;  %12966 = vmatpush3.bf16.msra.mxu1 %v12965_v44  ;;  %v7927_v46 = vld [vmem:[%s19514_s11 + $0xd88] sm:$0xff]  ;;  %v7924_v20 = vld [vmem:[%s19514_s11 + $0xd70] sm:$0xff] }
 0x896   :  { %12968 = vmatprep.subr.bf16.mxu1 %v12967_v7  ;;  %v13007_v35 = vpack.c.bf16 %v7927_v46, %v7926_v3  ;;  %v7940_v7 = vld [vmem:[%s19514_s11 + $0xdf0] sm:$0xff] }
 0x897   :  { %8776 = vmatprep.mubr.f32.mxu1 %v7454_v30  ;;  %v13035_v8 = vpack.c.bf16 %v7941_v59, %v7940_v7  ;;  %v7925_v30 = vld [vmem:[%s19514_s11 + $0xd78] sm:$0xff] }
 0x899   :  { %12970 = vmatpush3.bf16.msra.mxu1 %v12969_v9 }
 0x89a   :  { %12972 = vmatprep.subr.bf16.mxu1 %v12971_v38 }
 0x89d   :  { %12974 = vmatpush3.bf16.msra.mxu1 %v12973_v4 }
 0x89e   :  { %13008 = vmatprep.subr.bf16.mxu1 %v13007_v35 }
 0x8a0   :  { %8777 = vmatmul.mubr.f32.vlgmr.msra.gmra.mrb[100].mxu1 %v7453_v32  ;;  %v13033_v32 = vpack.c.bf16 %v7923_v23, %v7922_v34 }
 0x8a1   :  { %13010 = vmatpush3.bf16.msra.mxu1 %v13009_v16 }
 0x8a2   :  { %13012 = vmatprep.subr.bf16.mxu1 %v13011_v39 }
 0x8a5   :  { %13014 = vmatpush3.bf16.msra.mxu1 %v13013_v50  ;;  %v8925_v50 = vld [vmem:[%s19515_s13 + $0x18] sm:$0xff] }
 0x8a6   :  { %13016 = vmatprep.subr.bf16.mxu1 %v13015_v28 }
 0x8a9   :  { %13018 = vmatpush3.bf16.msra.mxu1 %v13017_v19 }
 0x8aa   :  { %13020 = vmatprep.subr.bf16.mxu1 %v13019_v12  ;;  %v13046_v12 = vpack.c.bf16 %v8927_v43, %v8926_v11 }
 0x8ad   :  { %13022 = vmatpush3.bf16.msra.mxu1 %v13021_v49  ;;  %v8928_v49 = vld [vmem:[%s19515_s13 + $0x30] sm:$0xff] }
 0x8ae   :  { %13024 = vmatprep.subr.bf16.mxu1 %v13023_v25 }
 0x8b1   :  { %13026 = vmatpush3.bf16.msra.mxu1 %v13025_v58 }
 0x8b2   :  { %13028 = vmatprep.subr.bf16.mxu1 %v13027_v26 }
 0x8b3   :  { %v7419_v24 = vpop.f32.mrb[88].mxu1  ;;  %v9319_v44 = vpop.f32.mrb[88].mxu0 }
 0x8b4   :  { %v7457_v10 = vmul.f32 %v19211_v41, %v7419_v24  ;;  %v7421_v2 = vpop.f32.mrb[89].mxu1  ;;  %v9320_v55 = vpop.f32.mrb[89].mxu0  ;;  %v13037_v41 = vpack.c.bf16 %v7925_v30, %v7924_v20 }
 0x8b5   :  { %v7458_v47 = vmul.f32 %v19002_v51, %v7421_v2  ;;  %v9321_v36 = vadd.f32 %v9320_v55, %v9319_v44  ;;  %13030 = vmatpush3.bf16.msra.mxu1 %v13029_v21 }
 0x8b6   :  { %13032 = vmatprep.subr.bf16.mxu1 %v13031_v60 }
 0x8b7   :  { %8916 = vmatprep.mubr.f32.mxu1 %v7458_v47 }
 0x8b9   :  { %13034 = vmatpush3.bf16.msra.mxu1 %v13033_v32  ;;  %v9019_v32 = vld [vmem:[%s19516_s15 + $0x8] sm:$0xff] }
 0x8ba   :  { %13036 = vmatprep.subr.bf16.mxu1 %v13035_v8 }
 0x8bd   :  { %13038 = vmatpush3.bf16.msra.mxu1 %v13037_v41 }
 0x8c0   :  { %8917 = vmatmul.mubr.f32.vlgmr.msra.gmra.mrb[102].mxu1 %v7457_v10 }
 0x8d3   :  { %v9284_v51 = vpop.f32.mrb[90].mxu1 }
 0x8d4   :  { %v9389_v9 = vpop.f32.mrb[90].mxu0  ;;  %v9285_v38 = vpop.f32.mrb[91].mxu1 }
 0x8d5   :  { %v9286_v42 = vadd.f32 %v9285_v38, %v9284_v51  ;;  %v9390_v53 = vpop.f32.mrb[91].mxu0  ;;  %v9020_v51 = vld [vmem:[%s19516_s15 + $0x10] sm:$0x3]  ;;  %v9011_v38 = vld [vmem:[%s19518_s12] sm:$0xff] }
 0x8d6   :  { %v9391_v3 = vadd.f32 %v9390_v53, %v9389_v9  ;;  %v9191_v9 = vld [vmem:[%s19517_s14] ss:$0 sm:$0xff] }
 0x8d7   :  { %v8079_v46 = vadd.f32 %v9286_v42, %v19321_v56  ;;  %v8924_v56 = vld [vmem:[%s19515_s13 + $0x10] sm:$0xff]  ;;  %v9012_v42 = vld [vmem:[%s19518_s12 + $0x8] sm:$0xff] }
 0x8d8   :  { %v13043_v28 = vpack.c.bf16 %v8925_v50, %v8924_v56 }
 0x8d9   :  { %v8149_v4 = vadd.f32 %v9321_v36, %v8079_v46  ;;  %v9018_v36 = vld [vmem:[%s19516_s15] sm:$0xff] }
 0x8da   :  { %13044 = vmatpush3.bf16.msra.mxu0 %v13043_v28  ;;  %v13049_v30 = vpack.c.bf16 %v9019_v32, %v9018_v36 }
 0x8db   :  { %13045 = vmatprep.subr.bf16.mxu0 %v21477_v0 }
 0x8de   :  { %13047 = vmatpush3.bf16.msra.mxu0 %v13046_v12 }
 0x8df   :  { %9781 = vmatprep.subr.mxu0 %v20330_v63 }
 0x8e2   :  { %9782 = vmatpush3.msra.mxu0 %v8928_v49 }
 0x8e3   :  { %13048 = vmatprep.subr.bf16.mxu0 %v21477_v0 }
 0x8f3   :  { %v9354_v35 = vpop.f32.mrb[92].mxu1 }
 0x8f4   :  { %v9459_v5 = vpop.f32.mrb[92].mxu0  ;;  %v9355_v22 = vpop.f32.mrb[93].mxu1 }
 0x8f5   :  { %v9356_v13 = vadd.f32 %v9355_v22, %v9354_v35  ;;  %v9460_v37 = vpop.f32.mrb[93].mxu0  ;;  %v9014_v22 = vld [vmem:[%s19518_s12 + $0x18] sm:$0xff] }
 0x8f6   :  { %v9461_v16 = vadd.f32 %v9460_v37, %v9459_v5  ;;  %v9013_v5 = vld [vmem:[%s19518_s12 + $0x10] sm:$0xff]  ;;  %v9015_v37 = vld [vmem:[%s19518_s12 + $0x20] sm:$0xff] }
 0x8f7   :  { %v8219_v39 = vadd.f32 %v9356_v13, %v8149_v4  ;;  %v13052_v4 = vpack.c.bf16 %v9012_v42, %v9011_v38  ;;  %v13055_v13 = vpack.c.bf16 %v9014_v22, %v9013_v5 }
 0x8f9   :  { %v8289_v1 = vadd.f32 %v9391_v3, %v8219_v39 }
 0x913   :  { %v9424_v61 = vpop.f32.mrb[94].mxu1 }
 0x914   :  { %v9529_v54 = vpop.f32.mrb[94].mxu0  ;;  %v9425_v19 = vpop.f32.mrb[95].mxu1 }
 0x915   :  { %v9426_v57 = vadd.f32 %v9425_v19, %v9424_v61  ;;  %v9530_v48 = vpop.f32.mrb[95].mxu0 }
 0x916   :  { %v9531_v52 = vadd.f32 %v9530_v48, %v9529_v54 }
 0x917   :  { %v8359_v29 = vadd.f32 %v9426_v57, %v8289_v1 }
 0x919   :  { %v8429_v25 = vadd.f32 %v9461_v16, %v8359_v29  ;;  %v9016_v16 = vld [vmem:[%s19518_s12 + $0x28] sm:$0xff] }
 0x91a   :  { %v13058_v39 = vpack.c.bf16 %v9016_v16, %v9015_v37 }
 0x933   :  { %v9494_v31 = vpop.f32.mrb[96].mxu1 }
 0x934   :  { %v9599_v33 = vpop.f32.mrb[96].mxu0  ;;  %v9495_v17 = vpop.f32.mrb[97].mxu1 }
 0x935   :  { %v9496_v15 = vadd.f32 %v9495_v17, %v9494_v31  ;;  %v9600_v58 = vpop.f32.mrb[97].mxu0 }
 0x936   :  { %v9601_v26 = vadd.f32 %v9600_v58, %v9599_v33 }
 0x937   :  { %v8499_v27 = vadd.f32 %v9496_v15, %v8429_v25 }
 0x939   :  { %v8569_v40 = vadd.f32 %v9531_v52, %v8499_v27 }
 0x953   :  { %v9564_v18 = vpop.f32.mrb[98].mxu1 }
 0x954   :  { %v9669_v14 = vpop.f32.mrb[98].mxu0  ;;  %v9565_v21 = vpop.f32.mrb[99].mxu1 }
 0x955   :  { %v9566_v60 = vadd.f32 %v9565_v21, %v9564_v18  ;;  %v9670_v34 = vpop.f32.mrb[99].mxu0 }
 0x956   :  { %v9671_v23 = vadd.f32 %v9670_v34, %v9669_v14 }
 0x957   :  { %v8639_v24 = vadd.f32 %v9566_v60, %v8569_v40 }
 0x959   :  { %v8709_v44 = vadd.f32 %v9601_v26, %v8639_v24 }
 0x973   :  { %v9634_v7 = vpop.f32.mrb[100].mxu1 }
 0x974   :  { %v9635_v59 = vpop.f32.mrb[101].mxu1 }
 0x975   :  { %v9636_v10 = vadd.f32 %v9635_v59, %v9634_v7 }
 0x977   :  { %v8779_v2 = vadd.f32 %v9636_v10, %v8709_v44 }
 0x979   :  { %v8849_v55 = vadd.f32 %v9671_v23, %v8779_v2 }
 0x993   :  { %v9704_v47 = vpop.f32.mrb[102].mxu1 }
 0x994   :  { %v9705_v8 = vpop.f32.mrb[103].mxu1 }
 0x995   :  { %v9706_v20 = vadd.f32 %v9705_v8, %v9704_v47 }
 0x997   :  { %v8919_v41 = vadd.f32 %v9706_v20, %v8849_v55 }
 0x999   :  { %9784 = vmatmul.mubr.msk.f32.vlgmr.msra.gmra.mrb[100].mxu0 %vm8936_vm4, %v8919_v41 }
 0x99a   :  { %13050 = vmatpush3.bf16.msra.mxu0 %v13049_v30  ;;  %9792 = vmatprep.mubr.msk.f32.mxu0 %vm13068_vm0, %v20330_v63 }
 0x99b   :  { %9790 = vmatprep.subr.mxu0 %v20330_v63 }
 0x99e   :  { %9791 = vmatpush3.msk.msra.mxu0 %vm9025_vm5, %v9020_v51 }
 0x99f   :  { %13051 = vmatprep.subr.bf16.mxu0 %v21477_v0 }
 0xa6c   :  { %v9006_v53 = vpop.f32.mrb[100].mxu0 }
 0xa6d   :  { %v9007_v3 = vadd.f32 %v9191_v9, %v9006_v53  ;;  %v9785_v46 = vpop.f32.mrb[101].mxu0 }
 0xa6f   :  { %v9010_v35 = vmax.f32 %v9007_v3, 0.0 }
 0xa71   :  { %9793 = vmatmul.mubr.msk.f32.vlgmr.msra.gmra.mrb[102].mxu0 %vm9021_vm6, %v9010_v35 }
 0xa72   :  { %13053 = vmatpush3.bf16.msra.mxu0 %v13052_v4  ;;  %9809 = vmatprep.mubr.msk.f32.mxu0 %vm13068_vm0, %v20330_v63 }
 0xa73   :  { %13054 = vmatprep.subr.bf16.mxu0 %v21477_v0 }
 0xa76   :  { %13056 = vmatpush3.bf16.msra.mxu0 %v13055_v13 }
 0xa77   :  { %13057 = vmatprep.subr.bf16.mxu0 %v21477_v0 }
 0xa7a   :  { %13059 = vmatpush3.bf16.msra.mxu0 %v13058_v39 }
 0xa7b   :  { %9807 = vmatprep.subr.mxu0 %v20330_v63 }
 0xa7e   :  { %9808 = vmatpush3.msra.mxu0 %v9017_v62 }
 0xa7f   :  { %9810 = vmatmul.mubr.msk.f32.vlgmr.msra.gmra.mrb[104].mxu0 %vm8936_vm4, %v8919_v41 }
 0xb44   :  { %v9095_v45 = vpop.f32.mrb[102].mxu0 }
 0xb45   :  { %v9794_v56 = vpop.f32.mrb[103].mxu0 }
 0xb52   :  { %v9165_v1 = vpop.f32.mrb[104].mxu0 }
 0xb53   :  { %v9166_v50 = vadd.f32 %v9165_v1, %v9095_v45  ;;  %v9811_v28 = vpop.f32.mrb[105].mxu0 }
 0xb55   :  { %v9176_v0 = vadd.f32 %v9196_v6, %v9166_v50 }
 0xb57   :  { %9178 = vst.msk [vmem:[%s19520_s17] sm:$0xff] %vm9177_vm7, %v9176_v0 }

</bundles_post_ra>
